<compile_context>
chip_gen: v6e
topology: v6e:2x2x1
jax: 0.10.0
libtpu: 0.0.40
codegen_flags: <defaults>
</compile_context>

<pallas_src>
import jax
import jax.numpy as jnp
import numpy as np
from jax.experimental import pallas as pl
from jax.experimental.pallas import tpu as pltpu


# ----------------------------- Pallas kernels ------------------------------ #

def _upsample_conv_packed_kernel(x_ref, h_ref, w_ref, o_ref):
    """Fused 2x-upsample + 3-tap conv, one packed MXU matmul per batch row.

    x_ref: (B, C, TL)     tile of the ORIGINAL (pre-upsample) signal
    h_ref: (B, 1, C, 2)   halo columns [x[t0-1], x[t0+TL]] (zeros at seq ends)
    w_ref: (2C, 3C)       packed fused weights [[W0, W1+W2, 0], [0, W0+W1, W2]]
    o_ref: (B, C, 2*TL)
    """
    B, C, TL = x_ref.shape
    w_big = w_ref[...]                                   # (2C, 3C)
    lane = jax.lax.broadcasted_iota(jnp.int32, (C, TL), 1)
    for b in range(B):                                   # B is small & static
        x = x_ref[b]                                     # (C, TL)
        h = h_ref[b, 0]                                  # (C, 2)
        hl, hr = h[:, 0:1], h[:, 1:2]
        # x_prev[:, t] = x[:, t-1]; x_next[:, t] = x[:, t+1]; halos at the ends.
        x_prev = jnp.where(lane == 0, hl, pltpu.roll(x, 1, axis=1))
        x_next = jnp.where(lane == TL - 1, hr, pltpu.roll(x, TL - 1, axis=1))
        x_big = jnp.concatenate([x_prev, x, x_next], axis=0)          # (3C, TL)
        y = jnp.dot(w_big, x_big, preferred_element_type=jnp.float32)  # (2C, TL)
        # Interleave even/odd output samples along lanes.
        out = jnp.stack([y[:C], y[C:]], axis=-1).reshape(C, 2 * TL)
        o_ref[b] = out.astype(o_ref.dtype)
    # TODO(synk): for bf16 outputs the even/odd lane interleave could be a
    # pltpu.pack_elementwise (2xbf16 -> u32) + u32 store, dropping the XLU
    # stack/reshape epilogue; kept the portable stack+reshape here.
    # TODO(synk): for C <= ~32 a pure-VPU multiply-add path would avoid the
    # (mostly padded) MXU pass entirely.


def _upsample_conv_wide_kernel(x_ref, h_ref, w_ref, o_ref):
    """Same fusion for large C (> 128): four (C,C) MXU matmuls
    (4*C^2 FLOPs/position instead of the packed form's 6*C^2)."""
    B, C, TL = x_ref.shape
    lane = jax.lax.broadcasted_iota(jnp.int32, (C, TL), 1)
    for b in range(B):
        x = x_ref[b]
        h = h_ref[b, 0]
        hl, hr = h[:, 0:1], h[:, 1:2]
        x_prev = jnp.where(lane == 0, hl, pltpu.roll(x, 1, axis=1))
        x_next = jnp.where(lane == TL - 1, hr, pltpu.roll(x, TL - 1, axis=1))
        y_even = jnp.dot(w_ref[0], x_prev, preferred_element_type=jnp.float32)
        y_even = y_even + jnp.dot(w_ref[1], x, preferred_element_type=jnp.float32)
        y_odd = jnp.dot(w_ref[2], x, preferred_element_type=jnp.float32)
        y_odd = y_odd + jnp.dot(w_ref[3], x_next, preferred_element_type=jnp.float32)
        out = jnp.stack([y_even, y_odd], axis=-1).reshape(C, 2 * TL)
        o_ref[b] = out.astype(o_ref.dtype)


def _upsample_kernel(x_ref, o_ref):
    """with_conv=False path: pure nearest-exact 2x upsample of (B, C, TL) tiles."""
    B, C, TL = x_ref.shape
    for b in range(B):
        x = x_ref[b]
        o_ref[b] = jnp.broadcast_to(x[:, :, None], (C, TL, 2)).reshape(C, 2 * TL)


# ------------------------------ JAX wrappers ------------------------------- #

def mp_conv1d_weight(weight, gain=1.0, eps=1e-4):
    """MPConv1D eval-path weight prep (EDM2 normalize + magnitude-preserving scale)."""
    out_c, in_c, k = weight.shape
    fan_in = in_c * k
    w32 = weight.astype(jnp.float32)
    norm = jnp.sqrt(jnp.sum(w32 * w32, axis=(1, 2), keepdims=True))
    norm = eps + norm * (1.0 / np.sqrt(fan_in))
    return (w32 / norm) * (gain / np.sqrt(fan_in))        # f32 (out_c, in_c, 3)


def _pack_upsample_weights(w):
    """(C, C, 3) -> (2C, 3C) = [[W0, W1+W2, 0], [0, W0+W1, W2]] (upsample folded in)."""
    w0, w1, w2 = w[..., 0], w[..., 1], w[..., 2]
    z = jnp.zeros_like(w0)
    top = jnp.concatenate([w0, w1 + w2, z], axis=1)
    bot = jnp.concatenate([z, w0 + w1, w2], axis=1)
    return jnp.concatenate([top, bot], axis=0)


def _stack_upsample_weights(w):
    """(C, C, 3) -> (4, C, C) = [W0, W1+W2, W0+W1, W2] (wide-channel path)."""
    w0, w1, w2 = w[..., 0], w[..., 1], w[..., 2]
    return jnp.stack([w0, w1 + w2, w0 + w1, w2], axis=0)


def _build_halos(x, tl, num_tiles):
    """Per-tile halo columns, shape (N, num_tiles, C, 2):
    [..., 0] = x[:, :, l*tl - 1] (zero for the first tile),
    [..., 1] = x[:, :, (l+1)*tl] (zero for the last tile)."""
    N, C, L = x.shape
    z = jnp.zeros((N, C, 1), x.dtype)
    if num_tiles == 1:
        left, right = z, z
    else:
        left = jnp.concatenate([z, x[:, :, tl - 1:L - 1:tl]], axis=-1)   # (N, C, nt)
        right = jnp.concatenate([x[:, :, tl:L:tl], z], axis=-1)          # (N, C, nt)
    halos = jnp.stack([left, right], axis=-1)                            # (N, C, nt, 2)
    return jnp.transpose(halos, (0, 2, 1, 3))                            # (N, nt, C, 2)
    # TODO(synk): a lane-dense (N, C, 2*nt) halo layout with a constant-over-l
    # index_map would replace the tiny per-step halo DMA with one per batch block.


# Tile-sizing budgets (review: target >=~0.5-1 MB DMAs to approach HBM roofline).
_IN_ROW_BUDGET = 2 << 20       # target bytes for one (C, tl) input row slab
_IN_BLOCK_BUDGET = 4 << 20     # target bytes for one (bblk, C, tl) input block
_MAX_BBLK = 8                  # static unroll bound of the in-kernel batch loop
_VMEM_LIMIT_BYTES = 48 << 20   # < v7x max scoped (~56 MiB); plenty on v5e/v6e


def _pick_tl(C, L, ebytes):
    """Largest 128-multiple divisor of L with C*tl*ebytes <= budget (else full L / 128)."""
    if L % 128 != 0 or C * L * ebytes <= _IN_ROW_BUDGET:
        return L
    best = 128
    for d in range(128, L + 1, 128):
        if L % d == 0 and C * d * ebytes <= _IN_ROW_BUDGET:
            best = d
    return best


def _pick_bblk(N, C, tl, ebytes):
    """Largest divisor of N (<= _MAX_BBLK) keeping the input block under budget."""
    row = C * tl * ebytes
    best = 1
    for d in range(1, min(N, _MAX_BBLK) + 1):
        if N % d == 0 and d * row <= _IN_BLOCK_BUDGET:
            best = d
    return best


def _ensure_two_grid_steps(N, L, tl, bblk):
    """v7x shards parallel grid axes over 2 TensorCores: avoid a 1-step grid."""
    if (N // bblk) * (L // tl) > 1:
        return tl, bblk
    if bblk > 1:
        for d in range(bblk // 2, 0, -1):
            if N % d == 0:
                return tl, d
    if tl == L and L % 256 == 0:
        return L // 2, bblk
    return tl, bblk


def upsample1d(x, weight=None, with_conv=True, *, tl=None, bblk=None):
    """Forward pass of Upsample1D.  x: (N, C, L) -> (N, C, 2L).

    Pass bf16 `x` for the full-rate MXU path on v6e/v7x; weights are cast to
    x.dtype (matching the PyTorch module's `w = w.to(x.dtype)`), and the conv
    accumulates in f32 on the MXU.
    """
    N, C, L = x.shape
    ebytes = jnp.dtype(x.dtype).itemsize
    auto = tl is None and bblk is None
    if tl is None:
        tl = _pick_tl(C, L, ebytes)
    if bblk is None:
        bblk = _pick_bblk(N, C, tl, ebytes)
    if auto:
        tl, bblk = _ensure_two_grid_steps(N, L, tl, bblk)
    if L % tl != 0:
        raise ValueError(f"spatial tile {tl} must divide L={L}")
    if tl != L and tl % 128 != 0:
        raise ValueError("spatial tile must be a multiple of 128 (or the full L)")
    if N % bblk != 0:
        raise ValueError(f"batch block {bblk} must divide N={N}")

    num_tiles = L // tl
    grid = (N // bblk, num_tiles)
    out_shape = jax.ShapeDtypeStruct((N, C, 2 * L), x.dtype)
    x_spec = pl.BlockSpec((bblk, C, tl), lambda b, l: (b, 0, l))
    o_spec = pl.BlockSpec((bblk, C, 2 * tl), lambda b, l: (b, 0, l))
    io_bytes = int(3 * N * C * L * ebytes)         # read x once, write 2x lanes
    cparams = pltpu.CompilerParams(
        dimension_semantics=("parallel", "parallel"),
        vmem_limit_bytes=_VMEM_LIMIT_BYTES)

    if not with_conv:
        return pl.pallas_call(
            _upsample_kernel,
            out_shape=out_shape,
            grid=grid,
            in_specs=[x_spec],
            out_specs=o_spec,
            compiler_params=cparams,
            cost_estimate=pl.CostEstimate(flops=0, transcendentals=0,
                                          bytes_accessed=io_bytes),
        )(x)

    if weight is None:
        raise ValueError("with_conv=True requires a (C, C, 3) weight")
    wn = mp_conv1d_weight(weight)                   # f32 (C, C, 3)
    halos = _build_halos(x, tl, num_tiles)          # (N, nt, C, 2)
    h_spec = pl.BlockSpec((bblk, 1, C, 2), lambda b, l: (b, l, 0, 0))

    if C <= 128:
        # Below the MXU tile: one packed (2C,3C)@(3C,TL) matmul per batch row.
        kernel = _upsample_conv_packed_kernel
        wk = _pack_upsample_weights(wn).astype(x.dtype)        # (2C, 3C)
        w_index = lambda b, l: (0, 0)
    else:
        kernel = _upsample_conv_wide_kernel
        wk = _stack_upsample_weights(wn).astype(x.dtype)       # (4, C, C)
        w_index = lambda b, l: (0, 0, 0)

    w_kwargs = {}
    if int(wk.size) * ebytes > (2 << 20):
        # Constant across the whole grid -> one VMEM copy is enough; keeps
        # large-C weights from eating a second (double-buffered) slab on v7x.
        w_kwargs["pipeline_mode"] = pl.Buffered(1)
    w_spec = pl.BlockSpec(wk.shape, w_index, **w_kwargs)

    flops = int(8 * N * C * C * L)                  # 4 fused (C,C)x(C,L) MACs x2
    return pl.pallas_call(
        kernel,
        out_shape=out_shape,
        grid=grid,
        in_specs=[x_spec, h_spec, w_spec],
        out_specs=o_spec,
        compiler_params=cparams,
        cost_estimate=pl.CostEstimate(flops=flops, transcendentals=0,
                                      bytes_accessed=io_bytes + int(wk.size) * ebytes),
    )(x, halos, wk)


# ----------------------------- reference (JAX) ----------------------------- #

def upsample1d_reference(x, weight=None, with_conv=True):
    u = jnp.repeat(x, 2, axis=-1)             # nearest-exact, scale=2 == repeat
    if not with_conv:
        return u
    w = mp_conv1d_weight(weight)
    return jax.lax.conv_general_dilated(
        u, w, window_strides=(1,), padding=((1, 1),),
        dimension_numbers=("NCH", "OIH", "NCH"))


# ---------------------------------- main ----------------------------------- #

if __name__ == "__main__":
    key = jax.random.PRNGKey(0)
    kx, kw, kx2, kw2 = jax.random.split(key, 4)

    # Small VAE-ish shape: exercises the packed (C <= 128) MXU path.
    N, C, L = 2, 8, 256
    x = jax.random.normal(kx, (N, C, L), dtype=jnp.float32)
    # MPConv1D.__init__: weight = randn(out_channels, in_channels, kernel_size)
    weight = jax.random.normal(kw, (C, C, 3), dtype=jnp.float32)
    ref = upsample1d_reference(x, weight, with_conv=True)

    # 1) auto tile selection (budget-sized tiles, >=2 grid steps).
    out = upsample1d(x, weight, with_conv=True)
    jax.block_until_ready(out)
    np.testing.assert_allclose(np.asarray(out), np.asarray(ref), rtol=1e-5, atol=1e-5)

    # 2) explicit spatial tiling + batch blocking (exercises halos and the
    #    in-kernel batch loop).
    out2 = upsample1d(x, weight, with_conv=True, tl=128, bblk=2)
    jax.block_until_ready(out2)
    np.testing.assert_allclose(np.asarray(out2), np.asarray(ref), rtol=1e-5, atol=1e-5)

    # 3) bf16 operands (full-rate MXU path on v6e/v7x, halves HBM traffic).
    out_bf16 = upsample1d(x.astype(jnp.bfloat16), weight, with_conv=True, tl=128, bblk=2)
    jax.block_until_ready(out_bf16)
    np.testing.assert_allclose(np.asarray(out_bf16.astype(jnp.float32)),
                               np.asarray(ref), rtol=5e-2, atol=5e-2)

    # 4) wide-channel path (C > 128 -> four separate (C,C) MXU matmuls).
    Nw, Cw, Lw = 1, 256, 256
    xw = jax.random.normal(kx2, (Nw, Cw, Lw), dtype=jnp.float32)
    ww = jax.random.normal(kw2, (Cw, Cw, 3), dtype=jnp.float32)
    refw = upsample1d_reference(xw, ww, with_conv=True)
    outw = upsample1d(xw, ww, with_conv=True)
    jax.block_until_ready(outw)
    np.testing.assert_allclose(np.asarray(outw), np.asarray(refw), rtol=1e-4, atol=1e-4)

    # 5) with_conv=False path (pure nearest-exact 2x upsample).
    out_nc = upsample1d(x, with_conv=False)
    jax.block_until_ready(out_nc)
    np.testing.assert_allclose(np.asarray(out_nc),
                               np.asarray(upsample1d_reference(x, with_conv=False)),
                               rtol=0, atol=0)

    print("KERNEL_OK")
</pallas_src>

<mosaic_0001>
module attributes {stable_mosaic.version = 11 : i64} {
  func.func @_upsample_conv_packed_kernel(%arg0: i32, %arg1: i32, %arg2: memref<1x8x256xf32, #tpu.memory_space<vmem>>, %arg3: memref<1x1x8x2xf32, #tpu.memory_space<vmem>>, %arg4: memref<16x24xf32, #tpu.memory_space<vmem>>, %arg5: memref<1x8x512xf32, #tpu.memory_space<vmem>>) attributes {dimension_semantics = [#tpu.dimension_semantics<parallel>, #tpu.dimension_semantics<parallel>], iteration_bounds = array<i64: 2, 1>, scalar_prefetch = 0 : i64, scratch_operands = 0 : i64, tpu.core_type = #tpu.core_type<tc>, window_params = [{transform_indices = @transform_0, window_bounds = array<i64: 1, 8, 256>}, {transform_indices = @transform_1, window_bounds = array<i64: 1, 1, 8, 2>}, {pipeline_mode = #tpu.pipeline_mode<synchronous>, transform_indices = @transform_2, window_bounds = array<i64: 16, 24>}, {transform_indices = @transform_3, window_bounds = array<i64: 1, 8, 512>}]} {
    %c0 = arith.constant 0 : index
    %c0_0 = arith.constant 0 : index
    %0 = vector.load %arg4[%c0, %c0_0] : memref<16x24xf32, #tpu.memory_space<vmem>>, vector<16x24xf32>
    %1 = tpu.iota {dimensions = array<i32: 1>} : vector<8x256xi32>
    %c0_1 = arith.constant 0 : index
    %c0_2 = arith.constant 0 : index
    %c0_3 = arith.constant 0 : index
    %2 = vector.load %arg2[%c0_1, %c0_2, %c0_3] : memref<1x8x256xf32, #tpu.memory_space<vmem>>, vector<1x8x256xf32>
    %3 = vector.shape_cast %2 : vector<1x8x256xf32> to vector<8x256xf32>
    %c0_4 = arith.constant 0 : index
    %c0_5 = arith.constant 0 : index
    %c0_6 = arith.constant 0 : index
    %c0_7 = arith.constant 0 : index
    %4 = vector.load %arg3[%c0_4, %c0_5, %c0_6, %c0_7] : memref<1x1x8x2xf32, #tpu.memory_space<vmem>>, vector<1x1x8x2xf32>
    %5 = vector.shape_cast %4 : vector<1x1x8x2xf32> to vector<8x2xf32>
    %6 = vector.extract_strided_slice %5 {offsets = [0, 0], sizes = [8, 1], strides = [1, 1]} : vector<8x2xf32> to vector<8x1xf32>
    %7 = vector.extract_strided_slice %5 {offsets = [0, 1], sizes = [8, 1], strides = [1, 1]} : vector<8x2xf32> to vector<8x1xf32>
    %c0_i32 = arith.constant 0 : i32
    %8 = vector.broadcast %c0_i32 : i32 to vector<8x256xi32>
    %9 = arith.cmpi eq, %1, %8 : vector<8x256xi32>
    %c1_i32 = arith.constant 1 : i32
    %10 = tpu.dynamic_rotate %3 by %c1_i32 dim 1 : vector<8x256xf32>, i32 -> vector<8x256xf32>
    %11 = vector.shape_cast %6 : vector<8x1xf32> to vector<8x1xf32>
    %12 = vector.broadcast %11 : vector<8x1xf32> to vector<8x256xf32>
    %13 = arith.select %9, %12, %10 : vector<8x256xi1>, vector<8x256xf32>
    %c255_i32 = arith.constant 255 : i32
    %14 = vector.broadcast %c255_i32 : i32 to vector<8x256xi32>
    %15 = arith.cmpi eq, %1, %14 : vector<8x256xi32>
    %c255_i32_8 = arith.constant 255 : i32
    %16 = tpu.dynamic_rotate %3 by %c255_i32_8 dim 1 : vector<8x256xf32>, i32 -> vector<8x256xf32>
    %17 = vector.shape_cast %7 : vector<8x1xf32> to vector<8x1xf32>
    %18 = vector.broadcast %17 : vector<8x1xf32> to vector<8x256xf32>
    %19 = arith.select %15, %18, %16 : vector<8x256xi1>, vector<8x256xf32>
    %20 = tpu.concatenate %13, %3, %19 in 0 : vector<8x256xf32>, vector<8x256xf32>, vector<8x256xf32> -> vector<24x256xf32>
    %cst = arith.constant dense<0.000000e+00> : vector<16x256xf32>
    %21 = tpu.matmul %0, %20, %cst {dimension_numbers = #tpu.dot_dimension_numbers<[1], [0], [0], [1], [0, 0, 1, 1], [], []>} : vector<16x24xf32>, vector<24x256xf32>, vector<16x256xf32> -> vector<16x256xf32>
    %22 = vector.extract_strided_slice %21 {offsets = [0, 0], sizes = [8, 256], strides = [1, 1]} : vector<16x256xf32> to vector<8x256xf32>
    %23 = vector.extract_strided_slice %21 {offsets = [8, 0], sizes = [8, 256], strides = [1, 1]} : vector<16x256xf32> to vector<8x256xf32>
    %24 = vector.shape_cast %22 : vector<8x256xf32> to vector<8x256x1xf32>
    %25 = vector.shape_cast %23 : vector<8x256xf32> to vector<8x256x1xf32>
    %26 = tpu.concatenate %24, %25 in 2 : vector<8x256x1xf32>, vector<8x256x1xf32> -> vector<8x256x2xf32>
    %27 = vector.shape_cast %26 : vector<8x256x2xf32> to vector<8x512xf32>
    %c0_9 = arith.constant 0 : index
    %c0_10 = arith.constant 0 : index
    %c0_11 = arith.constant 0 : index
    %28 = vector.load %arg5[%c0_9, %c0_10, %c0_11] : memref<1x8x512xf32, #tpu.memory_space<vmem>>, vector<1x8x512xf32>
    %29 = vector.shape_cast %28 : vector<1x8x512xf32> to vector<8x512xf32>
    %30 = vector.shape_cast %27 : vector<8x512xf32> to vector<1x8x512xf32>
    tpu.vector_store %arg5[%c0_9, %c0_10, %c0_11], %30 {strides = array<i32>} : memref<1x8x512xf32, #tpu.memory_space<vmem>>, vector<1x8x512xf32>,
    return
  }
  func.func @transform_0(%arg0: i32, %arg1: i32) -> (i32, i32, i32) {
    %c0_i32 = arith.constant 0 : i32
    %c0_i32_0 = arith.constant 0 : i32
    return %arg0, %c0_i32, %arg1 : i32, i32, i32
  }
  func.func @transform_1(%arg0: i32, %arg1: i32) -> (i32, i32, i32, i32) {
    %c0_i32 = arith.constant 0 : i32
    %c0_i32_0 = arith.constant 0 : i32
    %c0_i32_1 = arith.constant 0 : i32
    return %arg0, %arg1, %c0_i32, %c0_i32_0 : i32, i32, i32, i32
  }
  func.func @transform_2(%arg0: i32, %arg1: i32) -> (i32, i32) {
    %c0_i32 = arith.constant 0 : i32
    %c0_i32_0 = arith.constant 0 : i32
    %c0_i32_1 = arith.constant 0 : i32
    return %c0_i32, %c0_i32_0 : i32, i32
  }
  func.func @transform_3(%arg0: i32, %arg1: i32) -> (i32, i32, i32) {
    %c0_i32 = arith.constant 0 : i32
    %c0_i32_0 = arith.constant 0 : i32
    return %arg0, %c0_i32, %arg1 : i32, i32, i32
  }
}

</mosaic_0001>

<bundles_post_ra>
// kernel: tpu_custom_call.1
= control target key start
LH: loop header
LB: loop body
LE: loop exit
PB: predicated region body
PF: predicated region fallthrough
CT: control target
= control target key end

     0   :  { %s12757_s0 = inlined_call_operand.hbm [shape: f32[2,8,256], index: 0, kind: input, shape index: {}]   ;;  %s12758_s1 = inlined_call_operand.vmem [shape: f32[2,1,8,2], index: 1, kind: input, shape index: {}]   ;;  %s12759_s2 = inlined_call_operand.vmem [shape: f32[16,24], index: 2, kind: input, shape index: {}]   ;;  %s12760_s3 = inlined_call_operand.hbm [shape: f32[2,8,512], index: 3, kind: output, shape index: {}]  }
   0x1   :  { %12953 = sst [smem:[#allocation449_spill]] %s12757_s0 }
   0x2   :  { %12954 = sst [smem:[#allocation450_spill]] %s12758_s1 }
   0x3   :  { %12955 = sst [smem:[#allocation451_spill]] %s12759_s2 }
   0x4   :  { %12956 = sst [smem:[#allocation452_spill]] %s12760_s3 }
   0x5   :  { %8 = vsyncpa [#allocation3], 0 }
   0x6   :  { %10 = vsyncpa [#allocation3 + $0x1], 0 }
   0x7   :  { %11 = vsyncpa [#allocation4], 0 }
   0x8   :  { %13 = vsyncpa [#allocation4 + $0x1], 0  ;;  %s8916_s12 = smov 0   ;;  %s8918_s13 = smov 0  }
   0x9   :  { %s8920_s14 = smov 0   ;;  %s8922_s15 = smov 0  }
   0xa   :  { %s8924_s16 = smov 0   ;;  %s8926_s17 = smov 0  }
   0xb LB: > { %12957 = sst [smem:[#allocation8_spill]] %s8802_s12  ;;  %s8553_s18 = sadd.s32 4294967295, %s8822_s17   ;;  %s8822_s17 = sphi %s8926_s17, %s19_s17   ;;  %s8818_s16 = sphi %s8924_s16, %s14131_s16   ;;  %s8814_s15 = sphi %s8922_s15, %s14130_s15   ;;  %s8810_s14 = sphi %s8920_s14, %s14129_s14   ;;  %s8806_s13 = sphi %s8918_s13, %s14128_s13   ;;  %s8802_s12 = sphi %s8916_s12, %s14127_s12  }
   0xc   : > { %12958 = sst [smem:[#allocation9_spill]] %s8806_s13  ;;  %s8554_s19 = sadd.s32 4294967294, %s8822_s17  }
   0xd   : > { %12959 = sst [smem:[#allocation10_spill]] %s8810_s14  ;;  %s31_s20 = sadd.s32 1, %s8818_s16 }
   0xe   : > { %12960 = sst [smem:[#allocation11_spill]] %s8814_s15  ;;  %s40_s21 = sadd.s32 1, %s8810_s14 }
   0xf   : > { %12961 = sst [smem:[#allocation12_spill]] %s8818_s16  ;;  %p33_p0 = scmp.ge.s32.totalorder %s31_s20, 2 }
  0x10   : > { %12962 = sst [smem:[#allocation13_spill]] %s8822_s17  ;;  %p47_p1 = scmp.ne.s32.totalorder %s8810_s14, %s8806_s13 }
  0x11   : > { %p48_p2 = scmp.eq.s32.totalorder %s8822_s17, 0  ;;  %p53_p3 = scmp.ne.s32.totalorder %s8806_s13, %s8802_s12 }
  0x12   : > { %s14133_s20 = smov (%p33_p0, %s31_s20), 0  ;;  %p54_p5 = scmp.eq.s32.totalorder %s8553_s18, 0 }
  0x13   : > { %12963 = sst [smem:[#allocation14_spill]] %s14133_s20  ;;  %p8957_p4 = por %p48_p2, %p47_p1 }
  0x14   : > { %s35_s23 = ssub.s32 %s8818_s16, %s14133_s20  ;;  %p128_p6 = scmp.eq.s32.totalorder %s8553_s18, 1 }
  0x15   : > { %p38_p7 = scmp.eq.s32.totalorder %s35_s23, 0  ;;  %p8963_p8 = por %p54_p5, %p53_p3 }
  0x16   : > { %p8967_p9 = por %p128_p6, %p47_p1  ;;  %p134_p10 = scmp.eq.s32.totalorder %s8554_s19, 1 }
  0x17   : > { %s8972_s26 = scalar_select %p38_p7, %s8810_s14, %s40_s21  }
  0x18   : > { %s12966_s25 = scalar_select %p8967_p9, 1, 0 }
  0x19   : > { %12968 = sst [smem:[#allocation16_spill]] %s8972_s26  ;;  %p8974_p11 = por %p134_p10, %p53_p3 }
  0x1a   : > { %12967 = sst [smem:[#allocation15_spill]] %s12966_s25  ;;  %p8591_p13 = scmp.lt.s32.totalorder %s8822_s17, 2 }
  0x1b   : > { %s12969_s27 = scalar_select %p8974_p11, 1, 0 }
  0x1c   : > { %s157_s28 = sand.u32 1, %s8810_s14   ;;  %s8571_s30 = sshll.u32 %s8818_s16, 8 }
  0x1d   : > { %12970 = sst [smem:[#allocation17_spill]] %s12969_s27  ;;  %s8557_s29 = sshll.u32 %s157_s28, 4 }
  0x1e   : > { %s12971_s0 = sld [smem:[#allocation449_spill]]  ;;  %s161_s7 = scalar_lea.vmem [#allocation2], %s8557_s29 }
  0x1f   : > { %s171_s8 = sshll.u32 %s161_s7, 4  ;;  %p8987_p0 = pnand %p8591_p13, %p8957_p4  ;;  %s172_s8 = int_to_ptr.vmem [resolvable:$true] %s171_s8 }
  0x20   : > { %p8560_p1 = scmp.ge.s32.totalorder %s8822_s17, 1  ;;  %p186_p2 = scmp.lt.s32.totalorder %s8822_s17, 3 }
  0x21   : > { %s158_s10 = scalar_lea.sflag [#allocation3], %s157_s28  ;;  %p8716_p3 = pneg %p8987_p0 }
  0x22   : > { %s8727_s11 = scalar_lea.vmem %s172_s8, 256  ;;  %s8824_s18 = smov [#allocation2]  }
  0x23   : > { %p8728_p5 = scmp.ne.s32.totalorder %s172_s8, %s8727_s11  ;;  %s8732_s19 = sshll.u32 %s8824_s18, 4  ;;  %s8733_s19 = int_to_ptr.vmem [resolvable:$false] %s8732_s19 }
  0x24   : > { %s169_s6 = scalar_lea.hbm %s12971_s0, %s8571_s30  ;;  %s8734_s21 = scalar_lea.vmem %s8733_s19, 512 }
  0x25   : > { %p8730_p6 = pnand %p8728_p5, %p8716_p3  ;;  %p8735_p10 = scmp.lt.s32.totalorder %s172_s8, %s8733_s19 }
  0x26   : > { %p8736_p12 = scmp.lt.s32.totalorder %s8734_s21, %s8727_s11 }
  0x27   : > { %p8731_p7 = pneg %p8730_p6 }
  0x28   : > { %p8737_p4 = por %p8736_p12, %p8735_p10 }
  0x2a   : > { %p8738_p13 = pnand %p8737_p4, %p8731_p7 }
  0x2c   : > { %8741 = shalt.err (!%p8738_p13)
}
  0x2d   : > { %8586 = dma.hbm_to_vmem [thread:$0]  (!%p8987_p0), %s169_s6, 256, %s172_s8, %s158_s10  }
  0x2e   : > { %p187_p11 = pnand %p8560_p1, %p186_p2 }
  0x30   : > { %190 = sbr.rel (%p187_p11) target bundleno = 2115 (0x843), region = 32 }
  0x35   : > { %s9002_s22 = sand.u32 1, %s8806_s13  }
  0x36   : > { %12973 = sst [smem:[#allocation18_spill]] %s9002_s22  ;;  %s8561_s23 = sshll.u32 %s9002_s22, 4 }
  0x37   : > { %s193_s28 = scalar_lea.sflag [#allocation3], %s9002_s22  ;;  %s196_s29 = scalar_lea.vmem [#allocation2], %s8561_s23 }
  0x38   : > { %8793 = dma.done.wait (%p8963_p8), %s193_s28, 256  }
  0x39   : > { %8795 = vsyncadd (%p8963_p8), %s193_s28, 4294967040  ;;  %p227_p12 = scmp.lt.s32.totalorder %s8814_s15, 1  ;;  %v8825_v0 = vmov 0   ;;  %v8826_v1 = vmov 1   ;;  %s12974_s1 = sld [smem:[#allocation450_spill]]  ;;  %v240_v3 = vld [vmem:[%s196_s29] sm:$0xff]  ;;  %v237_v7 = vlaneseq }
  0x3a   : > { %8711 = vset.pattern.permute.xlu1 %v8825_v0  ;;  %8713 = vset.pattern.permute.xlu0 %v8826_v1  ;;  %s8827_s8 = smov 1   ;;  %v241_v4 = vld [vmem:[%s196_s29 + $0x8] sm:$0xff]  ;;  %s8828_s24 = smov 127   ;;  %v8829_v5 = vmov 0.0   ;;  %vm12856_vm4 = vcmask 195584   ;;  %vm2502_vm5 = vcmask 7168  }
  0x3b   : > { %s228_s30 = scalar_select %p227_p12, %s8814_s15, 1  ;;  %245 = vrot.lane.b32.xlu0 %v240_v3, %s8827_s8  ;;  %345 = vmatprep.mubr.f32.mxu0 %v8829_v5  ;;  %v238_v9 = vand.u32 127, %v237_v7  ;;  %v9019_v22 = vshrl.u32 %v237_v7, 7  ;;  %vm8119_vm6 = vcmask 15360   ;;  %vm8121_vm7 = vcmask 31744  }
  0x3c   : > { %351 = vmatprep.mubr.f32.mxu1 %v8829_v5  ;;  %s12975_s2 = sld [smem:[#allocation451_spill]]  ;;  %s12897_s19 = smov 4   ;;  %vm8123_vm8 = vcmask 48128   ;;  %vm8125_vm9 = vcmask 64512   ;;  %vm8127_vm10 = vcmask 80896   ;;  %vm8129_vm11 = vcmask 97280  }
  0x3d   : > { %s8563_s4 = sshll.u32 %s228_s30, 3  ;;  %v239_v11 = vadd.s32 128, %v238_v9  ;;  %vm265_vm0 = vcmp.lt.s32.totalorder %v238_v9, 127  ;;  %vm249_vm2 = vcmp.lt.s32.totalorder %v238_v9, 1  ;;  %vm243_vm3 = vcmp.eq.s32.totalorder %v238_v9, 0  ;;  %s12900_s21 = smov 2  }
  0x3e   : > { %v9022_v23 = vsub.s32 0, %v9019_v22  ;;  %v9029_v26 = vsub.s32 1, %v9019_v22  ;;  %v9034_v28 = vsub.s32 2, %v9019_v22  ;;  %v9039_v30 = vsub.s32 3, %v9019_v22  ;;  %s12891_s23 = smov 8   ;;  %s12894_s28 = smov 6  }
  0x3f   : > { %s233_s7 = scalar_lea.vmem %s12974_s1, %s8563_s4  ;;  %247 = vrot.lane.b32.xlu0 %v241_v4, %s8827_s8  ;;  %vm260_vm1 = vcmp.eq.s32.totalorder %v239_v11, 255  ;;  %v9052_v36 = vsub.s32 4, %v9019_v22  ;;  %v9089_v54 = vsub.s32 5, %v9019_v22  ;;  %s12885_s29 = smov 12   ;;  %vm8131_vm12 = vcmask 113664  }
  0x40   : > { %v242_v2 = vld [vmem:[%s233_s7] sm:$0xff]  ;;  %s12888_s30 = smov 10   ;;  %s12879_s4 = smov 16   ;;  %vm8133_vm13 = vcmask 130048   ;;  %vm8135_vm14 = vcmask 146432   ;;  %vm12948_vm15 = vcmask 162816  }
  0x41   : > { %254 = vperm.xlu1 %8711, %v242_v2   ;;  %s12882_s5 = smov 14   ;;  %s12873_s6 = smov 20  }
  0x42   : > { %v235_v20 = vld [vmem:[%s12975_s2] sm:$0xff]  ;;  %s12876_s7 = smov 18   ;;  %s12867_s8 = smov 24  }
  0x43   : > { %263 = vrot.lane.b32.xlu0 %v241_v4, %s8828_s24  ;;  %s12864_s9 = smov 28   ;;  %s12861_s10 = smov 26  }
  0x44   : > { %s12761_s11 = smov 32   ;;  %s12763_s18 = smov 30  }
  0x45   : > { %261 = vrot.lane.b32.xlu1 %v240_v3, %s8828_s24  ;;  %s12870_s24 = smov 22   ;;  %s13590_s0 = smov 62  }
  0x46   : > { %8712 = vset.pattern.permute.xlu1 %v8826_v1  ;;  %s13593_s1 = smov 64   ;;  %s13597_s20 = smov 68  }
  0x47   : > { %s13600_s16 = smov 70   ;;  %s13601_s26 = smov 72  }
  0x48   : > { %s13606_s14 = smov 74   ;;  %s13608_s13 = smov 76  }
  0x49   : > { %269 = vperm.xlu1 %8712, %v242_v2   ;;  %s13613_s17 = smov 78   ;;  %s13616_s27 = smov 80  }
  0x4a   : > { %s13621_s12 = smov 82   ;;  %s13622_s3 = smov 84  }
  0x4b   : > { %s13625_s25 = smov 86   ;;  %s13626_s15 = smov 88  }
  0xad   : > { %v246_v6 = vpop.permute.xlu0 %245 }
  0xb1   : > { %v248_v8 = vpop.permute.xlu0 %247 }
  0xb2   : > { %v251_v18 = vsel %vm249_vm2, %v248_v8, %v246_v6  ;;  %v250_v19 = vsel %vm249_vm2, %v246_v6, %v248_v8  ;;  %vm12858_vm2 = vcmask 228352  }
  0xb5   : > { %v264_v13 = vpop.permute.xlu0 %263 }
  0xbc   : > { %v255_v10 = vpop.permute.xlu1 %254 }
  0xbd   : > { %v257_v21 = vsel %vm243_vm3, %v255_v10, %v251_v18  ;;  %vm12857_vm3 = vcmask 244736  }
  0xc0   : > { %v262_v12 = vpop.permute.xlu1 %261 }
  0xc1   : > { %v267_v15 = vsel %vm265_vm0, %v264_v13, %v262_v12  ;;  %v266_v17 = vsel %vm265_vm0, %v262_v12, %v264_v13  ;;  %v236_v12 = vld [vmem:[%s12975_s2 + $0x8] sm:$0xff]  ;;  %vm12949_vm0 = vcmask 179200   ;;  %s13596_s2 = smov 66  }
  0xc4   : > { %v270_v14 = vpop.permute.xlu1 %269 }
  0xc5   : > { %v273_v16 = vsel %vm260_vm1, %v270_v14, %v267_v15  ;;  %vm12855_vm1 = vcmask 211968  }
  0xc6   : > { %307 = vmatprep.subr.mxu0 %v273_v16  ;;  %8573 = vmatprep.subr.mxu1 %v273_v16 }
  0xc7   : > { %308 = vmatpush1.msra.mxu0 %v266_v17  ;;  %8576 = vmatpush1.msra.mxu1 %v266_v17 }
  0xc8   : > { %309 = vmatprep.subr.mxu0 %v241_v4  ;;  %8574 = vmatprep.subr.mxu1 %v241_v4 }
  0xc9   : > { %310 = vmatpush1.msra.mxu0 %v240_v3  ;;  %8577 = vmatpush1.msra.mxu1 %v240_v3 }
  0xca   : > { %311 = vmatprep.subr.mxu0 %v250_v19  ;;  %8575 = vmatprep.subr.mxu1 %v250_v19 }
  0xcb   : > { %312 = vmatpush1.msra.mxu0 %v257_v21  ;;  %8578 = vmatpush1.msra.mxu1 %v257_v21 }
  0xcc   : > { %8564 = vmatmul.mubr.msk.f32.vlgmr.msra.gmra.mxu0 %vm12856_vm4, %v235_v20  ;;  %8565 = vmatmul.mubr.msk.f32.vlgmr.msra.gmra.mxu1 %vm12856_vm4, %v236_v12 }
 0x18c   : > { %v9024_v24 = vpop.f32.mrf.mxu0 }
 0x18d   : > { %v361_v25 = vrot.slane %v9024_v24, %v9022_v23  ;;  %v495_v27 = vrot.slane %v9024_v24, %v9029_v26  ;;  %v629_v29 = vrot.slane %v9024_v24, %v9034_v28  ;;  %v763_v31 = vrot.slane %v9024_v24, %v9039_v30 }
 0x18e   : > { %v897_v39 = vrot.slane %v9024_v24, %v9052_v36  ;;  %v9097_v57 = vrot.slane %v9024_v24, %v9089_v54  ;;  %v9107_v61 = vpop.f32.mrf.mxu0 }
 0x18f   : > { %367 = vbcast.lane.b32.xlu1 %v361_v25, 264  ;;  %363 = vbcast.lane.b32.xlu0 %v361_v25, 256  ;;  %v428_v63 = vrot.slane %v9107_v61, %v9022_v23  ;;  %v562_v17 = vrot.slane %v9107_v61, %v9029_v26 }
 0x193   : > { %375 = vbcast.lane.b32.xlu1 %v361_v25, 280  ;;  %371 = vbcast.lane.b32.xlu0 %v361_v25, 272 }
 0x197   : > { %383 = vbcast.lane.b32.xlu1 %v361_v25, 296  ;;  %379 = vbcast.lane.b32.xlu0 %v361_v25, 288 }
 0x19b   : > { %391 = vbcast.lane.b32.xlu1 %v361_v25, 312  ;;  %387 = vbcast.lane.b32.xlu0 %v361_v25, 304 }
 0x19f   : > { %399 = vbcast.lane.b32.xlu1 %v361_v25, 328  ;;  %395 = vbcast.lane.b32.xlu0 %v361_v25, 320 }
 0x1a3   : > { %407 = vbcast.lane.b32.xlu1 %v361_v25, 344  ;;  %403 = vbcast.lane.b32.xlu0 %v361_v25, 336 }
 0x1a7   : > { %415 = vbcast.lane.b32.xlu1 %v361_v25, 360  ;;  %411 = vbcast.lane.b32.xlu0 %v361_v25, 352 }
 0x1ab   : > { %423 = vbcast.lane.b32.xlu1 %v361_v25, 376  ;;  %419 = vbcast.lane.b32.xlu0 %v361_v25, 368 }
 0x1af   : > { %501 = vbcast.lane.b32.xlu1 %v495_v27, 264  ;;  %497 = vbcast.lane.b32.xlu0 %v495_v27, 256 }
 0x1b3   : > { %509 = vbcast.lane.b32.xlu1 %v495_v27, 280  ;;  %505 = vbcast.lane.b32.xlu0 %v495_v27, 272 }
 0x1b7   : > { %517 = vbcast.lane.b32.xlu1 %v495_v27, 296  ;;  %513 = vbcast.lane.b32.xlu0 %v495_v27, 288 }
 0x1bb   : > { %525 = vbcast.lane.b32.xlu1 %v495_v27, 312  ;;  %521 = vbcast.lane.b32.xlu0 %v495_v27, 304 }
 0x1bf   : > { %533 = vbcast.lane.b32.xlu1 %v495_v27, 328  ;;  %529 = vbcast.lane.b32.xlu0 %v495_v27, 320 }
 0x1c3   : > { %541 = vbcast.lane.b32.xlu1 %v495_v27, 344  ;;  %537 = vbcast.lane.b32.xlu0 %v495_v27, 336 }
 0x1c7   : > { %549 = vbcast.lane.b32.xlu1 %v495_v27, 360  ;;  %545 = vbcast.lane.b32.xlu0 %v495_v27, 352 }
 0x1cb   : > { %557 = vbcast.lane.b32.xlu1 %v495_v27, 376  ;;  %553 = vbcast.lane.b32.xlu0 %v495_v27, 368 }
 0x1cf   : > { %635 = vbcast.lane.b32.xlu1 %v629_v29, 264  ;;  %631 = vbcast.lane.b32.xlu0 %v629_v29, 256 }
 0x1d3   : > { %643 = vbcast.lane.b32.xlu1 %v629_v29, 280  ;;  %639 = vbcast.lane.b32.xlu0 %v629_v29, 272 }
 0x1d7   : > { %651 = vbcast.lane.b32.xlu1 %v629_v29, 296  ;;  %647 = vbcast.lane.b32.xlu0 %v629_v29, 288 }
 0x1db   : > { %659 = vbcast.lane.b32.xlu1 %v629_v29, 312  ;;  %655 = vbcast.lane.b32.xlu0 %v629_v29, 304 }
 0x1df   : > { %667 = vbcast.lane.b32.xlu1 %v629_v29, 328  ;;  %663 = vbcast.lane.b32.xlu0 %v629_v29, 320 }
 0x1e3   : > { %675 = vbcast.lane.b32.xlu1 %v629_v29, 344  ;;  %671 = vbcast.lane.b32.xlu0 %v629_v29, 336 }
 0x1e7   : > { %683 = vbcast.lane.b32.xlu1 %v629_v29, 360  ;;  %679 = vbcast.lane.b32.xlu0 %v629_v29, 352 }
 0x1eb   : > { %691 = vbcast.lane.b32.xlu1 %v629_v29, 376  ;;  %687 = vbcast.lane.b32.xlu0 %v629_v29, 368 }
 0x1ef   : > { %769 = vbcast.lane.b32.xlu1 %v763_v31, 264  ;;  %765 = vbcast.lane.b32.xlu0 %v763_v31, 256 }
 0x1f3   : > { %777 = vbcast.lane.b32.xlu1 %v763_v31, 280  ;;  %773 = vbcast.lane.b32.xlu0 %v763_v31, 272 }
 0x1f7   : > { %785 = vbcast.lane.b32.xlu1 %v763_v31, 296  ;;  %781 = vbcast.lane.b32.xlu0 %v763_v31, 288 }
 0x1fb   : > { %793 = vbcast.lane.b32.xlu1 %v763_v31, 312  ;;  %789 = vbcast.lane.b32.xlu0 %v763_v31, 304 }
 0x1ff   : > { %801 = vbcast.lane.b32.xlu1 %v763_v31, 328  ;;  %797 = vbcast.lane.b32.xlu0 %v763_v31, 320 }
 0x201   : > { %v9043_v32 = vpop.permute.xlu1 %367  ;;  %v9045_v33 = vpop.permute.xlu0 %363 }
 0x203   : > { %809 = vbcast.lane.b32.xlu1 %v763_v31, 344  ;;  %805 = vbcast.lane.b32.xlu0 %v763_v31, 336 }
 0x205   : > { %v9047_v34 = vpop.permute.xlu1 %375  ;;  %v9049_v35 = vpop.permute.xlu0 %371 }
 0x206   : > { %12976 = vst [vmem:[#allocation19_spill] sm:$0xff] %v9047_v34 }
 0x207   : > { %817 = vbcast.lane.b32.xlu1 %v763_v31, 360  ;;  %813 = vbcast.lane.b32.xlu0 %v763_v31, 352 }
 0x209   : > { %v9054_v37 = vpop.permute.xlu1 %383  ;;  %v9056_v38 = vpop.permute.xlu0 %379 }
 0x20a   : > { %12977 = vst [vmem:[#allocation20_spill] sm:$0xff] %v9054_v37  ;;  %12978 = vst [vmem:[#allocation21_spill] sm:$0xff] %v9056_v38 }
 0x20b   : > { %825 = vbcast.lane.b32.xlu1 %v763_v31, 376  ;;  %821 = vbcast.lane.b32.xlu0 %v763_v31, 368 }
 0x20d   : > { %v9060_v40 = vpop.permute.xlu1 %391  ;;  %v9062_v41 = vpop.permute.xlu0 %387 }
 0x20e   : > { %12979 = vst [vmem:[#allocation22_spill] sm:$0xff] %v9060_v40  ;;  %12980 = vst [vmem:[#allocation23_spill] sm:$0xff] %v9062_v41 }
 0x20f   : > { %903 = vbcast.lane.b32.xlu1 %v897_v39, 264  ;;  %899 = vbcast.lane.b32.xlu0 %v897_v39, 256 }
 0x211   : > { %v9064_v42 = vpop.permute.xlu1 %399  ;;  %v9066_v43 = vpop.permute.xlu0 %395 }
 0x212   : > { %12981 = vst [vmem:[#allocation24_spill] sm:$0xff] %v9064_v42  ;;  %12982 = vst [vmem:[#allocation25_spill] sm:$0xff] %v9066_v43  ;;  %v964_v43 = vrot.slane %v9107_v61, %v9052_v36 }
 0x213   : > { %911 = vbcast.lane.b32.xlu1 %v897_v39, 280  ;;  %907 = vbcast.lane.b32.xlu0 %v897_v39, 272 }
 0x215   : > { %v9068_v44 = vpop.permute.xlu1 %407  ;;  %v9070_v45 = vpop.permute.xlu0 %403 }
 0x216   : > { %12983 = vst [vmem:[#allocation26_spill] sm:$0xff] %v9068_v44  ;;  %12984 = vst [vmem:[#allocation27_spill] sm:$0xff] %v9070_v45 }
 0x217   : > { %919 = vbcast.lane.b32.xlu1 %v897_v39, 296  ;;  %915 = vbcast.lane.b32.xlu0 %v897_v39, 288 }
 0x219   : > { %v9072_v46 = vpop.permute.xlu1 %415  ;;  %v9074_v47 = vpop.permute.xlu0 %411 }
 0x21a   : > { %12985 = vst [vmem:[#allocation28_spill] sm:$0xff] %v9072_v46  ;;  %12986 = vst [vmem:[#allocation29_spill] sm:$0xff] %v9074_v47 }
 0x21b   : > { %927 = vbcast.lane.b32.xlu1 %v897_v39, 312  ;;  %923 = vbcast.lane.b32.xlu0 %v897_v39, 304 }
 0x21d   : > { %v9076_v48 = vpop.permute.xlu1 %423  ;;  %v9078_v49 = vpop.permute.xlu0 %419 }
 0x21e   : > { %12987 = vst [vmem:[#allocation30_spill] sm:$0xff] %v9076_v48  ;;  %12988 = vst [vmem:[#allocation31_spill] sm:$0xff] %v9078_v49 }
 0x21f   : > { %935 = vbcast.lane.b32.xlu1 %v897_v39, 328  ;;  %931 = vbcast.lane.b32.xlu0 %v897_v39, 320 }
 0x221   : > { %v9080_v50 = vpop.permute.xlu1 %501  ;;  %v9082_v51 = vpop.permute.xlu0 %497 }
 0x223   : > { %943 = vbcast.lane.b32.xlu1 %v897_v39, 344  ;;  %939 = vbcast.lane.b32.xlu0 %v897_v39, 336 }
 0x225   : > { %v9084_v52 = vpop.permute.xlu1 %509  ;;  %v9086_v53 = vpop.permute.xlu0 %505 }
 0x226   : > { %12989 = vst [vmem:[#allocation32_spill] sm:$0xff] %v9084_v52 }
 0x227   : > { %951 = vbcast.lane.b32.xlu1 %v897_v39, 360  ;;  %947 = vbcast.lane.b32.xlu0 %v897_v39, 352 }
 0x229   : > { %v9091_v55 = vpop.permute.xlu1 %517  ;;  %v9093_v56 = vpop.permute.xlu0 %513 }
 0x22a   : > { %12990 = vst [vmem:[#allocation33_spill] sm:$0xff] %v9091_v55  ;;  %12991 = vst [vmem:[#allocation34_spill] sm:$0xff] %v9093_v56 }
 0x22b   : > { %959 = vbcast.lane.b32.xlu1 %v897_v39, 376  ;;  %955 = vbcast.lane.b32.xlu0 %v897_v39, 368 }
 0x22d   : > { %v9099_v58 = vpop.permute.xlu1 %525  ;;  %v9101_v59 = vpop.permute.xlu0 %521 }
 0x22e   : > { %12992 = vst [vmem:[#allocation35_spill] sm:$0xff] %v9099_v58  ;;  %12993 = vst [vmem:[#allocation36_spill] sm:$0xff] %v9101_v59 }
 0x22f   : > { %1037 = vbcast.lane.b32.xlu1 %v9097_v57, 264  ;;  %1033 = vbcast.lane.b32.xlu0 %v9097_v57, 256 }
 0x231   : > { %v9105_v60 = vpop.permute.xlu1 %533  ;;  %v9109_v62 = vpop.permute.xlu0 %529 }
 0x232   : > { %12994 = vst [vmem:[#allocation37_spill] sm:$0xff] %v9105_v60  ;;  %12995 = vst [vmem:[#allocation38_spill] sm:$0xff] %v9109_v62 }
 0x233   : > { %1045 = vbcast.lane.b32.xlu1 %v9097_v57, 280  ;;  %1041 = vbcast.lane.b32.xlu0 %v9097_v57, 272 }
 0x235   : > { %v9115_v0 = vpop.permute.xlu1 %541  ;;  %v9117_v1 = vpop.permute.xlu0 %537 }
 0x236   : > { %12996 = vst [vmem:[#allocation39_spill] sm:$0xff] %v9115_v0  ;;  %12997 = vst [vmem:[#allocation40_spill] sm:$0xff] %v9117_v1  ;;  %v830_v1 = vrot.slane %v9107_v61, %v9039_v30 }
 0x237   : > { %434 = vbcast.lane.b32.xlu1 %v428_v63, 264  ;;  %430 = vbcast.lane.b32.xlu0 %v428_v63, 256 }
 0x239   : > { %v9119_v2 = vpop.permute.xlu1 %549  ;;  %v9121_v3 = vpop.permute.xlu0 %545 }
 0x23a   : > { %12998 = vst [vmem:[#allocation41_spill] sm:$0xff] %v9119_v2  ;;  %12999 = vst [vmem:[#allocation42_spill] sm:$0xff] %v9121_v3 }
 0x23b   : > { %442 = vbcast.lane.b32.xlu1 %v428_v63, 280  ;;  %438 = vbcast.lane.b32.xlu0 %v428_v63, 272 }
 0x23d   : > { %v9123_v4 = vpop.permute.xlu1 %557  ;;  %v9125_v5 = vpop.permute.xlu0 %553 }
 0x23e   : > { %13000 = vst [vmem:[#allocation43_spill] sm:$0xff] %v9123_v4  ;;  %13001 = vst [vmem:[#allocation44_spill] sm:$0xff] %v9125_v5 }
 0x23f   : > { %450 = vbcast.lane.b32.xlu1 %v428_v63, 296  ;;  %446 = vbcast.lane.b32.xlu0 %v428_v63, 288 }
 0x241   : > { %v9127_v6 = vpop.permute.xlu1 %635  ;;  %v9129_v7 = vpop.permute.xlu0 %631 }
 0x243   : > { %458 = vbcast.lane.b32.xlu1 %v428_v63, 312  ;;  %454 = vbcast.lane.b32.xlu0 %v428_v63, 304 }
 0x245   : > { %v9131_v8 = vpop.permute.xlu1 %643  ;;  %v9133_v9 = vpop.permute.xlu0 %639 }
 0x246   : > { %13002 = vst [vmem:[#allocation45_spill] sm:$0xff] %v9131_v8 }
 0x247   : > { %466 = vbcast.lane.b32.xlu1 %v428_v63, 328  ;;  %462 = vbcast.lane.b32.xlu0 %v428_v63, 320 }
 0x249   : > { %v9135_v10 = vpop.permute.xlu1 %651  ;;  %v9137_v11 = vpop.permute.xlu0 %647 }
 0x24a   : > { %13003 = vst [vmem:[#allocation46_spill] sm:$0xff] %v9135_v10  ;;  %13004 = vst [vmem:[#allocation47_spill] sm:$0xff] %v9137_v11 }
 0x24b   : > { %474 = vbcast.lane.b32.xlu1 %v428_v63, 344  ;;  %470 = vbcast.lane.b32.xlu0 %v428_v63, 336 }
 0x24d   : > { %v9143_v13 = vpop.permute.xlu1 %659  ;;  %v9145_v14 = vpop.permute.xlu0 %655 }
 0x24e   : > { %13005 = vst [vmem:[#allocation48_spill] sm:$0xff] %v9143_v13  ;;  %13006 = vst [vmem:[#allocation49_spill] sm:$0xff] %v9145_v14 }
 0x24f   : > { %482 = vbcast.lane.b32.xlu1 %v428_v63, 360  ;;  %478 = vbcast.lane.b32.xlu0 %v428_v63, 352 }
 0x251   : > { %v9147_v15 = vpop.permute.xlu1 %667  ;;  %v9149_v16 = vpop.permute.xlu0 %663 }
 0x252   : > { %13007 = vst [vmem:[#allocation50_spill] sm:$0xff] %v9147_v15  ;;  %13008 = vst [vmem:[#allocation51_spill] sm:$0xff] %v9149_v16 }
 0x253   : > { %490 = vbcast.lane.b32.xlu1 %v428_v63, 376  ;;  %486 = vbcast.lane.b32.xlu0 %v428_v63, 368 }
 0x255   : > { %v9153_v18 = vpop.permute.xlu1 %675  ;;  %v9155_v19 = vpop.permute.xlu0 %671 }
 0x256   : > { %13009 = vst [vmem:[#allocation52_spill] sm:$0xff] %v9153_v18  ;;  %13010 = vst [vmem:[#allocation53_spill] sm:$0xff] %v9155_v19 }
 0x257   : > { %568 = vbcast.lane.b32.xlu1 %v562_v17, 264  ;;  %564 = vbcast.lane.b32.xlu0 %v562_v17, 256 }
 0x259   : > { %v9157_v20 = vpop.permute.xlu1 %683  ;;  %v9159_v21 = vpop.permute.xlu0 %679 }
 0x25a   : > { %13011 = vst [vmem:[#allocation54_spill] sm:$0xff] %v9157_v20  ;;  %13012 = vst [vmem:[#allocation55_spill] sm:$0xff] %v9159_v21  ;;  %v696_v20 = vrot.slane %v9107_v61, %v9034_v28 }
 0x25b   : > { %576 = vbcast.lane.b32.xlu1 %v562_v17, 280  ;;  %572 = vbcast.lane.b32.xlu0 %v562_v17, 272 }
 0x25d   : > { %v9161_v25 = vpop.permute.xlu1 %691  ;;  %v9163_v27 = vpop.permute.xlu0 %687 }
 0x25e   : > { %13013 = vst [vmem:[#allocation56_spill] sm:$0xff] %v9161_v25  ;;  %13014 = vst [vmem:[#allocation57_spill] sm:$0xff] %v9163_v27 }
 0x25f   : > { %584 = vbcast.lane.b32.xlu1 %v562_v17, 296  ;;  %580 = vbcast.lane.b32.xlu0 %v562_v17, 288 }
 0x261   : > { %v9165_v29 = vpop.permute.xlu1 %769  ;;  %v9167_v31 = vpop.permute.xlu0 %765 }
 0x263   : > { %592 = vbcast.lane.b32.xlu1 %v562_v17, 312  ;;  %588 = vbcast.lane.b32.xlu0 %v562_v17, 304 }
 0x265   : > { %v9169_v39 = vpop.permute.xlu1 %777  ;;  %v9171_v63 = vpop.permute.xlu0 %773 }
 0x267   : > { %600 = vbcast.lane.b32.xlu1 %v562_v17, 328  ;;  %596 = vbcast.lane.b32.xlu0 %v562_v17, 320 }
 0x269   : > { %v9173_v12 = vpop.permute.xlu1 %785  ;;  %v9175_v4 = vpop.permute.xlu0 %781 }
 0x26a   : > { %13015 = vst [vmem:[#allocation58_spill] sm:$0xff] %v9173_v12  ;;  %13016 = vst [vmem:[#allocation59_spill] sm:$0xff] %v9175_v4 }
 0x26b   : > { %608 = vbcast.lane.b32.xlu1 %v562_v17, 344  ;;  %604 = vbcast.lane.b32.xlu0 %v562_v17, 336 }
 0x26d   : > { %v9177_v25 = vpop.permute.xlu1 %793  ;;  %v9179_v27 = vpop.permute.xlu0 %789 }
 0x26e   : > { %13017 = vst [vmem:[#allocation60_spill] sm:$0xff] %v9177_v25  ;;  %13018 = vst [vmem:[#allocation61_spill] sm:$0xff] %v9179_v27 }
 0x26f   : > { %616 = vbcast.lane.b32.xlu1 %v562_v17, 360  ;;  %612 = vbcast.lane.b32.xlu0 %v562_v17, 352 }
 0x271   : > { %v9181_v5 = vpop.permute.xlu1 %801  ;;  %v9183_v49 = vpop.permute.xlu0 %797 }
 0x272   : > { %13019 = vst [vmem:[#allocation62_spill] sm:$0xff] %v9181_v5  ;;  %13020 = vst [vmem:[#allocation63_spill] sm:$0xff] %v9183_v49 }
 0x273   : > { %624 = vbcast.lane.b32.xlu1 %v562_v17, 376  ;;  %620 = vbcast.lane.b32.xlu0 %v562_v17, 368 }
 0x275   : > { %v9187_v2 = vpop.permute.xlu1 %809  ;;  %v9189_v48 = vpop.permute.xlu0 %805 }
 0x276   : > { %13021 = vst [vmem:[#allocation64_spill] sm:$0xff] %v9187_v2  ;;  %13022 = vst [vmem:[#allocation65_spill] sm:$0xff] %v9189_v48 }
 0x277   : > { %702 = vbcast.lane.b32.xlu1 %v696_v20, 264  ;;  %698 = vbcast.lane.b32.xlu0 %v696_v20, 256 }
 0x279   : > { %v9191_v21 = vpop.permute.xlu1 %817  ;;  %v9193_v3 = vpop.permute.xlu0 %813 }
 0x27a   : > { %13023 = vst [vmem:[#allocation66_spill] sm:$0xff] %v9191_v21  ;;  %13024 = vst [vmem:[#allocation67_spill] sm:$0xff] %v9193_v3 }
 0x27b   : > { %710 = vbcast.lane.b32.xlu1 %v696_v20, 280  ;;  %706 = vbcast.lane.b32.xlu0 %v696_v20, 272 }
 0x27d   : > { %v9195_v47 = vpop.permute.xlu1 %825  ;;  %v9197_v18 = vpop.permute.xlu0 %821 }
 0x27e   : > { %13025 = vst [vmem:[#allocation68_spill] sm:$0xff] %v9195_v47  ;;  %13026 = vst [vmem:[#allocation69_spill] sm:$0xff] %v9197_v18 }
 0x27f   : > { %718 = vbcast.lane.b32.xlu1 %v696_v20, 296  ;;  %714 = vbcast.lane.b32.xlu0 %v696_v20, 288 }
 0x281   : > { %v9199_v17 = vpop.permute.xlu1 %903  ;;  %v9201_v0 = vpop.permute.xlu0 %899 }
 0x283   : > { %726 = vbcast.lane.b32.xlu1 %v696_v20, 312  ;;  %722 = vbcast.lane.b32.xlu0 %v696_v20, 304 }
 0x285   : > { %v9203_v2 = vpop.permute.xlu1 %911  ;;  %v9205_v46 = vpop.permute.xlu0 %907 }
 0x286   : > { %13027 = vst [vmem:[#allocation70_spill] sm:$0xff] %v9203_v2 }
 0x287   : > { %734 = vbcast.lane.b32.xlu1 %v696_v20, 328  ;;  %730 = vbcast.lane.b32.xlu0 %v696_v20, 320 }
 0x289   : > { %v9207_v21 = vpop.permute.xlu1 %919  ;;  %v9209_v3 = vpop.permute.xlu0 %915 }
 0x28a   : > { %13028 = vst [vmem:[#allocation71_spill] sm:$0xff] %v9207_v21  ;;  %13029 = vst [vmem:[#allocation72_spill] sm:$0xff] %v9209_v3 }
 0x28b   : > { %742 = vbcast.lane.b32.xlu1 %v696_v20, 344  ;;  %738 = vbcast.lane.b32.xlu0 %v696_v20, 336 }
 0x28d   : > { %v9211_v47 = vpop.permute.xlu1 %927  ;;  %v9213_v18 = vpop.permute.xlu0 %923 }
 0x28e   : > { %13030 = vst [vmem:[#allocation73_spill] sm:$0xff] %v9211_v47  ;;  %13031 = vst [vmem:[#allocation74_spill] sm:$0xff] %v9213_v18 }
 0x28f   : > { %750 = vbcast.lane.b32.xlu1 %v696_v20, 360  ;;  %746 = vbcast.lane.b32.xlu0 %v696_v20, 352 }
 0x291   : > { %v9215_v48 = vpop.permute.xlu1 %935  ;;  %v9217_v19 = vpop.permute.xlu0 %931 }
 0x292   : > { %13032 = vst [vmem:[#allocation75_spill] sm:$0xff] %v9215_v48  ;;  %13033 = vst [vmem:[#allocation76_spill] sm:$0xff] %v9217_v19 }
 0x293   : > { %758 = vbcast.lane.b32.xlu1 %v696_v20, 376  ;;  %754 = vbcast.lane.b32.xlu0 %v696_v20, 368 }
 0x295   : > { %v9221_v45 = vpop.permute.xlu1 %943  ;;  %v9223_v44 = vpop.permute.xlu0 %939 }
 0x296   : > { %13034 = vst [vmem:[#allocation77_spill] sm:$0xff] %v9221_v45  ;;  %13035 = vst [vmem:[#allocation78_spill] sm:$0xff] %v9223_v44 }
 0x297   : > { %836 = vbcast.lane.b32.xlu1 %v830_v1, 264  ;;  %832 = vbcast.lane.b32.xlu0 %v830_v1, 256 }
 0x299   : > { %v9225_v5 = vpop.permute.xlu1 %951  ;;  %v9227_v15 = vpop.permute.xlu0 %947 }
 0x29a   : > { %13036 = vst [vmem:[#allocation79_spill] sm:$0xff] %v9225_v5  ;;  %13037 = vst [vmem:[#allocation80_spill] sm:$0xff] %v9227_v15 }
 0x29b   : > { %844 = vbcast.lane.b32.xlu1 %v830_v1, 280  ;;  %840 = vbcast.lane.b32.xlu0 %v830_v1, 272 }
 0x29d   : > { %v9229_v48 = vpop.permute.xlu1 %959  ;;  %v9231_v60 = vpop.permute.xlu0 %955 }
 0x29e   : > { %13038 = vst [vmem:[#allocation81_spill] sm:$0xff] %v9229_v48  ;;  %13039 = vst [vmem:[#allocation82_spill] sm:$0xff] %v9231_v60 }
 0x29f   : > { %852 = vbcast.lane.b32.xlu1 %v830_v1, 296  ;;  %848 = vbcast.lane.b32.xlu0 %v830_v1, 288 }
 0x2a1   : > { %v9233_v20 = vpop.permute.xlu1 %1037  ;;  %v9235_v42 = vpop.permute.xlu0 %1033 }
 0x2a3   : > { %860 = vbcast.lane.b32.xlu1 %v830_v1, 312  ;;  %856 = vbcast.lane.b32.xlu0 %v830_v1, 304 }
 0x2a5   : > { %v9237_v45 = vpop.permute.xlu1 %1045  ;;  %v9239_v44 = vpop.permute.xlu0 %1041 }
 0x2a7   : > { %868 = vbcast.lane.b32.xlu1 %v830_v1, 328  ;;  %864 = vbcast.lane.b32.xlu0 %v830_v1, 320 }
 0x2a9   : > { %v9241_v5 = vpop.permute.xlu1 %434  ;;  %v9243_v15 = vpop.permute.xlu0 %430 }
 0x2aa   : > { %13040 = vst [vmem:[#allocation83_spill] sm:$0xff] %v9241_v5  ;;  %13041 = vst [vmem:[#allocation84_spill] sm:$0xff] %v9243_v15 }
 0x2ab   : > { %876 = vbcast.lane.b32.xlu1 %v830_v1, 344  ;;  %872 = vbcast.lane.b32.xlu0 %v830_v1, 336 }
 0x2ad   : > { %v9245_v48 = vpop.permute.xlu1 %442  ;;  %v9247_v60 = vpop.permute.xlu0 %438 }
 0x2ae   : > { %13042 = vst [vmem:[#allocation85_spill] sm:$0xff] %v9245_v48  ;;  %13043 = vst [vmem:[#allocation86_spill] sm:$0xff] %v9247_v60 }
 0x2af   : > { %884 = vbcast.lane.b32.xlu1 %v830_v1, 360  ;;  %880 = vbcast.lane.b32.xlu0 %v830_v1, 352 }
 0x2b1   : > { %v9249_v19 = vpop.permute.xlu1 %450  ;;  %v9251_v62 = vpop.permute.xlu0 %446 }
 0x2b2   : > { %13044 = vst [vmem:[#allocation87_spill] sm:$0xff] %v9249_v19  ;;  %13045 = vst [vmem:[#allocation88_spill] sm:$0xff] %v9251_v62 }
 0x2b3   : > { %892 = vbcast.lane.b32.xlu1 %v830_v1, 376  ;;  %888 = vbcast.lane.b32.xlu0 %v830_v1, 368 }
 0x2b5   : > { %v9255_v5 = vpop.permute.xlu1 %458  ;;  %v9257_v15 = vpop.permute.xlu0 %454 }
 0x2b6   : > { %13046 = vst [vmem:[#allocation89_spill] sm:$0xff] %v9255_v5  ;;  %13047 = vst [vmem:[#allocation90_spill] sm:$0xff] %v9257_v15 }
 0x2b7   : > { %970 = vbcast.lane.b32.xlu1 %v964_v43, 264  ;;  %966 = vbcast.lane.b32.xlu0 %v964_v43, 256 }
 0x2b9   : > { %v9259_v48 = vpop.permute.xlu1 %466  ;;  %v9261_v60 = vpop.permute.xlu0 %462 }
 0x2ba   : > { %13048 = vst [vmem:[#allocation91_spill] sm:$0xff] %v9259_v48  ;;  %13049 = vst [vmem:[#allocation92_spill] sm:$0xff] %v9261_v60 }
 0x2bb   : > { %978 = vbcast.lane.b32.xlu1 %v964_v43, 280  ;;  %974 = vbcast.lane.b32.xlu0 %v964_v43, 272 }
 0x2bd   : > { %v9263_v19 = vpop.permute.xlu1 %474  ;;  %v9265_v62 = vpop.permute.xlu0 %470 }
 0x2be   : > { %13050 = vst [vmem:[#allocation93_spill] sm:$0xff] %v9263_v19  ;;  %13051 = vst [vmem:[#allocation94_spill] sm:$0xff] %v9265_v62 }
 0x2bf   : > { %986 = vbcast.lane.b32.xlu1 %v964_v43, 296  ;;  %982 = vbcast.lane.b32.xlu0 %v964_v43, 288 }
 0x2c1   : > { %v9267_v1 = vpop.permute.xlu1 %482  ;;  %v9269_v49 = vpop.permute.xlu0 %478 }
 0x2c2   : > { %13052 = vst [vmem:[#allocation95_spill] sm:$0xff] %v9267_v1  ;;  %13053 = vst [vmem:[#allocation96_spill] sm:$0xff] %v9269_v49 }
 0x2c3   : > { %994 = vbcast.lane.b32.xlu1 %v964_v43, 312  ;;  %990 = vbcast.lane.b32.xlu0 %v964_v43, 304 }
 0x2c5   : > { %v9271_v5 = vpop.permute.xlu1 %490  ;;  %v9273_v15 = vpop.permute.xlu0 %486 }
 0x2c6   : > { %13054 = vst [vmem:[#allocation97_spill] sm:$0xff] %v9271_v5  ;;  %13055 = vst [vmem:[#allocation98_spill] sm:$0xff] %v9273_v15 }
 0x2c7   : > { %1002 = vbcast.lane.b32.xlu1 %v964_v43, 328  ;;  %998 = vbcast.lane.b32.xlu0 %v964_v43, 320 }
 0x2c9   : > { %v9275_v48 = vpop.permute.xlu1 %568  ;;  %v9277_v60 = vpop.permute.xlu0 %564 }
 0x2ca   : > { %13056 = vst [vmem:[#allocation99_spill] sm:$0xff] %v9275_v48  ;;  %13057 = vst [vmem:[#allocation100_spill] sm:$0xff] %v9277_v60 }
 0x2cb   : > { %1010 = vbcast.lane.b32.xlu1 %v964_v43, 344  ;;  %1006 = vbcast.lane.b32.xlu0 %v964_v43, 336 }
 0x2cd   : > { %v9279_v19 = vpop.permute.xlu1 %576  ;;  %v9281_v62 = vpop.permute.xlu0 %572 }
 0x2ce   : > { %13058 = vst [vmem:[#allocation101_spill] sm:$0xff] %v9279_v19  ;;  %13059 = vst [vmem:[#allocation102_spill] sm:$0xff] %v9281_v62 }
 0x2cf   : > { %1018 = vbcast.lane.b32.xlu1 %v964_v43, 360  ;;  %1014 = vbcast.lane.b32.xlu0 %v964_v43, 352 }
 0x2d1   : > { %v9283_v1 = vpop.permute.xlu1 %584  ;;  %v9285_v49 = vpop.permute.xlu0 %580 }
 0x2d2   : > { %13060 = vst [vmem:[#allocation103_spill] sm:$0xff] %v9283_v1  ;;  %13061 = vst [vmem:[#allocation104_spill] sm:$0xff] %v9285_v49 }
 0x2d3   : > { %1026 = vbcast.lane.b32.xlu1 %v964_v43, 376  ;;  %1022 = vbcast.lane.b32.xlu0 %v964_v43, 368 }
 0x2d5   : > { %v9287_v5 = vpop.permute.xlu1 %592  ;;  %v9289_v15 = vpop.permute.xlu0 %588 }
 0x2d6   : > { %13062 = vst [vmem:[#allocation105_spill] sm:$0xff] %v9287_v5  ;;  %13063 = vst [vmem:[#allocation106_spill] sm:$0xff] %v9289_v15 }
 0x2d7   : > { %1053 = vbcast.lane.b32.xlu1 %v9097_v57, 296  ;;  %1049 = vbcast.lane.b32.xlu0 %v9097_v57, 288 }
 0x2d9   : > { %v9293_v48 = vpop.permute.xlu1 %600  ;;  %v9295_v19 = vpop.permute.xlu0 %596 }
 0x2da   : > { %13064 = vst [vmem:[#allocation107_spill] sm:$0xff] %v9293_v48  ;;  %13065 = vst [vmem:[#allocation108_spill] sm:$0xff] %v9295_v19 }
 0x2db   : > { %1061 = vbcast.lane.b32.xlu1 %v9097_v57, 312  ;;  %1057 = vbcast.lane.b32.xlu0 %v9097_v57, 304 }
 0x2dd   : > { %v9299_v1 = vpop.permute.xlu1 %608  ;;  %v9301_v49 = vpop.permute.xlu0 %604 }
 0x2de   : > { %13066 = vst [vmem:[#allocation109_spill] sm:$0xff] %v9299_v1  ;;  %13067 = vst [vmem:[#allocation110_spill] sm:$0xff] %v9301_v49 }
 0x2df   : > { %1069 = vbcast.lane.b32.xlu1 %v9097_v57, 328  ;;  %1065 = vbcast.lane.b32.xlu0 %v9097_v57, 320 }
 0x2e1   : > { %v9305_v43 = vpop.permute.xlu1 %616  ;;  %v9307_v5 = vpop.permute.xlu0 %612 }
 0x2e2   : > { %13068 = vst [vmem:[#allocation111_spill] sm:$0xff] %v9305_v43  ;;  %13069 = vst [vmem:[#allocation112_spill] sm:$0xff] %v9307_v5  ;;  %v1098_v43 = vrot.slane %v9107_v61, %v9089_v54 }
 0x2e3   : > { %1077 = vbcast.lane.b32.xlu1 %v9097_v57, 344  ;;  %1073 = vbcast.lane.b32.xlu0 %v9097_v57, 336 }
 0x2e5   : > { %v9311_v48 = vpop.permute.xlu1 %624  ;;  %v9313_v19 = vpop.permute.xlu0 %620 }
 0x2e6   : > { %13070 = vst [vmem:[#allocation113_spill] sm:$0xff] %v9311_v48  ;;  %13071 = vst [vmem:[#allocation114_spill] sm:$0xff] %v9313_v19 }
 0x2e7   : > { %1085 = vbcast.lane.b32.xlu1 %v9097_v57, 360  ;;  %1081 = vbcast.lane.b32.xlu0 %v9097_v57, 352 }
 0x2e9   : > { %v9317_v1 = vpop.permute.xlu1 %702  ;;  %v9319_v49 = vpop.permute.xlu0 %698 }
 0x2ea   : > { %13072 = vst [vmem:[#allocation115_spill] sm:$0xff] %v9317_v1  ;;  %13073 = vst [vmem:[#allocation116_spill] sm:$0xff] %v9319_v49 }
 0x2eb   : > { %1093 = vbcast.lane.b32.xlu1 %v9097_v57, 376  ;;  %1089 = vbcast.lane.b32.xlu0 %v9097_v57, 368 }
 0x2ed   : > { %v9325_v5 = vpop.permute.xlu1 %710  ;;  %v9327_v48 = vpop.permute.xlu0 %706 }
 0x2ee   : > { %13074 = vst [vmem:[#allocation117_spill] sm:$0xff] %v9325_v5  ;;  %13075 = vst [vmem:[#allocation118_spill] sm:$0xff] %v9327_v48 }
 0x2ef   : > { %1104 = vbcast.lane.b32.xlu1 %v1098_v43, 264  ;;  %1100 = vbcast.lane.b32.xlu0 %v1098_v43, 256 }
 0x2f1   : > { %v9329_v19 = vpop.permute.xlu1 %718  ;;  %v9331_v15 = vpop.permute.xlu0 %714 }
 0x2f2   : > { %13076 = vst [vmem:[#allocation119_spill] sm:$0xff] %v9329_v19  ;;  %13077 = vst [vmem:[#allocation120_spill] sm:$0xff] %v9331_v15 }
 0x2f3   : > { %1112 = vbcast.lane.b32.xlu1 %v1098_v43, 280  ;;  %1108 = vbcast.lane.b32.xlu0 %v1098_v43, 272 }
 0x2f5   : > { %v9333_v62 = vpop.permute.xlu1 %726  ;;  %v9335_v49 = vpop.permute.xlu0 %722 }
 0x2f6   : > { %13078 = vst [vmem:[#allocation121_spill] sm:$0xff] %v9333_v62  ;;  %13079 = vst [vmem:[#allocation122_spill] sm:$0xff] %v9335_v49 }
 0x2f7   : > { %1120 = vbcast.lane.b32.xlu1 %v1098_v43, 296  ;;  %1116 = vbcast.lane.b32.xlu0 %v1098_v43, 288 }
 0x2f9   : > { %v9337_v57 = vpop.permute.xlu1 %734  ;;  %v9339_v1 = vpop.permute.xlu0 %730 }
 0x2fa   : > { %13080 = vst [vmem:[#allocation123_spill] sm:$0xff] %v9337_v57  ;;  %13081 = vst [vmem:[#allocation124_spill] sm:$0xff] %v9339_v1  ;;  %v9354_v57 = vsub.s32 6, %v9019_v22 }
 0x2fb   : > { %1128 = vbcast.lane.b32.xlu1 %v1098_v43, 312  ;;  %1124 = vbcast.lane.b32.xlu0 %v1098_v43, 304 }
 0x2fd   : > { %v9341_v5 = vpop.permute.xlu1 %742  ;;  %v9343_v48 = vpop.permute.xlu0 %738 }
 0x2fe   : > { %13082 = vst [vmem:[#allocation125_spill] sm:$0xff] %v9341_v5  ;;  %13083 = vst [vmem:[#allocation126_spill] sm:$0xff] %v9343_v48 }
 0x2ff   : > { %1136 = vbcast.lane.b32.xlu1 %v1098_v43, 328  ;;  %1132 = vbcast.lane.b32.xlu0 %v1098_v43, 320 }
 0x301   : > { %v9345_v19 = vpop.permute.xlu1 %750  ;;  %v9347_v15 = vpop.permute.xlu0 %746 }
 0x302   : > { %13084 = vst [vmem:[#allocation127_spill] sm:$0xff] %v9345_v19  ;;  %13085 = vst [vmem:[#allocation128_spill] sm:$0xff] %v9347_v15  ;;  %v1165_v19 = vrot.slane %v9024_v24, %v9354_v57 }
 0x303   : > { %1144 = vbcast.lane.b32.xlu1 %v1098_v43, 344  ;;  %1140 = vbcast.lane.b32.xlu0 %v1098_v43, 336 }
 0x305   : > { %v9349_v62 = vpop.permute.xlu1 %758  ;;  %v9351_v49 = vpop.permute.xlu0 %754 }
 0x306   : > { %13086 = vst [vmem:[#allocation129_spill] sm:$0xff] %v9349_v62  ;;  %13087 = vst [vmem:[#allocation130_spill] sm:$0xff] %v9351_v49 }
 0x307   : > { %1152 = vbcast.lane.b32.xlu1 %v1098_v43, 360  ;;  %1148 = vbcast.lane.b32.xlu0 %v1098_v43, 352 }
 0x309   : > { %v9356_v5 = vpop.permute.xlu1 %836  ;;  %v9358_v48 = vpop.permute.xlu0 %832 }
 0x30a   : > { %13088 = vst [vmem:[#allocation131_spill] sm:$0xff] %v9356_v5  ;;  %13089 = vst [vmem:[#allocation132_spill] sm:$0xff] %v9358_v48 }
 0x30b   : > { %1160 = vbcast.lane.b32.xlu1 %v1098_v43, 376  ;;  %1156 = vbcast.lane.b32.xlu0 %v1098_v43, 368 }
 0x30d   : > { %v9362_v15 = vpop.permute.xlu1 %844  ;;  %v9364_v1 = vpop.permute.xlu0 %840 }
 0x30e   : > { %13090 = vst [vmem:[#allocation133_spill] sm:$0xff] %v9362_v15  ;;  %13091 = vst [vmem:[#allocation134_spill] sm:$0xff] %v9364_v1 }
 0x30f   : > { %1171 = vbcast.lane.b32.xlu1 %v1165_v19, 264  ;;  %1167 = vbcast.lane.b32.xlu0 %v1165_v19, 256 }
 0x311   : > { %v9366_v62 = vpop.permute.xlu1 %852  ;;  %v9368_v49 = vpop.permute.xlu0 %848 }
 0x312   : > { %13092 = vst [vmem:[#allocation135_spill] sm:$0xff] %v9366_v62  ;;  %13093 = vst [vmem:[#allocation136_spill] sm:$0xff] %v9368_v49 }
 0x313   : > { %1179 = vbcast.lane.b32.xlu1 %v1165_v19, 280  ;;  %1175 = vbcast.lane.b32.xlu0 %v1165_v19, 272 }
 0x315   : > { %v9370_v5 = vpop.permute.xlu1 %860  ;;  %v9372_v48 = vpop.permute.xlu0 %856 }
 0x316   : > { %13094 = vst [vmem:[#allocation137_spill] sm:$0xff] %v9370_v5  ;;  %13095 = vst [vmem:[#allocation138_spill] sm:$0xff] %v9372_v48 }
 0x317   : > { %1187 = vbcast.lane.b32.xlu1 %v1165_v19, 296  ;;  %1183 = vbcast.lane.b32.xlu0 %v1165_v19, 288 }
 0x319   : > { %v9374_v43 = vpop.permute.xlu1 %868  ;;  %v9376_v60 = vpop.permute.xlu0 %864 }
 0x31a   : > { %13096 = vst [vmem:[#allocation139_spill] sm:$0xff] %v9374_v43  ;;  %13097 = vst [vmem:[#allocation140_spill] sm:$0xff] %v9376_v60 }
 0x31b   : > { %1195 = vbcast.lane.b32.xlu1 %v1165_v19, 312  ;;  %1191 = vbcast.lane.b32.xlu0 %v1165_v19, 304 }
 0x31d   : > { %v9378_v15 = vpop.permute.xlu1 %876  ;;  %v9380_v1 = vpop.permute.xlu0 %872 }
 0x31e   : > { %13098 = vst [vmem:[#allocation141_spill] sm:$0xff] %v9378_v15  ;;  %13099 = vst [vmem:[#allocation142_spill] sm:$0xff] %v9380_v1  ;;  %v1232_v15 = vrot.slane %v9107_v61, %v9354_v57 }
 0x31f   : > { %1203 = vbcast.lane.b32.xlu1 %v1165_v19, 328  ;;  %1199 = vbcast.lane.b32.xlu0 %v1165_v19, 320 }
 0x321   : > { %v9382_v62 = vpop.permute.xlu1 %884  ;;  %v9384_v49 = vpop.permute.xlu0 %880 }
 0x322   : > { %13100 = vst [vmem:[#allocation143_spill] sm:$0xff] %v9382_v62  ;;  %13101 = vst [vmem:[#allocation144_spill] sm:$0xff] %v9384_v49 }
 0x323   : > { %1211 = vbcast.lane.b32.xlu1 %v1165_v19, 344  ;;  %1207 = vbcast.lane.b32.xlu0 %v1165_v19, 336 }
 0x325   : > { %v9386_v5 = vpop.permute.xlu1 %892  ;;  %v9388_v48 = vpop.permute.xlu0 %888 }
 0x326   : > { %13102 = vst [vmem:[#allocation145_spill] sm:$0xff] %v9386_v5  ;;  %13103 = vst [vmem:[#allocation146_spill] sm:$0xff] %v9388_v48 }
 0x327   : > { %1219 = vbcast.lane.b32.xlu1 %v1165_v19, 360  ;;  %1215 = vbcast.lane.b32.xlu0 %v1165_v19, 352 }
 0x329   : > { %v9390_v43 = vpop.permute.xlu1 %970  ;;  %v9392_v60 = vpop.permute.xlu0 %966 }
 0x32a   : > { %13104 = vst [vmem:[#allocation147_spill] sm:$0xff] %v9390_v43  ;;  %13105 = vst [vmem:[#allocation148_spill] sm:$0xff] %v9392_v60 }
 0x32b   : > { %1227 = vbcast.lane.b32.xlu1 %v1165_v19, 376  ;;  %1223 = vbcast.lane.b32.xlu0 %v1165_v19, 368 }
 0x32d   : > { %v9396_v62 = vpop.permute.xlu1 %978  ;;  %v9398_v49 = vpop.permute.xlu0 %974 }
 0x32e   : > { %13106 = vst [vmem:[#allocation149_spill] sm:$0xff] %v9396_v62  ;;  %13107 = vst [vmem:[#allocation150_spill] sm:$0xff] %v9398_v49 }
 0x32f   : > { %1238 = vbcast.lane.b32.xlu1 %v1232_v15, 264  ;;  %1234 = vbcast.lane.b32.xlu0 %v1232_v15, 256 }
 0x331   : > { %v9400_v5 = vpop.permute.xlu1 %986  ;;  %v9402_v48 = vpop.permute.xlu0 %982 }
 0x332   : > { %13108 = vst [vmem:[#allocation151_spill] sm:$0xff] %v9400_v5  ;;  %13109 = vst [vmem:[#allocation152_spill] sm:$0xff] %v9402_v48 }
 0x333   : > { %1246 = vbcast.lane.b32.xlu1 %v1232_v15, 280  ;;  %1242 = vbcast.lane.b32.xlu0 %v1232_v15, 272 }
 0x335   : > { %v9404_v1 = vpop.permute.xlu1 %994  ;;  %v9406_v43 = vpop.permute.xlu0 %990 }
 0x336   : > { %13110 = vst [vmem:[#allocation153_spill] sm:$0xff] %v9404_v1  ;;  %13111 = vst [vmem:[#allocation154_spill] sm:$0xff] %v9406_v43 }
 0x337   : > { %1254 = vbcast.lane.b32.xlu1 %v1232_v15, 296  ;;  %1250 = vbcast.lane.b32.xlu0 %v1232_v15, 288 }
 0x339   : > { %v9408_v19 = vpop.permute.xlu1 %1002  ;;  %v9410_v60 = vpop.permute.xlu0 %998 }
 0x33a   : > { %13112 = vst [vmem:[#allocation155_spill] sm:$0xff] %v9408_v19  ;;  %13113 = vst [vmem:[#allocation156_spill] sm:$0xff] %v9410_v60  ;;  %v9425_v19 = vsub.s32 7, %v9019_v22 }
 0x33b   : > { %1262 = vbcast.lane.b32.xlu1 %v1232_v15, 312  ;;  %1258 = vbcast.lane.b32.xlu0 %v1232_v15, 304 }
 0x33d   : > { %v9412_v62 = vpop.permute.xlu1 %1010  ;;  %v9414_v49 = vpop.permute.xlu0 %1006 }
 0x33e   : > { %13114 = vst [vmem:[#allocation157_spill] sm:$0xff] %v9412_v62  ;;  %13115 = vst [vmem:[#allocation158_spill] sm:$0xff] %v9414_v49 }
 0x33f   : > { %1270 = vbcast.lane.b32.xlu1 %v1232_v15, 328  ;;  %1266 = vbcast.lane.b32.xlu0 %v1232_v15, 320 }
 0x341   : > { %v9416_v5 = vpop.permute.xlu1 %1018  ;;  %v9418_v48 = vpop.permute.xlu0 %1014 }
 0x342   : > { %13116 = vst [vmem:[#allocation159_spill] sm:$0xff] %v9416_v5  ;;  %13117 = vst [vmem:[#allocation160_spill] sm:$0xff] %v9418_v48  ;;  %v1299_v5 = vrot.slane %v9024_v24, %v9425_v19 }
 0x343   : > { %1278 = vbcast.lane.b32.xlu1 %v1232_v15, 344  ;;  %1274 = vbcast.lane.b32.xlu0 %v1232_v15, 336 }
 0x345   : > { %v9420_v1 = vpop.permute.xlu1 %1026  ;;  %v9422_v43 = vpop.permute.xlu0 %1022 }
 0x346   : > { %13118 = vst [vmem:[#allocation161_spill] sm:$0xff] %v9420_v1  ;;  %13119 = vst [vmem:[#allocation162_spill] sm:$0xff] %v9422_v43 }
 0x347   : > { %1286 = vbcast.lane.b32.xlu1 %v1232_v15, 360  ;;  %1282 = vbcast.lane.b32.xlu0 %v1232_v15, 352 }
 0x349   : > { %v9427_v62 = vpop.permute.xlu1 %1053  ;;  %v9429_v49 = vpop.permute.xlu0 %1049 }
 0x34a   : > { %13120 = vst [vmem:[#allocation163_spill] sm:$0xff] %v9427_v62  ;;  %13121 = vst [vmem:[#allocation164_spill] sm:$0xff] %v9429_v49 }
 0x34b   : > { %1294 = vbcast.lane.b32.xlu1 %v1232_v15, 376  ;;  %1290 = vbcast.lane.b32.xlu0 %v1232_v15, 368 }
 0x34d   : > { %v9433_v48 = vpop.permute.xlu1 %1061  ;;  %v9435_v60 = vpop.permute.xlu0 %1057 }
 0x34e   : > { %13122 = vst [vmem:[#allocation165_spill] sm:$0xff] %v9433_v48  ;;  %13123 = vst [vmem:[#allocation166_spill] sm:$0xff] %v9435_v60 }
 0x34f   : > { %1305 = vbcast.lane.b32.xlu1 %v1299_v5, 264  ;;  %1301 = vbcast.lane.b32.xlu0 %v1299_v5, 256 }
 0x351   : > { %v9437_v1 = vpop.permute.xlu1 %1069  ;;  %v9439_v43 = vpop.permute.xlu0 %1065 }
 0x352   : > { %13124 = vst [vmem:[#allocation167_spill] sm:$0xff] %v9437_v1  ;;  %13125 = vst [vmem:[#allocation168_spill] sm:$0xff] %v9439_v43 }
 0x353   : > { %1313 = vbcast.lane.b32.xlu1 %v1299_v5, 280  ;;  %1309 = vbcast.lane.b32.xlu0 %v1299_v5, 272 }
 0x355   : > { %v9441_v16 = vpop.permute.xlu1 %1077  ;;  %v9443_v47 = vpop.permute.xlu0 %1073 }
 0x356   : > { %13126 = vst [vmem:[#allocation169_spill] sm:$0xff] %v9441_v16  ;;  %13127 = vst [vmem:[#allocation170_spill] sm:$0xff] %v9443_v47 }
 0x357   : > { %1321 = vbcast.lane.b32.xlu1 %v1299_v5, 296  ;;  %1317 = vbcast.lane.b32.xlu0 %v1299_v5, 288 }
 0x359   : > { %v9445_v15 = vpop.permute.xlu1 %1085  ;;  %v9447_v24 = vpop.permute.xlu0 %1081 }
 0x35a   : > { %13128 = vst [vmem:[#allocation171_spill] sm:$0xff] %v9445_v15  ;;  %13129 = vst [vmem:[#allocation172_spill] sm:$0xff] %v9447_v24 }
 0x35b   : > { %1329 = vbcast.lane.b32.xlu1 %v1299_v5, 312  ;;  %1325 = vbcast.lane.b32.xlu0 %v1299_v5, 304 }
 0x35d   : > { %v9449_v58 = vpop.permute.xlu1 %1093  ;;  %v9451_v40 = vpop.permute.xlu0 %1089 }
 0x35e   : > { %13130 = vst [vmem:[#allocation173_spill] sm:$0xff] %v9449_v58  ;;  %13131 = vst [vmem:[#allocation174_spill] sm:$0xff] %v9451_v40  ;;  %v1366_v58 = vrot.slane %v9107_v61, %v9425_v19 }
 0x35f   : > { %1337 = vbcast.lane.b32.xlu1 %v1299_v5, 328  ;;  %1333 = vbcast.lane.b32.xlu0 %v1299_v5, 320 }
 0x361   : > { %v9453_v1 = vpop.permute.xlu1 %1104  ;;  %v9455_v43 = vpop.permute.xlu0 %1100 }
 0x362   : > { %13132 = vst [vmem:[#allocation175_spill] sm:$0xff] %v9453_v1  ;;  %13133 = vst [vmem:[#allocation176_spill] sm:$0xff] %v9455_v43 }
 0x363   : > { %1345 = vbcast.lane.b32.xlu1 %v1299_v5, 344  ;;  %1341 = vbcast.lane.b32.xlu0 %v1299_v5, 336 }
 0x365   : > { %v9457_v16 = vpop.permute.xlu1 %1112  ;;  %v9459_v47 = vpop.permute.xlu0 %1108 }
 0x366   : > { %13134 = vst [vmem:[#allocation177_spill] sm:$0xff] %v9457_v16  ;;  %13135 = vst [vmem:[#allocation178_spill] sm:$0xff] %v9459_v47 }
 0x367   : > { %1353 = vbcast.lane.b32.xlu1 %v1299_v5, 360  ;;  %1349 = vbcast.lane.b32.xlu0 %v1299_v5, 352 }
 0x369   : > { %v9461_v15 = vpop.permute.xlu1 %1120  ;;  %v9463_v24 = vpop.permute.xlu0 %1116 }
 0x36a   : > { %13136 = vst [vmem:[#allocation179_spill] sm:$0xff] %v9461_v15  ;;  %13137 = vst [vmem:[#allocation180_spill] sm:$0xff] %v9463_v24 }
 0x36b   : > { %1361 = vbcast.lane.b32.xlu1 %v1299_v5, 376  ;;  %1357 = vbcast.lane.b32.xlu0 %v1299_v5, 368 }
 0x36d   : > { %v9467_v1 = vpop.permute.xlu1 %1128  ;;  %v9469_v43 = vpop.permute.xlu0 %1124 }
 0x36e   : > { %13138 = vst [vmem:[#allocation181_spill] sm:$0xff] %v9467_v1  ;;  %13139 = vst [vmem:[#allocation182_spill] sm:$0xff] %v9469_v43 }
 0x36f   : > { %1372 = vbcast.lane.b32.xlu1 %v1366_v58, 264  ;;  %1368 = vbcast.lane.b32.xlu0 %v1366_v58, 256 }
 0x371   : > { %v9471_v16 = vpop.permute.xlu1 %1136  ;;  %v9473_v47 = vpop.permute.xlu0 %1132 }
 0x372   : > { %13140 = vst [vmem:[#allocation183_spill] sm:$0xff] %v9471_v16  ;;  %13141 = vst [vmem:[#allocation184_spill] sm:$0xff] %v9473_v47 }
 0x373   : > { %1380 = vbcast.lane.b32.xlu1 %v1366_v58, 280  ;;  %1376 = vbcast.lane.b32.xlu0 %v1366_v58, 272 }
 0x375   : > { %v9475_v15 = vpop.permute.xlu1 %1144  ;;  %v9477_v24 = vpop.permute.xlu0 %1140 }
 0x376   : > { %13142 = vst [vmem:[#allocation185_spill] sm:$0xff] %v9475_v15  ;;  %13143 = vst [vmem:[#allocation186_spill] sm:$0xff] %v9477_v24 }
 0x377   : > { %1388 = vbcast.lane.b32.xlu1 %v1366_v58, 296  ;;  %1384 = vbcast.lane.b32.xlu0 %v1366_v58, 288 }
 0x379   : > { %v9479_v5 = vpop.permute.xlu1 %1152  ;;  %v9481_v61 = vpop.permute.xlu0 %1148 }
 0x37a   : > { %13144 = vst [vmem:[#allocation187_spill] sm:$0xff] %v9479_v5  ;;  %13145 = vst [vmem:[#allocation188_spill] sm:$0xff] %v9481_v61 }
 0x37b   : > { %1396 = vbcast.lane.b32.xlu1 %v1366_v58, 312  ;;  %1392 = vbcast.lane.b32.xlu0 %v1366_v58, 304 }
 0x37d   : > { %v9483_v1 = vpop.permute.xlu1 %1160  ;;  %v9485_v43 = vpop.permute.xlu0 %1156 }
 0x37e   : > { %13146 = vst [vmem:[#allocation189_spill] sm:$0xff] %v9483_v1  ;;  %13147 = vst [vmem:[#allocation190_spill] sm:$0xff] %v9485_v43  ;;  %v9499_v1 = vpop.f32.mrf.mxu1 }
 0x37f   : > { %1404 = vbcast.lane.b32.xlu1 %v1366_v58, 328  ;;  %1400 = vbcast.lane.b32.xlu0 %v1366_v58, 320  ;;  %v1433_v43 = vrot.slane %v9499_v1, %v9022_v23 }
 0x381   : > { %v9487_v16 = vpop.permute.xlu1 %1171  ;;  %v9489_v47 = vpop.permute.xlu0 %1167 }
 0x383   : > { %1412 = vbcast.lane.b32.xlu1 %v1366_v58, 344  ;;  %1408 = vbcast.lane.b32.xlu0 %v1366_v58, 336 }
 0x385   : > { %v9491_v15 = vpop.permute.xlu1 %1179  ;;  %v9493_v24 = vpop.permute.xlu0 %1175 }
 0x386   : > { %13148 = vst [vmem:[#allocation191_spill] sm:$0xff] %v9491_v15 }
 0x387   : > { %1420 = vbcast.lane.b32.xlu1 %v1366_v58, 360  ;;  %1416 = vbcast.lane.b32.xlu0 %v1366_v58, 352 }
 0x389   : > { %v9495_v5 = vpop.permute.xlu1 %1187  ;;  %v9497_v61 = vpop.permute.xlu0 %1183 }
 0x38a   : > { %13149 = vst [vmem:[#allocation192_spill] sm:$0xff] %v9495_v5  ;;  %13150 = vst [vmem:[#allocation193_spill] sm:$0xff] %v9497_v61 }
 0x38b   : > { %1428 = vbcast.lane.b32.xlu1 %v1366_v58, 376  ;;  %1424 = vbcast.lane.b32.xlu0 %v1366_v58, 368 }
 0x38d   : > { %v9503_v40 = vpop.permute.xlu1 %1195  ;;  %v9505_v48 = vpop.permute.xlu0 %1191 }
 0x38e   : > { %13151 = vst [vmem:[#allocation194_spill] sm:$0xff] %v9503_v40  ;;  %13152 = vst [vmem:[#allocation195_spill] sm:$0xff] %v9505_v48 }
 0x38f   : > { %1439 = vbcast.lane.b32.xlu1 %v1433_v43, 264  ;;  %1435 = vbcast.lane.b32.xlu0 %v1433_v43, 256 }
 0x391   : > { %v9507_v25 = vpop.permute.xlu1 %1203  ;;  %v9509_v13 = vpop.permute.xlu0 %1199 }
 0x392   : > { %13153 = vst [vmem:[#allocation196_spill] sm:$0xff] %v9507_v25  ;;  %13154 = vst [vmem:[#allocation197_spill] sm:$0xff] %v9509_v13 }
 0x393   : > { %1447 = vbcast.lane.b32.xlu1 %v1433_v43, 280  ;;  %1443 = vbcast.lane.b32.xlu0 %v1433_v43, 272 }
 0x395   : > { %v9511_v18 = vpop.permute.xlu1 %1211  ;;  %v9513_v59 = vpop.permute.xlu0 %1207 }
 0x396   : > { %13155 = vst [vmem:[#allocation198_spill] sm:$0xff] %v9511_v18  ;;  %13156 = vst [vmem:[#allocation199_spill] sm:$0xff] %v9513_v59 }
 0x397   : > { %1455 = vbcast.lane.b32.xlu1 %v1433_v43, 296  ;;  %1451 = vbcast.lane.b32.xlu0 %v1433_v43, 288 }
 0x399   : > { %v9515_v41 = vpop.permute.xlu1 %1219  ;;  %v9517_v58 = vpop.permute.xlu0 %1215 }
 0x39a   : > { %13157 = vst [vmem:[#allocation200_spill] sm:$0xff] %v9515_v41  ;;  %13158 = vst [vmem:[#allocation201_spill] sm:$0xff] %v9517_v58  ;;  %v9533_v58 = vpop.f32.mrf.mxu1 }
 0x39b   : > { %1463 = vbcast.lane.b32.xlu1 %v1433_v43, 312  ;;  %1459 = vbcast.lane.b32.xlu0 %v1433_v43, 304 }
 0x39d   : > { %v9519_v40 = vpop.permute.xlu1 %1227  ;;  %v9521_v48 = vpop.permute.xlu0 %1223 }
 0x39e   : > { %13159 = vst [vmem:[#allocation202_spill] sm:$0xff] %v9519_v40  ;;  %13160 = vst [vmem:[#allocation203_spill] sm:$0xff] %v9521_v48 }
 0x39f   : > { %1471 = vbcast.lane.b32.xlu1 %v1433_v43, 328  ;;  %1467 = vbcast.lane.b32.xlu0 %v1433_v43, 320 }
 0x3a1   : > { %v9523_v25 = vpop.permute.xlu1 %1238  ;;  %v9525_v13 = vpop.permute.xlu0 %1234 }
 0x3a2   : > { %13161 = vst [vmem:[#allocation204_spill] sm:$0xff] %v9523_v25  ;;  %13162 = vst [vmem:[#allocation205_spill] sm:$0xff] %v9525_v13  ;;  %v1500_v25 = vrot.slane %v9533_v58, %v9022_v23 }
 0x3a3   : > { %1479 = vbcast.lane.b32.xlu1 %v1433_v43, 344  ;;  %1475 = vbcast.lane.b32.xlu0 %v1433_v43, 336 }
 0x3a5   : > { %v9527_v18 = vpop.permute.xlu1 %1246  ;;  %v9529_v59 = vpop.permute.xlu0 %1242 }
 0x3a6   : > { %13163 = vst [vmem:[#allocation206_spill] sm:$0xff] %v9527_v18  ;;  %13164 = vst [vmem:[#allocation207_spill] sm:$0xff] %v9529_v59 }
 0x3a7   : > { %1487 = vbcast.lane.b32.xlu1 %v1433_v43, 360  ;;  %1483 = vbcast.lane.b32.xlu0 %v1433_v43, 352 }
 0x3a9   : > { %v9531_v41 = vpop.permute.xlu1 %1254  ;;  %v9535_v40 = vpop.permute.xlu0 %1250 }
 0x3aa   : > { %13165 = vst [vmem:[#allocation208_spill] sm:$0xff] %v9531_v41  ;;  %13166 = vst [vmem:[#allocation209_spill] sm:$0xff] %v9535_v40 }
 0x3ab   : > { %1495 = vbcast.lane.b32.xlu1 %v1433_v43, 376  ;;  %1491 = vbcast.lane.b32.xlu0 %v1433_v43, 368 }
 0x3ad   : > { %v9539_v13 = vpop.permute.xlu1 %1262  ;;  %v9541_v48 = vpop.permute.xlu0 %1258 }
 0x3ae   : > { %13167 = vst [vmem:[#allocation210_spill] sm:$0xff] %v9539_v13  ;;  %13168 = vst [vmem:[#allocation211_spill] sm:$0xff] %v9541_v48 }
 0x3af   : > { %1506 = vbcast.lane.b32.xlu1 %v1500_v25, 264  ;;  %1502 = vbcast.lane.b32.xlu0 %v1500_v25, 256 }
 0x3b1   : > { %v9543_v18 = vpop.permute.xlu1 %1270  ;;  %v9545_v59 = vpop.permute.xlu0 %1266 }
 0x3b2   : > { %13169 = vst [vmem:[#allocation212_spill] sm:$0xff] %v9543_v18  ;;  %13170 = vst [vmem:[#allocation213_spill] sm:$0xff] %v9545_v59 }
 0x3b3   : > { %1514 = vbcast.lane.b32.xlu1 %v1500_v25, 280  ;;  %1510 = vbcast.lane.b32.xlu0 %v1500_v25, 272 }
 0x3b5   : > { %v9547_v41 = vpop.permute.xlu1 %1278  ;;  %v9549_v40 = vpop.permute.xlu0 %1274 }
 0x3b6   : > { %13171 = vst [vmem:[#allocation214_spill] sm:$0xff] %v9547_v41  ;;  %13172 = vst [vmem:[#allocation215_spill] sm:$0xff] %v9549_v40 }
 0x3b7   : > { %1522 = vbcast.lane.b32.xlu1 %v1500_v25, 296  ;;  %1518 = vbcast.lane.b32.xlu0 %v1500_v25, 288 }
 0x3b9   : > { %v9551_v43 = vpop.permute.xlu1 %1286  ;;  %v9553_v23 = vpop.permute.xlu0 %1282 }
 0x3ba   : > { %13173 = vst [vmem:[#allocation216_spill] sm:$0xff] %v9551_v43  ;;  %13174 = vst [vmem:[#allocation217_spill] sm:$0xff] %v9553_v23 }
 0x3bb   : > { %1530 = vbcast.lane.b32.xlu1 %v1500_v25, 312  ;;  %1526 = vbcast.lane.b32.xlu0 %v1500_v25, 304 }
 0x3bd   : > { %v9555_v13 = vpop.permute.xlu1 %1294  ;;  %v9557_v48 = vpop.permute.xlu0 %1290 }
 0x3be   : > { %13175 = vst [vmem:[#allocation218_spill] sm:$0xff] %v9555_v13  ;;  %13176 = vst [vmem:[#allocation219_spill] sm:$0xff] %v9557_v48  ;;  %v1567_v13 = vrot.slane %v9499_v1, %v9029_v26 }
 0x3bf   : > { %1538 = vbcast.lane.b32.xlu1 %v1500_v25, 328  ;;  %1534 = vbcast.lane.b32.xlu0 %v1500_v25, 320 }
 0x3c1   : > { %v9559_v18 = vpop.permute.xlu1 %1305  ;;  %v9561_v59 = vpop.permute.xlu0 %1301 }
 0x3c3   : > { %1546 = vbcast.lane.b32.xlu1 %v1500_v25, 344  ;;  %1542 = vbcast.lane.b32.xlu0 %v1500_v25, 336 }
 0x3c5   : > { %v9563_v41 = vpop.permute.xlu1 %1313  ;;  %v9565_v40 = vpop.permute.xlu0 %1309 }
 0x3c7   : > { %1554 = vbcast.lane.b32.xlu1 %v1500_v25, 360  ;;  %1550 = vbcast.lane.b32.xlu0 %v1500_v25, 352 }
 0x3c9   : > { %v9567_v43 = vpop.permute.xlu1 %1321  ;;  %v9569_v23 = vpop.permute.xlu0 %1317 }
 0x3ca   : > { %13177 = vst [vmem:[#allocation220_spill] sm:$0xff] %v9567_v43  ;;  %13178 = vst [vmem:[#allocation221_spill] sm:$0xff] %v9569_v23 }
 0x3cb   : > { %1562 = vbcast.lane.b32.xlu1 %v1500_v25, 376  ;;  %1558 = vbcast.lane.b32.xlu0 %v1500_v25, 368 }
 0x3cd   : > { %v9573_v48 = vpop.permute.xlu1 %1329  ;;  %v9575_v60 = vpop.permute.xlu0 %1325 }
 0x3ce   : > { %13179 = vst [vmem:[#allocation222_spill] sm:$0xff] %v9573_v48  ;;  %13180 = vst [vmem:[#allocation223_spill] sm:$0xff] %v9575_v60 }
 0x3cf   : > { %1573 = vbcast.lane.b32.xlu1 %v1567_v13, 264  ;;  %1569 = vbcast.lane.b32.xlu0 %v1567_v13, 256 }
 0x3d1   : > { %v9577_v27 = vpop.permute.xlu1 %1337  ;;  %v9579_v14 = vpop.permute.xlu0 %1333 }
 0x3d2   : > { %13181 = vst [vmem:[#allocation224_spill] sm:$0xff] %v9577_v27  ;;  %13182 = vst [vmem:[#allocation225_spill] sm:$0xff] %v9579_v14 }
 0x3d3   : > { %1581 = vbcast.lane.b32.xlu1 %v1567_v13, 280  ;;  %1577 = vbcast.lane.b32.xlu0 %v1567_v13, 272 }
 0x3d5   : > { %v9581_v21 = vpop.permute.xlu1 %1345  ;;  %v9583_v55 = vpop.permute.xlu0 %1341 }
 0x3d6   : > { %13183 = vst [vmem:[#allocation226_spill] sm:$0xff] %v9581_v21  ;;  %13184 = vst [vmem:[#allocation227_spill] sm:$0xff] %v9583_v55 }
 0x3d7   : > { %1589 = vbcast.lane.b32.xlu1 %v1567_v13, 296  ;;  %1585 = vbcast.lane.b32.xlu0 %v1567_v13, 288 }
 0x3d9   : > { %v9585_v25 = vpop.permute.xlu1 %1353  ;;  %v9587_v37 = vpop.permute.xlu0 %1349 }
 0x3da   : > { %13185 = vst [vmem:[#allocation228_spill] sm:$0xff] %v9585_v25  ;;  %13186 = vst [vmem:[#allocation229_spill] sm:$0xff] %v9587_v37 }
 0x3db   : > { %1597 = vbcast.lane.b32.xlu1 %v1567_v13, 312  ;;  %1593 = vbcast.lane.b32.xlu0 %v1567_v13, 304 }
 0x3dd   : > { %v9589_v48 = vpop.permute.xlu1 %1361  ;;  %v9591_v60 = vpop.permute.xlu0 %1357 }
 0x3de   : > { %13187 = vst [vmem:[#allocation230_spill] sm:$0xff] %v9589_v48  ;;  %13188 = vst [vmem:[#allocation231_spill] sm:$0xff] %v9591_v60  ;;  %v1634_v48 = vrot.slane %v9533_v58, %v9029_v26 }
 0x3df   : > { %1605 = vbcast.lane.b32.xlu1 %v1567_v13, 328  ;;  %1601 = vbcast.lane.b32.xlu0 %v1567_v13, 320 }
 0x3e1   : > { %v9593_v27 = vpop.permute.xlu1 %1372  ;;  %v9595_v14 = vpop.permute.xlu0 %1368 }
 0x3e2   : > { %13189 = vst [vmem:[#allocation232_spill] sm:$0xff] %v9593_v27  ;;  %13190 = vst [vmem:[#allocation233_spill] sm:$0xff] %v9595_v14 }
 0x3e3   : > { %1613 = vbcast.lane.b32.xlu1 %v1567_v13, 344  ;;  %1609 = vbcast.lane.b32.xlu0 %v1567_v13, 336 }
 0x3e5   : > { %v9597_v21 = vpop.permute.xlu1 %1380  ;;  %v9599_v55 = vpop.permute.xlu0 %1376 }
 0x3e6   : > { %13191 = vst [vmem:[#allocation234_spill] sm:$0xff] %v9597_v21  ;;  %13192 = vst [vmem:[#allocation235_spill] sm:$0xff] %v9599_v55 }
 0x3e7   : > { %1621 = vbcast.lane.b32.xlu1 %v1567_v13, 360  ;;  %1617 = vbcast.lane.b32.xlu0 %v1567_v13, 352 }
 0x3e9   : > { %v9601_v25 = vpop.permute.xlu1 %1388  ;;  %v9603_v37 = vpop.permute.xlu0 %1384 }
 0x3ea   : > { %13193 = vst [vmem:[#allocation236_spill] sm:$0xff] %v9601_v25  ;;  %13194 = vst [vmem:[#allocation237_spill] sm:$0xff] %v9603_v37 }
 0x3eb   : > { %1629 = vbcast.lane.b32.xlu1 %v1567_v13, 376  ;;  %1625 = vbcast.lane.b32.xlu0 %v1567_v13, 368 }
 0x3ed   : > { %v9607_v27 = vpop.permute.xlu1 %1396  ;;  %v9609_v14 = vpop.permute.xlu0 %1392 }
 0x3ee   : > { %13195 = vst [vmem:[#allocation238_spill] sm:$0xff] %v9607_v27  ;;  %13196 = vst [vmem:[#allocation239_spill] sm:$0xff] %v9609_v14 }
 0x3ef   : > { %1640 = vbcast.lane.b32.xlu1 %v1634_v48, 264  ;;  %1636 = vbcast.lane.b32.xlu0 %v1634_v48, 256 }
 0x3f1   : > { %v9611_v21 = vpop.permute.xlu1 %1404  ;;  %v9613_v55 = vpop.permute.xlu0 %1400 }
 0x3f2   : > { %13197 = vst [vmem:[#allocation240_spill] sm:$0xff] %v9611_v21  ;;  %13198 = vst [vmem:[#allocation241_spill] sm:$0xff] %v9613_v55 }
 0x3f3   : > { %1648 = vbcast.lane.b32.xlu1 %v1634_v48, 280  ;;  %1644 = vbcast.lane.b32.xlu0 %v1634_v48, 272 }
 0x3f5   : > { %v9615_v25 = vpop.permute.xlu1 %1412  ;;  %v9617_v37 = vpop.permute.xlu0 %1408 }
 0x3f6   : > { %13199 = vst [vmem:[#allocation242_spill] sm:$0xff] %v9615_v25  ;;  %13200 = vst [vmem:[#allocation243_spill] sm:$0xff] %v9617_v37 }
 0x3f7   : > { %1656 = vbcast.lane.b32.xlu1 %v1634_v48, 296  ;;  %1652 = vbcast.lane.b32.xlu0 %v1634_v48, 288 }
 0x3f9   : > { %v9619_v13 = vpop.permute.xlu1 %1420  ;;  %v9621_v26 = vpop.permute.xlu0 %1416 }
 0x3fa   : > { %13201 = vst [vmem:[#allocation244_spill] sm:$0xff] %v9619_v13  ;;  %13202 = vst [vmem:[#allocation245_spill] sm:$0xff] %v9621_v26 }
 0x3fb   : > { %1664 = vbcast.lane.b32.xlu1 %v1634_v48, 312  ;;  %1660 = vbcast.lane.b32.xlu0 %v1634_v48, 304 }
 0x3fd   : > { %v9623_v27 = vpop.permute.xlu1 %1428  ;;  %v9625_v14 = vpop.permute.xlu0 %1424 }
 0x3fe   : > { %13203 = vst [vmem:[#allocation246_spill] sm:$0xff] %v9623_v27  ;;  %13204 = vst [vmem:[#allocation247_spill] sm:$0xff] %v9625_v14  ;;  %v1701_v27 = vrot.slane %v9499_v1, %v9034_v28 }
 0x3ff   : > { %1672 = vbcast.lane.b32.xlu1 %v1634_v48, 328  ;;  %1668 = vbcast.lane.b32.xlu0 %v1634_v48, 320 }
 0x401   : > { %v9627_v21 = vpop.permute.xlu1 %1439  ;;  %v9629_v55 = vpop.permute.xlu0 %1435 }
 0x403   : > { %1680 = vbcast.lane.b32.xlu1 %v1634_v48, 344  ;;  %1676 = vbcast.lane.b32.xlu0 %v1634_v48, 336 }
 0x405   : > { %v9631_v25 = vpop.permute.xlu1 %1447  ;;  %v9633_v37 = vpop.permute.xlu0 %1443 }
 0x406   : > { %13205 = vst [vmem:[#allocation248_spill] sm:$0xff] %v9631_v25 }
 0x407   : > { %1688 = vbcast.lane.b32.xlu1 %v1634_v48, 360  ;;  %1684 = vbcast.lane.b32.xlu0 %v1634_v48, 352 }
 0x409   : > { %v9635_v13 = vpop.permute.xlu1 %1455  ;;  %v9637_v26 = vpop.permute.xlu0 %1451 }
 0x40a   : > { %13206 = vst [vmem:[#allocation249_spill] sm:$0xff] %v9635_v13  ;;  %13207 = vst [vmem:[#allocation250_spill] sm:$0xff] %v9637_v26 }
 0x40b   : > { %1696 = vbcast.lane.b32.xlu1 %v1634_v48, 376  ;;  %1692 = vbcast.lane.b32.xlu0 %v1634_v48, 368 }
 0x40d   : > { %v9641_v14 = vpop.permute.xlu1 %1463  ;;  %v9643_v60 = vpop.permute.xlu0 %1459 }
 0x40e   : > { %13208 = vst [vmem:[#allocation251_spill] sm:$0xff] %v9641_v14  ;;  %13209 = vst [vmem:[#allocation252_spill] sm:$0xff] %v9643_v60 }
 0x40f   : > { %1707 = vbcast.lane.b32.xlu1 %v1701_v27, 264  ;;  %1703 = vbcast.lane.b32.xlu0 %v1701_v27, 256 }
 0x411   : > { %v9645_v5 = vpop.permute.xlu1 %1471  ;;  %v9647_v62 = vpop.permute.xlu0 %1467 }
 0x412   : > { %13210 = vst [vmem:[#allocation253_spill] sm:$0xff] %v9645_v5  ;;  %13211 = vst [vmem:[#allocation254_spill] sm:$0xff] %v9647_v62 }
 0x413   : > { %1715 = vbcast.lane.b32.xlu1 %v1701_v27, 280  ;;  %1711 = vbcast.lane.b32.xlu0 %v1701_v27, 272 }
 0x415   : > { %v9649_v13 = vpop.permute.xlu1 %1479  ;;  %v9651_v12 = vpop.permute.xlu0 %1475 }
 0x416   : > { %13212 = vst [vmem:[#allocation255_spill] sm:$0xff] %v9649_v13  ;;  %13213 = vst [vmem:[#allocation256_spill] sm:$0xff] %v9651_v12 }
 0x417   : > { %1723 = vbcast.lane.b32.xlu1 %v1701_v27, 296  ;;  %1719 = vbcast.lane.b32.xlu0 %v1701_v27, 288 }
 0x419   : > { %v9653_v48 = vpop.permute.xlu1 %1487  ;;  %v9655_v43 = vpop.permute.xlu0 %1483 }
 0x41a   : > { %13214 = vst [vmem:[#allocation257_spill] sm:$0xff] %v9653_v48  ;;  %13215 = vst [vmem:[#allocation258_spill] sm:$0xff] %v9655_v43 }
 0x41b   : > { %1731 = vbcast.lane.b32.xlu1 %v1701_v27, 312  ;;  %1727 = vbcast.lane.b32.xlu0 %v1701_v27, 304 }
 0x41d   : > { %v9657_v14 = vpop.permute.xlu1 %1495  ;;  %v9659_v60 = vpop.permute.xlu0 %1491 }
 0x41e   : > { %13216 = vst [vmem:[#allocation259_spill] sm:$0xff] %v9657_v14  ;;  %13217 = vst [vmem:[#allocation260_spill] sm:$0xff] %v9659_v60  ;;  %v1768_v60 = vrot.slane %v9533_v58, %v9034_v28 }
 0x41f   : > { %1739 = vbcast.lane.b32.xlu1 %v1701_v27, 328  ;;  %1735 = vbcast.lane.b32.xlu0 %v1701_v27, 320 }
 0x421   : > { %v9661_v5 = vpop.permute.xlu1 %1506  ;;  %v9663_v62 = vpop.permute.xlu0 %1502 }
 0x422   : > { %13218 = vst [vmem:[#allocation261_spill] sm:$0xff] %v9661_v5  ;;  %13219 = vst [vmem:[#allocation262_spill] sm:$0xff] %v9663_v62 }
 0x423   : > { %1747 = vbcast.lane.b32.xlu1 %v1701_v27, 344  ;;  %1743 = vbcast.lane.b32.xlu0 %v1701_v27, 336 }
 0x425   : > { %v9665_v12 = vpop.permute.xlu1 %1514  ;;  %v9667_v13 = vpop.permute.xlu0 %1510 }
 0x426   : > { %13220 = vst [vmem:[#allocation263_spill] sm:$0xff] %v9665_v12  ;;  %13221 = vst [vmem:[#allocation264_spill] sm:$0xff] %v9667_v13 }
 0x427   : > { %1755 = vbcast.lane.b32.xlu1 %v1701_v27, 360  ;;  %1751 = vbcast.lane.b32.xlu0 %v1701_v27, 352 }
 0x429   : > { %v9669_v43 = vpop.permute.xlu1 %1522  ;;  %v9671_v48 = vpop.permute.xlu0 %1518 }
 0x42a   : > { %13222 = vst [vmem:[#allocation265_spill] sm:$0xff] %v9669_v43  ;;  %13223 = vst [vmem:[#allocation266_spill] sm:$0xff] %v9671_v48 }
 0x42b   : > { %1763 = vbcast.lane.b32.xlu1 %v1701_v27, 376  ;;  %1759 = vbcast.lane.b32.xlu0 %v1701_v27, 368 }
 0x42d   : > { %v9675_v5 = vpop.permute.xlu1 %1530  ;;  %v9677_v62 = vpop.permute.xlu0 %1526 }
 0x42e   : > { %13224 = vst [vmem:[#allocation267_spill] sm:$0xff] %v9675_v5  ;;  %13225 = vst [vmem:[#allocation268_spill] sm:$0xff] %v9677_v62 }
 0x42f   : > { %1774 = vbcast.lane.b32.xlu1 %v1768_v60, 264  ;;  %1770 = vbcast.lane.b32.xlu0 %v1768_v60, 256 }
 0x431   : > { %v9679_v12 = vpop.permute.xlu1 %1538  ;;  %v9681_v13 = vpop.permute.xlu0 %1534 }
 0x432   : > { %13226 = vst [vmem:[#allocation269_spill] sm:$0xff] %v9679_v12  ;;  %13227 = vst [vmem:[#allocation270_spill] sm:$0xff] %v9681_v13 }
 0x433   : > { %1782 = vbcast.lane.b32.xlu1 %v1768_v60, 280  ;;  %1778 = vbcast.lane.b32.xlu0 %v1768_v60, 272 }
 0x435   : > { %v9683_v43 = vpop.permute.xlu1 %1546  ;;  %v9685_v48 = vpop.permute.xlu0 %1542 }
 0x436   : > { %13228 = vst [vmem:[#allocation271_spill] sm:$0xff] %v9683_v43  ;;  %13229 = vst [vmem:[#allocation272_spill] sm:$0xff] %v9685_v48 }
 0x437   : > { %1790 = vbcast.lane.b32.xlu1 %v1768_v60, 296  ;;  %1786 = vbcast.lane.b32.xlu0 %v1768_v60, 288 }
 0x439   : > { %v9687_v27 = vpop.permute.xlu1 %1554  ;;  %v9689_v28 = vpop.permute.xlu0 %1550 }
 0x43a   : > { %13230 = vst [vmem:[#allocation273_spill] sm:$0xff] %v9687_v27  ;;  %13231 = vst [vmem:[#allocation274_spill] sm:$0xff] %v9689_v28 }
 0x43b   : > { %1798 = vbcast.lane.b32.xlu1 %v1768_v60, 312  ;;  %1794 = vbcast.lane.b32.xlu0 %v1768_v60, 304 }
 0x43d   : > { %v9691_v5 = vpop.permute.xlu1 %1562  ;;  %v9693_v62 = vpop.permute.xlu0 %1558 }
 0x43e   : > { %13232 = vst [vmem:[#allocation275_spill] sm:$0xff] %v9691_v5  ;;  %13233 = vst [vmem:[#allocation276_spill] sm:$0xff] %v9693_v62  ;;  %v1835_v5 = vrot.slane %v9499_v1, %v9039_v30 }
 0x43f   : > { %1806 = vbcast.lane.b32.xlu1 %v1768_v60, 328  ;;  %1802 = vbcast.lane.b32.xlu0 %v1768_v60, 320 }
 0x441   : > { %v9695_v12 = vpop.permute.xlu1 %1573  ;;  %v9697_v13 = vpop.permute.xlu0 %1569 }
 0x443   : > { %1814 = vbcast.lane.b32.xlu1 %v1768_v60, 344  ;;  %1810 = vbcast.lane.b32.xlu0 %v1768_v60, 336 }
 0x445   : > { %v9699_v43 = vpop.permute.xlu1 %1581  ;;  %v9701_v48 = vpop.permute.xlu0 %1577 }
 0x446   : > { %13234 = vst [vmem:[#allocation277_spill] sm:$0xff] %v9699_v43 }
 0x447   : > { %1822 = vbcast.lane.b32.xlu1 %v1768_v60, 360  ;;  %1818 = vbcast.lane.b32.xlu0 %v1768_v60, 352 }
 0x449   : > { %v9703_v27 = vpop.permute.xlu1 %1589  ;;  %v9705_v28 = vpop.permute.xlu0 %1585 }
 0x44a   : > { %13235 = vst [vmem:[#allocation278_spill] sm:$0xff] %v9703_v27  ;;  %13236 = vst [vmem:[#allocation279_spill] sm:$0xff] %v9705_v28 }
 0x44b   : > { %1830 = vbcast.lane.b32.xlu1 %v1768_v60, 376  ;;  %1826 = vbcast.lane.b32.xlu0 %v1768_v60, 368 }
 0x44d   : > { %v9709_v62 = vpop.permute.xlu1 %1597  ;;  %v9711_v14 = vpop.permute.xlu0 %1593 }
 0x44e   : > { %13237 = vst [vmem:[#allocation280_spill] sm:$0xff] %v9709_v62  ;;  %13238 = vst [vmem:[#allocation281_spill] sm:$0xff] %v9711_v14 }
 0x44f   : > { %1841 = vbcast.lane.b32.xlu1 %v1835_v5, 264  ;;  %1837 = vbcast.lane.b32.xlu0 %v1835_v5, 256 }
 0x451   : > { %v9713_v10 = vpop.permute.xlu1 %1605  ;;  %v9715_v38 = vpop.permute.xlu0 %1601 }
 0x452   : > { %13239 = vst [vmem:[#allocation282_spill] sm:$0xff] %v9713_v10  ;;  %13240 = vst [vmem:[#allocation283_spill] sm:$0xff] %v9715_v38 }
 0x453   : > { %1849 = vbcast.lane.b32.xlu1 %v1835_v5, 280  ;;  %1845 = vbcast.lane.b32.xlu0 %v1835_v5, 272 }
 0x455   : > { %v9717_v27 = vpop.permute.xlu1 %1613  ;;  %v9719_v26 = vpop.permute.xlu0 %1609 }
 0x456   : > { %13241 = vst [vmem:[#allocation284_spill] sm:$0xff] %v9717_v27  ;;  %13242 = vst [vmem:[#allocation285_spill] sm:$0xff] %v9719_v26 }
 0x457   : > { %1857 = vbcast.lane.b32.xlu1 %v1835_v5, 296  ;;  %1853 = vbcast.lane.b32.xlu0 %v1835_v5, 288 }
 0x459   : > { %v9721_v60 = vpop.permute.xlu1 %1621  ;;  %v9723_v3 = vpop.permute.xlu0 %1617 }
 0x45a   : > { %13243 = vst [vmem:[#allocation286_spill] sm:$0xff] %v9721_v60  ;;  %13244 = vst [vmem:[#allocation287_spill] sm:$0xff] %v9723_v3 }
 0x45b   : > { %1865 = vbcast.lane.b32.xlu1 %v1835_v5, 312  ;;  %1861 = vbcast.lane.b32.xlu0 %v1835_v5, 304 }
 0x45d   : > { %v9725_v62 = vpop.permute.xlu1 %1629  ;;  %v9727_v14 = vpop.permute.xlu0 %1625 }
 0x45e   : > { %13245 = vst [vmem:[#allocation288_spill] sm:$0xff] %v9725_v62  ;;  %13246 = vst [vmem:[#allocation289_spill] sm:$0xff] %v9727_v14  ;;  %v1902_v62 = vrot.slane %v9533_v58, %v9039_v30 }
 0x45f   : > { %1873 = vbcast.lane.b32.xlu1 %v1835_v5, 328  ;;  %1869 = vbcast.lane.b32.xlu0 %v1835_v5, 320 }
 0x461   : > { %v9729_v10 = vpop.permute.xlu1 %1640  ;;  %v9731_v38 = vpop.permute.xlu0 %1636 }
 0x462   : > { %13247 = vst [vmem:[#allocation290_spill] sm:$0xff] %v9729_v10  ;;  %13248 = vst [vmem:[#allocation291_spill] sm:$0xff] %v9731_v38 }
 0x463   : > { %1881 = vbcast.lane.b32.xlu1 %v1835_v5, 344  ;;  %1877 = vbcast.lane.b32.xlu0 %v1835_v5, 336 }
 0x465   : > { %v9733_v27 = vpop.permute.xlu1 %1648  ;;  %v9735_v26 = vpop.permute.xlu0 %1644 }
 0x466   : > { %13249 = vst [vmem:[#allocation292_spill] sm:$0xff] %v9733_v27  ;;  %13250 = vst [vmem:[#allocation293_spill] sm:$0xff] %v9735_v26 }
 0x467   : > { %1889 = vbcast.lane.b32.xlu1 %v1835_v5, 360  ;;  %1885 = vbcast.lane.b32.xlu0 %v1835_v5, 352 }
 0x469   : > { %v9737_v60 = vpop.permute.xlu1 %1656  ;;  %v9739_v3 = vpop.permute.xlu0 %1652 }
 0x46a   : > { %13251 = vst [vmem:[#allocation294_spill] sm:$0xff] %v9737_v60  ;;  %13252 = vst [vmem:[#allocation295_spill] sm:$0xff] %v9739_v3 }
 0x46b   : > { %1897 = vbcast.lane.b32.xlu1 %v1835_v5, 376  ;;  %1893 = vbcast.lane.b32.xlu0 %v1835_v5, 368 }
 0x46d   : > { %v9743_v10 = vpop.permute.xlu1 %1664  ;;  %v9745_v38 = vpop.permute.xlu0 %1660 }
 0x46e   : > { %13253 = vst [vmem:[#allocation296_spill] sm:$0xff] %v9743_v10  ;;  %13254 = vst [vmem:[#allocation297_spill] sm:$0xff] %v9745_v38 }
 0x46f   : > { %1908 = vbcast.lane.b32.xlu1 %v1902_v62, 264  ;;  %1904 = vbcast.lane.b32.xlu0 %v1902_v62, 256 }
 0x471   : > { %v9747_v27 = vpop.permute.xlu1 %1672  ;;  %v9749_v26 = vpop.permute.xlu0 %1668 }
 0x472   : > { %13255 = vst [vmem:[#allocation298_spill] sm:$0xff] %v9747_v27  ;;  %13256 = vst [vmem:[#allocation299_spill] sm:$0xff] %v9749_v26 }
 0x473   : > { %1916 = vbcast.lane.b32.xlu1 %v1902_v62, 280  ;;  %1912 = vbcast.lane.b32.xlu0 %v1902_v62, 272 }
 0x475   : > { %v9751_v60 = vpop.permute.xlu1 %1680  ;;  %v9753_v3 = vpop.permute.xlu0 %1676 }
 0x476   : > { %13257 = vst [vmem:[#allocation300_spill] sm:$0xff] %v9751_v60  ;;  %13258 = vst [vmem:[#allocation301_spill] sm:$0xff] %v9753_v3 }
 0x477   : > { %1924 = vbcast.lane.b32.xlu1 %v1902_v62, 296  ;;  %1920 = vbcast.lane.b32.xlu0 %v1902_v62, 288 }
 0x479   : > { %v9755_v5 = vpop.permute.xlu1 %1688  ;;  %v9757_v30 = vpop.permute.xlu0 %1684 }
 0x47a   : > { %13259 = vst [vmem:[#allocation302_spill] sm:$0xff] %v9755_v5  ;;  %13260 = vst [vmem:[#allocation303_spill] sm:$0xff] %v9757_v30 }
 0x47b   : > { %1932 = vbcast.lane.b32.xlu1 %v1902_v62, 312  ;;  %1928 = vbcast.lane.b32.xlu0 %v1902_v62, 304 }
 0x47d   : > { %v9759_v10 = vpop.permute.xlu1 %1696  ;;  %v9761_v38 = vpop.permute.xlu0 %1692 }
 0x47e   : > { %13261 = vst [vmem:[#allocation304_spill] sm:$0xff] %v9759_v10  ;;  %13262 = vst [vmem:[#allocation305_spill] sm:$0xff] %v9761_v38  ;;  %v1969_v10 = vrot.slane %v9499_v1, %v9052_v36 }
 0x47f   : > { %1940 = vbcast.lane.b32.xlu1 %v1902_v62, 328  ;;  %1936 = vbcast.lane.b32.xlu0 %v1902_v62, 320 }
 0x481   : > { %v9763_v27 = vpop.permute.xlu1 %1707  ;;  %v9765_v26 = vpop.permute.xlu0 %1703 }
 0x483   : > { %1948 = vbcast.lane.b32.xlu1 %v1902_v62, 344  ;;  %1944 = vbcast.lane.b32.xlu0 %v1902_v62, 336 }
 0x485   : > { %v9767_v60 = vpop.permute.xlu1 %1715  ;;  %v9769_v3 = vpop.permute.xlu0 %1711 }
 0x486   : > { %13263 = vst [vmem:[#allocation306_spill] sm:$0xff] %v9767_v60 }
 0x487   : > { %1956 = vbcast.lane.b32.xlu1 %v1902_v62, 360  ;;  %1952 = vbcast.lane.b32.xlu0 %v1902_v62, 352 }
 0x489   : > { %v9771_v5 = vpop.permute.xlu1 %1723  ;;  %v9773_v30 = vpop.permute.xlu0 %1719 }
 0x48a   : > { %13264 = vst [vmem:[#allocation307_spill] sm:$0xff] %v9771_v5  ;;  %13265 = vst [vmem:[#allocation308_spill] sm:$0xff] %v9773_v30 }
 0x48b   : > { %1964 = vbcast.lane.b32.xlu1 %v1902_v62, 376  ;;  %1960 = vbcast.lane.b32.xlu0 %v1902_v62, 368 }
 0x48d   : > { %v9777_v38 = vpop.permute.xlu1 %1731  ;;  %v9779_v14 = vpop.permute.xlu0 %1727 }
 0x48e   : > { %13266 = vst [vmem:[#allocation309_spill] sm:$0xff] %v9777_v38  ;;  %13267 = vst [vmem:[#allocation310_spill] sm:$0xff] %v9779_v14 }
 0x48f   : > { %1975 = vbcast.lane.b32.xlu1 %v1969_v10, 264  ;;  %1971 = vbcast.lane.b32.xlu0 %v1969_v10, 256 }
 0x491   : > { %v9781_v56 = vpop.permute.xlu1 %1739  ;;  %v9783_v28 = vpop.permute.xlu0 %1735 }
 0x492   : > { %13268 = vst [vmem:[#allocation311_spill] sm:$0xff] %v9781_v56  ;;  %13269 = vst [vmem:[#allocation312_spill] sm:$0xff] %v9783_v28 }
 0x493   : > { %1983 = vbcast.lane.b32.xlu1 %v1969_v10, 280  ;;  %1979 = vbcast.lane.b32.xlu0 %v1969_v10, 272 }
 0x495   : > { %v9785_v5 = vpop.permute.xlu1 %1747  ;;  %v9787_v11 = vpop.permute.xlu0 %1743 }
 0x496   : > { %13270 = vst [vmem:[#allocation313_spill] sm:$0xff] %v9785_v5  ;;  %13271 = vst [vmem:[#allocation314_spill] sm:$0xff] %v9787_v11 }
 0x497   : > { %1991 = vbcast.lane.b32.xlu1 %v1969_v10, 296  ;;  %1987 = vbcast.lane.b32.xlu0 %v1969_v10, 288 }
 0x499   : > { %v9789_v62 = vpop.permute.xlu1 %1755  ;;  %v9791_v30 = vpop.permute.xlu0 %1751 }
 0x49a   : > { %13272 = vst [vmem:[#allocation315_spill] sm:$0xff] %v9789_v62  ;;  %13273 = vst [vmem:[#allocation316_spill] sm:$0xff] %v9791_v30 }
 0x49b   : > { %1999 = vbcast.lane.b32.xlu1 %v1969_v10, 312  ;;  %1995 = vbcast.lane.b32.xlu0 %v1969_v10, 304 }
 0x49d   : > { %v9793_v38 = vpop.permute.xlu1 %1763  ;;  %v9795_v14 = vpop.permute.xlu0 %1759 }
 0x49e   : > { %13274 = vst [vmem:[#allocation317_spill] sm:$0xff] %v9793_v38  ;;  %13275 = vst [vmem:[#allocation318_spill] sm:$0xff] %v9795_v14  ;;  %v2036_v38 = vrot.slane %v9533_v58, %v9052_v36 }
 0x49f   : > { %2007 = vbcast.lane.b32.xlu1 %v1969_v10, 328  ;;  %2003 = vbcast.lane.b32.xlu0 %v1969_v10, 320 }
 0x4a1   : > { %v9797_v56 = vpop.permute.xlu1 %1774  ;;  %v9799_v28 = vpop.permute.xlu0 %1770 }
 0x4a2   : > { %13276 = vst [vmem:[#allocation319_spill] sm:$0xff] %v9797_v56  ;;  %13277 = vst [vmem:[#allocation320_spill] sm:$0xff] %v9799_v28 }
 0x4a3   : > { %2015 = vbcast.lane.b32.xlu1 %v1969_v10, 344  ;;  %2011 = vbcast.lane.b32.xlu0 %v1969_v10, 336 }
 0x4a5   : > { %v9801_v5 = vpop.permute.xlu1 %1782  ;;  %v9803_v11 = vpop.permute.xlu0 %1778 }
 0x4a6   : > { %13278 = vst [vmem:[#allocation321_spill] sm:$0xff] %v9801_v5  ;;  %13279 = vst [vmem:[#allocation322_spill] sm:$0xff] %v9803_v11 }
 0x4a7   : > { %2023 = vbcast.lane.b32.xlu1 %v1969_v10, 360  ;;  %2019 = vbcast.lane.b32.xlu0 %v1969_v10, 352 }
 0x4a9   : > { %v9805_v62 = vpop.permute.xlu1 %1790  ;;  %v9807_v30 = vpop.permute.xlu0 %1786 }
 0x4aa   : > { %13280 = vst [vmem:[#allocation323_spill] sm:$0xff] %v9805_v62  ;;  %13281 = vst [vmem:[#allocation324_spill] sm:$0xff] %v9807_v30 }
 0x4ab   : > { %2031 = vbcast.lane.b32.xlu1 %v1969_v10, 376  ;;  %2027 = vbcast.lane.b32.xlu0 %v1969_v10, 368 }
 0x4ad   : > { %v9811_v56 = vpop.permute.xlu1 %1798  ;;  %v9813_v28 = vpop.permute.xlu0 %1794 }
 0x4ae   : > { %13282 = vst [vmem:[#allocation325_spill] sm:$0xff] %v9811_v56  ;;  %13283 = vst [vmem:[#allocation326_spill] sm:$0xff] %v9813_v28 }
 0x4af   : > { %2042 = vbcast.lane.b32.xlu1 %v2036_v38, 264  ;;  %2038 = vbcast.lane.b32.xlu0 %v2036_v38, 256 }
 0x4b1   : > { %v9815_v5 = vpop.permute.xlu1 %1806  ;;  %v9817_v11 = vpop.permute.xlu0 %1802 }
 0x4b2   : > { %13284 = vst [vmem:[#allocation327_spill] sm:$0xff] %v9815_v5  ;;  %13285 = vst [vmem:[#allocation328_spill] sm:$0xff] %v9817_v11 }
 0x4b3   : > { %2050 = vbcast.lane.b32.xlu1 %v2036_v38, 280  ;;  %2046 = vbcast.lane.b32.xlu0 %v2036_v38, 272 }
 0x4b5   : > { %v9819_v62 = vpop.permute.xlu1 %1814  ;;  %v9821_v30 = vpop.permute.xlu0 %1810 }
 0x4b6   : > { %13286 = vst [vmem:[#allocation329_spill] sm:$0xff] %v9819_v62  ;;  %13287 = vst [vmem:[#allocation330_spill] sm:$0xff] %v9821_v30 }
 0x4b7   : > { %2058 = vbcast.lane.b32.xlu1 %v2036_v38, 296  ;;  %2054 = vbcast.lane.b32.xlu0 %v2036_v38, 288 }
 0x4b9   : > { %v9823_v10 = vpop.permute.xlu1 %1822  ;;  %v9825_v36 = vpop.permute.xlu0 %1818 }
 0x4ba   : > { %13288 = vst [vmem:[#allocation331_spill] sm:$0xff] %v9823_v10  ;;  %13289 = vst [vmem:[#allocation332_spill] sm:$0xff] %v9825_v36 }
 0x4bb   : > { %2066 = vbcast.lane.b32.xlu1 %v2036_v38, 312  ;;  %2062 = vbcast.lane.b32.xlu0 %v2036_v38, 304 }
 0x4bd   : > { %v9827_v56 = vpop.permute.xlu1 %1830  ;;  %v9829_v28 = vpop.permute.xlu0 %1826 }
 0x4be   : > { %13290 = vst [vmem:[#allocation333_spill] sm:$0xff] %v9827_v56  ;;  %13291 = vst [vmem:[#allocation334_spill] sm:$0xff] %v9829_v28  ;;  %v2103_v56 = vrot.slane %v9499_v1, %v9089_v54 }
 0x4bf   : > { %2074 = vbcast.lane.b32.xlu1 %v2036_v38, 328  ;;  %2070 = vbcast.lane.b32.xlu0 %v2036_v38, 320 }
 0x4c1   : > { %v9831_v5 = vpop.permute.xlu1 %1841  ;;  %v9833_v11 = vpop.permute.xlu0 %1837 }
 0x4c3   : > { %2082 = vbcast.lane.b32.xlu1 %v2036_v38, 344  ;;  %2078 = vbcast.lane.b32.xlu0 %v2036_v38, 336 }
 0x4c5   : > { %v9835_v62 = vpop.permute.xlu1 %1849  ;;  %v9837_v30 = vpop.permute.xlu0 %1845 }
 0x4c7   : > { %2090 = vbcast.lane.b32.xlu1 %v2036_v38, 360  ;;  %2086 = vbcast.lane.b32.xlu0 %v2036_v38, 352 }
 0x4c9   : > { %v9839_v10 = vpop.permute.xlu1 %1857  ;;  %v9841_v36 = vpop.permute.xlu0 %1853 }
 0x4ca   : > { %13292 = vst [vmem:[#allocation335_spill] sm:$0xff] %v9839_v10  ;;  %13293 = vst [vmem:[#allocation336_spill] sm:$0xff] %v9841_v36 }
 0x4cb   : > { %2098 = vbcast.lane.b32.xlu1 %v2036_v38, 376  ;;  %2094 = vbcast.lane.b32.xlu0 %v2036_v38, 368 }
 0x4cd   : > { %v9845_v28 = vpop.permute.xlu1 %1865  ;;  %v9847_v14 = vpop.permute.xlu0 %1861 }
 0x4ce   : > { %13294 = vst [vmem:[#allocation337_spill] sm:$0xff] %v9845_v28  ;;  %13295 = vst [vmem:[#allocation338_spill] sm:$0xff] %v9847_v14 }
 0x4cf   : > { %2109 = vbcast.lane.b32.xlu1 %v2103_v56, 264  ;;  %2105 = vbcast.lane.b32.xlu0 %v2103_v56, 256 }
 0x4d1   : > { %v9849_v61 = vpop.permute.xlu1 %1873  ;;  %v9851_v49 = vpop.permute.xlu0 %1869 }
 0x4d2   : > { %13296 = vst [vmem:[#allocation339_spill] sm:$0xff] %v9849_v61  ;;  %13297 = vst [vmem:[#allocation340_spill] sm:$0xff] %v9851_v49 }
 0x4d3   : > { %2117 = vbcast.lane.b32.xlu1 %v2103_v56, 280  ;;  %2113 = vbcast.lane.b32.xlu0 %v2103_v56, 272 }
 0x4d5   : > { %v9853_v10 = vpop.permute.xlu1 %1881  ;;  %v9855_v4 = vpop.permute.xlu0 %1877 }
 0x4d6   : > { %13298 = vst [vmem:[#allocation341_spill] sm:$0xff] %v9853_v10  ;;  %13299 = vst [vmem:[#allocation342_spill] sm:$0xff] %v9855_v4 }
 0x4d7   : > { %2125 = vbcast.lane.b32.xlu1 %v2103_v56, 296  ;;  %2121 = vbcast.lane.b32.xlu0 %v2103_v56, 288 }
 0x4d9   : > { %v9857_v38 = vpop.permute.xlu1 %1889  ;;  %v9859_v36 = vpop.permute.xlu0 %1885 }
 0x4da   : > { %13300 = vst [vmem:[#allocation343_spill] sm:$0xff] %v9857_v38  ;;  %13301 = vst [vmem:[#allocation344_spill] sm:$0xff] %v9859_v36 }
 0x4db   : > { %2133 = vbcast.lane.b32.xlu1 %v2103_v56, 312  ;;  %2129 = vbcast.lane.b32.xlu0 %v2103_v56, 304 }
 0x4dd   : > { %v9861_v28 = vpop.permute.xlu1 %1897  ;;  %v9863_v14 = vpop.permute.xlu0 %1893 }
 0x4de   : > { %13302 = vst [vmem:[#allocation345_spill] sm:$0xff] %v9861_v28  ;;  %13303 = vst [vmem:[#allocation346_spill] sm:$0xff] %v9863_v14  ;;  %v2170_v28 = vrot.slane %v9533_v58, %v9089_v54 }
 0x4df   : > { %2141 = vbcast.lane.b32.xlu1 %v2103_v56, 328  ;;  %2137 = vbcast.lane.b32.xlu0 %v2103_v56, 320 }
 0x4e1   : > { %v9865_v61 = vpop.permute.xlu1 %1908  ;;  %v9867_v49 = vpop.permute.xlu0 %1904 }
 0x4e2   : > { %13304 = vst [vmem:[#allocation347_spill] sm:$0xff] %v9865_v61  ;;  %13305 = vst [vmem:[#allocation348_spill] sm:$0xff] %v9867_v49 }
 0x4e3   : > { %2149 = vbcast.lane.b32.xlu1 %v2103_v56, 344  ;;  %2145 = vbcast.lane.b32.xlu0 %v2103_v56, 336 }
 0x4e5   : > { %v9869_v10 = vpop.permute.xlu1 %1916  ;;  %v9871_v4 = vpop.permute.xlu0 %1912 }
 0x4e6   : > { %13306 = vst [vmem:[#allocation349_spill] sm:$0xff] %v9869_v10  ;;  %13307 = vst [vmem:[#allocation350_spill] sm:$0xff] %v9871_v4 }
 0x4e7   : > { %2157 = vbcast.lane.b32.xlu1 %v2103_v56, 360  ;;  %2153 = vbcast.lane.b32.xlu0 %v2103_v56, 352 }
 0x4e9   : > { %v9873_v38 = vpop.permute.xlu1 %1924  ;;  %v9875_v36 = vpop.permute.xlu0 %1920 }
 0x4ea   : > { %13308 = vst [vmem:[#allocation351_spill] sm:$0xff] %v9873_v38  ;;  %13309 = vst [vmem:[#allocation352_spill] sm:$0xff] %v9875_v36 }
 0x4eb   : > { %2165 = vbcast.lane.b32.xlu1 %v2103_v56, 376  ;;  %2161 = vbcast.lane.b32.xlu0 %v2103_v56, 368 }
 0x4ed   : > { %v9879_v61 = vpop.permute.xlu1 %1932  ;;  %v9881_v49 = vpop.permute.xlu0 %1928 }
 0x4ee   : > { %13310 = vst [vmem:[#allocation353_spill] sm:$0xff] %v9879_v61  ;;  %13311 = vst [vmem:[#allocation354_spill] sm:$0xff] %v9881_v49 }
 0x4ef   : > { %2176 = vbcast.lane.b32.xlu1 %v2170_v28, 264  ;;  %2172 = vbcast.lane.b32.xlu0 %v2170_v28, 256 }
 0x4f1   : > { %v9883_v10 = vpop.permute.xlu1 %1940  ;;  %v9885_v4 = vpop.permute.xlu0 %1936 }
 0x4f2   : > { %13312 = vst [vmem:[#allocation355_spill] sm:$0xff] %v9883_v10  ;;  %13313 = vst [vmem:[#allocation356_spill] sm:$0xff] %v9885_v4 }
 0x4f3   : > { %2184 = vbcast.lane.b32.xlu1 %v2170_v28, 280  ;;  %2180 = vbcast.lane.b32.xlu0 %v2170_v28, 272 }
 0x4f5   : > { %v9887_v38 = vpop.permute.xlu1 %1948  ;;  %v9889_v36 = vpop.permute.xlu0 %1944 }
 0x4f6   : > { %13314 = vst [vmem:[#allocation357_spill] sm:$0xff] %v9887_v38  ;;  %13315 = vst [vmem:[#allocation358_spill] sm:$0xff] %v9889_v36 }
 0x4f7   : > { %2192 = vbcast.lane.b32.xlu1 %v2170_v28, 296  ;;  %2188 = vbcast.lane.b32.xlu0 %v2170_v28, 288 }
 0x4f9   : > { %v9891_v56 = vpop.permute.xlu1 %1956  ;;  %v9893_v54 = vpop.permute.xlu0 %1952 }
 0x4fa   : > { %13316 = vst [vmem:[#allocation359_spill] sm:$0xff] %v9891_v56  ;;  %13317 = vst [vmem:[#allocation360_spill] sm:$0xff] %v9893_v54 }
 0x4fb   : > { %2200 = vbcast.lane.b32.xlu1 %v2170_v28, 312  ;;  %2196 = vbcast.lane.b32.xlu0 %v2170_v28, 304 }
 0x4fd   : > { %v9895_v61 = vpop.permute.xlu1 %1964  ;;  %v9897_v49 = vpop.permute.xlu0 %1960 }
 0x4fe   : > { %13318 = vst [vmem:[#allocation361_spill] sm:$0xff] %v9895_v61  ;;  %13319 = vst [vmem:[#allocation362_spill] sm:$0xff] %v9897_v49  ;;  %v2237_v61 = vrot.slane %v9499_v1, %v9354_v57 }
 0x4ff   : > { %2208 = vbcast.lane.b32.xlu1 %v2170_v28, 328  ;;  %2204 = vbcast.lane.b32.xlu0 %v2170_v28, 320 }
 0x501   : > { %v9899_v10 = vpop.permute.xlu1 %1975  ;;  %v9901_v4 = vpop.permute.xlu0 %1971 }
 0x503   : > { %2216 = vbcast.lane.b32.xlu1 %v2170_v28, 344  ;;  %2212 = vbcast.lane.b32.xlu0 %v2170_v28, 336 }
 0x505   : > { %v9903_v38 = vpop.permute.xlu1 %1983  ;;  %v9905_v36 = vpop.permute.xlu0 %1979 }
 0x506   : > { %13320 = vst [vmem:[#allocation363_spill] sm:$0xff] %v9903_v38 }
 0x507   : > { %2224 = vbcast.lane.b32.xlu1 %v2170_v28, 360  ;;  %2220 = vbcast.lane.b32.xlu0 %v2170_v28, 352 }
 0x509   : > { %v9907_v56 = vpop.permute.xlu1 %1991  ;;  %v9909_v54 = vpop.permute.xlu0 %1987 }
 0x50a   : > { %13321 = vst [vmem:[#allocation364_spill] sm:$0xff] %v9907_v56  ;;  %13322 = vst [vmem:[#allocation365_spill] sm:$0xff] %v9909_v54 }
 0x50b   : > { %2232 = vbcast.lane.b32.xlu1 %v2170_v28, 376  ;;  %2228 = vbcast.lane.b32.xlu0 %v2170_v28, 368 }
 0x50d   : > { %v9913_v49 = vpop.permute.xlu1 %1999  ;;  %v9915_v14 = vpop.permute.xlu0 %1995 }
 0x50e   : > { %13323 = vst [vmem:[#allocation366_spill] sm:$0xff] %v9913_v49  ;;  %13324 = vst [vmem:[#allocation367_spill] sm:$0xff] %v9915_v14 }
 0x50f   : > { %2243 = vbcast.lane.b32.xlu1 %v2237_v61, 264  ;;  %2239 = vbcast.lane.b32.xlu0 %v2237_v61, 256 }
 0x511   : > { %v9917_v23 = vpop.permute.xlu1 %2007  ;;  %v9919_v34 = vpop.permute.xlu0 %2003 }
 0x512   : > { %13325 = vst [vmem:[#allocation368_spill] sm:$0xff] %v9917_v23  ;;  %13326 = vst [vmem:[#allocation369_spill] sm:$0xff] %v9919_v34 }
 0x513   : > { %2251 = vbcast.lane.b32.xlu1 %v2237_v61, 280  ;;  %2247 = vbcast.lane.b32.xlu0 %v2237_v61, 272 }
 0x515   : > { %v9921_v56 = vpop.permute.xlu1 %2015  ;;  %v9923_v54 = vpop.permute.xlu0 %2011 }
 0x516   : > { %13327 = vst [vmem:[#allocation370_spill] sm:$0xff] %v9921_v56  ;;  %13328 = vst [vmem:[#allocation371_spill] sm:$0xff] %v9923_v54 }
 0x517   : > { %2259 = vbcast.lane.b32.xlu1 %v2237_v61, 296  ;;  %2255 = vbcast.lane.b32.xlu0 %v2237_v61, 288 }
 0x519   : > { %v9925_v28 = vpop.permute.xlu1 %2023  ;;  %v9927_v25 = vpop.permute.xlu0 %2019 }
 0x51a   : > { %13329 = vst [vmem:[#allocation372_spill] sm:$0xff] %v9925_v28  ;;  %13330 = vst [vmem:[#allocation373_spill] sm:$0xff] %v9927_v25 }
 0x51b   : > { %2267 = vbcast.lane.b32.xlu1 %v2237_v61, 312  ;;  %2263 = vbcast.lane.b32.xlu0 %v2237_v61, 304 }
 0x51d   : > { %v9929_v49 = vpop.permute.xlu1 %2031  ;;  %v9931_v14 = vpop.permute.xlu0 %2027 }
 0x51e   : > { %13331 = vst [vmem:[#allocation374_spill] sm:$0xff] %v9929_v49  ;;  %13332 = vst [vmem:[#allocation375_spill] sm:$0xff] %v9931_v14  ;;  %v2304_v49 = vrot.slane %v9533_v58, %v9354_v57 }
 0x51f   : > { %2275 = vbcast.lane.b32.xlu1 %v2237_v61, 328  ;;  %2271 = vbcast.lane.b32.xlu0 %v2237_v61, 320 }
 0x521   : > { %v9933_v23 = vpop.permute.xlu1 %2042  ;;  %v9935_v34 = vpop.permute.xlu0 %2038 }
 0x522   : > { %13333 = vst [vmem:[#allocation376_spill] sm:$0xff] %v9933_v23  ;;  %13334 = vst [vmem:[#allocation377_spill] sm:$0xff] %v9935_v34 }
 0x523   : > { %2283 = vbcast.lane.b32.xlu1 %v2237_v61, 344  ;;  %2279 = vbcast.lane.b32.xlu0 %v2237_v61, 336 }
 0x525   : > { %v9937_v56 = vpop.permute.xlu1 %2050  ;;  %v9939_v54 = vpop.permute.xlu0 %2046 }
 0x526   : > { %13335 = vst [vmem:[#allocation378_spill] sm:$0xff] %v9937_v56  ;;  %13336 = vst [vmem:[#allocation379_spill] sm:$0xff] %v9939_v54 }
 0x527   : > { %2291 = vbcast.lane.b32.xlu1 %v2237_v61, 360  ;;  %2287 = vbcast.lane.b32.xlu0 %v2237_v61, 352 }
 0x529   : > { %v9941_v28 = vpop.permute.xlu1 %2058  ;;  %v9943_v25 = vpop.permute.xlu0 %2054 }
 0x52a   : > { %13337 = vst [vmem:[#allocation380_spill] sm:$0xff] %v9941_v28  ;;  %13338 = vst [vmem:[#allocation381_spill] sm:$0xff] %v9943_v25 }
 0x52b   : > { %2299 = vbcast.lane.b32.xlu1 %v2237_v61, 376  ;;  %2295 = vbcast.lane.b32.xlu0 %v2237_v61, 368 }
 0x52d   : > { %v9947_v23 = vpop.permute.xlu1 %2066  ;;  %v9949_v34 = vpop.permute.xlu0 %2062 }
 0x52e   : > { %13339 = vst [vmem:[#allocation382_spill] sm:$0xff] %v9947_v23  ;;  %13340 = vst [vmem:[#allocation383_spill] sm:$0xff] %v9949_v34 }
 0x52f   : > { %2310 = vbcast.lane.b32.xlu1 %v2304_v49, 264  ;;  %2306 = vbcast.lane.b32.xlu0 %v2304_v49, 256 }
 0x531   : > { %v9951_v56 = vpop.permute.xlu1 %2074  ;;  %v9953_v54 = vpop.permute.xlu0 %2070 }
 0x532   : > { %13341 = vst [vmem:[#allocation384_spill] sm:$0xff] %v9951_v56  ;;  %13342 = vst [vmem:[#allocation385_spill] sm:$0xff] %v9953_v54 }
 0x533   : > { %2318 = vbcast.lane.b32.xlu1 %v2304_v49, 280  ;;  %2314 = vbcast.lane.b32.xlu0 %v2304_v49, 272 }
 0x535   : > { %v9955_v28 = vpop.permute.xlu1 %2082  ;;  %v9957_v25 = vpop.permute.xlu0 %2078 }
 0x536   : > { %13343 = vst [vmem:[#allocation386_spill] sm:$0xff] %v9955_v28  ;;  %13344 = vst [vmem:[#allocation387_spill] sm:$0xff] %v9957_v25 }
 0x537   : > { %2326 = vbcast.lane.b32.xlu1 %v2304_v49, 296  ;;  %2322 = vbcast.lane.b32.xlu0 %v2304_v49, 288 }
 0x539   : > { %v9959_v61 = vpop.permute.xlu1 %2090  ;;  %v9961_v57 = vpop.permute.xlu0 %2086 }
 0x53a   : > { %13345 = vst [vmem:[#allocation388_spill] sm:$0xff] %v9959_v61  ;;  %13346 = vst [vmem:[#allocation389_spill] sm:$0xff] %v9961_v57 }
 0x53b   : > { %2334 = vbcast.lane.b32.xlu1 %v2304_v49, 312  ;;  %2330 = vbcast.lane.b32.xlu0 %v2304_v49, 304 }
 0x53d   : > { %v9963_v23 = vpop.permute.xlu1 %2098  ;;  %v9965_v34 = vpop.permute.xlu0 %2094 }
 0x53e   : > { %13347 = vst [vmem:[#allocation390_spill] sm:$0xff] %v9963_v23  ;;  %13348 = vst [vmem:[#allocation391_spill] sm:$0xff] %v9965_v34  ;;  %v2371_v23 = vrot.slane %v9499_v1, %v9425_v19 }
 0x53f   : > { %2342 = vbcast.lane.b32.xlu1 %v2304_v49, 328  ;;  %2338 = vbcast.lane.b32.xlu0 %v2304_v49, 320 }
 0x541   : > { %v9967_v56 = vpop.permute.xlu1 %2109  ;;  %v9969_v54 = vpop.permute.xlu0 %2105 }
 0x543   : > { %2350 = vbcast.lane.b32.xlu1 %v2304_v49, 344  ;;  %2346 = vbcast.lane.b32.xlu0 %v2304_v49, 336 }
 0x545   : > { %v9971_v28 = vpop.permute.xlu1 %2117  ;;  %v9973_v25 = vpop.permute.xlu0 %2113 }
 0x547   : > { %2358 = vbcast.lane.b32.xlu1 %v2304_v49, 360  ;;  %2354 = vbcast.lane.b32.xlu0 %v2304_v49, 352 }
 0x549   : > { %v9975_v61 = vpop.permute.xlu1 %2125  ;;  %v9977_v57 = vpop.permute.xlu0 %2121 }
 0x54a   : > { %13349 = vst [vmem:[#allocation392_spill] sm:$0xff] %v9975_v61  ;;  %13350 = vst [vmem:[#allocation393_spill] sm:$0xff] %v9977_v57 }
 0x54b   : > { %2366 = vbcast.lane.b32.xlu1 %v2304_v49, 376  ;;  %2362 = vbcast.lane.b32.xlu0 %v2304_v49, 368 }
 0x54d   : > { %v9981_v34 = vpop.permute.xlu1 %2133  ;;  %v9983_v14 = vpop.permute.xlu0 %2129 }
 0x54e   : > { %13351 = vst [vmem:[#allocation394_spill] sm:$0xff] %v9981_v34  ;;  %13352 = vst [vmem:[#allocation395_spill] sm:$0xff] %v9983_v14 }
 0x54f   : > { %2377 = vbcast.lane.b32.xlu1 %v2371_v23, 264  ;;  %2373 = vbcast.lane.b32.xlu0 %v2371_v23, 256 }
 0x551   : > { %v9985_v2 = vpop.permute.xlu1 %2141  ;;  %v9987_v38 = vpop.permute.xlu0 %2137 }
 0x552   : > { %13353 = vst [vmem:[#allocation396_spill] sm:$0xff] %v9985_v2  ;;  %13354 = vst [vmem:[#allocation397_spill] sm:$0xff] %v9987_v38 }
 0x553   : > { %2385 = vbcast.lane.b32.xlu1 %v2371_v23, 280  ;;  %2381 = vbcast.lane.b32.xlu0 %v2371_v23, 272 }
 0x555   : > { %v9989_v61 = vpop.permute.xlu1 %2149  ;;  %v9991_v57 = vpop.permute.xlu0 %2145 }
 0x556   : > { %13355 = vst [vmem:[#allocation398_spill] sm:$0xff] %v9989_v61  ;;  %13356 = vst [vmem:[#allocation399_spill] sm:$0xff] %v9991_v57 }
 0x557   : > { %2393 = vbcast.lane.b32.xlu1 %v2371_v23, 296  ;;  %2389 = vbcast.lane.b32.xlu0 %v2371_v23, 288 }
 0x559   : > { %v9993_v49 = vpop.permute.xlu1 %2157  ;;  %v9995_v1 = vpop.permute.xlu0 %2153 }
 0x55a   : > { %13357 = vst [vmem:[#allocation400_spill] sm:$0xff] %v9993_v49  ;;  %13358 = vst [vmem:[#allocation401_spill] sm:$0xff] %v9995_v1 }
 0x55b   : > { %2401 = vbcast.lane.b32.xlu1 %v2371_v23, 312  ;;  %2397 = vbcast.lane.b32.xlu0 %v2371_v23, 304 }
 0x55d   : > { %v9997_v34 = vpop.permute.xlu1 %2165  ;;  %v9999_v14 = vpop.permute.xlu0 %2161 }
 0x55e   : > { %13359 = vst [vmem:[#allocation402_spill] sm:$0xff] %v9997_v34  ;;  %13360 = vst [vmem:[#allocation403_spill] sm:$0xff] %v9999_v14  ;;  %v2438_v34 = vrot.slane %v9533_v58, %v9425_v19 }
 0x55f   : > { %2409 = vbcast.lane.b32.xlu1 %v2371_v23, 328  ;;  %2405 = vbcast.lane.b32.xlu0 %v2371_v23, 320 }
 0x561   : > { %v10001_v2 = vpop.permute.xlu1 %2176  ;;  %v10003_v38 = vpop.permute.xlu0 %2172 }
 0x562   : > { %13361 = vst [vmem:[#allocation404_spill] sm:$0xff] %v10001_v2  ;;  %13362 = vst [vmem:[#allocation405_spill] sm:$0xff] %v10003_v38 }
 0x563   : > { %2417 = vbcast.lane.b32.xlu1 %v2371_v23, 344  ;;  %2413 = vbcast.lane.b32.xlu0 %v2371_v23, 336 }
 0x565   : > { %v10005_v61 = vpop.permute.xlu1 %2184  ;;  %v10007_v57 = vpop.permute.xlu0 %2180 }
 0x566   : > { %13363 = vst [vmem:[#allocation406_spill] sm:$0xff] %v10005_v61  ;;  %13364 = vst [vmem:[#allocation407_spill] sm:$0xff] %v10007_v57 }
 0x567   : > { %2425 = vbcast.lane.b32.xlu1 %v2371_v23, 360  ;;  %2421 = vbcast.lane.b32.xlu0 %v2371_v23, 352 }
 0x569   : > { %v10009_v49 = vpop.permute.xlu1 %2192  ;;  %v10011_v1 = vpop.permute.xlu0 %2188 }
 0x56a   : > { %13365 = vst [vmem:[#allocation408_spill] sm:$0xff] %v10009_v49  ;;  %13366 = vst [vmem:[#allocation409_spill] sm:$0xff] %v10011_v1 }
 0x56b   : > { %2433 = vbcast.lane.b32.xlu1 %v2371_v23, 376  ;;  %2429 = vbcast.lane.b32.xlu0 %v2371_v23, 368 }
 0x56d   : > { %v10015_v2 = vpop.permute.xlu1 %2200  ;;  %v10017_v38 = vpop.permute.xlu0 %2196 }
 0x56e   : > { %13367 = vst [vmem:[#allocation410_spill] sm:$0xff] %v10015_v2  ;;  %13368 = vst [vmem:[#allocation411_spill] sm:$0xff] %v10017_v38 }
 0x56f   : > { %2444 = vbcast.lane.b32.xlu1 %v2438_v34, 264  ;;  %2440 = vbcast.lane.b32.xlu0 %v2438_v34, 256 }
 0x571   : > { %v10019_v61 = vpop.permute.xlu1 %2208  ;;  %v10021_v57 = vpop.permute.xlu0 %2204 }
 0x572   : > { %13369 = vst [vmem:[#allocation412_spill] sm:$0xff] %v10019_v61  ;;  %13370 = vst [vmem:[#allocation413_spill] sm:$0xff] %v10021_v57 }
 0x573   : > { %2452 = vbcast.lane.b32.xlu1 %v2438_v34, 280  ;;  %2448 = vbcast.lane.b32.xlu0 %v2438_v34, 272 }
 0x575   : > { %v10023_v49 = vpop.permute.xlu1 %2216  ;;  %v10025_v1 = vpop.permute.xlu0 %2212 }
 0x576   : > { %13371 = vst [vmem:[#allocation414_spill] sm:$0xff] %v10023_v49  ;;  %13372 = vst [vmem:[#allocation415_spill] sm:$0xff] %v10025_v1 }
 0x577   : > { %2460 = vbcast.lane.b32.xlu1 %v2438_v34, 296  ;;  %2456 = vbcast.lane.b32.xlu0 %v2438_v34, 288 }
 0x579   : > { %v10027_v23 = vpop.permute.xlu1 %2224  ;;  %v10029_v19 = vpop.permute.xlu0 %2220 }
 0x57a   : > { %13373 = vst [vmem:[#allocation416_spill] sm:$0xff] %v10027_v23  ;;  %13374 = vst [vmem:[#allocation417_spill] sm:$0xff] %v10029_v19 }
 0x57b   : > { %2468 = vbcast.lane.b32.xlu1 %v2438_v34, 312  ;;  %2464 = vbcast.lane.b32.xlu0 %v2438_v34, 304 }
 0x57d   : > { %v10031_v58 = vpop.permute.xlu1 %2232  ;;  %v10033_v2 = vpop.permute.xlu0 %2228 }
 0x57e   : > { %13375 = vst [vmem:[#allocation418_spill] sm:$0xff] %v10031_v58  ;;  %13376 = vst [vmem:[#allocation419_spill] sm:$0xff] %v10033_v2 }
 0x57f   : > { %2476 = vbcast.lane.b32.xlu1 %v2438_v34, 328  ;;  %2472 = vbcast.lane.b32.xlu0 %v2438_v34, 320 }
 0x581   : > { %v10035_v61 = vpop.permute.xlu1 %2243  ;;  %v2240_v57 = vpop.permute.xlu0 %2239 }
 0x583   : > { %2484 = vbcast.lane.b32.xlu1 %v2438_v34, 344  ;;  %2480 = vbcast.lane.b32.xlu0 %v2438_v34, 336 }
 0x585   : > { %v10037_v49 = vpop.permute.xlu1 %2251  ;;  %v10039_v1 = vpop.permute.xlu0 %2247 }
 0x586   : > { %13377 = vst [vmem:[#allocation420_spill] sm:$0xff] %v10037_v49 }
 0x587   : > { %2492 = vbcast.lane.b32.xlu1 %v2438_v34, 360  ;;  %2488 = vbcast.lane.b32.xlu0 %v2438_v34, 352 }
 0x589   : > { %v10041_v23 = vpop.permute.xlu1 %2259  ;;  %v10043_v19 = vpop.permute.xlu0 %2255 }
 0x58a   : > { %13378 = vst [vmem:[#allocation421_spill] sm:$0xff] %v10041_v23  ;;  %13379 = vst [vmem:[#allocation422_spill] sm:$0xff] %v10043_v19 }
 0x58b   : > { %2500 = vbcast.lane.b32.xlu1 %v2438_v34, 376  ;;  %2496 = vbcast.lane.b32.xlu0 %v2438_v34, 368 }
 0x58d   : > { %v10045_v58 = vpop.permute.xlu1 %2267  ;;  %v10047_v2 = vpop.permute.xlu0 %2263 }
 0x58e   : > { %13380 = vst [vmem:[#allocation423_spill] sm:$0xff] %v10045_v58  ;;  %13381 = vst [vmem:[#allocation424_spill] sm:$0xff] %v10047_v2 }
 0x591   : > { %v10049_v38 = vpop.permute.xlu1 %2275  ;;  %v10051_v14 = vpop.permute.xlu0 %2271 }
 0x592   : > { %13382 = vst [vmem:[#allocation425_spill] sm:$0xff] %v10049_v38  ;;  %13383 = vst [vmem:[#allocation426_spill] sm:$0xff] %v10051_v14 }
 0x595   : > { %v10053_v8 = vpop.permute.xlu1 %2283  ;;  %v10055_v60 = vpop.permute.xlu0 %2279 }
 0x596   : > { %13384 = vst [vmem:[#allocation427_spill] sm:$0xff] %v10053_v8  ;;  %13385 = vst [vmem:[#allocation428_spill] sm:$0xff] %v10055_v60 }
 0x599   : > { %v10057_v52 = vpop.permute.xlu1 %2291  ;;  %v10059_v43 = vpop.permute.xlu0 %2287 }
 0x59a   : > { %13386 = vst [vmem:[#allocation429_spill] sm:$0xff] %v10057_v52  ;;  %13387 = vst [vmem:[#allocation430_spill] sm:$0xff] %v10059_v43 }
 0x59d   : > { %v10061_v23 = vpop.permute.xlu1 %2299  ;;  %v10063_v19 = vpop.permute.xlu0 %2295 }
 0x59e   : > { %13388 = vst [vmem:[#allocation431_spill] sm:$0xff] %v10061_v23  ;;  %13389 = vst [vmem:[#allocation432_spill] sm:$0xff] %v10063_v19  ;;  %v8830_v19 = vmov 1983009808  }
 0x5a1   : > { %v10065_v34 = vpop.permute.xlu1 %2310  ;;  %v10067_v58 = vpop.permute.xlu0 %2306 }
 0x5a2   : > { %13390 = vst [vmem:[#allocation433_spill] sm:$0xff] %v10065_v34  ;;  %13391 = vst [vmem:[#allocation434_spill] sm:$0xff] %v10067_v58  ;;  %v2762_v34 = vunpack.c.l.s4 %v8830_v19 }
 0x5a5   : > { %v10069_v2 = vpop.permute.xlu1 %2318  ;;  %v10071_v38 = vpop.permute.xlu0 %2314 }
 0x5a6   : > { %13392 = vst [vmem:[#allocation435_spill] sm:$0xff] %v10069_v2  ;;  %13393 = vst [vmem:[#allocation436_spill] sm:$0xff] %v10071_v38 }
 0x5a9   : > { %v10073_v14 = vpop.permute.xlu0 %2322  ;;  %v10075_v8 = vpop.permute.xlu1 %2326 }
 0x5aa   : > { %13394 = vst [vmem:[#allocation437_spill] sm:$0xff] %v10073_v14  ;;  %13395 = vst [vmem:[#allocation438_spill] sm:$0xff] %v10075_v8  ;;  %v2599_v14 = vsel %vm2502_vm5, %v9167_v31, %v9833_v11  ;;  %v2763_v8 = vunpack.c.0.s8 %v2762_v34  ;;  %v2503_v11 = vsel %vm2502_vm5, %v9045_v33, %v9629_v55  ;;  %v2695_v31 = vsel %vm2502_vm5, %v9489_v47, %v2240_v57 }
 0x5ab   : > { %v2663_v33 = vsel %vm2502_vm5, %v9235_v42, %v9969_v54 }
 0x5ad   : > { %v10077_v60 = vpop.permute.xlu0 %2330  ;;  %v10079_v52 = vpop.permute.xlu1 %2334 }
 0x5ae   : > { %13396 = vst [vmem:[#allocation439_spill] sm:$0xff] %v10077_v60  ;;  %13397 = vst [vmem:[#allocation440_spill] sm:$0xff] %v10079_v52  ;;  %v2535_v52 = vsel %vm2502_vm5, %v9082_v51, %v9697_v13  ;;  %v10108_v51 = vsub.s32 %v2763_v8, %v9019_v22 }
 0x5af   : > { %v2775_v60 = vcombine.low %v2535_v52, %v2599_v14  ;;  %v2776_v54 = vcombine.high %v2535_v52, %v2599_v14 }
 0x5b1   : > { %v10081_v43 = vpop.permute.xlu0 %2338  ;;  %v10085_v15 = vpop.permute.xlu1 %2342  ;;  %v2790_v58 = vrot.slane %v2776_v54, %v10108_v51 }
 0x5b2   : > { %13398 = vst [vmem:[#allocation441_spill] sm:$0xff] %v10081_v43  ;;  %13400 = vst [vmem:[#allocation443_spill] sm:$0xff] %v10085_v15  ;;  %v8831_v43 = vmov 1934713408  }
 0x5b3   : > { %v2826_v19 = vunpack.c.l.s4 %v8831_v43 }
 0x5b5   : > { %v10083_v23 = vpop.permute.xlu0 %2346  ;;  %v10098_v15 = vpop.permute.xlu1 %2350  ;;  %v2827_v43 = vunpack.c.0.s8 %v2826_v19 }
 0x5b6   : > { %13399 = vst [vmem:[#allocation442_spill] sm:$0xff] %v10083_v23  ;;  %v2567_v23 = vsel %vm2502_vm5, %v9129_v7, %v9765_v26  ;;  %13402 = vst [vmem:[#allocation445_spill] sm:$0xff] %v10098_v15  ;;  %v2631_v7 = vsel %vm2502_vm5, %v9201_v0, %v9901_v4  ;;  %v2783_v26 = vrot.slane %v2775_v60, %v10108_v51 }
 0x5b7   : > { %v2759_v13 = vcombine.low %v2503_v11, %v2567_v23  ;;  %v2791_v34 = vcombine.low %v2631_v7, %v2695_v31 }
 0x5b9   : > { %v10087_v2 = vpop.permute.xlu0 %2354  ;;  %v2767_v55 = vrot.slane %v2759_v13, %v10108_v51  ;;  %v10120_v8 = vpop.permute.xlu1 %2358  ;;  %v2799_v4 = vrot.slane %v2791_v34, %v10108_v51  ;;  %v2792_v13 = vcombine.high %v2631_v7, %v2695_v31 }
 0x5ba   : > { %13401 = vst [vmem:[#allocation444_spill] sm:$0xff] %v10087_v2  ;;  %13404 = vst [vmem:[#allocation447_spill] sm:$0xff] %v10120_v8  ;;  %v10123_v2 = vsub.s32 %v2827_v43, %v9019_v22  ;;  %v2760_v43 = vcombine.high %v2503_v11, %v2567_v23 }
 0x5bb   : > { %v2823_v0 = vcombine.low %v2767_v55, %v2783_v26  ;;  %v2824_v34 = vcombine.high %v2767_v55, %v2783_v26  ;;  %v2600_v26 = vsel %vm2502_vm5, %v9165_v29, %v9831_v5  ;;  %v2664_v55 = vsel %vm2502_vm5, %v9233_v20, %v9967_v56 }
 0x5bc   : > { %v2568_v29 = vsel %vm2502_vm5, %v9127_v6, %v9763_v27  ;;  %v2632_v20 = vsel %vm2502_vm5, %v9199_v17, %v9899_v10 }
 0x5bd   : > { %v10100_v38 = vpop.permute.xlu0 %2362  ;;  %v10128_v15 = vrot.slane %v2823_v0, %v10123_v2  ;;  %v10130_v42 = vpop.permute.xlu1 %2366  ;;  %v2806_v0 = vrot.slane %v2792_v13, %v10108_v51  ;;  %v2838_v52 = vrot.slane %v2824_v34, %v10123_v2 }
 0x5be   : > { %13403 = vst [vmem:[#allocation446_spill] sm:$0xff] %v10100_v38  ;;  %13405 = vst [vmem:[#allocation448_spill] sm:$0xff] %v10130_v42 }
 0x5c1   : > { %v2374_v38 = vpop.permute.xlu0 %2373  ;;  %v2378_v49 = vpop.permute.xlu1 %2377 }
 0x5c2   : > { %v2727_v47 = vsel %vm2502_vm5, %v9561_v59, %v2374_v38  ;;  %v2728_v31 = vsel %vm2502_vm5, %v9559_v18, %v2378_v49  ;;  %v2536_v49 = vsel %vm2502_vm5, %v9080_v50, %v9695_v12 }
 0x5c3   : > { %v2807_v57 = vcombine.low %v2663_v33, %v2727_v47  ;;  %v2808_v59 = vcombine.high %v2663_v33, %v2727_v47  ;;  %v2774_v47 = vrot.slane %v2760_v43, %v10108_v51 }
 0x5c5   : > { %v2815_v60 = vrot.slane %v2807_v57, %v10108_v51  ;;  %v2822_v57 = vrot.slane %v2808_v59, %v10108_v51  ;;  %v2839_v7 = vcombine.low %v2774_v47, %v2790_v58 }
 0x5c7   : > { %v2855_v19 = vcombine.low %v2799_v4, %v2815_v60  ;;  %v2856_v8 = vcombine.high %v2799_v4, %v2815_v60  ;;  %v2871_v14 = vcombine.low %v2806_v0, %v2822_v57  ;;  %v2943_v4 = vcombine.low %v2664_v55, %v2728_v31 }
 0x5c8   : > { %v2847_v5 = vrot.slane %v2839_v7, %v10123_v2  ;;  %v2872_v60 = vcombine.high %v2806_v0, %v2822_v57  ;;  %v2912_v7 = vcombine.high %v2536_v49, %v2600_v26 }
 0x5c9   : > { %v10133_v38 = vrot.slane %v2855_v19, %v10123_v2  ;;  %v2870_v33 = vrot.slane %v2856_v8, %v10123_v2  ;;  %v2696_v8 = vsel %vm2502_vm5, %v9487_v16, %v10035_v61  ;;  %v2879_v18 = vrot.slane %v2871_v14, %v10123_v2 }
 0x5ca   : > { %v2911_v16 = vcombine.low %v2536_v49, %v2600_v26  ;;  %v2927_v56 = vcombine.low %v2632_v20, %v2696_v8  ;;  %v2504_v61 = vsel %vm2502_vm5, %v9043_v32, %v9627_v21  ;;  %v2951_v12 = vrot.slane %v2943_v4, %v10108_v51 }
 0x5cb   : > { %v2889_v23 = vcombine.low %v2838_v52, %v2870_v33  ;;  %v2888_v11 = vcombine.high %v10128_v15, %v10133_v38  ;;  %v2895_v50 = vcombine.low %v2504_v61, %v2568_v29  ;;  %v2891_v6 = vcombine.low %v2847_v5, %v2879_v18 }
 0x5cc   : > { %v2919_v27 = vrot.slane %v2911_v16, %v10108_v51  ;;  %v2840_v19 = vcombine.high %v2774_v47, %v2790_v58  ;;  %v2935_v17 = vrot.slane %v2927_v56, %v10108_v51  ;;  %v2886_v54 = vrot.slane %v2872_v60, %v10123_v2 }
 0x5cd   : > { %7116 = vrot.lane.b32.xlu1 %v2889_v23, %s12897_s19  ;;  %7112 = vrot.lane.b32.xlu0 %v2888_v11, %s12900_s21  ;;  %v2903_v10 = vrot.slane %v2895_v50, %v10108_v51  ;;  %v2890_v13 = vcombine.high %v2838_v52, %v2870_v33  ;;  %v2892_v57 = vcombine.high %v2847_v5, %v2879_v18  ;;  %v2382_v11 = vpop.permute.xlu0 %2381 }
 0x5ce   : > { %v2991_v59 = vcombine.low %v2935_v17, %v2951_v12  ;;  %v2854_v21 = vrot.slane %v2840_v19, %v10123_v2  ;;  %v2992_v33 = vcombine.high %v2935_v17, %v2951_v12  ;;  %v2944_v52 = vcombine.high %v2664_v55, %v2728_v31 }
 0x5cf   : > { %v2959_v32 = vcombine.low %v2903_v10, %v2919_v27  ;;  %v2960_v47 = vcombine.high %v2903_v10, %v2919_v27  ;;  %v2928_v23 = vcombine.high %v2632_v20, %v2696_v8  ;;  %v2896_v56 = vcombine.high %v2504_v61, %v2568_v29 }
 0x5d0   : > { %v2999_v43 = vrot.slane %v2991_v59, %v10123_v2  ;;  %v2893_v58 = vcombine.low %v2854_v21, %v2886_v54  ;;  %v3006_v14 = vrot.slane %v2992_v33, %v10123_v2  ;;  %v2894_v4 = vcombine.high %v2854_v21, %v2886_v54  ;;  %v2386_v54 = vpop.permute.xlu1 %2385 }
 0x5d1   : > { %7124 = vrot.lane.b32.xlu1 %v2891_v6, %s12891_s23  ;;  %7120 = vrot.lane.b32.xlu0 %v2890_v13, %s12894_s28  ;;  %v2967_v34 = vrot.slane %v2959_v32, %v10123_v2  ;;  %v2974_v16 = vrot.slane %v2960_v47, %v10123_v2  ;;  %v2958_v18 = vrot.slane %v2944_v52, %v10108_v51 }
 0x5d2   : > { %v10191_v5 = vsel %vm2502_vm5, %v9565_v40, %v2382_v11  ;;  %v2926_v31 = vrot.slane %v2912_v7, %v10108_v51  ;;  %v2942_v26 = vrot.slane %v2928_v23, %v10108_v51  ;;  %v10198_v8 = vsel %vm2502_vm5, %v9171_v63, %v9837_v30 }
 0x5d3   : > { %v3023_v0 = vcombine.low %v2967_v34, %v2999_v43  ;;  %v3025_v50 = vcombine.low %v2974_v16, %v3006_v14  ;;  %v3024_v55 = vcombine.high %v2967_v34, %v2999_v43  ;;  %v2665_v49 = vsel %vm2502_vm5, %v9239_v44, %v9973_v25 }
 0x5d4   : > { %v10206_v40 = vsel %vm2502_vm5, %v9493_v24, %v10039_v1  ;;  %v2910_v29 = vrot.slane %v2896_v56, %v10108_v51  ;;  %v3007_v20 = vcombine.low %v2942_v26, %v2958_v18  ;;  %v3079_v61 = vcombine.low %v2665_v49, %v10191_v5 }
 0x5d5   : > { %7132 = vrot.lane.b32.xlu1 %v2893_v58, %s12885_s29  ;;  %7128 = vrot.lane.b32.xlu0 %v2892_v57, %s12888_s30  ;;  %v2537_v44 = vsel %vm2502_vm5, %v9086_v53, %v9701_v48  ;;  %v2569_v63 = vsel %vm2502_vm5, %v9133_v9, %v9769_v3  ;;  %v2633_v24 = vsel %vm2502_vm5, %v9205_v46, %v9905_v36  ;;  %v10240_v57 = vpop.permute.xlu1 %2393 }
 0x5d6   : > { %v2975_v25 = vcombine.low %v2910_v29, %v2926_v31  ;;  %v3047_v30 = vcombine.low %v2537_v44, %v10198_v8  ;;  %v3063_v1 = vcombine.low %v2633_v24, %v10206_v40  ;;  %v2505_v12 = vsel %vm2502_vm5, %v9049_v35, %v9633_v37 }
 0x5d7   : > { %v3031_v60 = vcombine.low %v2505_v12, %v2569_v63  ;;  %v3008_v6 = vcombine.high %v2942_v26, %v2958_v18  ;;  %v3015_v53 = vrot.slane %v3007_v20, %v10123_v2  ;;  %v3087_v48 = vrot.slane %v3079_v61, %v10108_v51 }
 0x5d8   : > { %v2976_v3 = vcombine.high %v2910_v29, %v2926_v31  ;;  %v2983_v9 = vrot.slane %v2975_v25, %v10123_v2  ;;  %v3055_v46 = vrot.slane %v3047_v30, %v10108_v51  ;;  %v3071_v36 = vrot.slane %v3063_v1, %v10108_v51  ;;  %v13406_v25 = vld [vmem:[#allocation420_spill] sm:$0xff]  ;;  %v13407_v30 = vld [vmem:[#allocation191_spill] sm:$0xff] }
 0x5d9   : > { %7140 = vrot.lane.b32.xlu1 %v3023_v0, %s12879_s4  ;;  %7136 = vrot.lane.b32.xlu0 %v2894_v4, %s12882_s5  ;;  %v3039_v27 = vrot.slane %v3031_v60, %v10108_v51  ;;  %v3022_v19 = vrot.slane %v3008_v6, %v10123_v2  ;;  %v3026_v35 = vcombine.high %v2974_v16, %v3006_v14  ;;  %v10242_v0 = vpop.permute.xlu0 %2389  ;;  %v10251_v56 = vpop.permute.xlu1 %2401  ;;  %v13408_v6 = vld [vmem:[#allocation277_spill] sm:$0xff] }
 0x5da   : > { %v3127_v17 = vcombine.low %v3071_v36, %v3087_v48  ;;  %v3027_v10 = vcombine.low %v2983_v9, %v3015_v53  ;;  %v2990_v37 = vrot.slane %v2976_v3, %v10123_v2  ;;  %v3028_v21 = vcombine.high %v2983_v9, %v3015_v53  ;;  %v13409_v53 = vld [vmem:[#allocation32_spill] sm:$0xff]  ;;  %v13410_v3 = vld [vmem:[#allocation306_spill] sm:$0xff]  ;;  %v13411_v9 = vld [vmem:[#allocation45_spill] sm:$0xff] }
 0x5db   : > { %v3095_v59 = vcombine.low %v3039_v27, %v3055_v46  ;;  %v3080_v33 = vcombine.high %v2665_v49, %v10191_v5  ;;  %v3128_v47 = vcombine.high %v3071_v36, %v3087_v48  ;;  %v3048_v52 = vcombine.high %v2537_v44, %v10198_v8 }
 0x5dc   : > { %v3135_v13 = vrot.slane %v3127_v17, %v10123_v2  ;;  %v3029_v32 = vcombine.low %v2990_v37, %v3022_v19  ;;  %v3030_v34 = vcombine.high %v2990_v37, %v3022_v19  ;;  %v3096_v14 = vcombine.high %v3039_v27, %v3055_v46  ;;  %v13413_v46 = vld [vmem:[#allocation70_spill] sm:$0xff]  ;;  %v13415_v37 = vld [vmem:[#allocation19_spill] sm:$0xff] }
 0x5dd   : > { %7148 = vrot.lane.b32.xlu1 %v3025_v50, %s12873_s6  ;;  %7144 = vrot.lane.b32.xlu0 %v3024_v55, %s12876_s7  ;;  %v3103_v43 = vrot.slane %v3095_v59, %v10123_v2  ;;  %v3064_v7 = vcombine.high %v2633_v24, %v10206_v40  ;;  %v3032_v11 = vcombine.high %v2505_v12, %v2569_v63  ;;  %v10253_v18 = vpop.permute.xlu0 %2397  ;;  %v10260_v29 = vpop.permute.xlu1 %2409 }
 0x5de   : > { %v3094_v4 = vrot.slane %v3080_v33, %v10108_v51  ;;  %v3142_v16 = vrot.slane %v3128_v47, %v10123_v2  ;;  %v3062_v5 = vrot.slane %v3048_v52, %v10108_v51  ;;  %v3110_v50 = vrot.slane %v3096_v14, %v10123_v2 }
 0x5df   : > { %v3159_v58 = vcombine.low %v3103_v43, %v3135_v13  ;;  %v3160_v23 = vcombine.high %v3103_v43, %v3135_v13  ;;  %v3078_v31 = vrot.slane %v3064_v7, %v10108_v51  ;;  %v3046_v26 = vrot.slane %v3032_v11, %v10108_v51 }
 0x5e0   : > { %v3161_v8 = vcombine.low %v3110_v50, %v3142_v16  ;;  %v3162_v49 = vcombine.high %v3110_v50, %v3142_v16  ;;  %v2730_v61 = vsel %vm2502_vm5, %v9563_v41, %v2386_v54  ;;  %v2602_v63 = vsel %vm2502_vm5, %v9169_v39, %v9835_v62  ;;  %v13412_v62 = vld [vmem:[#allocation363_spill] sm:$0xff] }
 0x5e1   : > { %7156 = vrot.lane.b32.xlu1 %v3027_v10, %s12867_s8  ;;  %7152 = vrot.lane.b32.xlu0 %v3026_v35, %s12870_s24  ;;  %v3143_v55 = vcombine.low %v3078_v31, %v3094_v4  ;;  %v3111_v40 = vcombine.low %v3046_v26, %v3062_v5  ;;  %v10262_v20 = vpop.permute.xlu0 %2405  ;;  %v2666_v24 = vsel %vm2502_vm5, %v9237_v45, %v9971_v28  ;;  %v10288_v19 = vpop.permute.xlu1 %2417  ;;  %v13414_v35 = vld [vmem:[#allocation248_spill] sm:$0xff] }
 0x5e2   : > { %v2698_v1 = vsel %vm2502_vm5, %v13407_v30, %v13406_v25  ;;  %v3215_v41 = vcombine.low %v2666_v24, %v2730_v61  ;;  %v3144_v60 = vcombine.high %v3078_v31, %v3094_v4  ;;  %v2538_v48 = vsel %vm2502_vm5, %v13409_v53, %v13408_v6  ;;  %v13420_v6 = vld [vmem:[#allocation164_spill] sm:$0xff] }
 0x5e3   : > { %v3151_v44 = vrot.slane %v3143_v55, %v10123_v2  ;;  %v3119_v12 = vrot.slane %v3111_v40, %v10123_v2  ;;  %v2570_v39 = vsel %vm2502_vm5, %v13411_v9, %v13410_v3  ;;  %v2634_v45 = vsel %vm2502_vm5, %v13413_v46, %v13412_v62  ;;  %v13422_v3 = vld [vmem:[#allocation193_spill] sm:$0xff]  ;;  %v13423_v62 = vld [vmem:[#allocation308_spill] sm:$0xff]  ;;  %v13424_v46 = vld [vmem:[#allocation47_spill] sm:$0xff] }
 0x5e4   : > { %v3183_v28 = vcombine.low %v2538_v48, %v2602_v63  ;;  %v3112_v36 = vcombine.high %v3046_v26, %v3062_v5  ;;  %v3199_v27 = vcombine.low %v2634_v45, %v2698_v1  ;;  %v2506_v59 = vsel %vm2502_vm5, %v13415_v37, %v13414_v35 }
 0x5e5   : > { %7164 = vrot.lane.b32.xlu1 %v3029_v32, %s12864_s9  ;;  %7160 = vrot.lane.b32.xlu0 %v3028_v21, %s12861_s10  ;;  %v10290_v17 = vpop.permute.xlu0 %2413  ;;  %v3163_v10 = vcombine.low %v3119_v12, %v3151_v44  ;;  %v3164_v54 = vcombine.high %v3119_v12, %v3151_v44  ;;  %v3167_v13 = vcombine.low %v2506_v59, %v2570_v39  ;;  %v10303_v52 = vpop.permute.xlu1 %2425  ;;  %v13418_v12 = vld [vmem:[#allocation59_spill] sm:$0xff] }
 0x5e6   : > { %v3223_v32 = vrot.slane %v3215_v41, %v10108_v51  ;;  %v3158_v21 = vrot.slane %v3144_v60, %v10123_v2  ;;  %v3191_v43 = vrot.slane %v3183_v28, %v10108_v51  ;;  %v3216_v4 = vcombine.high %v2666_v24, %v2730_v61  ;;  %v13416_v61 = vld [vmem:[#allocation221_spill] sm:$0xff] }
 0x5e7   : > { %v3175_v33 = vrot.slane %v3167_v13, %v10108_v51  ;;  %v3184_v5 = vcombine.high %v2538_v48, %v2602_v63  ;;  %v3200_v50 = vcombine.high %v2634_v45, %v2698_v1  ;;  %v2731_v24 = vsel %vm2502_vm5, %v13416_v61, %v10242_v0  ;;  %v13417_v1 = vld [vmem:[#allocation336_spill] sm:$0xff]  ;;  %v13419_v60 = vld [vmem:[#allocation393_spill] sm:$0xff]  ;;  %v13421_v48 = vld [vmem:[#allocation422_spill] sm:$0xff] }
 0x5e8   : > { %v3230_v40 = vrot.slane %v3216_v4, %v10108_v51  ;;  %v10324_v41 = vsel %vm2502_vm5, %v13418_v12, %v13417_v1  ;;  %v2667_v53 = vsel %vm2502_vm5, %v13420_v6, %v13419_v60  ;;  %v10332_v9 = vsel %vm2502_vm5, %v13422_v3, %v13421_v48 }
 0x5e9   : > { %7172 = vrot.lane.b32.xlu1 %v3159_v58, %s12761_s11  ;;  %7168 = vrot.lane.b32.xlu0 %v3030_v34, %s12763_s18  ;;  %s12765_s11 = smov 34   ;;  %s12769_s18 = smov 36   ;;  %v3126_v58 = vrot.slane %v3112_v36, %v10123_v2  ;;  %v3207_v34 = vrot.slane %v3199_v27, %v10108_v51  ;;  %v10305_v14 = vpop.permute.xlu0 %2421  ;;  %v3231_v11 = vcombine.low %v3175_v33, %v3191_v43  ;;  %v10311_v55 = vpop.permute.xlu1 %2433  ;;  %v13425_v27 = vld [vmem:[#allocation279_spill] sm:$0xff] }
 0x5ea   : > { %v3232_v44 = vcombine.high %v3175_v33, %v3191_v43  ;;  %v3198_v30 = vrot.slane %v3184_v5, %v10108_v51  ;;  %v3214_v63 = vrot.slane %v3200_v50, %v10108_v51  ;;  %v2571_v45 = vsel %vm2502_vm5, %v13424_v46, %v13423_v62  ;;  %v13429_v43 = vld [vmem:[#allocation250_spill] sm:$0xff] }
 0x5eb   : > { %v3263_v47 = vcombine.low %v3207_v34, %v3223_v32  ;;  %v3165_v7 = vcombine.low %v3126_v58, %v3158_v21  ;;  %v3239_v31 = vrot.slane %v3231_v11, %v10123_v2  ;;  %v3264_v26 = vcombine.high %v3207_v34, %v3223_v32 }
 0x5ec   : > { %v3279_v28 = vcombine.low %v3214_v63, %v3230_v40  ;;  %v3351_v36 = vcombine.low %v2667_v53, %v2731_v24  ;;  %v3246_v37 = vrot.slane %v3232_v44, %v10123_v2  ;;  %v3280_v5 = vcombine.high %v3214_v63, %v3230_v40 }
 0x5ed   : > { %7176 = vrot.lane.b32.xlu0 %v3160_v23, %s12765_s11  ;;  %7180 = vrot.lane.b32.xlu1 %v3161_v8, %s12769_s18  ;;  %s12767_s11 = smov 38   ;;  %s12773_s18 = smov 42   ;;  %v3166_v23 = vcombine.high %v3126_v58, %v3158_v21  ;;  %v3271_v16 = vrot.slane %v3263_v47, %v10123_v2  ;;  %v10313_v8 = vpop.permute.xlu0 %2429  ;;  %v3278_v0 = vrot.slane %v3264_v26, %v10123_v2  ;;  %v10347_v32 = vpop.permute.xlu1 %2444  ;;  %v13430_v58 = vld [vmem:[#allocation21_spill] sm:$0xff] }
 0x5ee   : > { %v2507_v34 = vsel %vm2502_vm5, %v13430_v58, %v13429_v43  ;;  %v3287_v50 = vrot.slane %v3279_v28, %v10123_v2  ;;  %v3359_v26 = vrot.slane %v3351_v36, %v10108_v51  ;;  %v3294_v1 = vrot.slane %v3280_v5, %v10123_v2  ;;  %v13431_v28 = vld [vmem:[#allocation307_spill] sm:$0xff]  ;;  %v13432_v36 = vld [vmem:[#allocation46_spill] sm:$0xff] }
 0x5ef   : > { %v3295_v25 = vcombine.low %v3239_v31, %v3271_v16  ;;  %v3296_v11 = vcombine.high %v3239_v31, %v3271_v16  ;;  %v3297_v4 = vcombine.low %v3246_v37, %v3278_v0  ;;  %v3298_v63 = vcombine.high %v3246_v37, %v3278_v0  ;;  %v13434_v58 = vld [vmem:[#allocation335_spill] sm:$0xff] }
 0x5f0   : > { %v3352_v12 = vcombine.high %v2667_v53, %v2731_v24  ;;  %v3304_v48 = vcombine.high %v2507_v34, %v2571_v45 }
 0x5f1   : > { %7184 = vrot.lane.b32.xlu0 %v3162_v49, %s12767_s11  ;;  %s12771_s11 = smov 40   ;;  %v3168_v49 = vcombine.high %v2506_v59, %v2570_v39  ;;  %v13427_v59 = vld [vmem:[#allocation365_spill] sm:$0xff]  ;;  %v10349_v21 = vpop.permute.xlu0 %2440  ;;  %v10364_v31 = vpop.permute.xlu1 %2452 }
 0x5f2   : > { %7188 = vrot.lane.b32.xlu1 %v3163_v10, %s12771_s11  ;;  %s12779_s11 = smov 44   ;;  %v13426_v10 = vld [vmem:[#allocation34_spill] sm:$0xff]  ;;  %v3366_v46 = vrot.slane %v3352_v12, %v10108_v51  ;;  %v13443_v12 = vld [vmem:[#allocation33_spill] sm:$0xff] }
 0x5f3   : > { %v3182_v39 = vrot.slane %v3168_v49, %v10108_v51  ;;  %v2539_v35 = vsel %vm2502_vm5, %v13426_v10, %v13425_v27  ;;  %v10379_v27 = vsel %vm2502_vm5, %v13432_v36, %v13431_v28  ;;  %v13433_v10 = vld [vmem:[#allocation220_spill] sm:$0xff] }
 0x5f4   : > { %v3319_v47 = vcombine.low %v2539_v35, %v10324_v41  ;;  %v3320_v3 = vcombine.high %v2539_v35, %v10324_v41  ;;  %v3318_v41 = vrot.slane %v3304_v48, %v10108_v51  ;;  %v13445_v48 = vld [vmem:[#allocation71_spill] sm:$0xff] }
 0x5f5   : > { %7192 = vrot.lane.b32.xlu0 %v3164_v54, %s12773_s18  ;;  %s12775_s18 = smov 46   ;;  %v13428_v54 = vld [vmem:[#allocation72_spill] sm:$0xff]  ;;  %v3247_v33 = vcombine.low %v3182_v39, %v3198_v30  ;;  %v3248_v49 = vcombine.high %v3182_v39, %v3198_v30  ;;  %v10366_v40 = vpop.permute.xlu0 %2448  ;;  %v10387_v35 = vpop.permute.xlu1 %2460 }
 0x5f6   : > { %7196 = vrot.lane.b32.xlu1 %v3165_v7, %s12779_s11  ;;  %v2635_v13 = vsel %vm2502_vm5, %v13428_v54, %v13427_v59  ;;  %s12781_s11 = smov 52   ;;  %v3327_v61 = vrot.slane %v3319_v47, %v10108_v51  ;;  %v3334_v59 = vrot.slane %v3320_v3, %v10108_v51  ;;  %v13437_v47 = vld [vmem:[#allocation163_spill] sm:$0xff] }
 0x5f7   : > { %v3335_v7 = vcombine.low %v2635_v13, %v10332_v9  ;;  %v3255_v44 = vrot.slane %v3247_v33, %v10123_v2  ;;  %v3262_v30 = vrot.slane %v3248_v49, %v10123_v2  ;;  %v3336_v62 = vcombine.high %v2635_v13, %v10332_v9  ;;  %v13436_v33 = vld [vmem:[#allocation392_spill] sm:$0xff] }
 0x5f8   : > { %v10385_v9 = vsel %vm2502_vm5, %v13433_v10, %v10240_v57  ;;  %v13435_v57 = vld [vmem:[#allocation58_spill] sm:$0xff] }
 0x5f9   : > { %7200 = vrot.lane.b32.xlu0 %v3166_v23, %s12775_s18  ;;  %s12777_s18 = smov 48   ;;  %v3303_v23 = vcombine.low %v2507_v34, %v2571_v45  ;;  %v3299_v6 = vcombine.low %v3255_v44, %v3287_v50  ;;  %v3300_v0 = vcombine.high %v3255_v44, %v3287_v50  ;;  %v3301_v45 = vcombine.low %v3262_v30, %v3294_v1  ;;  %v10389_v37 = vpop.permute.xlu0 %2456 }
 0x5fa   : > { %7204 = vrot.lane.b32.xlu1 %v3295_v25, %s12777_s18  ;;  %s12783_s18 = smov 50   ;;  %v3343_v25 = vrot.slane %v3335_v7, %v10108_v51  ;;  %v3350_v43 = vrot.slane %v3336_v62, %v10108_v51  ;;  %v10399_v34 = vsel %vm2502_vm5, %v13435_v57, %v13434_v58  ;;  %v2668_v7 = vsel %vm2502_vm5, %v13437_v47, %v13436_v33 }
 0x5fb   : > { %v3311_v16 = vrot.slane %v3303_v23, %v10108_v51  ;;  %v13438_v23 = vld [vmem:[#allocation421_spill] sm:$0xff]  ;;  %v3302_v5 = vcombine.high %v3262_v30, %v3294_v1  ;;  %v3487_v50 = vcombine.low %v2668_v7, %v10385_v9  ;;  %v3384_v33 = vcombine.high %v3318_v41, %v3334_v59 }
 0x5fc   : > { %v3399_v60 = vcombine.low %v3343_v25, %v3359_v26  ;;  %v3400_v24 = vcombine.high %v3343_v25, %v3359_v26  ;;  %v3415_v49 = vcombine.low %v3350_v43, %v3366_v46  ;;  %v13441_v25 = vld [vmem:[#allocation20_spill] sm:$0xff]  ;;  %v3416_v10 = vcombine.high %v3350_v43, %v3366_v46 }
 0x5fd   : > { %7208 = vrot.lane.b32.xlu0 %v3296_v11, %s12783_s18  ;;  %v3367_v39 = vcombine.low %v3311_v16, %v3327_v61  ;;  %s12785_s18 = smov 56   ;;  %v3368_v54 = vcombine.high %v3311_v16, %v3327_v61  ;;  %v13439_v11 = vld [vmem:[#allocation192_spill] sm:$0xff]  ;;  %v13440_v61 = vld [vmem:[#allocation249_spill] sm:$0xff]  ;;  %v3495_v36 = vrot.slane %v3487_v50, %v10108_v51  ;;  %v3488_v46 = vcombine.high %v2668_v7, %v10385_v9 }
 0x5fe   : > { %7212 = vrot.lane.b32.xlu1 %v3297_v4, %s12781_s11  ;;  %s12787_s11 = smov 54   ;;  %v3407_v53 = vrot.slane %v3399_v60, %v10123_v2  ;;  %v10407_v4 = vsel %vm2502_vm5, %v13439_v11, %v13438_v23  ;;  %v3414_v26 = vrot.slane %v3400_v24, %v10123_v2  ;;  %v2508_v16 = vsel %vm2502_vm5, %v13441_v25, %v13440_v61  ;;  %v10426_v24 = vpop.permute.xlu1 %2468 }
 0x5ff   : > { %v3375_v13 = vrot.slane %v3367_v39, %v10123_v2  ;;  %v3382_v30 = vrot.slane %v3368_v54, %v10123_v2  ;;  %v3383_v39 = vcombine.low %v3318_v41, %v3334_v59  ;;  %v3423_v58 = vrot.slane %v3415_v49, %v10123_v2 }
 0x600   : > { %v3430_v11 = vrot.slane %v3416_v10, %v10123_v2  ;;  %v3440_v50 = vcombine.high %v2508_v16, %v10379_v27  ;;  %v13454_v10 = vld [vmem:[#allocation424_spill] sm:$0xff] }
 0x601   : > { %7216 = vrot.lane.b32.xlu0 %v3298_v63, %s12787_s11  ;;  %s12789_s11 = smov 60   ;;  %v3431_v44 = vcombine.low %v3375_v13, %v3407_v53  ;;  %v13442_v63 = vld [vmem:[#allocation278_spill] sm:$0xff]  ;;  %v3432_v28 = vcombine.high %v3375_v13, %v3407_v53  ;;  %v3433_v57 = vcombine.low %v3382_v30, %v3414_v26  ;;  %v3391_v47 = vrot.slane %v3383_v39, %v10123_v2 }
 0x602   : > { %7220 = vrot.lane.b32.xlu1 %v3299_v6, %s12785_s18  ;;  %s12791_s18 = smov 58   ;;  %v2540_v60 = vsel %vm2502_vm5, %v13443_v12, %v13442_v63  ;;  %v13444_v6 = vld [vmem:[#allocation364_spill] sm:$0xff]  ;;  %v3434_v13 = vcombine.high %v3382_v30, %v3414_v26  ;;  %v10441_v49 = vpop.permute.xlu1 %2476  ;;  %v3398_v26 = vrot.slane %v3384_v33, %v10123_v2  ;;  %v3454_v63 = vrot.slane %v3440_v50, %v10108_v51  ;;  %v13447_v12 = vld [vmem:[#allocation310_spill] sm:$0xff] }
 0x603   : > { %v2636_v3 = vsel %vm2502_vm5, %v13445_v48, %v13444_v6  ;;  %v3455_v1 = vcombine.low %v2540_v60, %v10399_v34  ;;  %13446 = vst [vmem:[#allocation420_spill] sm:$0xff] %v10441_v49  ;;  %v3456_v59 = vcombine.high %v2540_v60, %v10399_v34  ;;  %v3436_v7 = vcombine.high %v3391_v47, %v3423_v58  ;;  %v13448_v6 = vld [vmem:[#allocation49_spill] sm:$0xff]  ;;  %v13449_v60 = vld [vmem:[#allocation223_spill] sm:$0xff]  ;;  %v13450_v39 = vld [vmem:[#allocation338_spill] sm:$0xff] }
 0x604   : > { %v3471_v62 = vcombine.low %v2636_v3, %v10407_v4  ;;  %v3472_v9 = vcombine.high %v2636_v3, %v10407_v4  ;;  %v10456_v34 = vsel %vm2502_vm5, %v13448_v6, %v13447_v12  ;;  %v10461_v4 = vsel %vm2502_vm5, %v13449_v60, %v10253_v18  ;;  %v13452_v18 = vld [vmem:[#allocation395_spill] sm:$0xff] }
 0x605   : > { %7224 = vrot.lane.b32.xlu0 %v3300_v0, %s12791_s18  ;;  %s12795_s18 = smov 64   ;;  %v3439_v0 = vcombine.low %v2508_v16, %v10379_v27  ;;  %v3463_v54 = vrot.slane %v3455_v1, %v10108_v51  ;;  %v3502_v27 = vrot.slane %v3488_v46, %v10108_v51  ;;  %v3437_v16 = vcombine.low %v3398_v26, %v3430_v11 }
 0x606   : > { %7228 = vrot.lane.b32.xlu1 %v3301_v45, %s12789_s11  ;;  %s12793_s11 = smov 62   ;;  %v10428_v45 = vpop.permute.xlu0 %2464  ;;  %v3479_v23 = vrot.slane %v3471_v62, %v10108_v51  ;;  %v3470_v48 = vrot.slane %v3456_v59, %v10108_v51  ;;  %v3486_v30 = vrot.slane %v3472_v9, %v10108_v51  ;;  %v13451_v62 = vld [vmem:[#allocation61_spill] sm:$0xff] }
 0x607   : > { %v3447_v53 = vrot.slane %v3439_v0, %v10108_v51  ;;  %v10471_v0 = vsel %vm2502_vm5, %v13451_v62, %v13450_v39  ;;  %v13460_v59 = vld [vmem:[#allocation281_spill] sm:$0xff] }
 0x608   : > { %v3535_v43 = vcombine.low %v3479_v23, %v3495_v36  ;;  %v3536_v61 = vcombine.high %v3479_v23, %v3495_v36  ;;  %v3552_v62 = vcombine.high %v3486_v30, %v3502_v27 }
 0x609   : > { %7232 = vrot.lane.b32.xlu0 %v3302_v5, %s12793_s11  ;;  %s12797_s11 = smov 66   ;;  %v3435_v5 = vcombine.low %v3391_v47, %v3423_v58  ;;  %v3504_v3 = vcombine.high %v3447_v53, %v3463_v54  ;;  %v13455_v58 = vld [vmem:[#allocation195_spill] sm:$0xff]  ;;  %v3438_v47 = vcombine.high %v3398_v26, %v3430_v11  ;;  %v3519_v26 = vcombine.low %v3454_v63, %v3470_v48 }
 0x60a   : > { %7236 = vrot.lane.b32.xlu1 %v3431_v44, %s12795_s18  ;;  %s12799_s18 = smov 68   ;;  %v10443_v41 = vpop.permute.xlu0 %2472  ;;  %v3503_v44 = vcombine.low %v3447_v53, %v3463_v54  ;;  %v3543_v25 = vrot.slane %v3535_v43, %v10123_v2  ;;  %v10481_v54 = vpop.permute.xlu1 %2484  ;;  %v3550_v23 = vrot.slane %v3536_v61, %v10123_v2  ;;  %v3551_v53 = vcombine.low %v3486_v30, %v3502_v27  ;;  %v13458_v43 = vld [vmem:[#allocation252_spill] sm:$0xff] }
 0x60b   : > { %13456 = vst [vmem:[#allocation191_spill] sm:$0xff] %v10481_v54  ;;  %v3518_v11 = vrot.slane %v3504_v3, %v10123_v2  ;;  %v3566_v30 = vrot.slane %v3552_v62, %v10123_v2 }
 0x60c   : > { %v3511_v1 = vrot.slane %v3503_v44, %v10123_v2  ;;  %v13461_v44 = vld [vmem:[#allocation36_spill] sm:$0xff] }
 0x60d   : > { %7240 = vrot.lane.b32.xlu0 %v3432_v28, %s12797_s11  ;;  %s12803_s11 = smov 70   ;;  %v13453_v28 = vld [vmem:[#allocation166_spill] sm:$0xff]  ;;  %v2541_v9 = vsel %vm2502_vm5, %v13461_v44, %v13460_v59 }
 0x60e   : > { %7244 = vrot.lane.b32.xlu1 %v3433_v57, %s12799_s18  ;;  %s12801_s18 = smov 72   ;;  %v2669_v36 = vsel %vm2502_vm5, %v13453_v28, %v13452_v18  ;;  %v10479_v57 = vsel %vm2502_vm5, %v13455_v58, %v13454_v10  ;;  %v10483_v33 = vpop.permute.xlu0 %2480  ;;  %v3567_v46 = vcombine.low %v3511_v1, %v3543_v25  ;;  %v3591_v61 = vcombine.low %v2541_v9, %v10471_v0  ;;  %v10504_v58 = vpop.permute.xlu1 %2492 }
 0x60f   : > { %13457 = vst [vmem:[#allocation277_spill] sm:$0xff] %v10483_v33  ;;  %v3568_v39 = vcombine.high %v3511_v1, %v3543_v25  ;;  %v3559_v18 = vrot.slane %v3551_v53, %v10123_v2  ;;  %v3569_v10 = vcombine.low %v3518_v11, %v3550_v23  ;;  %13464 = vst [vmem:[#allocation32_spill] sm:$0xff] %v10504_v58  ;;  %v13502_v33 = vld [vmem:[#allocation311_spill] sm:$0xff] }
 0x610   : > { %v3570_v1 = vcombine.high %v3518_v11, %v3550_v23  ;;  %v3624_v53 = vcombine.high %v2669_v36, %v10461_v4  ;;  %v3592_v59 = vcombine.high %v2541_v9, %v10471_v0  ;;  %v13470_v9 = vld [vmem:[#allocation222_spill] sm:$0xff] }
 0x611   : > { %7248 = vrot.lane.b32.xlu0 %v3434_v13, %s12803_s11  ;;  %s12805_s11 = smov 76   ;;  %v3623_v13 = vcombine.low %v2669_v36, %v10461_v4 }
 0x612   : > { %7252 = vrot.lane.b32.xlu1 %v3435_v5, %s12801_s18  ;;  %s12807_s18 = smov 74   ;;  %v13459_v5 = vld [vmem:[#allocation23_spill] sm:$0xff]  ;;  %v10506_v3 = vpop.permute.xlu0 %2488  ;;  %v10522_v23 = vpop.permute.xlu1 %2500 }
 0x613   : > { %v2509_v50 = vsel %vm2502_vm5, %v13459_v5, %v13458_v43  ;;  %v3631_v28 = vrot.slane %v3623_v13, %v10108_v51  ;;  %13465 = vst [vmem:[#allocation306_spill] sm:$0xff] %v10506_v3  ;;  %v3527_v43 = vrot.slane %v3519_v26, %v10123_v2  ;;  %13466 = vst [vmem:[#allocation45_spill] sm:$0xff] %v10522_v23  ;;  %v13468_v26 = vld [vmem:[#allocation309_spill] sm:$0xff]  ;;  %v13500_v23 = vld [vmem:[#allocation282_spill] sm:$0xff] }
 0x614   : > { %v3575_v60 = vcombine.low %v2509_v50, %v10456_v34 }
 0x615   : > { %7256 = vrot.lane.b32.xlu0 %v3436_v7, %s12807_s18  ;;  %v13462_v7 = vld [vmem:[#allocation367_spill] sm:$0xff]  ;;  %s12811_s18 = smov 80   ;;  %v3571_v5 = vcombine.low %v3527_v43, %v3559_v18  ;;  %v3572_v36 = vcombine.high %v3527_v43, %v3559_v18  ;;  %v13471_v18 = vld [vmem:[#allocation337_spill] sm:$0xff] }
 0x616   : > { %7260 = vrot.lane.b32.xlu1 %v3437_v16, %s12805_s11  ;;  %v13463_v16 = vld [vmem:[#allocation74_spill] sm:$0xff]  ;;  %s12809_s11 = smov 78   ;;  %v3583_v27 = vrot.slane %v3575_v60, %v10108_v51  ;;  %v10524_v4 = vpop.permute.xlu0 %2496 }
 0x617   : > { %v2637_v12 = vsel %vm2502_vm5, %v13463_v16, %v13462_v7  ;;  %13467 = vst [vmem:[#allocation363_spill] sm:$0xff] %v10524_v4 }
 0x618   : > { %v3607_v6 = vcombine.low %v2637_v12, %v10479_v57  ;;  %v3608_v7 = vcombine.high %v2637_v12, %v10479_v57  ;;  %v10537_v12 = vsel %vm2502_vm5, %v13470_v9, %v10251_v56  ;;  %v13473_v56 = vld [vmem:[#allocation394_spill] sm:$0xff] }
 0x619   : > { %7264 = vrot.lane.b32.xlu0 %v3438_v47, %s12809_s11  ;;  %s12813_s11 = smov 82   ;;  %v3520_v47 = vcombine.high %v3454_v63, %v3470_v48  ;;  %v3576_v63 = vcombine.high %v2509_v50, %v10456_v34  ;;  %v3638_v34 = vrot.slane %v3624_v53, %v10108_v51 }
 0x61a   : > { %7268 = vrot.lane.b32.xlu1 %v3567_v46, %s12811_s18  ;;  %v3599_v46 = vrot.slane %v3591_v61, %v10108_v51  ;;  %v3615_v25 = vrot.slane %v3607_v6, %v10108_v51  ;;  %s12815_s18 = smov 84   ;;  %v13469_v61 = vld [vmem:[#allocation48_spill] sm:$0xff]  ;;  %v3606_v6 = vrot.slane %v3592_v59, %v10108_v51  ;;  %v3622_v62 = vrot.slane %v3608_v7, %v10108_v51  ;;  %v13477_v7 = vld [vmem:[#allocation251_spill] sm:$0xff] }
 0x61b   : > { %v3534_v48 = vrot.slane %v3520_v47, %v10123_v2  ;;  %v10531_v0 = vsel %vm2502_vm5, %v13469_v61, %v13468_v26  ;;  %v3590_v57 = vrot.slane %v3576_v63, %v10108_v51  ;;  %v13474_v47 = vld [vmem:[#allocation165_spill] sm:$0xff]  ;;  %v13479_v26 = vld [vmem:[#allocation280_spill] sm:$0xff]  ;;  %v13480_v61 = vld [vmem:[#allocation35_spill] sm:$0xff] }
 0x61c   : > { %v3671_v13 = vcombine.low %v3615_v25, %v3631_v28  ;;  %v3639_v44 = vcombine.low %v3583_v27, %v3599_v46  ;;  %v3672_v50 = vcombine.high %v3615_v25, %v3631_v28  ;;  %v3640_v60 = vcombine.high %v3583_v27, %v3599_v46  ;;  %v13472_v28 = vld [vmem:[#allocation60_spill] sm:$0xff]  ;;  %v13475_v25 = vld [vmem:[#allocation423_spill] sm:$0xff] }
 0x61d   : > { %7272 = vrot.lane.b32.xlu0 %v3568_v39, %s12813_s11  ;;  %s12819_s11 = smov 86   ;;  %v3573_v11 = vcombine.low %v3534_v48, %v3566_v30  ;;  %v2670_v43 = vsel %vm2502_vm5, %v13474_v47, %v13473_v56  ;;  %v3574_v27 = vcombine.high %v3534_v48, %v3566_v30  ;;  %v3687_v59 = vcombine.low %v3622_v62, %v3638_v34  ;;  %v13482_v30 = vld [vmem:[#allocation73_spill] sm:$0xff] }
 0x61e   : > { %7276 = vrot.lane.b32.xlu1 %v3569_v10, %s12815_s18  ;;  %s12817_s18 = smov 88   ;;  %v3679_v16 = vrot.slane %v3671_v13, %v10123_v2  ;;  %v3647_v39 = vrot.slane %v3639_v44, %v10123_v2  ;;  %v10547_v10 = vsel %vm2502_vm5, %v13472_v28, %v13471_v18  ;;  %v3686_v63 = vrot.slane %v3672_v50, %v10123_v2  ;;  %v13481_v18 = vld [vmem:[#allocation366_spill] sm:$0xff] }
 0x61f   : > { %v2542_v9 = vsel %vm2502_vm5, %v13480_v61, %v13479_v26  ;;  %v2638_v48 = vsel %vm2502_vm5, %v13482_v30, %v13481_v18  ;;  %v3654_v50 = vrot.slane %v3640_v60, %v10123_v2  ;;  %v3655_v56 = vcombine.low %v3590_v57, %v3606_v6 }
 0x620   : > { %v3703_v44 = vcombine.low %v3647_v39, %v3679_v16  ;;  %v3727_v28 = vcombine.low %v2542_v9, %v10547_v10  ;;  %v3695_v26 = vrot.slane %v3687_v59, %v10123_v2  ;;  %v3656_v30 = vcombine.high %v3590_v57, %v3606_v6 }
 0x621   : > { %7280 = vrot.lane.b32.xlu0 %v3570_v1, %s12819_s11  ;;  %s12821_s11 = smov 92   ;;  %v13476_v1 = vld [vmem:[#allocation194_spill] sm:$0xff]  ;;  %v3705_v61 = vcombine.low %v3654_v50, %v3686_v63  ;;  %v3728_v57 = vcombine.high %v2542_v9, %v10547_v10  ;;  %v13483_v9 = vld [vmem:[#allocation312_spill] sm:$0xff] }
 0x622   : > { %7284 = vrot.lane.b32.xlu1 %v3571_v5, %s12817_s18  ;;  %s12823_s18 = smov 90   ;;  %v10555_v46 = vsel %vm2502_vm5, %v13476_v1, %v13475_v25  ;;  %v3759_v5 = vcombine.low %v2670_v43, %v10537_v12  ;;  %v3704_v1 = vcombine.high %v3647_v39, %v3679_v16  ;;  %v3735_v18 = vrot.slane %v3727_v28, %v10108_v51 }
 0x623   : > { %v3743_v47 = vcombine.low %v2638_v48, %v10555_v46  ;;  %v3706_v39 = vcombine.high %v3654_v50, %v3686_v63  ;;  %v3670_v28 = vrot.slane %v3656_v30, %v10123_v2  ;;  %v13486_v30 = vld [vmem:[#allocation340_spill] sm:$0xff] }
 0x625   : > { %7288 = vrot.lane.b32.xlu0 %v3572_v36, %s12823_s18  ;;  %v13478_v36 = vld [vmem:[#allocation22_spill] sm:$0xff]  ;;  %s12827_s18 = smov 96   ;;  %v3751_v16 = vrot.slane %v3743_v47, %v10108_v51 }
 0x626   : > { %7292 = vrot.lane.b32.xlu1 %v3573_v11, %s12821_s11  ;;  %v2510_v11 = vsel %vm2502_vm5, %v13478_v36, %v13477_v7  ;;  %s12825_s11 = smov 94   ;;  %v3767_v7 = vrot.slane %v3759_v5, %v10108_v51  ;;  %v3688_v36 = vcombine.high %v3622_v62, %v3638_v34  ;;  %v3760_v62 = vcombine.high %v2670_v43, %v10537_v12 }
 0x627   : > { %v3711_v25 = vcombine.low %v2510_v11, %v10531_v0  ;;  %v3712_v22 = vcombine.high %v2510_v11, %v10531_v0 }
 0x628   : > { %v3807_v5 = vcombine.low %v3751_v16, %v3767_v7  ;;  %v3702_v59 = vrot.slane %v3688_v36, %v10123_v2  ;;  %v3774_v0 = vrot.slane %v3760_v62, %v10108_v51  ;;  %v3808_v11 = vcombine.high %v3751_v16, %v3767_v7 }
 0x629   : > { %7296 = vrot.lane.b32.xlu0 %v3574_v27, %s12825_s11  ;;  %s12829_s11 = smov 98   ;;  %v3719_v34 = vrot.slane %v3711_v25, %v10108_v51  ;;  %v10605_v10 = vrot.slane %v3712_v22, %v10108_v51  ;;  %v13484_v25 = vld [vmem:[#allocation51_spill] sm:$0xff]  ;;  %v10617_v7 = vrot.slane %v3728_v57, %v10108_v51 }
 0x62a   : > { %7300 = vrot.lane.b32.xlu1 %v3703_v44, %s12827_s18  ;;  %v3663_v44 = vrot.slane %v3655_v56, %v10123_v2  ;;  %s12831_s18 = smov 100   ;;  %v3744_v56 = vcombine.high %v2638_v48, %v10555_v46  ;;  %v3815_v50 = vrot.slane %v3807_v5, %v10123_v2  ;;  %v3709_v47 = vcombine.low %v3670_v28, %v3702_v59  ;;  %v13485_v48 = vld [vmem:[#allocation225_spill] sm:$0xff]  ;;  %v13490_v5 = vld [vmem:[#allocation426_spill] sm:$0xff] }
 0x62b   : > { %v3775_v6 = vcombine.low %v3719_v34, %v3735_v18  ;;  %v2575_v46 = vsel %vm2502_vm5, %v13484_v25, %v13483_v9  ;;  %v10613_v36 = vsel %vm2502_vm5, %v13485_v48, %v10262_v20  ;;  %v13488_v20 = vld [vmem:[#allocation397_spill] sm:$0xff]  ;;  %v3822_v57 = vrot.slane %v3808_v11, %v10123_v2  ;;  %v13494_v48 = vld [vmem:[#allocation283_spill] sm:$0xff] }
 0x62c   : > { %v3708_v12 = vcombine.high %v3663_v44, %v3695_v26  ;;  %v3758_v22 = vrot.slane %v3744_v56, %v10108_v51  ;;  %v13493_v9 = vld [vmem:[#allocation25_spill] sm:$0xff] }
 0x62d   : > { %7304 = vrot.lane.b32.xlu0 %v3704_v1, %s12829_s11  ;;  %v3707_v1 = vcombine.low %v3663_v44, %v3695_v26  ;;  %s12835_s11 = smov 102   ;;  %v3776_v26 = vcombine.high %v3719_v34, %v3735_v18  ;;  %v13487_v44 = vld [vmem:[#allocation63_spill] sm:$0xff]  ;;  %v3710_v34 = vcombine.high %v3670_v28, %v3702_v59 }
 0x62e   : > { %7308 = vrot.lane.b32.xlu1 %v3705_v61, %s12831_s18  ;;  %s12833_s18 = smov 104   ;;  %v3783_v61 = vrot.slane %v3775_v6, %v10123_v2  ;;  %v2607_v16 = vsel %vm2502_vm5, %v13487_v44, %v13486_v30  ;;  %v3823_v6 = vcombine.low %v3758_v22, %v3774_v0  ;;  %v13495_v30 = vld [vmem:[#allocation38_spill] sm:$0xff] }
 0x62f   : > { %v2543_v44 = vsel %vm2502_vm5, %v13495_v30, %v13494_v48  ;;  %v3790_v11 = vrot.slane %v3776_v26, %v10123_v2  ;;  %v13498_v48 = vld [vmem:[#allocation253_spill] sm:$0xff]  ;;  %v13499_v30 = vld [vmem:[#allocation24_spill] sm:$0xff] }
 0x630   : > { %v3840_v42 = vcombine.high %v3783_v61, %v3815_v50  ;;  %v13501_v26 = vld [vmem:[#allocation37_spill] sm:$0xff]  ;;  %v3831_v58 = vrot.slane %v3823_v6, %v10123_v2 }
 0x631   : > { %7312 = vrot.lane.b32.xlu0 %v3706_v39, %s12835_s11  ;;  %s12837_s11 = smov 108   ;;  %v13489_v39 = vld [vmem:[#allocation168_spill] sm:$0xff]  ;;  %v10668_v4 = vsel %vm2502_vm5, %v13501_v26, %v13500_v23  ;;  %v3841_v54 = vcombine.low %v3790_v11, %v3822_v57 }
 0x632   : > { %7316 = vrot.lane.b32.xlu1 %v3707_v1, %s12833_s18  ;;  %s12839_s18 = smov 106   ;;  %v10628_v62 = vsel %vm2502_vm5, %v13489_v39, %v13488_v20  ;;  %v13491_v1 = vld [vmem:[#allocation197_spill] sm:$0xff]  ;;  %v13497_v39 = vld [vmem:[#allocation76_spill] sm:$0xff] }
 0x633   : > { %v10633_v18 = vsel %vm2502_vm5, %v13491_v1, %v13490_v5  ;;  %v3895_v56 = vcombine.low %v10628_v62, %v10613_v36  ;;  %v13496_v20 = vld [vmem:[#allocation369_spill] sm:$0xff]  ;;  %v3791_v1 = vcombine.low %v10605_v10, %v10617_v7 }
 0x634   : > { %v10647_v5 = vsel %vm2502_vm5, %v13497_v39, %v13496_v20  ;;  %v3824_v39 = vcombine.high %v3758_v22, %v3774_v0  ;;  %v3792_v0 = vcombine.high %v10605_v10, %v10617_v7  ;;  %v3896_v10 = vcombine.high %v10628_v62, %v10613_v36 }
 0x635   : > { %7320 = vrot.lane.b32.xlu0 %v3708_v12, %s12839_s18  ;;  %v3839_v12 = vcombine.low %v3783_v61, %v3815_v50  ;;  %s12841_s18 = smov 112   ;;  %v3903_v3 = vrot.slane %v3895_v56, %v10108_v51  ;;  %v3799_v23 = vrot.slane %v3791_v1, %v10123_v2  ;;  %v3864_v50 = vcombine.high %v2543_v44, %v2607_v16  ;;  %v13505_v1 = vld [vmem:[#allocation339_spill] sm:$0xff] }
 0x636   : > { %7324 = vrot.lane.b32.xlu1 %v3709_v47, %s12837_s11  ;;  %v13492_v47 = vld [vmem:[#allocation254_spill] sm:$0xff]  ;;  %s12843_s11 = smov 110   ;;  %v3842_v7 = vcombine.high %v3790_v11, %v3822_v57  ;;  %v13504_v56 = vcombine.low %v10128_v15, %v10133_v38  ;;  %v3880_v62 = vcombine.high %v10647_v5, %v10633_v18  ;;  %v3806_v15 = vrot.slane %v3792_v0, %v10123_v2  ;;  %v13507_v57 = vld [vmem:[#allocation224_spill] sm:$0xff] }
 0x637   : > { %v2511_v25 = vsel %vm2502_vm5, %v13493_v9, %v13492_v47  ;;  %v3863_v47 = vcombine.low %v2543_v44, %v2607_v16  ;;  %v3879_v9 = vcombine.low %v10647_v5, %v10633_v18  ;;  %v10710_v38 = vrot.slane %v3864_v50, %v10108_v51  ;;  %v13510_v50 = vld [vmem:[#allocation425_spill] sm:$0xff] }
 0x638   : > { %v3847_v20 = vcombine.low %v2511_v25, %v2575_v46  ;;  %v10715_v11 = vsel %vm2502_vm5, %v13507_v57, %v10260_v29  ;;  %v10719_v18 = vrot.slane %v3896_v10, %v10108_v51 }
 0x639   : > { %7328 = vrot.lane.b32.xlu0 %v3710_v34, %s12843_s11  ;;  %v10663_v34 = vsel %vm2502_vm5, %v13499_v30, %v13498_v48  ;;  %v3848_v48 = vcombine.high %v2511_v25, %v2575_v46  ;;  %v3871_v61 = vrot.slane %v3863_v47, %v10108_v51  ;;  %v3887_v22 = vrot.slane %v3879_v9, %v10108_v51  ;;  %s12845_s11 = smov 116   ;;  %v13506_v47 = vld [vmem:[#allocation62_spill] sm:$0xff] }
 0x63a   : > { %7332 = vrot.lane.b32.xlu1 %v3839_v12, %s12841_s18  ;;  %v13503_v12 = vld [vmem:[#allocation50_spill] sm:$0xff]  ;;  %s12847_s18 = smov 114   ;;  %v3838_v46 = vrot.slane %v3824_v39, %v10123_v2  ;;  %v3843_v25 = vcombine.low %v3799_v23, %v3831_v58  ;;  %v10703_v36 = vsel %vm2502_vm5, %v13506_v47, %v13505_v1  ;;  %v3844_v30 = vcombine.high %v3799_v23, %v3831_v58 }
 0x63b   : > { %v10675_v49 = vsel %vm2502_vm5, %v13503_v12, %v13502_v33  ;;  %v3855_v33 = vrot.slane %v3847_v20, %v10108_v51  ;;  %v3943_v16 = vcombine.low %v3887_v22, %v3903_v3  ;;  %v10698_v44 = vrot.slane %v3848_v48, %v10108_v51  ;;  %v13508_v12 = vld [vmem:[#allocation396_spill] sm:$0xff]  ;;  %v13509_v48 = vld [vmem:[#allocation167_spill] sm:$0xff] }
 0x63c   : > { %v3944_v5 = vcombine.high %v3887_v22, %v3903_v3  ;;  %v3845_v29 = vcombine.low %v3806_v15, %v3838_v46  ;;  %v10731_v0 = vsel %vm2502_vm5, %v13509_v48, %v13508_v12  ;;  %v3894_v3 = vrot.slane %v3880_v62, %v10108_v51 }
 0x63d   : > { %7336 = vrot.lane.b32.xlu0 %v3840_v42, %s12847_s18  ;;  %s12849_s18 = smov 120   ;;  %v10724_v20 = vrot.slane %v3943_v16, %v10123_v2  ;;  %v3912_v26 = vcombine.high %v3855_v33, %v3871_v61  ;;  %v3927_v57 = vcombine.low %v10698_v44, %v10710_v38 }
 0x63e   : > { %7340 = vrot.lane.b32.xlu1 %v3841_v54, %s12845_s11  ;;  %s12906_s11 = smov 118   ;;  %v3958_v10 = vrot.slane %v3944_v5, %v10123_v2 }
 0x63f   : > { %v10557_v53 = vpop.permute.xlu1 %7116  ;;  %v10559_v13 = vpop.permute.xlu0 %7112 }
 0x640   : > { %v8120_v54 = vsel %vm8119_vm6, %v13504_v56, %v10559_v13  ;;  %v3911_v13 = vcombine.low %v3855_v33, %v3871_v61  ;;  %v13511_v61 = vld [vmem:[#allocation196_spill] sm:$0xff]  ;;  %v4031_v33 = vcombine.low %v10731_v0, %v10715_v11  ;;  %v3846_v56 = vcombine.high %v3806_v15, %v3838_v46  ;;  %v13515_v46 = vld [vmem:[#allocation26_spill] sm:$0xff] }
 0x641   : > { %7344 = vrot.lane.b32.xlu0 %v3842_v7, %s12906_s11  ;;  %v8122_v9 = vsel %vm8121_vm7, %v8120_v54, %v10557_v53  ;;  %v10747_v22 = vsel %vm2502_vm5, %v13511_v61, %v13510_v50  ;;  %v3959_v7 = vcombine.low %v3894_v3, %v10719_v18  ;;  %v13512_v54 = vld [vmem:[#allocation368_spill] sm:$0xff]  ;;  %s13587_s11 = smov 60  }
 0x642   : > { %7348 = vrot.lane.b32.xlu1 %v3843_v25, %s12849_s18  ;;  %s12851_s18 = smov 122   ;;  %v10742_v23 = vrot.slane %v3911_v13, %v10123_v2  ;;  %v13513_v25 = vld [vmem:[#allocation75_spill] sm:$0xff]  ;;  %v3926_v13 = vrot.slane %v3912_v26, %v10123_v2  ;;  %v3960_v26 = vcombine.high %v3894_v3, %v10719_v18  ;;  %v3928_v18 = vcombine.high %v10698_v44, %v10710_v38 }
 0x643   : > { %v10581_v27 = vpop.permute.xlu1 %7124  ;;  %v10583_v60 = vpop.permute.xlu0 %7120  ;;  %v2640_v1 = vsel %vm2502_vm5, %v13513_v25, %v13512_v54  ;;  %v3967_v12 = vrot.slane %v3959_v7, %v10123_v2  ;;  %v3935_v3 = vrot.slane %v3927_v57, %v10123_v2  ;;  %v13519_v25 = vld [vmem:[#allocation40_spill] sm:$0xff]  ;;  %v4032_v44 = vcombine.high %v10731_v0, %v10715_v11 }
 0x644   : > { %v8124_v39 = vsel %vm8123_vm8, %v8122_v9, %v10583_v60  ;;  %v3999_v60 = vcombine.low %v10668_v4, %v10703_v36  ;;  %v3976_v62 = vcombine.high %v10742_v23, %v10724_v20  ;;  %v4015_v5 = vcombine.low %v2640_v1, %v10747_v22  ;;  %v13517_v9 = vld [vmem:[#allocation27_spill] sm:$0xff] }
 0x645   : > { %7352 = vrot.lane.b32.xlu0 %v3844_v30, %s12851_s18  ;;  %s12853_s18 = smov 124   ;;  %v8126_v16 = vsel %vm8125_vm9, %v8124_v39, %v10581_v27  ;;  %v13514_v27 = vld [vmem:[#allocation255_spill] sm:$0xff]  ;;  %v3983_v39 = vcombine.low %v10663_v34, %v10675_v49  ;;  %v3977_v50 = vcombine.low %v3926_v13, %v3958_v10  ;;  %v4016_v57 = vcombine.high %v2640_v1, %v10747_v22  ;;  %v13520_v1 = vld [vmem:[#allocation314_spill] sm:$0xff] }
 0x646   : > { %7356 = vrot.lane.b32.xlu1 %v3845_v29, %s12853_s18  ;;  %s12903_s18 = smov 126   ;;  %v10771_v15 = vsel %vm2502_vm5, %v13515_v46, %v13514_v27  ;;  %v4039_v29 = vrot.slane %v4031_v33, %v10108_v51  ;;  %v3978_v33 = vcombine.high %v3926_v13, %v3958_v10  ;;  %v4023_v7 = vrot.slane %v4015_v5, %v10108_v51 }
 0x647   : > { %v10598_v43 = vpop.permute.xlu1 %7132  ;;  %v10600_v63 = vpop.permute.xlu0 %7128  ;;  %v3991_v10 = vrot.slane %v3983_v39, %v10108_v51  ;;  %v3979_v13 = vcombine.low %v3935_v3, %v3967_v12  ;;  %v3942_v0 = vrot.slane %v3928_v18, %v10123_v2 }
 0x648   : > { %v8128_v47 = vsel %vm8127_vm10, %v8126_v16, %v10600_v63  ;;  %v13516_v63 = vld [vmem:[#allocation256_spill] sm:$0xff]  ;;  %v4079_v38 = vcombine.low %v4023_v7, %v4039_v29  ;;  %v4080_v39 = vcombine.high %v4023_v7, %v4039_v29 }
 0x649   : > { %7360 = vrot.lane.b32.xlu0 %v3846_v56, %s12903_s18  ;;  %v10776_v30 = vsel %vm2502_vm5, %v13517_v9, %v13516_v63  ;;  %v8130_v48 = vsel %vm8129_vm11, %v8128_v47, %v10598_v43  ;;  %v10789_v56 = vrot.slane %v3999_v60, %v10108_v51  ;;  %v13518_v43 = vld [vmem:[#allocation285_spill] sm:$0xff]  ;;  %v3974_v47 = vrot.slane %v3960_v26, %v10123_v2  ;;  %v13522_v63 = vld [vmem:[#allocation342_spill] sm:$0xff]  ;;  %s13584_s18 = smov 58  }
 0x64a   : > { %7364 = vrot.lane.b32.xlu1 %v3976_v62, %s12900_s21  ;;  %v10801_v60 = vsel %vm2502_vm5, %v13519_v25, %v13518_v43  ;;  %v4046_v9 = vrot.slane %v4032_v44, %v10108_v51  ;;  %v4087_v26 = vrot.slane %v4079_v38, %v10123_v2  ;;  %v13525_v25 = vld [vmem:[#allocation399_spill] sm:$0xff]  ;;  %v13527_v44 = vld [vmem:[#allocation428_spill] sm:$0xff]  ;;  %s13580_s21 = smov 56  }
 0x64b   : > { %v10650_v59 = vpop.permute.xlu1 %7140  ;;  %v10652_v28 = vpop.permute.xlu0 %7136  ;;  %v4047_v11 = vcombine.low %v3991_v10, %v10789_v56  ;;  %v4048_v29 = vcombine.high %v3991_v10, %v10789_v56  ;;  %v13528_v38 = vld [vmem:[#allocation199_spill] sm:$0xff]  ;;  %v4094_v56 = vrot.slane %v4080_v39, %v10123_v2  ;;  %v13532_v39 = vld [vmem:[#allocation28_spill] sm:$0xff] }
 0x64c   : > { %v8132_v54 = vsel %vm8131_vm12, %v8130_v48, %v10652_v28  ;;  %v3984_v28 = vcombine.high %v10663_v34, %v10675_v49  ;;  %v3980_v49 = vcombine.high %v3935_v3, %v3967_v12  ;;  %v4000_v34 = vcombine.high %v10668_v4, %v10703_v36  ;;  %v13523_v4 = vld [vmem:[#allocation65_spill] sm:$0xff] }
 0x64d   : > { %7368 = vrot.lane.b32.xlu0 %v3977_v50, %s12897_s19  ;;  %v8134_v62 = vsel %vm8133_vm13, %v8132_v54, %v10650_v59  ;;  %v10833_v36 = vsel %vm2502_vm5, %v13523_v4, %v13522_v63  ;;  %v3981_v48 = vcombine.low %v3942_v0, %v3974_v47  ;;  %v4030_v50 = vrot.slane %v4016_v57, %v10108_v51  ;;  %v13524_v54 = vld [vmem:[#allocation227_spill] sm:$0xff]  ;;  %s13579_s19 = smov 54  }
 0x64e   : > { %7372 = vrot.lane.b32.xlu1 %v3978_v33, %s12894_s28  ;;  %v10823_v22 = vrot.slane %v3984_v28, %v10108_v51  ;;  %v10844_v33 = vsel %vm2502_vm5, %v13524_v54, %v10290_v17  ;;  %v3982_v3 = vcombine.high %v3942_v0, %v3974_v47  ;;  %v4014_v43 = vrot.slane %v4000_v34, %v10108_v51  ;;  %v13526_v28 = vld [vmem:[#allocation170_spill] sm:$0xff]  ;;  %v13534_v54 = vld [vmem:[#allocation39_spill] sm:$0xff]  ;;  %s13576_s28 = smov 52  }
 0x64f   : > { %v10688_v42 = vpop.permute.xlu1 %7148  ;;  %v10690_v6 = vpop.permute.xlu0 %7144  ;;  %v4055_v7 = vrot.slane %v4047_v11, %v10123_v2  ;;  %v2673_v17 = vsel %vm2502_vm5, %v13526_v28, %v13525_v25  ;;  %v4095_v47 = vcombine.low %v4030_v50, %v4046_v9  ;;  %v13530_v34 = vld [vmem:[#allocation78_spill] sm:$0xff] }
 0x650   : > { %v8136_v5 = vsel %vm8135_vm14, %v8134_v62, %v10690_v6  ;;  %v13521_v6 = vld [vmem:[#allocation53_spill] sm:$0xff]  ;;  %v4167_v10 = vcombine.low %v2673_v17, %v10844_v33  ;;  %v4063_v63 = vcombine.low %v10823_v22, %v4014_v43  ;;  %v4064_v28 = vcombine.high %v10823_v22, %v4014_v43 }
 0x651   : > { %7376 = vrot.lane.b32.xlu0 %v3979_v13, %s12891_s23  ;;  %v10828_v46 = vsel %vm2502_vm5, %v13521_v6, %v13520_v1  ;;  %v8138_v12 = vsel %vm12948_vm15, %v8136_v5, %v10688_v42  ;;  %v4135_v42 = vcombine.low %v10801_v60, %v10833_v36  ;;  %v4111_v13 = vcombine.low %v4055_v7, %v4087_v26  ;;  %s13575_s23 = smov 50  }
 0x652   : > { %7380 = vrot.lane.b32.xlu1 %v3980_v49, %s12888_s30  ;;  %v13529_v49 = vld [vmem:[#allocation371_spill] sm:$0xff]  ;;  %v4112_v1 = vcombine.high %v4055_v7, %v4087_v26  ;;  %v4062_v6 = vrot.slane %v4048_v29, %v10123_v2  ;;  %v4119_v26 = vcombine.low %v10776_v30, %v10828_v46  ;;  %v4175_v29 = vrot.slane %v4167_v10, %v10108_v51  ;;  %s13570_s30 = smov 48  }
 0x653   : > { %v10735_v58 = vpop.permute.xlu1 %7156  ;;  %v10737_v53 = vpop.permute.xlu0 %7152  ;;  %v10870_v11 = vsel %vm2502_vm5, %v13530_v34, %v13529_v49  ;;  %v4136_v22 = vcombine.high %v10801_v60, %v10833_v36  ;;  %v4168_v43 = vcombine.high %v2673_v17, %v10844_v33  ;;  %v4078_v60 = vrot.slane %v4064_v28, %v10123_v2  ;;  %v13537_v17 = vld [vmem:[#allocation341_spill] sm:$0xff] }
 0x654   : > { %v8140_v18 = vsel %vm12949_vm0, %v8138_v12, %v10737_v53  ;;  %v10860_v53 = vsel %vm2502_vm5, %v13528_v38, %v13527_v44  ;;  %v4113_v25 = vcombine.low %v4062_v6, %v4094_v56  ;;  %v4114_v38 = vcombine.high %v4062_v6, %v4094_v56  ;;  %v13541_v28 = vld [vmem:[#allocation169_spill] sm:$0xff] }
 0x655   : > { %7384 = vrot.lane.b32.xlu0 %v3981_v48, %s12885_s29  ;;  %v8141_v62 = vsel %vm12856_vm4, %v8140_v18, %v10735_v58  ;;  %v4151_v4 = vcombine.low %v10870_v11, %v10860_v53  ;;  %v13531_v58 = vld [vmem:[#allocation257_spill] sm:$0xff]  ;;  %v13533_v48 = vld [vmem:[#allocation284_spill] sm:$0xff]  ;;  %v4096_v18 = vcombine.high %v4030_v50, %v4046_v9  ;;  %v4143_v9 = vrot.slane %v4135_v42, %v10108_v51  ;;  %s13567_s29 = smov 46  }
 0x656   : > { %7388 = vrot.lane.b32.xlu1 %v3982_v3, %s12882_s5  ;;  %v10881_v12 = vsel %vm2502_vm5, %v13532_v39, %v13531_v58  ;;  %v4103_v3 = vrot.slane %v4095_v47, %v10123_v2  ;;  %vm12859_vm4 = vcmask 277504   ;;  %v4152_v33 = vcombine.high %v10870_v11, %v10860_v53  ;;  %s13562_s5 = smov 44  }
 0x657   : > { %v10786_v61 = vpop.permute.xlu1 %7164  ;;  %v7161_v16 = vpop.permute.xlu0 %7160  ;;  %v4159_v50 = vrot.slane %v4151_v4, %v10108_v51  ;;  %v4110_v42 = vrot.slane %v4096_v18, %v10123_v2  ;;  %v13538_v4 = vld [vmem:[#allocation64_spill] sm:$0xff]  ;;  %v4182_v58 = vrot.slane %v4168_v43, %v10108_v51  ;;  %v13545_v43 = vld [vmem:[#allocation370_spill] sm:$0xff] }
 0x658   : > { %v8143_v0 = vsel %vm12855_vm1, %v8141_v62, %v7161_v16  ;;  %v10886_v16 = vsel %vm2502_vm5, %v13534_v54, %v13533_v48  ;;  %vm12866_vm1 = vcmask 261120   ;;  %v4071_v62 = vrot.slane %v4063_v63, %v10123_v2 }
 0x659   : > { %7392 = vrot.lane.b32.xlu0 %v4111_v13, %s12879_s4  ;;  %v8145_v7 = vsel %vm12858_vm2, %v8143_v0, %v10786_v61  ;;  %v13535_v13 = vld [vmem:[#allocation313_spill] sm:$0xff]  ;;  %v13536_v61 = vld [vmem:[#allocation52_spill] sm:$0xff]  ;;  %v4215_v56 = vcombine.low %v4159_v50, %v4175_v29  ;;  %vm12863_vm2 = vcmask 310272   ;;  %v4216_v53 = vcombine.high %v4159_v50, %v4175_v29  ;;  %s13560_s4 = smov 42  }
 0x65a   : > { %7396 = vrot.lane.b32.xlu1 %v4112_v1, %s12876_s7  ;;  %v10904_v49 = vsel %vm2502_vm5, %v13536_v61, %v13535_v13  ;;  %v4115_v0 = vcombine.low %v4071_v62, %v4103_v3  ;;  %v4120_v1 = vcombine.high %v10776_v30, %v10828_v46  ;;  %v4116_v63 = vcombine.high %v4071_v62, %v4103_v3  ;;  %v13539_v46 = vld [vmem:[#allocation226_spill] sm:$0xff]  ;;  %v13542_v62 = vld [vmem:[#allocation427_spill] sm:$0xff]  ;;  %s13555_s7 = smov 40  }
 0x65b   : > { %v10820_v27 = vpop.permute.xlu1 %7172  ;;  %v7169_v59 = vpop.permute.xlu0 %7168  ;;  %v10927_v30 = vrot.slane %v4136_v22, %v10108_v51  ;;  %v4223_v11 = vrot.slane %v4215_v56, %v10123_v2  ;;  %v4117_v48 = vcombine.low %v4078_v60, %v4110_v42  ;;  %v4166_v29 = vrot.slane %v4152_v33, %v10108_v51  ;;  %v13549_v33 = vld [vmem:[#allocation29_spill] sm:$0xff] }
 0x65c   : > { %v8147_v44 = vsel %vm12857_vm3, %v8145_v7, %v7169_v59  ;;  %v4127_v59 = vrot.slane %v4119_v26, %v10108_v51  ;;  %vm12860_vm3 = vcmask 293888   ;;  %v4118_v7 = vcombine.high %v4078_v60, %v4110_v42  ;;  %v13546_v42 = vld [vmem:[#allocation77_spill] sm:$0xff] }
 0x65d   : > { %7400 = vrot.lane.b32.xlu0 %v4113_v25, %s12873_s6  ;;  %v8149_v34 = vsel %vm12866_vm1, %v8147_v44, %v10820_v27  ;;  %v10924_v27 = vsel %vm2502_vm5, %v13538_v4, %v13537_v17  ;;  %v13540_v25 = vld [vmem:[#allocation398_spill] sm:$0xff]  ;;  %v4230_v13 = vrot.slane %v4216_v53, %v10123_v2  ;;  %v4231_v61 = vcombine.low %v4166_v29, %v4182_v58  ;;  %s13554_s6 = smov 38  }
 0x65e   : > { %7404 = vrot.lane.b32.xlu1 %v4114_v38, %s12870_s24  ;;  %v4183_v36 = vcombine.low %v4127_v59, %v4143_v9  ;;  %v4184_v18 = vcombine.high %v4127_v59, %v4143_v9  ;;  %v10943_v44 = vsel %vm2502_vm5, %v13541_v28, %v13540_v25  ;;  %v4271_v38 = vcombine.low %v10886_v16, %v10924_v27  ;;  %v13543_v9 = vld [vmem:[#allocation198_spill] sm:$0xff]  ;;  %s13551_s24 = smov 36  }
 0x65f   : > { %v7181_v57 = vpop.permute.xlu1 %7180  ;;  %v7177_v5 = vpop.permute.xlu0 %7176  ;;  %v2706_v50 = vsel %vm2502_vm5, %v13543_v9, %v13542_v62  ;;  %v2642_v56 = vsel %vm2502_vm5, %v13546_v42, %v13545_v43  ;;  %vm12875_vm1 = vcmask 375808   ;;  %v4255_v4 = vcombine.low %v10771_v15, %v10904_v49  ;;  %v13553_v25 = vld [vmem:[#allocation42_spill] sm:$0xff]  ;;  %v13556_v43 = vld [vmem:[#allocation316_spill] sm:$0xff]  ;;  %v13557_v42 = vld [vmem:[#allocation55_spill] sm:$0xff] }
 0x660   : > { %v8151_v6 = vsel %vm12859_vm4, %v8149_v34, %v7177_v5  ;;  %v10932_v5 = vsel %vm2502_vm5, %v13539_v46, %v10288_v19  ;;  %vm12872_vm4 = vcmask 326656   ;;  %v4191_v19 = vrot.slane %v4183_v36, %v10123_v2 }
 0x661   : > { %7408 = vrot.lane.b32.xlu0 %v4115_v0, %s12867_s8  ;;  %v8153_v39 = vsel %vm12860_vm3, %v8151_v6, %v7181_v57  ;;  %vm12869_vm3 = vcmask 343040   ;;  %v4134_v57 = vrot.slane %v4120_v1, %v10108_v51  ;;  %v4198_v1 = vrot.slane %v4184_v18, %v10123_v2  ;;  %s13550_s8 = smov 34  }
 0x662   : > { %7412 = vrot.lane.b32.xlu1 %v4116_v63, %s12861_s10  ;;  %s13544_s10 = smov 30   ;;  %v4247_v22 = vcombine.low %v4191_v19, %v4223_v11  ;;  %v4248_v0 = vcombine.high %v4191_v19, %v4223_v11  ;;  %v4287_v63 = vcombine.low %v2642_v56, %v2706_v50  ;;  %v4256_v46 = vcombine.high %v10771_v15, %v10904_v49 }
 0x663   : > { %v7185_v10 = vpop.permute.xlu0 %7184  ;;  %v4199_v6 = vcombine.low %v4134_v57, %v10927_v30  ;;  %v4232_v11 = vcombine.high %v4166_v29, %v4182_v58  ;;  %v10979_v18 = vrot.slane %v4271_v38, %v10108_v51  ;;  %v4200_v19 = vcombine.high %v4134_v57, %v10927_v30  ;;  %v13552_v58 = vld [vmem:[#allocation287_spill] sm:$0xff] }
 0x664   : > { %v7189_v47 = vpop.permute.xlu1 %7188  ;;  %v8155_v3 = vsel %vm12863_vm2, %v8153_v39, %v7185_v10  ;;  %v4303_v10 = vcombine.low %v10943_v44, %v10932_v5  ;;  %vm12878_vm2 = vcmask 359424   ;;  %v4239_v39 = vrot.slane %v4231_v61, %v10123_v2 }
 0x665   : > { %7416 = vrot.lane.b32.xlu0 %v4117_v48, %s12864_s9  ;;  %v8157_v59 = vsel %vm12872_vm4, %v8155_v3, %v7189_v47  ;;  %s13547_s9 = smov 32   ;;  %v13548_v47 = vld [vmem:[#allocation258_spill] sm:$0xff]  ;;  %v4207_v15 = vrot.slane %v4199_v6, %v10123_v2  ;;  %v4295_v49 = vrot.slane %v4287_v63, %v10108_v51  ;;  %vm12881_vm4 = vcmask 408576  }
 0x666   : > { %7420 = vrot.lane.b32.xlu1 %v4118_v7, %s13544_s10  ;;  %v10968_v17 = vsel %vm2502_vm5, %v13549_v33, %v13548_v47  ;;  %v4311_v53 = vrot.slane %v4303_v10, %v10108_v51  ;;  %v4250_v7 = vcombine.high %v4198_v1, %v4230_v13  ;;  %v4263_v28 = vrot.slane %v4255_v4, %v10108_v51  ;;  %v13561_v33 = vld [vmem:[#allocation229_spill] sm:$0xff] }
 0x667   : > { %v7193_v26 = vpop.permute.xlu0 %7192  ;;  %v4288_v29 = vcombine.high %v2642_v56, %v2706_v50  ;;  %v4304_v38 = vcombine.high %v10943_v44, %v10932_v5  ;;  %v4246_v57 = vrot.slane %v4232_v11, %v10123_v2  ;;  %v10998_v61 = vrot.slane %v4256_v46, %v10108_v51 }
 0x668   : > { %v7197_v54 = vpop.permute.xlu1 %7196  ;;  %v8159_v34 = vsel %vm12869_vm3, %v8157_v59, %v7193_v26  ;;  %v4249_v26 = vcombine.low %v4198_v1, %v4230_v13  ;;  %vm12896_vm3 = vcmask 392192   ;;  %v4351_v30 = vcombine.low %v4295_v49, %v4311_v53 }
 0x669   : > { %7424 = vrot.lane.b32.xlu0 %v4247_v22, %s13547_s9  ;;  %v8161_v48 = vsel %vm12878_vm2, %v8159_v34, %v7197_v54  ;;  %v10989_v54 = vsel %vm2502_vm5, %v13553_v25, %v13552_v58  ;;  %v4251_v13 = vcombine.low %v4207_v15, %v4239_v39  ;;  %v4252_v22 = vcombine.high %v4207_v15, %v4239_v39  ;;  %v13558_v34 = vld [vmem:[#allocation344_spill] sm:$0xff]  ;;  %v13565_v15 = vld [vmem:[#allocation430_spill] sm:$0xff] }
 0x66a   : > { %7428 = vrot.lane.b32.xlu1 %v4248_v0, %s13550_s8  ;;  %v4272_v5 = vcombine.high %v10886_v16, %v10924_v27  ;;  %v4319_v44 = vcombine.low %v4263_v28, %v10979_v18  ;;  %v4214_v50 = vrot.slane %v4200_v19, %v10123_v2  ;;  %vm12887_vm2 = vcmask 441344   ;;  %v13559_v0 = vld [vmem:[#allocation67_spill] sm:$0xff] }
 0x66b   : > { %v7201_v36 = vpop.permute.xlu0 %7200  ;;  %v11009_v56 = vsel %vm2502_vm5, %v13557_v42, %v13556_v43  ;;  %v11014_v1 = vsel %vm2502_vm5, %v13559_v0, %v13558_v34  ;;  %v11017_v6 = vrot.slane %v4288_v29, %v10108_v51  ;;  %v11020_v16 = vrot.slane %v4304_v38, %v10108_v51  ;;  %v13572_v43 = vld [vmem:[#allocation30_spill] sm:$0xff]  ;;  %v13574_v0 = vld [vmem:[#allocation41_spill] sm:$0xff] }
 0x66c   : > { %v7205_v60 = vpop.permute.xlu1 %7204  ;;  %v8163_v3 = vsel %vm12875_vm1, %v8161_v48, %v7201_v36  ;;  %vm12884_vm1 = vcmask 424960   ;;  %v4352_v27 = vcombine.high %v4295_v49, %v4311_v53  ;;  %v4359_v63 = vrot.slane %v4351_v30, %v10123_v2  ;;  %v13566_v49 = vld [vmem:[#allocation201_spill] sm:$0xff]  ;;  %v13573_v34 = vld [vmem:[#allocation286_spill] sm:$0xff] }
 0x66d   : > { %7432 = vrot.lane.b32.xlu0 %v4249_v26, %s13551_s24  ;;  %v8165_v9 = vsel %vm12896_vm3, %v8163_v3, %v7205_v60  ;;  %v4253_v47 = vcombine.low %v4214_v50, %v4246_v57  ;;  %v11028_v4 = vsel %vm2502_vm5, %v13561_v33, %v10305_v14  ;;  %v4254_v39 = vcombine.high %v4214_v50, %v4246_v57  ;;  %v13564_v14 = vld [vmem:[#allocation172_spill] sm:$0xff]  ;;  %v13568_v57 = vld [vmem:[#allocation373_spill] sm:$0xff]  ;;  %v13571_v50 = vld [vmem:[#allocation259_spill] sm:$0xff] }
 0x66e   : > { %7436 = vrot.lane.b32.xlu1 %v4250_v7, %s13554_s6  ;;  %v4286_v48 = vrot.slane %v4272_v5, %v10108_v51  ;;  %v4320_v53 = vcombine.high %v4263_v28, %v10979_v18  ;;  %v4327_v26 = vrot.slane %v4319_v44, %v10123_v2  ;;  %v4407_v3 = vcombine.low %v10989_v54, %v11014_v1  ;;  %v13563_v7 = vld [vmem:[#allocation401_spill] sm:$0xff] }
 0x66f   : > { %v7209_v10 = vpop.permute.xlu0 %7208  ;;  %v11040_v19 = vsel %vm2502_vm5, %v13564_v14, %v13563_v7  ;;  %v11045_v58 = vsel %vm2502_vm5, %v13566_v49, %v13565_v15  ;;  %v4367_v18 = vcombine.low %v11017_v6, %v11020_v16  ;;  %v4366_v25 = vrot.slane %v4352_v27, %v10123_v2  ;;  %v13577_v15 = vld [vmem:[#allocation315_spill] sm:$0xff]  ;;  %v13578_v49 = vld [vmem:[#allocation54_spill] sm:$0xff] }
 0x670   : > { %v7213_v62 = vpop.permute.xlu1 %7212  ;;  %v8167_v59 = vsel %vm12881_vm4, %v8165_v9, %v7209_v10  ;;  %vm12890_vm4 = vcmask 457728   ;;  %v4439_v28 = vcombine.low %v11040_v19, %v11028_v4  ;;  %v4383_v30 = vcombine.low %v4327_v26, %v4359_v63 }
 0x671   : > { %7440 = vrot.lane.b32.xlu0 %v4251_v13, %s13555_s7  ;;  %v8169_v60 = vsel %vm12884_vm1, %v8167_v59, %v7213_v62  ;;  %vm12893_vm1 = vcmask 474112   ;;  %v13569_v62 = vld [vmem:[#allocation80_spill] sm:$0xff]  ;;  %v4384_v59 = vcombine.high %v4327_v26, %v4359_v63  ;;  %v4335_v5 = vcombine.low %v10998_v61, %v4286_v48 }
 0x672   : > { %7444 = vrot.lane.b32.xlu1 %v4252_v22, %s13560_s4  ;;  %v11057_v9 = vsel %vm2502_vm5, %v13569_v62, %v13568_v57  ;;  %v4334_v22 = vrot.slane %v4320_v53, %v10123_v2  ;;  %v11068_v42 = vsel %vm2502_vm5, %v13572_v43, %v13571_v50  ;;  %v11073_v27 = vsel %vm2502_vm5, %v13574_v0, %v13573_v34 }
 0x673   : > { %v7217_v36 = vpop.permute.xlu0 %7216  ;;  %v4423_v44 = vcombine.low %v11057_v9, %v11045_v58  ;;  %v4391_v63 = vcombine.low %v10968_v17, %v11009_v56  ;;  %v4343_v14 = vrot.slane %v4335_v5, %v10123_v2  ;;  %vm12905_vm3 = vcmask 539648  }
 0x674   : > { %v7221_v46 = vpop.permute.xlu1 %7220  ;;  %v8171_v11 = vsel %vm12887_vm2, %v8169_v60, %v7217_v36  ;;  %vm12902_vm2 = vcmask 490496   ;;  %v4368_v60 = vcombine.high %v11017_v6, %v11020_v16  ;;  %v4375_v36 = vrot.slane %v4367_v18, %v10123_v2 }
 0x675   : > { %7448 = vrot.lane.b32.xlu0 %v4253_v47, %s13562_s5  ;;  %v8173_v29 = vsel %vm12890_vm4, %v8171_v11, %v7221_v46  ;;  %vm12899_vm4 = vcmask 506880   ;;  %v4447_v47 = vrot.slane %v4439_v28, %v10108_v51  ;;  %v4385_v11 = vcombine.low %v4334_v22, %v4366_v25 }
 0x676   : > { %7452 = vrot.lane.b32.xlu1 %v4254_v39, %s13567_s29  ;;  %v4336_v39 = vcombine.high %v10998_v61, %v4286_v48  ;;  %v4386_v7 = vcombine.high %v4334_v22, %v4366_v25  ;;  %v4415_v6 = vrot.slane %v4407_v3, %v10108_v51  ;;  %v4431_v16 = vrot.slane %v4423_v44, %v10108_v51 }
 0x677   : > { %v7225_v38 = vpop.permute.xlu0 %7224  ;;  %v11092_v18 = vsel %vm2502_vm5, %v13578_v49, %v13577_v15  ;;  %v4399_v61 = vrot.slane %v4391_v63, %v10108_v51  ;;  %v4408_v48 = vcombine.high %v10989_v54, %v11014_v1  ;;  %v4440_v25 = vcombine.high %v11040_v19, %v11028_v4  ;;  %v13581_v19 = vld [vmem:[#allocation343_spill] sm:$0xff] }
 0x678   : > { %v7229_v10 = vpop.permute.xlu1 %7228  ;;  %v8175_v13 = vsel %vm12893_vm1, %v8173_v29, %v7225_v38  ;;  %vm12913_vm1 = vcmask 523264   ;;  %v4382_v3 = vrot.slane %v4368_v60, %v10123_v2  ;;  %v4487_v28 = vcombine.low %v4431_v16, %v4447_v47 }
 0x679   : > { %7456 = vrot.lane.b32.xlu0 %v4383_v30, %s13570_s30  ;;  %v8177_v33 = vsel %vm12902_vm2, %v8175_v13, %v7229_v10  ;;  %v4387_v30 = vcombine.low %v4343_v14, %v4375_v36  ;;  %v4392_v57 = vcombine.high %v10968_v17, %v11009_v56  ;;  %v4388_v13 = vcombine.high %v4343_v14, %v4375_v36  ;;  %v13583_v56 = vld [vmem:[#allocation228_spill] sm:$0xff] }
 0x67a   : > { %7460 = vrot.lane.b32.xlu1 %v4384_v59, %s13575_s23  ;;  %v4350_v54 = vrot.slane %v4336_v39, %v10123_v2  ;;  %v4455_v1 = vcombine.low %v4399_v61, %v4415_v6  ;;  %v4424_v4 = vcombine.high %v11057_v9, %v11045_v58  ;;  %vm12909_vm2 = vcmask 572416   ;;  %v13582_v59 = vld [vmem:[#allocation66_spill] sm:$0xff] }
 0x67b   : > { %v7233_v46 = vpop.permute.xlu0 %7232  ;;  %v11112_v22 = vsel %vm2502_vm5, %v13582_v59, %v13581_v19  ;;  %v11115_v17 = vrot.slane %v4408_v48, %v10108_v51  ;;  %v11120_v5 = vsel %vm2502_vm5, %v13583_v56, %v10303_v52  ;;  %v11123_v44 = vrot.slane %v4440_v25, %v10108_v51  ;;  %v13591_v25 = vld [vmem:[#allocation372_spill] sm:$0xff] }
 0x67c   : > { %v7237_v53 = vpop.permute.xlu1 %7236  ;;  %v8179_v26 = vsel %vm12899_vm4, %v8177_v33, %v7233_v46  ;;  %vm12908_vm4 = vcmask 556032   ;;  %v4488_v58 = vcombine.high %v4431_v16, %v4447_v47  ;;  %v4495_v9 = vrot.slane %v4487_v28, %v10123_v2  ;;  %v13585_v33 = vld [vmem:[#allocation400_spill] sm:$0xff]  ;;  %v13586_v46 = vld [vmem:[#allocation171_spill] sm:$0xff] }
 0x67d   : > { %7464 = vrot.lane.b32.xlu0 %v4385_v11, %s13576_s28  ;;  %v8181_v29 = vsel %vm12913_vm1, %v8179_v26, %v7237_v53  ;;  %v4389_v34 = vcombine.low %v4350_v54, %v4382_v3  ;;  %v4456_v0 = vcombine.high %v4399_v61, %v4415_v6  ;;  %v4390_v36 = vcombine.high %v4350_v54, %v4382_v3  ;;  %v13588_v26 = vld [vmem:[#allocation429_spill] sm:$0xff]  ;;  %v13592_v3 = vld [vmem:[#allocation79_spill] sm:$0xff] }
 0x67e   : > { %7468 = vrot.lane.b32.xlu1 %v4386_v7, %s13579_s19  ;;  %v4463_v52 = vrot.slane %v4455_v1, %v10123_v2  ;;  %v11133_v11 = vsel %vm2502_vm5, %v13586_v46, %v13585_v33  ;;  %v4438_v47 = vrot.slane %v4424_v4, %v10108_v51  ;;  %v4406_v39 = vrot.slane %v4392_v57, %v10108_v51  ;;  %v13589_v7 = vld [vmem:[#allocation200_spill] sm:$0xff]  ;;  %v13595_v54 = vld [vmem:[#allocation31_spill] sm:$0xff] }
 0x67f   : > { %v7241_v38 = vpop.permute.xlu0 %7240  ;;  %v4543_v53 = vcombine.low %v11073_v27, %v11112_v22  ;;  %v11143_v14 = vsel %vm2502_vm5, %v13589_v7, %v13588_v26  ;;  %v4575_v6 = vcombine.low %v11133_v11, %v11120_v5  ;;  %v4502_v16 = vrot.slane %v4488_v58, %v10123_v2 }
 0x680   : > { %v7245_v62 = vpop.permute.xlu1 %7244  ;;  %v8183_v10 = vsel %vm12905_vm3, %v8181_v29, %v7241_v38  ;;  %vm12910_vm3 = vcmask 588800   ;;  %v4503_v15 = vcombine.low %v4438_v47, %v11123_v44  ;;  %v4519_v48 = vcombine.low %v4463_v52, %v4495_v9 }
 0x681   : > { %7472 = vrot.lane.b32.xlu0 %v4387_v30, %s13580_s21  ;;  %v8185_v50 = vsel %vm12908_vm4, %v8183_v10, %v7245_v62  ;;  %vm12911_vm4 = vcmask 605184   ;;  %v11154_v28 = vsel %vm2502_vm5, %v13592_v3, %v13591_v25  ;;  %v4520_v30 = vcombine.high %v4463_v52, %v4495_v9  ;;  %v13599_v52 = vld [vmem:[#allocation44_spill] sm:$0xff] }
 0x682   : > { %7476 = vrot.lane.b32.xlu1 %v4388_v13, %s13584_s18  ;;  %v4470_v57 = vrot.slane %v4456_v0, %v10123_v2  ;;  %v4471_v62 = vcombine.low %v4406_v39, %v11115_v17  ;;  %v4559_v10 = vcombine.low %v11154_v28, %v11143_v14  ;;  %v13594_v13 = vld [vmem:[#allocation260_spill] sm:$0xff]  ;;  %v4527_v4 = vcombine.low %v10881_v12, %v11092_v18 }
 0x683   : > { %v7249_v43 = vpop.permute.xlu0 %7248  ;;  %v11165_v1 = vsel %vm2502_vm5, %v13595_v54, %v13594_v13  ;;  %v4528_v19 = vcombine.high %v10881_v12, %v11092_v18  ;;  %v4583_v59 = vrot.slane %v4575_v6, %v10108_v51  ;;  %v4504_v56 = vcombine.high %v4438_v47, %v11123_v44  ;;  %v13607_v54 = vld [vmem:[#allocation231_spill] sm:$0xff] }
 0x684   : > { %v7253_v63 = vpop.permute.xlu1 %7252  ;;  %v8187_v60 = vsel %vm12909_vm2, %v8185_v50, %v7249_v43  ;;  %vm12929_vm2 = vcmask 621568   ;;  %v4511_v58 = vrot.slane %v4503_v15, %v10123_v2  ;;  %v4521_v43 = vcombine.low %v4470_v57, %v4502_v16 }
 0x685   : > { %7480 = vrot.lane.b32.xlu0 %v4389_v34, %s13587_s11  ;;  %v8189_v49 = vsel %vm12910_vm3, %v8187_v60, %v7253_v63  ;;  %vm12915_vm3 = vcmask 637952   ;;  %v11177_v34 = vrot.slane %v4543_v53, %v10108_v51  ;;  %v4522_v60 = vcombine.high %v4470_v57, %v4502_v16 }
 0x686   : > { %7484 = vrot.lane.b32.xlu1 %v4390_v36, %s13590_s0  ;;  %v4472_v12 = vcombine.high %v4406_v39, %v11115_v17  ;;  %v4479_v18 = vrot.slane %v4471_v62, %v10123_v2  ;;  %v4567_v44 = vrot.slane %v4559_v10, %v10108_v51  ;;  %vm12918_vm1 = vcmask 670720   ;;  %v13598_v36 = vld [vmem:[#allocation289_spill] sm:$0xff] }
 0x687   : > { %v7257_v61 = vpop.permute.xlu0 %7256  ;;  %v11187_v33 = vsel %vm2502_vm5, %v13599_v52, %v13598_v36  ;;  %v4535_v46 = vrot.slane %v4527_v4, %v10108_v51  ;;  %v4544_v47 = vcombine.high %v11073_v27, %v11112_v22  ;;  %v4576_v17 = vcombine.high %v11133_v11, %v11120_v5  ;;  %v13602_v11 = vld [vmem:[#allocation318_spill] sm:$0xff] }
 0x688   : > { %v7261_v29 = vpop.permute.xlu1 %7260  ;;  %v8191_v38 = vsel %vm12911_vm4, %v8189_v49, %v7257_v61  ;;  %vm12916_vm4 = vcmask 654336   ;;  %v4623_v39 = vcombine.low %v4567_v44, %v4583_v59  ;;  %v4518_v53 = vrot.slane %v4504_v56, %v10123_v2 }
 0x689   : > { %7488 = vrot.lane.b32.xlu0 %v4519_v48, %s13593_s1  ;;  %v8193_v9 = vsel %vm12929_vm2, %v8191_v38, %v7261_v29  ;;  %v4523_v6 = vcombine.low %v4479_v18, %v4511_v58  ;;  %v11198_v16 = vrot.slane %v4528_v19, %v10108_v51  ;;  %v4524_v61 = vcombine.high %v4479_v18, %v4511_v58  ;;  %v13603_v48 = vld [vmem:[#allocation57_spill] sm:$0xff]  ;;  %v13604_v29 = vld [vmem:[#allocation346_spill] sm:$0xff] }
 0x68a   : > { %7492 = vrot.lane.b32.xlu1 %v4520_v30, %s13596_s2  ;;  %v4591_v27 = vcombine.low %v4535_v46, %v11177_v34  ;;  %v4486_v22 = vrot.slane %v4472_v12, %v10123_v2  ;;  %v4560_v5 = vcombine.high %v11154_v28, %v11143_v14  ;;  %v11209_v25 = vsel %vm2502_vm5, %v13603_v48, %v13602_v11  ;;  %v13605_v38 = vld [vmem:[#allocation69_spill] sm:$0xff]  ;;  %v13612_v12 = vld [vmem:[#allocation203_spill] sm:$0xff]  ;;  %v13619_v11 = vld [vmem:[#allocation288_spill] sm:$0xff] }
 0x68b   : > { %v7265_v50 = vpop.permute.xlu0 %7264  ;;  %v11212_v3 = vrot.slane %v4544_v47, %v10108_v51  ;;  %v11217_v30 = vsel %vm2502_vm5, %v13605_v38, %v13604_v29  ;;  %v4624_v57 = vcombine.high %v4567_v44, %v4583_v59  ;;  %v4590_v14 = vrot.slane %v4576_v17, %v10108_v51  ;;  %v13614_v17 = vld [vmem:[#allocation375_spill] sm:$0xff] }
 0x68c   : > { %v7269_v0 = vpop.permute.xlu1 %7268  ;;  %v8195_v63 = vsel %vm12915_vm3, %v8193_v9, %v7265_v50  ;;  %vm12920_vm3 = vcmask 687104   ;;  %v4631_v28 = vrot.slane %v4623_v39, %v10123_v2  ;;  %v4525_v13 = vcombine.low %v4486_v22, %v4518_v53  ;;  %v13615_v39 = vld [vmem:[#allocation82_spill] sm:$0xff]  ;;  %v13620_v48 = vld [vmem:[#allocation43_spill] sm:$0xff] }
 0x68d   : > { %7496 = vrot.lane.b32.xlu0 %v4521_v43, %s13597_s20  ;;  %v8197_v26 = vsel %vm12916_vm4, %v8195_v63, %v7269_v0  ;;  %vm12923_vm4 = vcmask 703488   ;;  %v11226_v4 = vsel %vm2502_vm5, %v13607_v54, %v10313_v8  ;;  %v4526_v58 = vcombine.high %v4486_v22, %v4518_v53  ;;  %v13609_v0 = vld [vmem:[#allocation403_spill] sm:$0xff]  ;;  %v13610_v8 = vld [vmem:[#allocation174_spill] sm:$0xff]  ;;  %v13618_v22 = vld [vmem:[#allocation84_spill] sm:$0xff] }
 0x68e   : > { %7500 = vrot.lane.b32.xlu1 %v4522_v60, %s13600_s16  ;;  %v4592_v59 = vcombine.high %v4535_v46, %v11177_v34  ;;  %v4599_v9 = vrot.slane %v4591_v27, %v10123_v2  ;;  %v4574_v50 = vrot.slane %v4560_v5, %v10108_v51  ;;  %v4607_v43 = vcombine.low %v11198_v16, %v11212_v3  ;;  %v13611_v60 = vld [vmem:[#allocation432_spill] sm:$0xff]  ;;  %v13617_v27 = vld [vmem:[#allocation262_spill] sm:$0xff] }
 0x68f   : > { %v7273_v7 = vpop.permute.xlu0 %7272  ;;  %v11238_v63 = vsel %vm2502_vm5, %v13610_v8, %v13609_v0  ;;  %v11243_v18 = vsel %vm2502_vm5, %v13612_v12, %v13611_v60  ;;  %v4638_v34 = vrot.slane %v4624_v57, %v10123_v2  ;;  %v11253_v53 = vsel %vm2502_vm5, %v13615_v39, %v13614_v17  ;;  %v13623_v0 = vld [vmem:[#allocation317_spill] sm:$0xff]  ;;  %v13624_v8 = vld [vmem:[#allocation56_spill] sm:$0xff] }
 0x690   : > { %v7277_v15 = vpop.permute.xlu1 %7276  ;;  %v8199_v49 = vsel %vm12918_vm1, %v8197_v26, %v7273_v7  ;;  %vm12925_vm1 = vcmask 719872   ;;  %v4639_v44 = vcombine.low %v4574_v50, %v4590_v14  ;;  %v4711_v36 = vcombine.low %v11238_v63, %v11226_v4 }
 0x691   : > { %7504 = vrot.lane.b32.xlu0 %v4523_v6, %s13601_s26  ;;  %v8201_v62 = vsel %vm12920_vm3, %v8199_v49, %v7277_v15  ;;  %vm12927_vm3 = vcmask 736256   ;;  %v4655_v47 = vcombine.low %v4599_v9, %v4631_v28  ;;  %v4656_v6 = vcombine.high %v4599_v9, %v4631_v28 }
 0x692   : > { %7508 = vrot.lane.b32.xlu1 %v4524_v61, %s13606_s14  ;;  %v4606_v15 = vrot.slane %v4592_v59, %v10123_v2  ;;  %v4679_v49 = vcombine.low %v11187_v33, %v11217_v30  ;;  %v4695_v61 = vcombine.low %v11253_v53, %v11243_v18  ;;  %v11265_v5 = vsel %vm2502_vm5, %v13618_v22, %v13617_v27 }
 0x693   : > { %v7281_v10 = vpop.permute.xlu0 %7280  ;;  %v11270_v29 = vsel %vm2502_vm5, %v13620_v48, %v13619_v11  ;;  %v4663_v38 = vcombine.low %v11165_v1, %v11209_v25  ;;  %v4640_v57 = vcombine.high %v4574_v50, %v4590_v14  ;;  %v4647_v28 = vrot.slane %v4639_v44, %v10123_v2 }
 0x694   : > { %v7285_v19 = vpop.permute.xlu1 %7284  ;;  %v8203_v56 = vsel %vm12923_vm4, %v8201_v62, %v7281_v10  ;;  %vm12934_vm4 = vcmask 752640   ;;  %v4719_v62 = vrot.slane %v4711_v36, %v10108_v51  ;;  %v4657_v54 = vcombine.low %v4606_v15, %v4638_v34 }
 0x695   : > { %7512 = vrot.lane.b32.xlu0 %v4525_v13, %s13608_s13  ;;  %v8205_v52 = vsel %vm12925_vm1, %v8203_v56, %v7285_v19  ;;  %vm12932_vm1 = vcmask 769024   ;;  %v4608_v19 = vcombine.high %v11198_v16, %v11212_v3  ;;  %v4658_v59 = vcombine.high %v4606_v15, %v4638_v34 }
 0x696   : > { %7516 = vrot.lane.b32.xlu1 %v4526_v58, %s13613_s17  ;;  %v4615_v14 = vrot.slane %v4607_v43, %v10123_v2  ;;  %v4687_v9 = vrot.slane %v4679_v49, %v10108_v51  ;;  %v4703_v50 = vrot.slane %v4695_v61, %v10108_v51  ;;  %vm12935_vm2 = vcmask 801792  }
 0x697   : > { %v7289_v46 = vpop.permute.xlu0 %7288  ;;  %v11288_v60 = vsel %vm2502_vm5, %v13624_v8, %v13623_v0  ;;  %v4671_v16 = vrot.slane %v4663_v38, %v10108_v51  ;;  %v4680_v3 = vcombine.high %v11187_v33, %v11217_v30  ;;  %v4712_v43 = vcombine.high %v11238_v63, %v11226_v4  ;;  %v13627_v63 = vld [vmem:[#allocation345_spill] sm:$0xff] }
 0x698   : > { %v7293_v26 = vpop.permute.xlu1 %7292  ;;  %v8207_v7 = vsel %vm12927_vm3, %v8205_v52, %v7289_v46  ;;  %vm12938_vm3 = vcmask 785408   ;;  %v4654_v12 = vrot.slane %v4640_v57, %v10123_v2  ;;  %v4759_v34 = vcombine.low %v4703_v50, %v4719_v62  ;;  %v13631_v57 = vld [vmem:[#allocation402_spill] sm:$0xff] }
 0x699   : > { %7520 = vrot.lane.b32.xlu0 %v4655_v47, %s13616_s27  ;;  %v8209_v10 = vsel %vm12934_vm4, %v8207_v7, %v7293_v26  ;;  %v4659_v52 = vcombine.low %v4615_v14, %v4647_v28  ;;  %v4664_v46 = vcombine.high %v11165_v1, %v11209_v25  ;;  %v4660_v39 = vcombine.high %v4615_v14, %v4647_v28  ;;  %v13628_v26 = vld [vmem:[#allocation68_spill] sm:$0xff]  ;;  %v13629_v25 = vld [vmem:[#allocation230_spill] sm:$0xff]  ;;  %v13632_v28 = vld [vmem:[#allocation173_spill] sm:$0xff] }
 0x69a   : > { %7524 = vrot.lane.b32.xlu1 %v4656_v6, %s13621_s12  ;;  %v4622_v33 = vrot.slane %v4608_v19, %v10123_v2  ;;  %v4727_v30 = vcombine.low %v4671_v16, %v4687_v9  ;;  %v4696_v4 = vcombine.high %v11253_v53, %v11243_v18  ;;  %vm12937_vm4 = vcmask 834560   ;;  %v13634_v19 = vld [vmem:[#allocation431_spill] sm:$0xff] }
 0x69b   : > { %v7297_v13 = vpop.permute.xlu0 %7296  ;;  %v11308_v7 = vsel %vm2502_vm5, %v13628_v26, %v13627_v63  ;;  %v11311_v1 = vrot.slane %v4680_v3, %v10108_v51  ;;  %v11316_v6 = vsel %vm2502_vm5, %v13629_v25, %v10311_v55  ;;  %v11319_v15 = vrot.slane %v4712_v43, %v10108_v51  ;;  %v13638_v3 = vld [vmem:[#allocation81_spill] sm:$0xff] }
 0x69c   : > { %v7301_v56 = vpop.permute.xlu1 %7300  ;;  %v8211_v58 = vsel %vm12932_vm1, %v8209_v10, %v7297_v13  ;;  %vm12936_vm1 = vcmask 818176   ;;  %v4760_v18 = vcombine.high %v4703_v50, %v4719_v62  ;;  %v4767_v53 = vrot.slane %v4759_v34, %v10123_v2 }
 0x69d   : > { %7528 = vrot.lane.b32.xlu0 %v4657_v54, %s13622_s3  ;;  %v8213_v44 = vsel %vm12938_vm3, %v8211_v58, %v7301_v56  ;;  %v4661_v27 = vcombine.low %v4622_v33, %v4654_v12  ;;  %v4728_v22 = vcombine.high %v4671_v16, %v4687_v9  ;;  %v4662_v38 = vcombine.high %v4622_v33, %v4654_v12  ;;  %v13635_v56 = vld [vmem:[#allocation202_spill] sm:$0xff]  ;;  %s13666_s3 = smov 118  }
 0x69e   : > { %7532 = vrot.lane.b32.xlu1 %v4658_v59, %s13625_s25  ;;  %s13630_s25 = smov 90   ;;  %v4735_v55 = vrot.slane %v4727_v30, %v10123_v2  ;;  %v11329_v10 = vsel %vm2502_vm5, %v13632_v28, %v13631_v57  ;;  %v4710_v62 = vrot.slane %v4696_v4, %v10108_v51  ;;  %v4678_v13 = vrot.slane %v4664_v46, %v10108_v51  ;;  %v13637_v16 = vld [vmem:[#allocation374_spill] sm:$0xff] }
 0x69f   : > { %v7305_v36 = vpop.permute.xlu0 %7304  ;;  %v4815_v54 = vcombine.low %v11270_v29, %v11308_v7  ;;  %v2710_v58 = vsel %vm2502_vm5, %v13635_v56, %v13634_v19  ;;  %v4847_v59 = vcombine.low %v11329_v10, %v11316_v6  ;;  %v4774_v14 = vrot.slane %v4760_v18, %v10123_v2  ;;  %v13646_v19 = vld [vmem:[#allocation115_spill] sm:$0xff] }
 0x6a0   : > { %v7309_v47 = vpop.permute.xlu1 %7308  ;;  %v8215_v17 = vsel %vm12935_vm2, %v8213_v44, %v7305_v36  ;;  %vm12940_vm2 = vcmask 850944   ;;  %v4775_v9 = vcombine.low %v4710_v62, %v11319_v15  ;;  %v4791_v8 = vcombine.low %v4735_v55, %v4767_v53 }
 0x6a1   : > { %7536 = vrot.lane.b32.xlu0 %v4659_v52, %s13626_s15  ;;  %v8217_v49 = vsel %vm12936_vm1, %v8215_v17, %v7309_v47  ;;  %vm12939_vm1 = vcmask 867328   ;;  %s13636_s15 = smov 94   ;;  %v2646_v43 = vsel %vm2502_vm5, %v13638_v3, %v13637_v16  ;;  %v4792_v44 = vcombine.high %v4735_v55, %v4767_v53  ;;  %v13640_v47 = vld [vmem:[#allocation291_spill] sm:$0xff]  ;;  %v13641_v17 = vld [vmem:[#allocation100_spill] sm:$0xff] }
 0x6a2   : > { %7540 = vrot.lane.b32.xlu1 %v4660_v39, %s13630_s25  ;;  %s13633_s25 = smov 92   ;;  %v4742_v36 = vrot.slane %v4728_v22, %v10123_v2  ;;  %v4743_v52 = vcombine.low %v4678_v13, %v11311_v1  ;;  %v4831_v46 = vcombine.low %v2646_v43, %v2710_v58  ;;  %vm12941_vm3 = vcmask 900096   ;;  %v13650_v16 = vld [vmem:[#allocation348_spill] sm:$0xff] }
 0x6a3   : > { %v7313_v61 = vpop.permute.xlu0 %7312  ;;  %v11355_v39 = vsel %vm2502_vm5, %v13641_v17, %v13640_v47  ;;  %v4799_v33 = vcombine.low %v11068_v42, %v11288_v60  ;;  %v4800_v30 = vcombine.high %v11068_v42, %v11288_v60  ;;  %v11362_v4 = vrot.slane %v4847_v59, %v10108_v51  ;;  %v13651_v3 = vld [vmem:[#allocation132_spill] sm:$0xff] }
 0x6a4   : > { %v7317_v11 = vpop.permute.xlu1 %7316  ;;  %v8219_v48 = vsel %vm12937_vm4, %v8217_v49, %v7313_v61  ;;  %vm8224_vm4 = vcmask 883712   ;;  %v4776_v63 = vcombine.high %v4710_v62, %v11319_v15  ;;  %v4783_v26 = vrot.slane %v4775_v9, %v10123_v2 }
 0x6a5   : > { %7544 = vrot.lane.b32.xlu0 %v4661_v27, %s13633_s25  ;;  %v8221_v50 = vsel %vm12940_vm2, %v8219_v48, %v7317_v11  ;;  %s13642_s25 = smov 98   ;;  %v4793_v53 = vcombine.low %v4742_v36, %v4774_v14  ;;  %v11369_v49 = vrot.slane %v4815_v54, %v10108_v51  ;;  %v4794_v42 = vcombine.high %v4742_v36, %v4774_v14  ;;  %v13645_v54 = vld [vmem:[#allocation319_spill] sm:$0xff] }
 0x6a6   : > { %7548 = vrot.lane.b32.xlu1 %v4662_v38, %s13636_s15  ;;  %s13639_s15 = smov 96   ;;  %v4744_v60 = vcombine.high %v4678_v13, %v11311_v1  ;;  %v4751_v22 = vrot.slane %v4743_v52, %v10123_v2  ;;  %v4839_v15 = vrot.slane %v4831_v46, %v10108_v51  ;;  %vm12943_vm2 = vcmask 932864   ;;  %v13653_v46 = vld [vmem:[#allocation233_spill] sm:$0xff] }
 0x6a7   : > { %v7321_v0 = vpop.permute.xlu0 %7320  ;;  %v4807_v11 = vrot.slane %v4799_v33, %v10108_v51  ;;  %v11378_v48 = vrot.slane %v4800_v30, %v10108_v51  ;;  %v4832_v38 = vcombine.high %v2646_v43, %v2710_v58  ;;  %v4848_v55 = vcombine.high %v11329_v10, %v11316_v6 }
 0x6a8   : > { %v7325_v12 = vpop.permute.xlu1 %7324  ;;  %v8223_v34 = vsel %vm12939_vm1, %v8221_v50, %v7321_v0  ;;  %vm12942_vm1 = vcmask 916480   ;;  %v4895_v1 = vcombine.low %v4839_v15, %v11362_v4  ;;  %v4790_v57 = vrot.slane %v4776_v63, %v10123_v2  ;;  %v13648_v50 = vld [vmem:[#allocation320_spill] sm:$0xff] }
 0x6a9   : > { %7552 = vrot.lane.b32.xlu0 %v4791_v8, %s13639_s15  ;;  %v8225_v25 = vsel %vm8224_vm4, %v8223_v34, %v7325_v12  ;;  %s13644_s15 = smov 102   ;;  %v4795_v13 = vcombine.low %v4751_v22, %v4783_v26  ;;  %v11389_v56 = vsel %vm2502_vm5, %v13646_v19, %v13645_v54  ;;  %v4796_v14 = vcombine.high %v4751_v22, %v4783_v26  ;;  %v13649_v0 = vld [vmem:[#allocation116_spill] sm:$0xff] }
 0x6aa   : > { %7556 = vrot.lane.b32.xlu1 %v4792_v44, %s13642_s25  ;;  %s13643_s25 = smov 100   ;;  %v4816_v6 = vcombine.high %v11270_v29, %v11308_v7  ;;  %v4863_v10 = vcombine.low %v4807_v11, %v11369_v49  ;;  %v4758_v9 = vrot.slane %v4744_v60, %v10123_v2  ;;  %v11400_v8 = vsel %vm2502_vm5, %v13649_v0, %v13648_v50 }
 0x6ab   : > { %v7329_v18 = vpop.permute.xlu0 %7328  ;;  %v11405_v43 = vsel %vm2502_vm5, %v13651_v3, %v13650_v16  ;;  %v11408_v12 = vrot.slane %v4832_v38, %v10108_v51  ;;  %v11411_v29 = vrot.slane %v4848_v55, %v10108_v51  ;;  %v4896_v7 = vcombine.high %v4839_v15, %v11362_v4  ;;  %v13660_v55 = vld [vmem:[#allocation377_spill] sm:$0xff] }
 0x6ac   : > { %v7333_v61 = vpop.permute.xlu1 %7332  ;;  %v8227_v27 = vsel %vm12941_vm3, %v8225_v25, %v7329_v18  ;;  %vm12944_vm3 = vcmask 949248   ;;  %v4903_v34 = vrot.slane %v4895_v1, %v10123_v2  ;;  %v4797_v52 = vcombine.low %v4758_v9, %v4790_v57  ;;  %v13655_v25 = vld [vmem:[#allocation405_spill] sm:$0xff]  ;;  %v13656_v18 = vld [vmem:[#allocation176_spill] sm:$0xff] }
 0x6ad   : > { %7560 = vrot.lane.b32.xlu0 %v4793_v53, %s13643_s25  ;;  %v8229_v28 = vsel %vm12942_vm1, %v8227_v27, %v7333_v61  ;;  %vm12945_vm1 = vcmask 965632   ;;  %s13652_s25 = smov 106   ;;  %v11420_v47 = vsel %vm2502_vm5, %v13653_v46, %v10349_v21  ;;  %v4798_v30 = vcombine.high %v4758_v9, %v4790_v57  ;;  %v13657_v61 = vld [vmem:[#allocation434_spill] sm:$0xff]  ;;  %v13658_v27 = vld [vmem:[#allocation205_spill] sm:$0xff]  ;;  %v13661_v1 = vld [vmem:[#allocation148_spill] sm:$0xff] }
 0x6ae   : > { %7564 = vrot.lane.b32.xlu1 %v4794_v42, %s13644_s15  ;;  %s13647_s15 = smov 104   ;;  %v11424_v63 = vrot.slane %v4816_v6, %v10108_v51  ;;  %v4864_v4 = vcombine.high %v4807_v11, %v11369_v49  ;;  %v4871_v26 = vrot.slane %v4863_v10, %v10123_v2  ;;  %v4951_v21 = vcombine.low %v11355_v39, %v11405_v43  ;;  %v13665_v46 = vld [vmem:[#allocation232_spill] sm:$0xff] }
 0x6af   : > { %v7337_v62 = vpop.permute.xlu0 %7336  ;;  %v2679_v53 = vsel %vm2502_vm5, %v13656_v18, %v13655_v25  ;;  %v11437_v42 = vsel %vm2502_vm5, %v13658_v27, %v13657_v61  ;;  %v4911_v49 = vcombine.low %v11408_v12, %v11411_v29  ;;  %v4910_v60 = vrot.slane %v4896_v7, %v10123_v2 }
 0x6b0   : > { %v7341_v59 = vpop.permute.xlu1 %7340  ;;  %v8231_v58 = vsel %vm12943_vm2, %v8229_v28, %v7337_v62  ;;  %vm12946_vm2 = vcmask 982016   ;;  %v4983_v22 = vcombine.low %v2679_v53, %v11420_v47  ;;  %v4927_v38 = vcombine.low %v4871_v26, %v4903_v34 }
 0x6b1   : > { %7568 = vrot.lane.b32.xlu0 %v4795_v13, %s13647_s15  ;;  %v8233_v44 = vsel %vm12944_vm3, %v8231_v58, %v7341_v59  ;;  %vm8238_vm3 = vcmask 998400   ;;  %s13659_s15 = smov 110   ;;  %v2647_v57 = vsel %vm2502_vm5, %v13661_v1, %v13660_v55  ;;  %v4928_v13 = vcombine.high %v4871_v26, %v4903_v34 }
 0x6b2   : > { %7572 = vrot.lane.b32.xlu1 %v4796_v14, %s13652_s25  ;;  %s13654_s25 = smov 108   ;;  %v4878_v54 = vrot.slane %v4864_v4, %v10123_v2  ;;  %v4879_v19 = vcombine.low %v11378_v48, %v11424_v63  ;;  %v4967_v59 = vcombine.low %v2647_v57, %v11437_v42  ;;  %v4935_v58 = vcombine.low %v11265_v5, %v11400_v8 }
 0x6b3   : > { %v7345_v36 = vpop.permute.xlu0 %7344  ;;  %v4936_v14 = vcombine.high %v11265_v5, %v11400_v8  ;;  %v4952_v6 = vcombine.high %v11355_v39, %v11405_v43  ;;  %v4912_v10 = vcombine.high %v11408_v12, %v11411_v29  ;;  %v4919_v9 = vrot.slane %v4911_v49, %v10123_v2 }
 0x6b4   : > { %v7349_v17 = vpop.permute.xlu1 %7348  ;;  %v8235_v33 = vsel %vm12945_vm1, %v8233_v44, %v7345_v36  ;;  %vm8240_vm1 = vcmask 1014784   ;;  %v4991_v50 = vrot.slane %v4983_v22, %v10108_v51  ;;  %v4929_v3 = vcombine.low %v4878_v54, %v4910_v60  ;;  %v13671_v22 = vld [vmem:[#allocation175_spill] sm:$0xff] }
 0x6b5   : > { %7576 = vrot.lane.b32.xlu0 %v4797_v52, %s13654_s25  ;;  %v8237_v15 = vsel %vm12946_vm2, %v8235_v33, %v7349_v17  ;;  %s8562_s25 = sshll.u32 %s9002_s22, 5  ;;  %vm8242_vm2 = vcmask 1031168   ;;  %s13663_s22 = smov 114   ;;  %v4959_v7 = vrot.slane %v4951_v21, %v10108_v51  ;;  %v4984_v5 = vcombine.high %v2679_v53, %v11420_v47  ;;  %v13668_v53 = vld [vmem:[#allocation131_spill] sm:$0xff] }
 0x6b6   : > { %7580 = vrot.lane.b32.xlu1 %v4798_v30, %s13659_s15  ;;  %s13662_s15 = smov 112   ;;  %v4930_v43 = vcombine.high %v4878_v54, %v4910_v60  ;;  %v4880_v12 = vcombine.high %v11378_v48, %v11424_v63  ;;  %v4887_v29 = vrot.slane %v4879_v19, %v10123_v2  ;;  %v4975_v34 = vrot.slane %v4967_v59, %v10108_v51  ;;  %v13670_v60 = vld [vmem:[#allocation404_spill] sm:$0xff] }
 0x6b7   : > { %v7353_v11 = vpop.permute.xlu0 %7352  ;;  %v3975_v44 = vcombine.low %v10742_v23, %v10724_v20  ;;  %v4943_v36 = vrot.slane %v4935_v58, %v10108_v51  ;;  %v11482_v52 = vrot.slane %v4936_v14, %v10108_v51  ;;  %v4968_v48 = vcombine.high %v2647_v57, %v11437_v42 }
 0x6b8   : > { %v7357_v28 = vpop.permute.xlu1 %7356  ;;  %v8239_v62 = vsel %vm8238_vm3, %v8237_v15, %v7353_v11  ;;  %v11488_v47 = vsel %vm2502_vm5, %v13665_v46, %v10347_v32  ;;  %v4926_v20 = vrot.slane %v4912_v10, %v10123_v2  ;;  %v5031_v23 = vcombine.low %v4975_v34, %v4991_v50  ;;  %v13667_v32 = vld [vmem:[#allocation347_spill] sm:$0xff]  ;;  %v13672_v11 = vld [vmem:[#allocation433_spill] sm:$0xff] }
 0x6b9   : > { %7584 = vrot.lane.b32.xlu0 %v4927_v38, %s13662_s15  ;;  %v8241_v0 = vsel %vm8240_vm1, %v8239_v62, %v7357_v28  ;;  %s13664_s15 = smov 116   ;;  %v4931_v30 = vcombine.low %v4887_v29, %v4919_v9  ;;  %v4998_v63 = vrot.slane %v4984_v5, %v10108_v51  ;;  %v5032_v4 = vcombine.high %v4975_v34, %v4991_v50  ;;  %v13673_v38 = vld [vmem:[#allocation204_spill] sm:$0xff]  ;;  %v13675_v10 = vld [vmem:[#allocation261_spill] sm:$0xff] }
 0x6ba   : > { %7588 = vrot.lane.b32.xlu1 %v4928_v13, %s13663_s22  ;;  %s11476_s22 = scalar_lea.vmem [#allocation5], %s8562_s25  ;;  %v4932_v25 = vcombine.high %v4887_v29, %v4919_v9  ;;  %v4894_v18 = vrot.slane %v4880_v12, %v10123_v2  ;;  %v11499_v61 = vsel %vm2502_vm5, %v13668_v53, %v13667_v32  ;;  %v4966_v27 = vrot.slane %v4952_v6, %v10108_v51  ;;  %s13669_s25 = smov 120   ;;  %v13676_v9 = vld [vmem:[#allocation83_spill] sm:$0xff]  ;;  %v13679_v5 = vld [vmem:[#allocation376_spill] sm:$0xff] }
 0x6bb   : > { %v7361_v16 = vpop.permute.xlu0 %7360  ;;  %v4999_v42 = vcombine.low %v4943_v36, %v4959_v7  ;;  %v5000_v49 = vcombine.high %v4943_v36, %v4959_v7  ;;  %v2680_v15 = vsel %vm2502_vm5, %v13671_v22, %v13670_v60  ;;  %v11509_v55 = vsel %vm2502_vm5, %v13673_v38, %v13672_v11 }
 0x6bc   : > { %v7365_v8 = vpop.permute.xlu1 %7364  ;;  %v8243_v39 = vsel %vm8242_vm2, %v8241_v0, %v7361_v16  ;;  %v4982_v1 = vrot.slane %v4968_v48, %v10108_v51  ;;  %v5119_v57 = vcombine.low %v2680_v15, %v11488_v47  ;;  %v11515_v28 = vrot.slane %v5031_v23, %v10123_v2  ;;  %v13677_v0 = vld [vmem:[#allocation290_spill] sm:$0xff]  ;;  %v13678_v16 = vld [vmem:[#allocation99_spill] sm:$0xff] }
 0x6bd   : > { %8433 = vst [vmem:[%s11476_s22] sm:$0xff] %v8243_v39  ;;  %7592 = vrot.lane.b32.xlu0 %v4929_v3, %s13664_s15  ;;  %v8244_v17 = vsel %vm8119_vm6, %v3975_v44, %v7365_v8  ;;  %v4933_v54 = vcombine.low %v4894_v18, %v4926_v20  ;;  %v5046_v19 = vrot.slane %v5032_v4, %v10123_v2  ;;  %v13680_v8 = vld [vmem:[#allocation147_spill] sm:$0xff] }
 0x6be   : > { %7596 = vrot.lane.b32.xlu1 %v4930_v43, %s13666_s3  ;;  %s13674_s3 = smov 122   ;;  %v5047_v59 = vcombine.low %v4982_v1, %v4998_v63  ;;  %v4934_v6 = vcombine.high %v4894_v18, %v4926_v20  ;;  %v2520_v50 = vsel %vm2502_vm5, %v13676_v9, %v13675_v10  ;;  %v2552_v3 = vsel %vm2502_vm5, %v13678_v16, %v13677_v0  ;;  %v13688_v10 = vld [vmem:[#allocation118_spill] sm:$0xff]  ;;  %v13689_v16 = vld [vmem:[#allocation235_spill] sm:$0xff] }
 0x6bf   : > { %v7369_v33 = vpop.permute.xlu0 %7368  ;;  %v11527_v7 = vrot.slane %v4999_v42, %v10123_v2  ;;  %v2648_v39 = vsel %vm2502_vm5, %v13680_v8, %v13679_v5  ;;  %v5087_v43 = vcombine.low %v2552_v3, %v11499_v61  ;;  %v5014_v12 = vrot.slane %v5000_v49, %v10123_v2 }
 0x6c0   : > { %v7373_v26 = vpop.permute.xlu1 %7372  ;;  %v8245_v21 = vsel %vm8121_vm7, %v8244_v17, %v7369_v33  ;;  %v5015_v29 = vcombine.low %v11482_v52, %v4966_v27  ;;  %v5103_v34 = vcombine.low %v2648_v39, %v11509_v55  ;;  %v5071_v44 = vcombine.low %v2520_v50, %v11389_v56 }
 0x6c1   : > { %7600 = vrot.lane.b32.xlu0 %v4931_v30, %s13669_s25  ;;  %v8246_v62 = vsel %vm8123_vm8, %v8245_v21, %v7373_v26  ;;  %s13682_s25 = smov 126   ;;  %v5127_v36 = vrot.slane %v5119_v57, %v10108_v51  ;;  %v5064_v20 = vcombine.high %v11527_v7, %v11515_v28  ;;  %v5048_v23 = vcombine.high %v4982_v1, %v4998_v63 }
 0x6c2   : > { %7604 = vrot.lane.b32.xlu1 %v4932_v25, %s13674_s3  ;;  %s13681_s3 = smov 124   ;;  %v5055_v17 = vrot.slane %v5047_v59, %v10123_v2  ;;  %v5065_v4 = vcombine.low %v5014_v12, %v5046_v19  ;;  %v5072_v26 = vcombine.high %v2520_v50, %v11389_v56  ;;  %v5095_v21 = vrot.slane %v5087_v43, %v10108_v51  ;;  %v13692_v43 = vld [vmem:[#allocation134_spill] sm:$0xff] }
 0x6c3   : > { %v7377_v13 = vpop.permute.xlu0 %7376  ;;  %v5016_v25 = vcombine.high %v11482_v52, %v4966_v27  ;;  %v5023_v18 = vrot.slane %v5015_v29, %v10123_v2  ;;  %v5111_v32 = vrot.slane %v5103_v34, %v10108_v51  ;;  %v5079_v63 = vrot.slane %v5071_v44, %v10108_v51  ;;  %v13693_v29 = vld [vmem:[#allocation407_spill] sm:$0xff]  ;;  %v13694_v34 = vld [vmem:[#allocation178_spill] sm:$0xff] }
 0x6c4   : > { %v7381_v58 = vpop.permute.xlu1 %7380  ;;  %v8247_v14 = vsel %vm8125_vm9, %v8246_v62, %v7377_v13  ;;  %v5120_v53 = vcombine.high %v2680_v15, %v11488_v47  ;;  %v5066_v56 = vcombine.high %v5014_v12, %v5046_v19  ;;  %v5062_v22 = vrot.slane %v5048_v23, %v10123_v2 }
 0x6c5   : > { %7608 = vrot.lane.b32.xlu0 %v4933_v54, %s13681_s3  ;;  %v8248_v48 = vsel %vm8127_vm10, %v8247_v14, %v7381_v58  ;;  %s13684_s3 = smov 4   ;;  %v5167_v60 = vcombine.low %v5111_v32, %v5127_v36  ;;  %v5067_v27 = vcombine.low %v5023_v18, %v5055_v17  ;;  %v5088_v38 = vcombine.high %v2552_v3, %v11499_v61 }
 0x6c6   : > { %7612 = vrot.lane.b32.xlu1 %v4934_v6, %s13682_s25  ;;  %s13683_s25 = smov 2   ;;  %v5104_v1 = vcombine.high %v2648_v39, %v11509_v55  ;;  %v5135_v57 = vcombine.low %v5079_v63, %v5095_v21  ;;  %v5030_v47 = vrot.slane %v5016_v25, %v10123_v2  ;;  %v11563_v15 = vrot.slane %v5072_v26, %v10108_v51  ;;  %v13687_v6 = vld [vmem:[#allocation322_spill] sm:$0xff]  ;;  %v13699_v25 = vld [vmem:[#allocation264_spill] sm:$0xff] }
 0x6c7   : > { %v7385_v46 = vpop.permute.xlu0 %7384  ;;  %v5134_v62 = vrot.slane %v5120_v53, %v10108_v51  ;;  %v5068_v19 = vcombine.high %v5023_v18, %v5055_v17  ;;  %v5168_v59 = vcombine.high %v5111_v32, %v5127_v36  ;;  %v5175_v61 = vrot.slane %v5167_v60, %v10123_v2  ;;  %v13691_v39 = vld [vmem:[#allocation350_spill] sm:$0xff]  ;;  %v13696_v36 = vld [vmem:[#allocation436_spill] sm:$0xff] }
 0x6c8   : > { %v7389_v33 = vpop.permute.xlu1 %7388  ;;  %v8249_v30 = vsel %vm8129_vm11, %v8248_v48, %v7385_v46  ;;  %v5069_v14 = vcombine.low %v5030_v47, %v5062_v22  ;;  %v11572_v9 = vsel %vm2502_vm5, %v13688_v10, %v13687_v6  ;;  %v5102_v50 = vrot.slane %v5088_v38, %v10108_v51  ;;  %v13697_v48 = vld [vmem:[#allocation207_spill] sm:$0xff]  ;;  %v13700_v18 = vld [vmem:[#allocation86_spill] sm:$0xff] }
 0x6c9   : > { %7616 = vrot.lane.b32.xlu0 %v5064_v20, %s13683_s25  ;;  %v8250_v42 = vsel %vm8131_vm12, %v8249_v30, %v7389_v33  ;;  %s13686_s25 = smov 8   ;;  %v5118_v0 = vrot.slane %v5104_v1, %v10108_v51  ;;  %v2745_v3 = vsel %vm2502_vm5, %v13689_v16, %v10366_v40  ;;  %v5136_v5 = vcombine.high %v5079_v63, %v5095_v21  ;;  %v13701_v63 = vld [vmem:[#allocation293_spill] sm:$0xff]  ;;  %v13702_v53 = vld [vmem:[#allocation102_spill] sm:$0xff] }
 0x6ca   : > { %7620 = vrot.lane.b32.xlu1 %v5065_v4, %s13684_s3  ;;  %s13685_s3 = smov 6   ;;  %v5143_v8 = vrot.slane %v5135_v57, %v10123_v2  ;;  %v11584_v12 = vsel %vm2502_vm5, %v13692_v43, %v13691_v39  ;;  %v2681_v44 = vsel %vm2502_vm5, %v13694_v34, %v13693_v29  ;;  %v11593_v40 = vsel %vm2502_vm5, %v13697_v48, %v13696_v36 }
 0x6cb   : > { %v7393_v49 = vpop.permute.xlu0 %7392  ;;  %v5183_v46 = vcombine.low %v5118_v0, %v5134_v62  ;;  %v5070_v17 = vcombine.high %v5030_v47, %v5062_v22  ;;  %v5182_v33 = vrot.slane %v5168_v59, %v10123_v2  ;;  %v5255_v30 = vcombine.low %v2681_v44, %v2745_v3 }
 0x6cc   : > { %v7397_v11 = vpop.permute.xlu1 %7396  ;;  %v8251_v52 = vsel %vm8133_vm13, %v8250_v42, %v7393_v49  ;;  %v5199_v21 = vcombine.low %v5143_v8, %v5175_v61  ;;  %v2521_v32 = vsel %vm2502_vm5, %v13700_v18, %v13699_v25  ;;  %v2553_v42 = vsel %vm2502_vm5, %v13702_v53, %v13701_v63  ;;  %v13703_v49 = vld [vmem:[#allocation379_spill] sm:$0xff]  ;;  %v13719_v25 = vld [vmem:[#allocation117_spill] sm:$0xff] }
 0x6cd   : > { %7624 = vrot.lane.b32.xlu0 %v5066_v56, %s13685_s3  ;;  %v8252_v13 = vsel %vm8135_vm14, %v8251_v52, %v7397_v11  ;;  %s13695_s3 = smov 12   ;;  %v13704_v56 = vld [vmem:[#allocation150_spill] sm:$0xff]  ;;  %v5150_v22 = vrot.slane %v5136_v5, %v10123_v2  ;;  %v5151_v11 = vcombine.low %v11563_v15, %v5102_v50  ;;  %v5223_v52 = vcombine.low %v2553_v42, %v11584_v12  ;;  %v13721_v63 = vld [vmem:[#allocation133_spill] sm:$0xff] }
 0x6ce   : > { %7628 = vrot.lane.b32.xlu1 %v5067_v27, %s13686_s25  ;;  %s13690_s25 = smov 10   ;;  %v2649_v60 = vsel %vm2502_vm5, %v13704_v56, %v13703_v49  ;;  %v5207_v38 = vcombine.low %v2521_v32, %v11572_v9  ;;  %v5184_v1 = vcombine.high %v5118_v0, %v5134_v62  ;;  %v5256_v0 = vcombine.high %v2681_v44, %v2745_v3 }
 0x6cf   : > { %v7401_v54 = vpop.permute.xlu0 %7400  ;;  %v5239_v27 = vcombine.low %v2649_v60, %v11593_v40  ;;  %v5159_v6 = vrot.slane %v5151_v11, %v10123_v2  ;;  %v5231_v62 = vrot.slane %v5223_v52, %v10108_v51  ;;  %v5208_v34 = vcombine.high %v2521_v32, %v11572_v9  ;;  %v13720_v32 = vld [vmem:[#allocation349_spill] sm:$0xff] }
 0x6d0   : > { %v7405_v55 = vpop.permute.xlu1 %7404  ;;  %v8253_v58 = vsel %vm12948_vm15, %v8252_v13, %v7401_v54  ;;  %vm13698_vm15 = vcmask 195584   ;;  %v5200_v13 = vcombine.high %v5143_v8, %v5175_v61  ;;  %v5191_v54 = vrot.slane %v5183_v46, %v10123_v2  ;;  %v13715_v46 = vld [vmem:[#allocation234_spill] sm:$0xff] }
 0x6d1   : > { %7632 = vrot.lane.b32.xlu0 %v5068_v19, %s13690_s25  ;;  %v8254_v20 = vsel %vm12949_vm0, %v8253_v58, %v7405_v55  ;;  %s13706_s25 = smov 16   ;;  %v5263_v19 = vrot.slane %v5255_v30, %v10108_v51  ;;  %vm13708_vm0 = vcmask 228352   ;;  %v5201_v58 = vcombine.low %v5150_v22, %v5182_v33 }
 0x6d2   : > { %7636 = vrot.lane.b32.xlu1 %v5069_v14, %s13695_s3  ;;  %s13705_s3 = smov 14   ;;  %v5152_v14 = vcombine.high %v11563_v15, %v5102_v50  ;;  %v5247_v10 = vrot.slane %v5239_v27, %v10108_v51  ;;  %v5215_v61 = vrot.slane %v5207_v38, %v10108_v51  ;;  %v5202_v8 = vcombine.high %v5150_v22, %v5182_v33  ;;  %v13724_v22 = vld [vmem:[#allocation177_spill] sm:$0xff]  ;;  %v13726_v27 = vld [vmem:[#allocation435_spill] sm:$0xff]  ;;  %v13727_v38 = vld [vmem:[#allocation206_spill] sm:$0xff] }
 0x6d3   : > { %v7409_v23 = vpop.permute.xlu0 %7408  ;;  %v5198_v39 = vrot.slane %v5184_v1, %v10123_v2  ;;  %v5203_v50 = vcombine.low %v5159_v6, %v5191_v54  ;;  %v5224_v36 = vcombine.high %v2553_v42, %v11584_v12  ;;  %v5240_v44 = vcombine.high %v2649_v60, %v11593_v40  ;;  %v13723_v60 = vld [vmem:[#allocation406_spill] sm:$0xff] }
 0x6d4   : > { %v7413_v4 = vpop.permute.xlu1 %7412  ;;  %v8255_v26 = vsel %vm13698_vm15, %v8254_v20, %v7409_v23  ;;  %vm13707_vm15 = vcmask 211968   ;;  %v5303_v43 = vcombine.low %v5247_v10, %v5263_v19  ;;  %v5166_v48 = vrot.slane %v5152_v14, %v10123_v2 }
 0x6d5   : > { %7640 = vrot.lane.b32.xlu0 %v5070_v17, %s13705_s3  ;;  %v8256_v57 = vsel %vm13707_vm15, %v8255_v26, %v7413_v4  ;;  %s13709_s3 = smov 18   ;;  %vm13711_vm15 = vcmask 244736   ;;  %v5271_v3 = vcombine.low %v5215_v61, %v5231_v62  ;;  %v11637_v20 = vsel %vm2502_vm5, %v13715_v46, %v10364_v31 }
 0x6d6   : > { %7644 = vrot.lane.b32.xlu1 %v5199_v21, %s13706_s25  ;;  %s13710_s25 = smov 20   ;;  %v5270_v23 = vrot.slane %v5256_v0, %v10108_v51  ;;  %v5204_v12 = vcombine.high %v5159_v6, %v5191_v54  ;;  %v5304_v33 = vcombine.high %v5247_v10, %v5263_v19  ;;  %v5311_v30 = vrot.slane %v5303_v43, %v10123_v2  ;;  %v13718_v21 = vld [vmem:[#allocation321_spill] sm:$0xff]  ;;  %v13730_v6 = vld [vmem:[#allocation263_spill] sm:$0xff] }
 0x6d7   : > { %v7417_v47 = vpop.permute.xlu0 %7416  ;;  %v5205_v40 = vcombine.low %v5166_v48, %v5198_v39  ;;  %v11646_v18 = vsel %vm2502_vm5, %v13719_v25, %v13718_v21  ;;  %v5222_v31 = vrot.slane %v5208_v34, %v10108_v51  ;;  %v11652_v53 = vsel %vm2502_vm5, %v13721_v63, %v13720_v32  ;;  %v13733_v0 = vld [vmem:[#allocation101_spill] sm:$0xff] }
 0x6d8   : > { %v7421_v59 = vpop.permute.xlu1 %7420  ;;  %v8257_v55 = vsel %vm13708_vm0, %v8256_v57, %v7417_v47  ;;  %vm13712_vm0 = vcmask 261120   ;;  %v5238_v42 = vrot.slane %v5224_v36, %v10108_v51  ;;  %v5272_v49 = vcombine.high %v5215_v61, %v5231_v62  ;;  %v13731_v62 = vld [vmem:[#allocation85_spill] sm:$0xff]  ;;  %v13732_v61 = vld [vmem:[#allocation292_spill] sm:$0xff] }
 0x6d9   : > { %7648 = vrot.lane.b32.xlu0 %v5200_v13, %s13709_s3  ;;  %v8258_v16 = vsel %vm13711_vm15, %v8257_v55, %v7421_v59  ;;  %s13713_s3 = smov 22   ;;  %vm13716_vm15 = vcmask 277504   ;;  %v5279_v56 = vrot.slane %v5271_v3, %v10123_v2  ;;  %v2682_v11 = vsel %vm2502_vm5, %v13724_v22, %v13723_v60 }
 0x6da   : > { %7652 = vrot.lane.b32.xlu1 %v5201_v58, %s13710_s25  ;;  %s13714_s25 = smov 24   ;;  %v5254_v52 = vrot.slane %v5240_v44, %v10108_v51  ;;  %v11665_v1 = vsel %vm2502_vm5, %v13727_v38, %v13726_v27  ;;  %v5391_v57 = vcombine.low %v2682_v11, %v11637_v20  ;;  %v5206_v54 = vcombine.high %v5166_v48, %v5198_v39 }
 0x6db   : > { %v7425_v5 = vpop.permute.xlu0 %7424  ;;  %v5318_v19 = vrot.slane %v5304_v33, %v10123_v2  ;;  %v5335_v14 = vcombine.low %v5279_v56, %v5311_v30  ;;  %v2522_v10 = vsel %vm2502_vm5, %v13731_v62, %v13730_v6  ;;  %v5336_v44 = vcombine.high %v5279_v56, %v5311_v30  ;;  %v13744_v6 = vld [vmem:[#allocation352_spill] sm:$0xff] }
 0x6dc   : > { %v7429_v29 = vpop.permute.xlu1 %7428  ;;  %v8259_v15 = vsel %vm13712_vm0, %v8258_v16, %v7425_v5  ;;  %vm13717_vm0 = vcmask 293888   ;;  %v5319_v59 = vcombine.low %v5254_v52, %v5270_v23  ;;  %v2554_v16 = vsel %vm2502_vm5, %v13733_v0, %v13732_v61  ;;  %v13734_v5 = vld [vmem:[#allocation378_spill] sm:$0xff]  ;;  %v13745_v62 = vld [vmem:[#allocation136_spill] sm:$0xff]  ;;  %v13746_v0 = vld [vmem:[#allocation237_spill] sm:$0xff] }
 0x6dd   : > { %7656 = vrot.lane.b32.xlu0 %v5202_v8, %s13713_s3  ;;  %v8260_v9 = vsel %vm13716_vm15, %v8259_v15, %v7429_v29  ;;  %s13725_s3 = smov 28   ;;  %vm13728_vm15 = vcmask 310272   ;;  %v13735_v8 = vld [vmem:[#allocation149_spill] sm:$0xff]  ;;  %v5359_v39 = vcombine.low %v2554_v16, %v11652_v53  ;;  %v5286_v29 = vrot.slane %v5272_v49, %v10123_v2 }
 0x6de   : > { %7660 = vrot.lane.b32.xlu1 %v5203_v50, %s13714_s25  ;;  %s13722_s25 = smov 26   ;;  %v2650_v43 = vsel %vm2502_vm5, %v13735_v8, %v13734_v5  ;;  %v5287_v15 = vcombine.low %v5222_v31, %v5238_v42  ;;  %v5343_v34 = vcombine.low %v2522_v10, %v11646_v18  ;;  %v5399_v36 = vrot.slane %v5391_v57, %v10108_v51 }
 0x6df   : > { %v7433_v17 = vpop.permute.xlu0 %7432  ;;  %v5375_v50 = vcombine.low %v2650_v43, %v11665_v1  ;;  %v5320_v46 = vcombine.high %v5254_v52, %v5270_v23  ;;  %v5337_v33 = vcombine.low %v5286_v29, %v5318_v19  ;;  %v5392_v30 = vcombine.high %v2682_v11, %v11637_v20 }
 0x6e0   : > { %v7437_v4 = vpop.permute.xlu1 %7436  ;;  %v8261_v26 = vsel %vm13717_vm0, %v8260_v9, %v7433_v17  ;;  %vm13729_vm0 = vcmask 326656   ;;  %v5327_v9 = vrot.slane %v5319_v59, %v10123_v2  ;;  %v5295_v21 = vrot.slane %v5287_v15, %v10123_v2 }
 0x6e1   : > { %7664 = vrot.lane.b32.xlu0 %v5204_v12, %s13722_s25  ;;  %v8262_v47 = vsel %vm13728_vm15, %v8261_v26, %v7437_v4  ;;  %vm13736_vm15 = vcmask 343040   ;;  %v5344_v4 = vcombine.high %v2522_v10, %v11646_v18  ;;  %v5367_v26 = vrot.slane %v5359_v39, %v10108_v51  ;;  %v13747_v39 = vld [vmem:[#allocation409_spill] sm:$0xff] }
 0x6e2   : > { %7668 = vrot.lane.b32.xlu1 %v5205_v40, %s13725_s3  ;;  %v5288_v40 = vcombine.high %v5222_v31, %v5238_v42  ;;  %v5383_v25 = vrot.slane %v5375_v50, %v10108_v51  ;;  %v5351_v23 = vrot.slane %v5343_v34, %v10108_v51  ;;  %v5338_v49 = vcombine.high %v5286_v29, %v5318_v19  ;;  %v13748_v29 = vld [vmem:[#allocation180_spill] sm:$0xff]  ;;  %v13749_v50 = vld [vmem:[#allocation437_spill] sm:$0xff] }
 0x6e3   : > { %v7441_v13 = vpop.permute.xlu0 %7440  ;;  %v5334_v56 = vrot.slane %v5320_v46, %v10123_v2  ;;  %v5339_v42 = vcombine.low %v5295_v21, %v5327_v9  ;;  %v5376_v22 = vcombine.high %v2650_v43, %v11665_v1  ;;  %v5360_v52 = vcombine.high %v2554_v16, %v11652_v53  ;;  %v13750_v34 = vld [vmem:[#allocation209_spill] sm:$0xff] }
 0x6e4   : > { %v7445_v55 = vpop.permute.xlu1 %7444  ;;  %v8263_v58 = vsel %vm13729_vm0, %v8262_v47, %v7441_v13  ;;  %vm13737_vm0 = vcmask 359424   ;;  %v5439_v18 = vcombine.low %v5383_v25, %v5399_v36  ;;  %v5407_v27 = vcombine.low %v5351_v23, %v5367_v26 }
 0x6e5   : > { %7672 = vrot.lane.b32.xlu0 %v5206_v54, %s13544_s10  ;;  %v8264_v48 = vsel %vm13736_vm15, %v8263_v58, %v7445_v55  ;;  %vm13738_vm15 = vcmask 375808   ;;  %v5302_v20 = vrot.slane %v5288_v40, %v10123_v2  ;;  %v11707_v11 = vrot.slane %v5344_v4, %v10108_v51  ;;  %v13742_v55 = vld [vmem:[#allocation324_spill] sm:$0xff]  ;;  %v13753_v4 = vld [vmem:[#allocation266_spill] sm:$0xff] }
 0x6e6   : > { %7676 = vrot.lane.b32.xlu1 %v5335_v14, %s13547_s9  ;;  %v5406_v38 = vrot.slane %v5392_v30, %v10108_v51  ;;  %v5340_v13 = vcombine.high %v5295_v21, %v5327_v9  ;;  %v5440_v54 = vcombine.high %v5383_v25, %v5399_v36  ;;  %v5447_v1 = vrot.slane %v5439_v18, %v10123_v2  ;;  %v13743_v58 = vld [vmem:[#allocation120_spill] sm:$0xff]  ;;  %v13755_v21 = vld [vmem:[#allocation295_spill] sm:$0xff]  ;;  %v13757_v30 = vld [vmem:[#allocation381_spill] sm:$0xff] }
 0x6e7   : > { %v7449_v3 = vpop.permute.xlu0 %7448  ;;  %v5341_v59 = vcombine.low %v5302_v20, %v5334_v56  ;;  %v11716_v14 = vsel %vm2502_vm5, %v13743_v58, %v13742_v55  ;;  %v11721_v10 = vsel %vm2502_vm5, %v13745_v62, %v13744_v6  ;;  %v5390_v61 = vrot.slane %v5376_v22, %v10108_v51  ;;  %v13756_v25 = vld [vmem:[#allocation104_spill] sm:$0xff] }
 0x6e8   : > { %v7453_v17 = vpop.permute.xlu1 %7452  ;;  %v8265_v12 = vsel %vm13737_vm0, %v8264_v48, %v7449_v3  ;;  %vm13739_vm0 = vcmask 392192   ;;  %v2747_v16 = vsel %vm2502_vm5, %v13746_v0, %v10389_v37  ;;  %v5374_v5 = vrot.slane %v5360_v52, %v10108_v51 }
 0x6e9   : > { %7680 = vrot.lane.b32.xlu0 %v5336_v44, %s13550_s8  ;;  %v8266_v32 = vsel %vm13738_vm15, %v8265_v12, %v7453_v17  ;;  %vm13740_vm15 = vcmask 408576   ;;  %v5408_v8 = vcombine.high %v5351_v23, %v5367_v26  ;;  %v5415_v43 = vrot.slane %v5407_v27, %v10123_v2  ;;  %v13754_v26 = vld [vmem:[#allocation88_spill] sm:$0xff] }
 0x6ea   : > { %7684 = vrot.lane.b32.xlu1 %v5337_v33, %s13551_s24  ;;  %v2683_v15 = vsel %vm2502_vm5, %v13748_v29, %v13747_v39  ;;  %v11737_v36 = vsel %vm2502_vm5, %v13750_v34, %v13749_v50  ;;  %v5455_v48 = vcombine.low %v5390_v61, %v5406_v38  ;;  %v5342_v44 = vcombine.high %v5302_v20, %v5334_v56  ;;  %v13763_v50 = vld [vmem:[#allocation236_spill] sm:$0xff] }
 0x6eb   : > { %v7457_v63 = vpop.permute.xlu0 %7456  ;;  %v5454_v46 = vrot.slane %v5440_v54, %v10123_v2  ;;  %v5527_v9 = vcombine.low %v2683_v15, %v2747_v16  ;;  %v5471_v33 = vcombine.low %v5415_v43, %v5447_v1  ;;  %v2523_v40 = vsel %vm2502_vm5, %v13754_v26, %v13753_v4  ;;  %v13768_v4 = vld [vmem:[#allocation351_spill] sm:$0xff] }
 0x6ec   : > { %v7461_v60 = vpop.permute.xlu1 %7460  ;;  %v8267_v31 = vsel %vm13739_vm0, %v8266_v32, %v7457_v63  ;;  %vm13741_vm0 = vcmask 424960   ;;  %v2555_v23 = vsel %vm2502_vm5, %v13756_v25, %v13755_v21  ;;  %v13758_v32 = vld [vmem:[#allocation152_spill] sm:$0xff]  ;;  %v5423_v18 = vcombine.low %v11707_v11, %v5374_v5  ;;  %v13769_v26 = vld [vmem:[#allocation135_spill] sm:$0xff] }
 0x6ed   : > { %7688 = vrot.lane.b32.xlu0 %v5338_v49, %s13554_s6  ;;  %v8268_v57 = vsel %vm13740_vm15, %v8267_v31, %v7461_v60  ;;  %vm13751_vm15 = vcmask 441344   ;;  %v2651_v63 = vsel %vm2502_vm5, %v13758_v32, %v13757_v30  ;;  %v5422_v49 = vrot.slane %v5408_v8, %v10123_v2  ;;  %v13770_v30 = vld [vmem:[#allocation408_spill] sm:$0xff]  ;;  %v13771_v32 = vld [vmem:[#allocation179_spill] sm:$0xff] }
 0x6ee   : > { %7692 = vrot.lane.b32.xlu1 %v5339_v42, %s13555_s7  ;;  %v5495_v56 = vcombine.low %v2555_v23, %v11721_v10  ;;  %v5511_v60 = vcombine.low %v2651_v63, %v11737_v36  ;;  %v5479_v31 = vcombine.low %v2523_v40, %v11716_v14  ;;  %v5456_v42 = vcombine.high %v5390_v61, %v5406_v38 }
 0x6ef   : > { %v7465_v47 = vpop.permute.xlu0 %7464  ;;  %v5472_v27 = vcombine.high %v5415_v43, %v5447_v1  ;;  %v5463_v20 = vrot.slane %v5455_v48, %v10123_v2  ;;  %v5473_v54 = vcombine.low %v5422_v49, %v5454_v46  ;;  %v5528_v55 = vcombine.high %v2683_v15, %v2747_v16 }
 0x6f0   : > { %v7469_v19 = vpop.permute.xlu1 %7468  ;;  %v8269_v53 = vsel %vm13741_vm0, %v8268_v57, %v7465_v47  ;;  %vm13752_vm0 = vcmask 457728   ;;  %v5535_v57 = vrot.slane %v5527_v9, %v10108_v51  ;;  %v5503_v38 = vrot.slane %v5495_v56, %v10108_v51  ;;  %v13773_v56 = vld [vmem:[#allocation208_spill] sm:$0xff] }
 0x6f1   : > { %7696 = vrot.lane.b32.xlu0 %v5340_v13, %s13560_s4  ;;  %v8270_v37 = vsel %vm13751_vm15, %v8269_v53, %v7469_v19  ;;  %vm13759_vm15 = vcmask 474112   ;;  %v5424_v19 = vcombine.high %v11707_v11, %v5374_v5  ;;  %v5431_v53 = vrot.slane %v5423_v18, %v10123_v2  ;;  %v13772_v18 = vld [vmem:[#allocation438_spill] sm:$0xff] }
 0x6f2   : > { %7700 = vrot.lane.b32.xlu1 %v5341_v59, %s13562_s5  ;;  %v5519_v59 = vrot.slane %v5511_v60, %v10108_v51  ;;  %v5487_v1 = vrot.slane %v5479_v31, %v10108_v51  ;;  %v5474_v62 = vcombine.high %v5422_v49, %v5454_v46  ;;  %v5470_v61 = vrot.slane %v5456_v42, %v10123_v2 }
 0x6f3   : > { %v7473_v3 = vpop.permute.xlu0 %7472  ;;  %v5475_v5 = vcombine.low %v5431_v53, %v5463_v20  ;;  %v5480_v43 = vcombine.high %v2523_v40, %v11716_v14  ;;  %v5496_v39 = vcombine.high %v2555_v23, %v11721_v10  ;;  %v5438_v29 = vrot.slane %v5424_v19, %v10123_v2  ;;  %v13777_v19 = vld [vmem:[#allocation87_spill] sm:$0xff] }
 0x6f4   : > { %v7477_v17 = vpop.permute.xlu1 %7476  ;;  %v8271_v12 = vsel %vm13752_vm0, %v8270_v37, %v7473_v3  ;;  %vm13760_vm0 = vcmask 490496   ;;  %v5575_v0 = vcombine.low %v5519_v59, %v5535_v57  ;;  %v5543_v16 = vcombine.low %v5487_v1, %v5503_v38 }
 0x6f5   : > { %7704 = vrot.lane.b32.xlu0 %v5342_v44, %s13567_s29  ;;  %v8272_v22 = vsel %vm13759_vm15, %v8271_v12, %v7477_v17  ;;  %vm13761_vm15 = vcmask 506880   ;;  %v5512_v15 = vcombine.high %v2651_v63, %v11737_v36  ;;  %v11781_v34 = vsel %vm2502_vm5, %v13763_v50, %v10387_v35  ;;  %v13766_v17 = vld [vmem:[#allocation323_spill] sm:$0xff] }
 0x6f6   : > { %7708 = vrot.lane.b32.xlu1 %v5471_v33, %s13570_s30  ;;  %v5542_v48 = vrot.slane %v5528_v55, %v10108_v51  ;;  %v5476_v10 = vcombine.high %v5431_v53, %v5463_v20  ;;  %v5576_v3 = vcombine.high %v5519_v59, %v5535_v57  ;;  %v5583_v44 = vrot.slane %v5575_v0, %v10123_v2  ;;  %v13767_v12 = vld [vmem:[#allocation119_spill] sm:$0xff]  ;;  %v13780_v55 = vld [vmem:[#allocation380_spill] sm:$0xff] }
 0x6f7   : > { %v7481_v52 = vpop.permute.xlu0 %7480  ;;  %v5477_v36 = vcombine.low %v5438_v29, %v5470_v61  ;;  %v11790_v33 = vsel %vm2502_vm5, %v13767_v12, %v13766_v17  ;;  %v5494_v35 = vrot.slane %v5480_v43, %v10108_v51  ;;  %v11796_v40 = vsel %vm2502_vm5, %v13769_v26, %v13768_v4  ;;  %v13779_v59 = vld [vmem:[#allocation103_spill] sm:$0xff] }
 0x6f8   : > { %v7485_v47 = vpop.permute.xlu1 %7484  ;;  %v8273_v13 = vsel %vm13760_vm0, %v8272_v22, %v7481_v52  ;;  %vm13762_vm0 = vcmask 523264   ;;  %v5510_v21 = vrot.slane %v5496_v39, %v10108_v51  ;;  %v5544_v25 = vcombine.high %v5487_v1, %v5503_v38  ;;  %v13778_v38 = vld [vmem:[#allocation294_spill] sm:$0xff] }
 0x6f9   : > { %7712 = vrot.lane.b32.xlu0 %v5472_v27, %s13575_s23  ;;  %v8274_v58 = vsel %vm13761_vm15, %v8273_v13, %v7485_v47  ;;  %vm13764_vm15 = vcmask 539648   ;;  %v5551_v23 = vrot.slane %v5543_v16, %v10123_v2  ;;  %v2684_v63 = vsel %vm2502_vm5, %v13771_v32, %v13770_v30 }
 0x6fa   : > { %7716 = vrot.lane.b32.xlu1 %v5473_v54, %s13576_s28  ;;  %v5526_v49 = vrot.slane %v5512_v15, %v10108_v51  ;;  %v11809_v60 = vsel %vm2502_vm5, %v13773_v56, %v13772_v18  ;;  %v5663_v31 = vcombine.low %v2684_v63, %v11781_v34  ;;  %v5478_v52 = vcombine.high %v5438_v29, %v5470_v61  ;;  %v13776_v54 = vld [vmem:[#allocation265_spill] sm:$0xff] }
 0x6fb   : > { %v7489_v6 = vpop.permute.xlu0 %7488  ;;  %v5590_v27 = vrot.slane %v5576_v3, %v10123_v2  ;;  %v5607_v13 = vcombine.low %v5551_v23, %v5583_v44  ;;  %v2524_v53 = vsel %vm2502_vm5, %v13777_v19, %v13776_v54  ;;  %v2556_v1 = vsel %vm2502_vm5, %v13779_v59, %v13778_v38  ;;  %v13790_v54 = vld [vmem:[#allocation239_spill] sm:$0xff]  ;;  %v13791_v59 = vld [vmem:[#allocation354_spill] sm:$0xff] }
 0x6fc   : > { %v7493_v8 = vpop.permute.xlu1 %7492  ;;  %v8275_v11 = vsel %vm13762_vm0, %v8274_v58, %v7489_v6  ;;  %vm13765_vm0 = vcmask 556032   ;;  %v5591_v20 = vcombine.low %v5526_v49, %v5542_v48  ;;  %v13781_v58 = vld [vmem:[#allocation151_spill] sm:$0xff]  ;;  %v5558_v61 = vrot.slane %v5544_v25, %v10123_v2 }
 0x6fd   : > { %7720 = vrot.lane.b32.xlu0 %v5474_v62, %s13579_s19  ;;  %v8276_v14 = vsel %vm13764_vm15, %v8275_v11, %v7493_v8  ;;  %vm13774_vm15 = vcmask 572416   ;;  %v2652_v6 = vsel %vm2502_vm5, %v13781_v58, %v13780_v55  ;;  %v5631_v62 = vcombine.low %v2556_v1, %v11796_v40  ;;  %v13793_v58 = vld [vmem:[#allocation411_spill] sm:$0xff] }
 0x6fe   : > { %7724 = vrot.lane.b32.xlu1 %v5475_v5, %s13580_s21  ;;  %v5559_v0 = vcombine.low %v5494_v35, %v5510_v21  ;;  %v5647_v8 = vcombine.low %v2652_v6, %v11809_v60  ;;  %v5615_v11 = vcombine.low %v2524_v53, %v11790_v33  ;;  %v5671_v5 = vrot.slane %v5663_v31, %v10108_v51 }
 0x6ff   : > { %v7497_v37 = vpop.permute.xlu0 %7496  ;;  %v5608_v29 = vcombine.high %v5551_v23, %v5583_v44  ;;  %v5592_v16 = vcombine.high %v5526_v49, %v5542_v48  ;;  %v5599_v15 = vrot.slane %v5591_v20, %v10123_v2  ;;  %v5639_v3 = vrot.slane %v5631_v62, %v10108_v51  ;;  %v13789_v20 = vld [vmem:[#allocation122_spill] sm:$0xff] }
 0x700   : > { %v7501_v46 = vpop.permute.xlu1 %7500  ;;  %v8277_v9 = vsel %vm13765_vm0, %v8276_v14, %v7497_v37  ;;  %vm13775_vm0 = vcmask 588800   ;;  %v5609_v37 = vcombine.low %v5558_v61, %v5590_v27  ;;  %v5623_v48 = vrot.slane %v5615_v11, %v10108_v51 }
 0x701   : > { %7728 = vrot.lane.b32.xlu0 %v5476_v10, %s13584_s18  ;;  %v8278_v42 = vsel %vm13774_vm15, %v8277_v9, %v7501_v46  ;;  %vm13782_vm15 = vcmask 605184   ;;  %v5616_v10 = vcombine.high %v2524_v53, %v11790_v33  ;;  %v5560_v46 = vcombine.high %v5494_v35, %v5510_v21 }
 0x702   : > { %7732 = vrot.lane.b32.xlu1 %v5477_v36, %s13587_s11  ;;  %v5567_v9 = vrot.slane %v5559_v0, %v10123_v2  ;;  %v5655_v36 = vrot.slane %v5647_v8, %v10108_v51  ;;  %v5664_v44 = vcombine.high %v2684_v63, %v11781_v34  ;;  %v5610_v4 = vcombine.high %v5558_v61, %v5590_v27  ;;  %v13788_v27 = vld [vmem:[#allocation326_spill] sm:$0xff]  ;;  %v13795_v61 = vld [vmem:[#allocation439_spill] sm:$0xff] }
 0x703   : > { %v7505_v22 = vpop.permute.xlu0 %7504  ;;  %v5606_v26 = vrot.slane %v5592_v16, %v10123_v2  ;;  %v5632_v23 = vcombine.high %v2556_v1, %v11796_v40  ;;  %v5648_v30 = vcombine.high %v2652_v6, %v11809_v60  ;;  %v5679_v32 = vcombine.low %v5623_v48, %v5639_v3  ;;  %v13792_v1 = vld [vmem:[#allocation138_spill] sm:$0xff]  ;;  %v13796_v0 = vld [vmem:[#allocation211_spill] sm:$0xff] }
 0x704   : > { %v7509_v57 = vpop.permute.xlu1 %7508  ;;  %v8279_v47 = vsel %vm13775_vm0, %v8278_v42, %v7505_v22  ;;  %vm13783_vm0 = vcmask 621568   ;;  %v5711_v33 = vcombine.low %v5655_v36, %v5671_v5  ;;  %v5611_v21 = vcombine.low %v5567_v9, %v5599_v15  ;;  %v13794_v6 = vld [vmem:[#allocation182_spill] sm:$0xff] }
 0x705   : > { %7736 = vrot.lane.b32.xlu0 %v5478_v52, %s13590_s0  ;;  %v8280_v43 = vsel %vm13782_vm15, %v8279_v47, %v7509_v57  ;;  %vm13784_vm15 = vcmask 637952   ;;  %v5574_v34 = vrot.slane %v5560_v46, %v10123_v2  ;;  %v11851_v63 = vrot.slane %v5616_v10, %v10108_v51  ;;  %v13802_v46 = vld [vmem:[#allocation106_spill] sm:$0xff] }
 0x706   : > { %7740 = vrot.lane.b32.xlu1 %v5607_v13, %s13593_s1  ;;  %v5678_v49 = vrot.slane %v5664_v44, %v10108_v51  ;;  %v5612_v31 = vcombine.high %v5567_v9, %v5599_v15  ;;  %v5712_v42 = vcombine.high %v5655_v36, %v5671_v5  ;;  %v5719_v40 = vrot.slane %v5711_v33, %v10123_v2  ;;  %v13803_v36 = vld [vmem:[#allocation383_spill] sm:$0xff] }
 0x707   : > { %v7513_v39 = vpop.permute.xlu0 %7512  ;;  %v5613_v52 = vcombine.low %v5574_v34, %v5606_v26  ;;  %v11860_v57 = vsel %vm2502_vm5, %v13789_v20, %v13788_v27  ;;  %v5646_v47 = vrot.slane %v5632_v23, %v10108_v51  ;;  %v5662_v13 = vrot.slane %v5648_v30, %v10108_v51 }
 0x708   : > { %v7517_v50 = vpop.permute.xlu1 %7516  ;;  %v8281_v14 = vsel %vm13783_vm0, %v8280_v43, %v7513_v39  ;;  %vm13785_vm0 = vcmask 654336   ;;  %v2749_v19 = vsel %vm2502_vm5, %v13790_v54, %v10428_v45  ;;  %v5680_v53 = vcombine.high %v5623_v48, %v5639_v3  ;;  %v13801_v3 = vld [vmem:[#allocation297_spill] sm:$0xff]  ;;  %v13804_v48 = vld [vmem:[#allocation154_spill] sm:$0xff] }
 0x709   : > { %7744 = vrot.lane.b32.xlu0 %v5608_v29, %s13596_s2  ;;  %v8282_v17 = vsel %vm13784_vm15, %v8281_v14, %v7517_v50  ;;  %vm13786_vm15 = vcmask 670720   ;;  %v5687_v38 = vrot.slane %v5679_v32, %v10123_v2  ;;  %v11872_v55 = vsel %vm2502_vm5, %v13792_v1, %v13791_v59  ;;  %v13799_v14 = vld [vmem:[#allocation268_spill] sm:$0xff] }
 0x70a   : > { %7748 = vrot.lane.b32.xlu1 %v5609_v37, %s13597_s20  ;;  %v2685_v62 = vsel %vm2502_vm5, %v13794_v6, %v13793_v58  ;;  %v11881_v45 = vsel %vm2502_vm5, %v13796_v0, %v13795_v61  ;;  %v5727_v8 = vcombine.low %v5662_v13, %v5678_v49  ;;  %v5614_v43 = vcombine.high %v5574_v34, %v5606_v26  ;;  %v13800_v37 = vld [vmem:[#allocation90_spill] sm:$0xff] }
 0x70b   : > { %v7521_v12 = vpop.permute.xlu0 %7520  ;;  %v5726_v39 = vrot.slane %v5712_v42, %v10123_v2  ;;  %v5799_v29 = vcombine.low %v2685_v62, %v2749_v19  ;;  %v5743_v50 = vcombine.low %v5687_v38, %v5719_v40  ;;  %v2525_v10 = vsel %vm2502_vm5, %v13800_v37, %v13799_v14  ;;  %v13812_v6 = vld [vmem:[#allocation238_spill] sm:$0xff] }
 0x70c   : > { %v7525_v25 = vpop.permute.xlu1 %7524  ;;  %v8283_v35 = vsel %vm13785_vm0, %v8282_v17, %v7521_v12  ;;  %vm13787_vm0 = vcmask 687104   ;;  %v2557_v9 = vsel %vm2502_vm5, %v13802_v46, %v13801_v3  ;;  %v2653_v44 = vsel %vm2502_vm5, %v13804_v48, %v13803_v36  ;;  %v13820_v46 = vld [vmem:[#allocation410_spill] sm:$0xff] }
 0x70d   : > { %7752 = vrot.lane.b32.xlu0 %v5610_v4, %s13600_s16  ;;  %v8284_v18 = vsel %vm13786_vm15, %v8283_v35, %v7525_v25  ;;  %vm13797_vm15 = vcmask 703488   ;;  %v5694_v17 = vrot.slane %v5680_v53, %v10123_v2  ;;  %v5695_v12 = vcombine.low %v11851_v63, %v5646_v47 }
 0x70e   : > { %7756 = vrot.lane.b32.xlu1 %v5611_v21, %s13601_s26  ;;  %v5767_v4 = vcombine.low %v2557_v9, %v11872_v55  ;;  %v5783_v33 = vcombine.low %v2653_v44, %v11881_v45  ;;  %v5751_v26 = vcombine.low %v2525_v10, %v11860_v57  ;;  %v5728_v25 = vcombine.high %v5662_v13, %v5678_v49 }
 0x70f   : > { %v7529_v56 = vpop.permute.xlu0 %7528  ;;  %v5744_v23 = vcombine.high %v5687_v38, %v5719_v40  ;;  %v5735_v30 = vrot.slane %v5727_v8, %v10123_v2  ;;  %v5807_v32 = vrot.slane %v5799_v29, %v10108_v51  ;;  %v5703_v42 = vrot.slane %v5695_v12, %v10123_v2  ;;  %v13816_v29 = vld [vmem:[#allocation121_spill] sm:$0xff] }
 0x710   : > { %v7533_v60 = vpop.permute.xlu1 %7532  ;;  %v8285_v22 = vsel %vm13787_vm0, %v8284_v18, %v7529_v56  ;;  %vm13798_vm0 = vcmask 719872   ;;  %v5745_v56 = vcombine.low %v5694_v17, %v5726_v39  ;;  %v5775_v49 = vrot.slane %v5767_v4, %v10108_v51 }
 0x711   : > { %7760 = vrot.lane.b32.xlu0 %v5612_v31, %s13606_s14  ;;  %v8286_v11 = vsel %vm13797_vm15, %v8285_v22, %v7533_v60  ;;  %vm13805_vm15 = vcmask 736256   ;;  %v5696_v31 = vcombine.high %v11851_v63, %v5646_v47  ;;  %v5791_v60 = vrot.slane %v5783_v33, %v10108_v51 }
 0x712   : > { %7764 = vrot.lane.b32.xlu1 %v5613_v52, %s13608_s13  ;;  %v5759_v40 = vrot.slane %v5751_v26, %v10108_v51  ;;  %v5800_v22 = vcombine.high %v2685_v62, %v2749_v19  ;;  %v5746_v20 = vcombine.high %v5694_v17, %v5726_v39  ;;  %v5742_v13 = vrot.slane %v5728_v25, %v10123_v2  ;;  %v13815_v39 = vld [vmem:[#allocation325_spill] sm:$0xff]  ;;  %v13824_v17 = vld [vmem:[#allocation210_spill] sm:$0xff] }
 0x713   : > { %v7537_v5 = vpop.permute.xlu0 %7536  ;;  %v5847_v54 = vcombine.low %v5791_v60, %v5807_v32  ;;  %v5747_v47 = vcombine.low %v5703_v42, %v5735_v30  ;;  %v5752_v38 = vcombine.high %v2525_v10, %v11860_v57  ;;  %v5768_v59 = vcombine.high %v2557_v9, %v11872_v55  ;;  %v13821_v9 = vld [vmem:[#allocation181_spill] sm:$0xff] }
 0x714   : > { %v7541_v16 = vpop.permute.xlu1 %7540  ;;  %v8287_v15 = vsel %vm13798_vm0, %v8286_v11, %v7537_v5  ;;  %vm13806_vm0 = vcmask 752640   ;;  %v5710_v1 = vrot.slane %v5696_v31, %v10123_v2  ;;  %v5815_v19 = vcombine.low %v5759_v40, %v5775_v49  ;;  %v13829_v31 = vld [vmem:[#allocation296_spill] sm:$0xff] }
 0x715   : > { %7768 = vrot.lane.b32.xlu0 %v5614_v43, %s13613_s17  ;;  %v8288_v35 = vsel %vm13805_vm15, %v8287_v15, %v7541_v16  ;;  %vm13808_vm15 = vcmask 769024   ;;  %v5784_v58 = vcombine.high %v2653_v44, %v11881_v45  ;;  %v11925_v62 = vsel %vm2502_vm5, %v13812_v6, %v10426_v24  ;;  %v13817_v15 = vld [vmem:[#allocation353_spill] sm:$0xff]  ;;  %v13823_v44 = vld [vmem:[#allocation440_spill] sm:$0xff] }
 0x716   : > { %7772 = vrot.lane.b32.xlu1 %v5743_v50, %s13616_s27  ;;  %s13807_s27 = smov 84   ;;  %v5814_v61 = vrot.slane %v5800_v22, %v10108_v51  ;;  %v5748_v55 = vcombine.high %v5703_v42, %v5735_v30  ;;  %v5848_v8 = vcombine.high %v5791_v60, %v5807_v32  ;;  %v5855_v11 = vrot.slane %v5847_v54, %v10123_v2  ;;  %v13818_v50 = vld [vmem:[#allocation137_spill] sm:$0xff]  ;;  %v13831_v60 = vld [vmem:[#allocation382_spill] sm:$0xff] }
 0x717   : > { %v7545_v21 = vpop.permute.xlu0 %7544  ;;  %v5749_v45 = vcombine.low %v5710_v1, %v5742_v13  ;;  %v11934_v16 = vsel %vm2502_vm5, %v13816_v29, %v13815_v39  ;;  %v5766_v24 = vrot.slane %v5752_v38, %v10108_v51  ;;  %v11940_v14 = vsel %vm2502_vm5, %v13818_v50, %v13817_v15  ;;  %v13830_v42 = vld [vmem:[#allocation105_spill] sm:$0xff] }
 0x718   : > { %v7549_v34 = vpop.permute.xlu1 %7548  ;;  %v8289_v18 = vsel %vm13806_vm0, %v8288_v35, %v7545_v21  ;;  %vm13809_vm0 = vcmask 785408   ;;  %v5782_v37 = vrot.slane %v5768_v59, %v10108_v51  ;;  %v5816_v10 = vcombine.high %v5759_v40, %v5775_v49  ;;  %v13832_v40 = vld [vmem:[#allocation153_spill] sm:$0xff] }
 0x719   : > { %7776 = vrot.lane.b32.xlu0 %v5744_v23, %s13621_s12  ;;  %v8290_v52 = vsel %vm13808_vm15, %v8289_v18, %v7549_v34  ;;  %s13810_s12 = smov 86   ;;  %vm13813_vm15 = vcmask 801792   ;;  %v5823_v3 = vrot.slane %v5815_v19, %v10123_v2  ;;  %v2686_v36 = vsel %vm2502_vm5, %v13821_v9, %v13820_v46  ;;  %v13827_v34 = vld [vmem:[#allocation267_spill] sm:$0xff]  ;;  %v13828_v18 = vld [vmem:[#allocation89_spill] sm:$0xff] }
 0x71a   : > { %7780 = vrot.lane.b32.xlu1 %v5745_v56, %s13807_s27  ;;  %s13811_s27 = smov 88   ;;  %v5798_v48 = vrot.slane %v5784_v58, %v10108_v51  ;;  %v11953_v12 = vsel %vm2502_vm5, %v13824_v17, %v13823_v44  ;;  %v5935_v4 = vcombine.low %v2686_v36, %v11925_v62  ;;  %v5750_v25 = vcombine.high %v5710_v1, %v5742_v13 }
 0x71b   : > { %v7553_v27 = vpop.permute.xlu0 %7552  ;;  %v5862_v35 = vrot.slane %v5848_v8, %v10123_v2  ;;  %v5879_v32 = vcombine.low %v5823_v3, %v5855_v11  ;;  %v2526_v56 = vsel %vm2502_vm5, %v13828_v18, %v13827_v34  ;;  %v2558_v49 = vsel %vm2502_vm5, %v13830_v42, %v13829_v31  ;;  %v13849_v34 = vld [vmem:[#allocation140_spill] sm:$0xff]  ;;  %v13850_v31 = vld [vmem:[#allocation241_spill] sm:$0xff] }
 0x71c   : > { %v7557_v53 = vpop.permute.xlu1 %7556  ;;  %v8291_v63 = vsel %vm13809_vm0, %v8290_v52, %v7553_v27  ;;  %vm13814_vm0 = vcmask 818176   ;;  %v5863_v21 = vcombine.low %v5798_v48, %v5814_v61  ;;  %v2654_v22 = vsel %vm2502_vm5, %v13832_v40, %v13831_v60 }
 0x71d   : > { %7784 = vrot.lane.b32.xlu0 %v5746_v20, %s13810_s12  ;;  %v8292_v57 = vsel %vm13813_vm15, %v8291_v63, %v7557_v53  ;;  %s13822_s12 = smov 92   ;;  %vm13825_vm15 = vcmask 834560   ;;  %v5903_v52 = vcombine.low %v2558_v49, %v11940_v14  ;;  %v5830_v27 = vrot.slane %v5816_v10, %v10123_v2  ;;  %v13841_v10 = vld [vmem:[#allocation299_spill] sm:$0xff] }
 0x71e   : > { %7788 = vrot.lane.b32.xlu1 %v5747_v47, %s13811_s27  ;;  %s13819_s27 = smov 90   ;;  %v5831_v20 = vcombine.low %v5766_v24, %v5782_v37  ;;  %v5919_v13 = vcombine.low %v2654_v22, %v11953_v12  ;;  %v5887_v54 = vcombine.low %v2526_v56, %v11934_v16  ;;  %v5943_v53 = vrot.slane %v5935_v4, %v10108_v51 }
 0x71f   : > { %v7561_v0 = vpop.permute.xlu0 %7560  ;;  %v5880_v38 = vcombine.high %v5823_v3, %v5855_v11  ;;  %v5864_v59 = vcombine.high %v5798_v48, %v5814_v61  ;;  %v5871_v1 = vrot.slane %v5863_v21, %v10123_v2  ;;  %v5881_v6 = vcombine.low %v5830_v27, %v5862_v35  ;;  %v13842_v3 = vld [vmem:[#allocation108_spill] sm:$0xff] }
 0x720   : > { %v7565_v5 = vpop.permute.xlu1 %7564  ;;  %v8293_v43 = vsel %vm13814_vm0, %v8292_v57, %v7561_v0  ;;  %vm13826_vm0 = vcmask 850944   ;;  %v5888_v57 = vcombine.high %v2526_v56, %v11934_v16  ;;  %v5911_v0 = vrot.slane %v5903_v52, %v10108_v51  ;;  %v13846_v21 = vld [vmem:[#allocation328_spill] sm:$0xff] }
 0x721   : > { %7792 = vrot.lane.b32.xlu0 %v5748_v55, %s13819_s27  ;;  %v8294_v33 = vsel %vm13825_vm15, %v8293_v43, %v7565_v5  ;;  %s13834_s27 = smov 96   ;;  %vm13835_vm15 = vcmask 867328   ;;  %v5832_v55 = vcombine.high %v5766_v24, %v5782_v37  ;;  %v5839_v8 = vrot.slane %v5831_v20, %v10123_v2  ;;  %v13853_v52 = vld [vmem:[#allocation184_spill] sm:$0xff]  ;;  %v13855_v20 = vld [vmem:[#allocation441_spill] sm:$0xff] }
 0x722   : > { %7796 = vrot.lane.b32.xlu1 %v5749_v45, %s13822_s12  ;;  %s13833_s12 = smov 94   ;;  %v5927_v5 = vrot.slane %v5919_v13, %v10108_v51  ;;  %v5895_v61 = vrot.slane %v5887_v54, %v10108_v51  ;;  %v5936_v11 = vcombine.high %v2686_v36, %v11925_v62  ;;  %v5882_v39 = vcombine.high %v5830_v27, %v5862_v35  ;;  %v13856_v13 = vld [vmem:[#allocation213_spill] sm:$0xff] }
 0x723   : > { %v7569_v26 = vpop.permute.xlu0 %7568  ;;  %v5878_v16 = vrot.slane %v5864_v59, %v10123_v2  ;;  %v5883_v50 = vcombine.low %v5839_v8, %v5871_v1  ;;  %v5920_v37 = vcombine.high %v2654_v22, %v11953_v12  ;;  %v11994_v46 = vsel %vm2502_vm5, %v13842_v3, %v13841_v10  ;;  %v13852_v22 = vld [vmem:[#allocation413_spill] sm:$0xff] }
 0x724   : > { %v7573_v23 = vpop.permute.xlu1 %7572  ;;  %v8295_v30 = vsel %vm13826_vm0, %v8294_v33, %v7569_v26  ;;  %vm13838_vm0 = vcmask 900096   ;;  %v5983_v29 = vcombine.low %v5927_v5, %v5943_v53  ;;  %v5904_v62 = vcombine.high %v2558_v49, %v11940_v14 }
 0x725   : > { %7800 = vrot.lane.b32.xlu0 %v5750_v25, %s13833_s12  ;;  %v8296_v63 = vsel %vm13835_vm15, %v8295_v30, %v7573_v23  ;;  %s13836_s12 = smov 98   ;;  %vm13839_vm15 = vcmask 916480   ;;  %v5951_v9 = vcombine.low %v5895_v61, %v5911_v0  ;;  %v5846_v36 = vrot.slane %v5832_v55, %v10123_v2  ;;  %v13847_v23 = vld [vmem:[#allocation124_spill] sm:$0xff] }
 0x726   : > { %7804 = vrot.lane.b32.xlu1 %v5879_v32, %s13834_s27  ;;  %s13837_s27 = smov 100   ;;  %v12000_v48 = vrot.slane %v5888_v57, %v10108_v51  ;;  %v5950_v44 = vrot.slane %v5936_v11, %v10108_v51  ;;  %v5884_v4 = vcombine.high %v5839_v8, %v5871_v1  ;;  %v5984_v33 = vcombine.high %v5927_v5, %v5943_v53  ;;  %v13848_v32 = vld [vmem:[#allocation356_spill] sm:$0xff]  ;;  %v13859_v57 = vld [vmem:[#allocation385_spill] sm:$0xff]  ;;  %v13862_v8 = vld [vmem:[#allocation270_spill] sm:$0xff] }
 0x727   : > { %v7577_v47 = vpop.permute.xlu0 %7576  ;;  %v5991_v26 = vrot.slane %v5983_v29, %v10123_v2  ;;  %v5885_v35 = vcombine.low %v5846_v36, %v5878_v16  ;;  %v12009_v30 = vsel %vm2502_vm5, %v13847_v23, %v13846_v21  ;;  %v12014_v18 = vsel %vm2502_vm5, %v13849_v34, %v13848_v32  ;;  %v13863_v5 = vld [vmem:[#allocation92_spill] sm:$0xff] }
 0x728   : > { %v7581_v19 = vpop.permute.xlu1 %7580  ;;  %v8297_v58 = vsel %vm8224_vm4, %v8296_v63, %v7577_v47  ;;  %v5934_v56 = vrot.slane %v5920_v37, %v10108_v51  ;;  %v12020_v42 = vsel %vm2502_vm5, %v13850_v31, %v10443_v41  ;;  %v5918_v49 = vrot.slane %v5904_v62, %v10108_v51 }
 0x729   : > { %7808 = vrot.lane.b32.xlu0 %v5880_v38, %s13836_s12  ;;  %v8298_v43 = vsel %vm13838_vm0, %v8297_v58, %v7581_v19  ;;  %s13840_s12 = smov 102   ;;  %vm13844_vm0 = vcmask 932864   ;;  %v5952_v60 = vcombine.high %v5895_v61, %v5911_v0  ;;  %v5959_v40 = vrot.slane %v5951_v9, %v10123_v2  ;;  %v13860_v0 = vld [vmem:[#allocation156_spill] sm:$0xff] }
 0x72a   : > { %7812 = vrot.lane.b32.xlu1 %v5881_v6, %s13837_s27  ;;  %s13843_s27 = smov 104   ;;  %v2687_v27 = vsel %vm2502_vm5, %v13853_v52, %v13852_v22  ;;  %v12032_v54 = vsel %vm2502_vm5, %v13856_v13, %v13855_v20  ;;  %v5999_v41 = vcombine.low %v5934_v56, %v5950_v44  ;;  %v5886_v47 = vcombine.high %v5846_v36, %v5878_v16  ;;  %v13871_v52 = vld [vmem:[#allocation420_spill] sm:$0xff] }
 0x72b   : > { %v7585_v45 = vpop.permute.xlu0 %7584  ;;  %v5998_v38 = vrot.slane %v5984_v33, %v10123_v2  ;;  %v6071_v59 = vcombine.low %v2687_v27, %v12020_v42  ;;  %v6015_v58 = vcombine.low %v5959_v40, %v5991_v26  ;;  %v6039_v6 = vcombine.low %v11994_v46, %v12014_v18 }
 0x72c   : > { %v7589_v15 = vpop.permute.xlu1 %7588  ;;  %v8299_v24 = vsel %vm13839_vm15, %v8298_v43, %v7585_v45  ;;  %vm13845_vm15 = vcmask 949248   ;;  %v2655_v55 = vsel %vm2502_vm5, %v13860_v0, %v13859_v57  ;;  %v2527_v61 = vsel %vm2502_vm5, %v13863_v5, %v13862_v8  ;;  %v13878_v8 = vld [vmem:[#allocation139_spill] sm:$0xff] }
 0x72d   : > { %7816 = vrot.lane.b32.xlu0 %v5882_v39, %s13840_s12  ;;  %v8300_v17 = vsel %vm13844_vm0, %v8299_v24, %v7589_v15  ;;  %s13854_s12 = smov 108   ;;  %vm13857_vm0 = vcmask 965632   ;;  %v5966_v11 = vrot.slane %v5952_v60, %v10123_v2  ;;  %v5967_v43 = vcombine.low %v12000_v48, %v5918_v49 }
 0x72e   : > { %7820 = vrot.lane.b32.xlu1 %v5883_v50, %s13843_s27  ;;  %s13851_s27 = smov 106   ;;  %v6055_v45 = vcombine.low %v2655_v55, %v12032_v54  ;;  %v6023_v39 = vcombine.low %v2527_v61, %v12009_v30  ;;  %v6000_v29 = vcombine.high %v5934_v56, %v5950_v44  ;;  %v6016_v24 = vcombine.high %v5959_v40, %v5991_v26  ;;  %v13866_v56 = vld [vmem:[#allocation269_spill] sm:$0xff] }
 0x72f   : > { %v7593_v12 = vpop.permute.xlu0 %7592  ;;  %v6007_v50 = vrot.slane %v5999_v41, %v10123_v2  ;;  %v6079_v37 = vrot.slane %v6071_v59, %v10108_v51  ;;  %v6017_v62 = vcombine.low %v5966_v11, %v5998_v38  ;;  %v6047_v9 = vrot.slane %v6039_v6, %v10108_v51  ;;  %v13875_v6 = vld [vmem:[#allocation183_spill] sm:$0xff] }
 0x730   : > { %v7597_v25 = vpop.permute.xlu1 %7596  ;;  %v8301_v14 = vsel %vm13845_vm15, %v8300_v17, %v7593_v12  ;;  %vm13858_vm15 = vcmask 982016   ;;  %v5968_v44 = vcombine.high %v12000_v48, %v5918_v49  ;;  %v5975_v17 = vrot.slane %v5967_v43, %v10123_v2  ;;  %v13870_v49 = vld [vmem:[#allocation123_spill] sm:$0xff]  ;;  %v13880_v43 = vld [vmem:[#allocation212_spill] sm:$0xff] }
 0x731   : > { %7824 = vrot.lane.b32.xlu0 %v5884_v4, %s13851_s27  ;;  %v8302_v53 = vsel %vm13857_vm0, %v8301_v14, %v7597_v25  ;;  %s13864_s27 = smov 112   ;;  %v6063_v12 = vrot.slane %v6055_v45, %v10108_v51  ;;  %v5063_v4 = vcombine.low %v11527_v7, %v11515_v28  ;;  %v6024_v33 = vcombine.high %v2527_v61, %v12009_v30  ;;  %v13867_v28 = vld [vmem:[#allocation91_spill] sm:$0xff] }
 0x732   : > { %7828 = vrot.lane.b32.xlu1 %v5885_v35, %s13854_s12  ;;  %s13861_s12 = smov 110   ;;  %v6031_v26 = vrot.slane %v6023_v39, %v10108_v51  ;;  %v6072_v25 = vcombine.high %v2687_v27, %v12020_v42  ;;  %v6018_v35 = vcombine.high %v5966_v11, %v5998_v38  ;;  %v6014_v48 = vrot.slane %v6000_v29, %v10123_v2  ;;  %v13869_v42 = vld [vmem:[#allocation327_spill] sm:$0xff]  ;;  %v13872_v27 = vld [vmem:[#allocation240_spill] sm:$0xff] }
 0x733   : > { %v7601_v63 = vpop.permute.xlu0 %7600  ;;  %v6119_v21 = vcombine.low %v6063_v12, %v6079_v37  ;;  %v6019_v34 = vcombine.low %v5975_v17, %v6007_v50  ;;  %v12074_v7 = vsel %vm2502_vm5, %v13867_v28, %v13866_v56  ;;  %v6040_v30 = vcombine.high %v11994_v46, %v12014_v18  ;;  %v13879_v11 = vld [vmem:[#allocation443_spill] sm:$0xff] }
 0x734   : > { %v7605_v1 = vpop.permute.xlu1 %7604  ;;  %v8303_v19 = vsel %vm13858_vm15, %v8302_v53, %v7601_v63  ;;  %v6056_v31 = vcombine.high %v2655_v55, %v12032_v54  ;;  %v12083_v60 = vsel %vm2502_vm5, %v13870_v49, %v13869_v42  ;;  %v5982_v40 = vrot.slane %v5968_v44, %v10123_v2  ;;  %v13877_v55 = vld [vmem:[#allocation355_spill] sm:$0xff] }
 0x735   : > { %7832 = vrot.lane.b32.xlu0 %v5886_v47, %s13861_s12  ;;  %v8304_v16 = vsel %vm8238_vm3, %v8303_v19, %v7605_v1  ;;  %v6087_v22 = vcombine.low %v6031_v26, %v6047_v9  ;;  %v12089_v20 = vsel %vm2502_vm5, %v13872_v27, %v13871_v52  ;;  %v6086_v46 = vrot.slane %v6072_v25, %v10108_v51 }
 0x736   : > { %7836 = vrot.lane.b32.xlu1 %v6015_v58, %s13864_s27  ;;  %s13865_s27 = smov 114   ;;  %v6120_v18 = vcombine.high %v6063_v12, %v6079_v37  ;;  %v6020_v41 = vcombine.high %v5975_v17, %v6007_v50  ;;  %v6038_v53 = vrot.slane %v6024_v33, %v10108_v51  ;;  %v12096_v63 = vrot.slane %v6119_v21, %v10123_v2  ;;  %v13874_v58 = vld [vmem:[#allocation412_spill] sm:$0xff]  ;;  %v13882_v37 = vld [vmem:[#allocation298_spill] sm:$0xff] }
 0x737   : > { %v7609_v15 = vpop.permute.xlu0 %7608  ;;  %v6021_v59 = vcombine.low %v5982_v40, %v6014_v48  ;;  %v6054_v1 = vrot.slane %v6040_v30, %v10108_v51  ;;  %v6088_v19 = vcombine.high %v6031_v26, %v6047_v9  ;;  %v2688_v57 = vsel %vm2502_vm5, %v13875_v6, %v13874_v58  ;;  %v13885_v9 = vld [vmem:[#allocation155_spill] sm:$0xff] }
 0x738   : > { %v7613_v10 = vpop.permute.xlu1 %7612  ;;  %v8305_v3 = vsel %vm8240_vm1, %v8304_v16, %v7609_v15  ;;  %v6070_v0 = vrot.slane %v6056_v31, %v10108_v51  ;;  %v12108_v5 = vsel %vm2502_vm5, %v13878_v8, %v13877_v55  ;;  %v12111_v61 = vrot.slane %v6087_v22, %v10123_v2 }
 0x739   : > { %v8306_v36 = vsel %vm8242_vm2, %v8305_v3, %v7613_v10  ;;  %7840 = vrot.lane.b32.xlu0 %v6016_v24, %s13865_s27  ;;  %s13873_s27 = smov 120   ;;  %v2720_v45 = vsel %vm2502_vm5, %v13880_v43, %v13879_v11  ;;  %v6207_v39 = vcombine.low %v2688_v57, %v12089_v20  ;;  %v6134_v29 = vrot.slane %v6120_v18, %v10123_v2  ;;  %v13883_v10 = vld [vmem:[#allocation107_spill] sm:$0xff] }
 0x73a   : > { %8434 = vst [vmem:[%s11476_s22 + $0x8] sm:$0xff] %v8306_v36  ;;  %7844 = vrot.lane.b32.xlu1 %v6017_v62, %s13664_s15  ;;  %s13868_s15 = smov 118   ;;  %v6135_v16 = vcombine.low %v6070_v0, %v6086_v46  ;;  %v6022_v50 = vcombine.high %v5982_v40, %v6014_v48  ;;  %v2560_v3 = vsel %vm2502_vm5, %v13883_v10, %v13882_v37  ;;  %v13884_v62 = vld [vmem:[#allocation384_spill] sm:$0xff]  ;;  %vm13894_vm0 = vcmask 162816   ;;  %v13899_v37 = vld [vmem:[#allocation126_spill] sm:$0xff] }
 0x73b   : > { %v7617_v14 = vpop.permute.xlu0 %7616  ;;  %v2656_v36 = vsel %vm2502_vm5, %v13885_v9, %v13884_v62  ;;  %v6152_v12 = vcombine.high %v12111_v61, %v12096_v63  ;;  %v6102_v33 = vrot.slane %v6088_v19, %v10123_v2  ;;  %v6103_v26 = vcombine.low %v6038_v53, %v6054_v1  ;;  %v13892_v19 = vld [vmem:[#allocation94_spill] sm:$0xff] }
 0x73c   : > { %v7621_v23 = vpop.permute.xlu1 %7620  ;;  %v8307_v32 = vsel %vm8119_vm6, %v5063_v4, %v7617_v14  ;;  %v6175_v4 = vcombine.low %v2560_v3, %v12108_v5  ;;  %v6191_v25 = vcombine.low %v2656_v36, %v2720_v45  ;;  %v6159_v14 = vcombine.low %v12074_v7, %v12083_v60 }
 0x73d   : > { %7848 = vrot.lane.b32.xlu0 %v6018_v35, %s13868_s15  ;;  %v8308_v13 = vsel %vm8121_vm7, %v8307_v32, %v7621_v23  ;;  %s13881_s15 = smov 124   ;;  %v6215_v35 = vrot.slane %v6207_v39, %v10108_v51  ;;  %v6136_v48 = vcombine.high %v6070_v0, %v6086_v46  ;;  %v6143_v21 = vrot.slane %v6135_v16, %v10123_v2  ;;  %v13896_v39 = vld [vmem:[#allocation243_spill] sm:$0xff] }
 0x73e   : > { %7852 = vrot.lane.b32.xlu1 %v6019_v34, %s13873_s27  ;;  %s13876_s27 = smov 122   ;;  %v6153_v34 = vcombine.low %v6102_v33, %v6134_v29  ;;  %v6154_v30 = vcombine.high %v6102_v33, %v6134_v29  ;;  %v6183_v31 = vrot.slane %v6175_v4, %v10108_v51  ;;  %v6104_v42 = vcombine.high %v6038_v53, %v6054_v1  ;;  %v13904_v4 = vld [vmem:[#allocation186_spill] sm:$0xff] }
 0x73f   : > { %v7625_v54 = vpop.permute.xlu0 %7624  ;;  %v6111_v49 = vrot.slane %v6103_v26, %v10123_v2  ;;  %v6199_v40 = vrot.slane %v6191_v25, %v10108_v51  ;;  %v6160_v22 = vcombine.high %v12074_v7, %v12083_v60  ;;  %v6167_v52 = vrot.slane %v6159_v14, %v10108_v51  ;;  %v13905_v26 = vld [vmem:[#allocation442_spill] sm:$0xff]  ;;  %v13906_v25 = vld [vmem:[#allocation215_spill] sm:$0xff] }
 0x740   : > { %v7629_v47 = vpop.permute.xlu1 %7628  ;;  %v8309_v38 = vsel %vm8123_vm8, %v8308_v13, %v7625_v54  ;;  %v6208_v27 = vcombine.high %v2688_v57, %v12089_v20  ;;  %v6150_v18 = vrot.slane %v6136_v48, %v10123_v2  ;;  %v6192_v53 = vcombine.high %v2656_v36, %v2720_v45  ;;  %v13891_v20 = vld [vmem:[#allocation272_spill] sm:$0xff]  ;;  %v13895_v45 = vld [vmem:[#allocation277_spill] sm:$0xff]  ;;  %v13901_v36 = vld [vmem:[#allocation358_spill] sm:$0xff] }
 0x741   : > { %7856 = vrot.lane.b32.xlu0 %v6020_v41, %s13876_s27  ;;  %v8310_v15 = vsel %vm8125_vm9, %v8309_v38, %v7629_v47  ;;  %s13887_s27 = smov 2   ;;  %v6255_v46 = vcombine.low %v6199_v40, %v6215_v35  ;;  %v6155_v41 = vcombine.low %v6111_v49, %v6143_v21  ;;  %v6176_v7 = vcombine.high %v2560_v3, %v12108_v5 }
 0x742   : > { %7860 = vrot.lane.b32.xlu1 %v6021_v59, %s13881_s15  ;;  %s13886_s15 = smov 126   ;;  %v6156_v59 = vcombine.high %v6111_v49, %v6143_v21  ;;  %v6223_v60 = vcombine.low %v6167_v52, %v6183_v31  ;;  %v6118_v1 = vrot.slane %v6104_v42, %v10123_v2  ;;  %v12157_v58 = vsel %vm2502_vm5, %v13892_v19, %v13891_v20  ;;  %v13912_v42 = vld [vmem:[#allocation158_spill] sm:$0xff] }
 0x743   : > { %v7633_v24 = vpop.permute.xlu0 %7632  ;;  %v12160_v6 = vrot.slane %v6160_v22, %v10108_v51  ;;  %v6222_v57 = vrot.slane %v6208_v27, %v10108_v51  ;;  %v6256_v0 = vcombine.high %v6199_v40, %v6215_v35  ;;  %v6263_v55 = vrot.slane %v6255_v46, %v10123_v2 }
 0x744   : > { %v7637_v44 = vpop.permute.xlu1 %7636  ;;  %v8311_v17 = vsel %vm8127_vm10, %v8310_v15, %v7633_v24  ;;  %v6157_v11 = vcombine.low %v6118_v1, %v6150_v18  ;;  %v6206_v43 = vrot.slane %v6192_v53, %v10108_v51  ;;  %v12170_v29 = vsel %vm2502_vm5, %v13896_v39, %v13895_v45 }
 0x745   : > { %7864 = vrot.lane.b32.xlu0 %v6022_v50, %s13886_s15  ;;  %v8312_v23 = vsel %vm8129_vm11, %v8311_v17, %v7637_v44  ;;  %s13888_s15 = smov 4   ;;  %vm13897_vm15 = vcmask 179200   ;;  %v6158_v24 = vcombine.high %v6118_v1, %v6150_v18  ;;  %v13898_v50 = vld [vmem:[#allocation330_spill] sm:$0xff]  ;;  %v6190_v3 = vrot.slane %v6176_v7, %v10108_v51 }
 0x746   : > { %7868 = vrot.lane.b32.xlu1 %v6152_v12, %s13887_s27  ;;  %s13889_s27 = smov 6   ;;  %v12176_v10 = vsel %vm2502_vm5, %v13899_v37, %v13898_v50  ;;  %v6224_v62 = vcombine.high %v6167_v52, %v6183_v31  ;;  %v6231_v9 = vrot.slane %v6223_v60, %v10123_v2  ;;  %v13902_v44 = vld [vmem:[#allocation142_spill] sm:$0xff]  ;;  %v13903_v12 = vld [vmem:[#allocation415_spill] sm:$0xff]  ;;  %v12192_v14 = vsel %vm2502_vm5, %v13906_v25, %v13905_v26 }
 0x747   : > { %v7641_v32 = vpop.permute.xlu0 %7640  ;;  %v12184_v17 = vsel %vm2502_vm5, %v13902_v44, %v13901_v36  ;;  %v2689_v33 = vsel %vm2502_vm5, %v13904_v4, %v13903_v12  ;;  %v6271_v35 = vcombine.low %v6206_v43, %v6222_v57  ;;  %v6270_v48 = vrot.slane %v6256_v0, %v10123_v2  ;;  %v13911_v31 = vld [vmem:[#allocation387_spill] sm:$0xff]  ;;  %v13926_v12 = vld [vmem:[#allocation242_spill] sm:$0xff] }
 0x748   : > { %v7645_v56 = vpop.permute.xlu1 %7644  ;;  %v8313_v28 = vsel %vm8131_vm12, %v8312_v23, %v7641_v32  ;;  %v6343_v21 = vcombine.low %v2689_v33, %v12170_v29  ;;  %v2657_v49 = vsel %vm2502_vm5, %v13912_v42, %v13911_v31  ;;  %v6288_v52 = vcombine.high %v6231_v9, %v6263_v55  ;;  %v13931_v31 = vld [vmem:[#allocation414_spill] sm:$0xff]  ;;  %v13932_v42 = vld [vmem:[#allocation185_spill] sm:$0xff] }
 0x749   : > { %7872 = vrot.lane.b32.xlu0 %v6153_v34, %s13888_s15  ;;  %v8314_v13 = vsel %vm8133_vm13, %v8313_v28, %v7645_v56  ;;  %s13890_s15 = smov 8   ;;  %v6287_v34 = vcombine.low %v6231_v9, %v6263_v55  ;;  %v13909_v56 = vld [vmem:[#allocation301_spill] sm:$0xff]  ;;  %v13910_v28 = vld [vmem:[#allocation110_spill] sm:$0xff]  ;;  %v6238_v27 = vrot.slane %v6224_v62, %v10123_v2  ;;  %v6239_v46 = vcombine.low %v12160_v6, %v6190_v3  ;;  %v13923_v62 = vld [vmem:[#allocation271_spill] sm:$0xff] }
 0x74a   : > { %7876 = vrot.lane.b32.xlu1 %v6154_v30, %s13889_s27  ;;  %s13893_s27 = smov 10   ;;  %v2561_v30 = vsel %vm2502_vm5, %v13910_v28, %v13909_v56  ;;  %v6279_v53 = vrot.slane %v6271_v35, %v10123_v2  ;;  %v6240_v19 = vcombine.high %v12160_v6, %v6190_v3  ;;  %v13924_v9 = vld [vmem:[#allocation93_spill] sm:$0xff]  ;;  %v6296_v44 = vcombine.high %v12157_v58, %v12176_v10 }
 0x74b   : > { %v7649_v54 = vpop.permute.xlu0 %7648  ;;  %v6311_v18 = vcombine.low %v2561_v30, %v12184_v17  ;;  %v6289_v7 = vcombine.low %v6238_v27, %v6270_v48  ;;  %v6290_v20 = vcombine.high %v6238_v27, %v6270_v48  ;;  %v6247_v0 = vrot.slane %v6239_v46, %v10123_v2  ;;  %v13934_v27 = vld [vmem:[#allocation141_spill] sm:$0xff] }
 0x74c   : > { %v7653_v47 = vpop.permute.xlu1 %7652  ;;  %v8315_v38 = vsel %vm8135_vm14, %v8314_v13, %v7649_v54  ;;  %v6327_v13 = vcombine.low %v2657_v49, %v12192_v14  ;;  %v6295_v54 = vcombine.low %v12157_v58, %v12176_v10  ;;  %v6254_v37 = vrot.slane %v6240_v19, %v10123_v2  ;;  %v13940_v19 = vld [vmem:[#allocation386_spill] sm:$0xff] }
 0x74d   : > { %7880 = vrot.lane.b32.xlu0 %v6155_v41, %s13890_s15  ;;  %v8316_v8 = vsel %vm13894_vm0, %v8315_v38, %v7653_v47  ;;  %s13900_s15 = smov 12   ;;  %vm13908_vm0 = vcmask 195584   ;;  %v6272_v41 = vcombine.high %v6206_v43, %v6222_v57  ;;  %v6351_v47 = vrot.slane %v6343_v21, %v10108_v51  ;;  %v13928_v21 = vld [vmem:[#allocation329_spill] sm:$0xff] }
 0x74e   : > { %7884 = vrot.lane.b32.xlu1 %v6156_v59, %s13893_s27  ;;  %s13907_s27 = smov 14   ;;  %v6319_v57 = vrot.slane %v6311_v18, %v10108_v51  ;;  %v6335_v55 = vrot.slane %v6327_v13, %v10108_v51  ;;  %v6291_v39 = vcombine.low %v6247_v0, %v6279_v53  ;;  %v6292_v50 = vcombine.high %v6247_v0, %v6279_v53  ;;  %v13935_v18 = vld [vmem:[#allocation445_spill] sm:$0xff]  ;;  %v13936_v13 = vld [vmem:[#allocation214_spill] sm:$0xff] }
 0x74f   : > { %v7657_v5 = vpop.permute.xlu0 %7656  ;;  %v12235_v36 = vsel %vm2502_vm5, %v13924_v9, %v13923_v62  ;;  %v13941_v0 = vld [vmem:[#allocation157_spill] sm:$0xff] }
 0x750   : > { %v7661_v16 = vpop.permute.xlu1 %7660  ;;  %v8317_v15 = vsel %vm13897_vm15, %v8316_v8, %v7657_v5  ;;  %vm13913_vm15 = vcmask 211968   ;;  %v6303_v8 = vrot.slane %v6295_v54, %v10108_v51  ;;  %v6344_v5 = vcombine.high %v2689_v33, %v12170_v29 }
 0x751   : > { %7888 = vrot.lane.b32.xlu0 %v6157_v11, %s13900_s15  ;;  %v8318_v23 = vsel %vm13908_vm0, %v8317_v15, %v7661_v16  ;;  %s13914_s15 = smov 16   ;;  %vm13916_vm0 = vcmask 228352   ;;  %v6286_v11 = vrot.slane %v6272_v41, %v10123_v2  ;;  %v6391_v43 = vcombine.low %v6335_v55, %v6351_v47 }
 0x752   : > { %7892 = vrot.lane.b32.xlu1 %v6158_v24, %s13907_s27  ;;  %s13915_s27 = smov 18   ;;  %v6312_v16 = vcombine.high %v2561_v30, %v12184_v17  ;;  %v6359_v3 = vcombine.low %v6303_v8, %v6319_v57  ;;  %v6328_v29 = vcombine.high %v2657_v49, %v12192_v14  ;;  %v13925_v17 = vld [vmem:[#allocation191_spill] sm:$0xff]  ;;  %v6358_v33 = vrot.slane %v6344_v5, %v10108_v51 }
 0x753   : > { %v7665_v32 = vpop.permute.xlu0 %7664  ;;  %v12242_v4 = vsel %vm2502_vm5, %v13926_v12, %v13925_v17  ;;  %v6392_v26 = vcombine.high %v6335_v55, %v6351_v47  ;;  %v6399_v25 = vrot.slane %v6391_v43, %v10123_v2  ;;  %v6293_v48 = vcombine.low %v6254_v37, %v6286_v11 }
 0x754   : > { %v7669_v40 = vpop.permute.xlu1 %7668  ;;  %v8319_v22 = vsel %vm13913_vm15, %v8318_v23, %v7665_v32  ;;  %vm13917_vm15 = vcmask 244736   ;;  %v13929_v23 = vld [vmem:[#allocation125_spill] sm:$0xff]  ;;  %v6326_v10 = vrot.slane %v6312_v16, %v10108_v51  ;;  %v6294_v56 = vcombine.high %v6254_v37, %v6286_v11 }
 0x755   : > { %7896 = vrot.lane.b32.xlu0 %v6287_v34, %s13914_s15  ;;  %v8320_v38 = vsel %vm13916_vm0, %v8319_v22, %v7669_v40  ;;  %s13918_s15 = smov 20   ;;  %vm13920_vm0 = vcmask 261120   ;;  %v12251_v58 = vsel %vm2502_vm5, %v13929_v23, %v13928_v21  ;;  %v6360_v28 = vcombine.high %v6303_v8, %v6319_v57 }
 0x756   : > { %7900 = vrot.lane.b32.xlu1 %v6288_v52, %s13915_s27  ;;  %s13919_s27 = smov 22   ;;  %v6367_v30 = vrot.slane %v6359_v3, %v10123_v2  ;;  %v2690_v49 = vsel %vm2502_vm5, %v13932_v42, %v13931_v31  ;;  %v6342_v40 = vrot.slane %v6328_v29, %v10108_v51  ;;  %v6310_v22 = vrot.slane %v6296_v44, %v10108_v51  ;;  %v13933_v52 = vld [vmem:[#allocation357_spill] sm:$0xff]  ;;  %v13948_v31 = vld [vmem:[#allocation96_spill] sm:$0xff] }
 0x757   : > { %v7673_v59 = vpop.permute.xlu0 %7672  ;;  %v12265_v46 = vsel %vm2502_vm5, %v13934_v27, %v13933_v52  ;;  %v2722_v54 = vsel %vm2502_vm5, %v13936_v13, %v13935_v18  ;;  %v6479_v41 = vcombine.low %v2690_v49, %v12242_v4  ;;  %v6406_v53 = vrot.slane %v6392_v26, %v10123_v2 }
 0x758   : > { %v7677_v60 = vpop.permute.xlu1 %7676  ;;  %v8321_v1 = vsel %vm13917_vm15, %v8320_v38, %v7673_v59  ;;  %vm13921_vm15 = vcmask 277504   ;;  %v6407_v47 = vcombine.low %v6342_v40, %v6358_v33  ;;  %v2658_v57 = vsel %vm2502_vm5, %v13941_v0, %v13940_v19 }
 0x759   : > { %7904 = vrot.lane.b32.xlu0 %v6289_v7, %s13918_s15  ;;  %v8322_v45 = vsel %vm13920_vm0, %v8321_v1, %v7677_v60  ;;  %s13922_s15 = smov 24   ;;  %vm13927_vm0 = vcmask 293888   ;;  %v6423_v7 = vcombine.low %v6367_v30, %v6399_v25  ;;  %v13938_v60 = vld [vmem:[#allocation300_spill] sm:$0xff]  ;;  %v13939_v1 = vld [vmem:[#allocation109_spill] sm:$0xff]  ;;  %v6424_v5 = vcombine.high %v6367_v30, %v6399_v25 }
 0x75a   : > { %7908 = vrot.lane.b32.xlu1 %v6290_v20, %s13919_s27  ;;  %v2562_v20 = vsel %vm2502_vm5, %v13939_v1, %v13938_v60  ;;  %v6374_v43 = vrot.slane %v6360_v28, %v10123_v2  ;;  %v6487_v16 = vrot.slane %v6479_v41, %v10108_v51  ;;  %v6376_v17 = vcombine.high %v6310_v22, %v6326_v10  ;;  %v13951_v41 = vld [vmem:[#allocation245_spill] sm:$0xff]  ;;  %v13954_v60 = vld [vmem:[#allocation128_spill] sm:$0xff] }
 0x75b   : > { %v7681_v6 = vpop.permute.xlu0 %7680  ;;  %v6447_v11 = vcombine.low %v2562_v20, %v12265_v46 }
 0x75c   : > { %v7685_v15 = vpop.permute.xlu1 %7684  ;;  %v8323_v24 = vsel %vm13921_vm15, %v8322_v45, %v7681_v6  ;;  %vm13930_vm15 = vcmask 310272   ;;  %v6375_v45 = vcombine.low %v6310_v22, %v6326_v10  ;;  %v6463_v6 = vcombine.low %v2658_v57, %v2722_v54 }
 0x75d   : > { %7912 = vrot.lane.b32.xlu0 %v6291_v39, %s13922_s15  ;;  %v8324_v14 = vsel %vm13927_vm0, %v8323_v24, %v7685_v15  ;;  %vm13937_vm0 = vcmask 326656   ;;  %v6431_v39 = vcombine.low %v12235_v36, %v12251_v58  ;;  %v6408_v15 = vcombine.high %v6342_v40, %v6358_v33 }
 0x75e   : > { %7916 = vrot.lane.b32.xlu1 %v6292_v50, %s13722_s25  ;;  %v6415_v24 = vrot.slane %v6407_v47, %v10123_v2  ;;  %v6425_v3 = vcombine.low %v6374_v43, %v6406_v53  ;;  %v6426_v9 = vcombine.high %v6374_v43, %v6406_v53  ;;  %v6455_v44 = vrot.slane %v6447_v11, %v10108_v51  ;;  %v13958_v11 = vld [vmem:[#allocation188_spill] sm:$0xff]  ;;  %s8454_s25 = sshll.u32 %s11476_s22, 4  ;;  %s8455_s25 = int_to_ptr.vmem [resolvable:$true] %s8454_s25 }
 0x75f   : > { %v7689_v35 = vpop.permute.xlu0 %7688  ;;  %v6383_v12 = vrot.slane %v6375_v45, %v10123_v2  ;;  %v6471_v26 = vrot.slane %v6463_v6, %v10108_v51  ;;  %v6432_v33 = vcombine.high %v12235_v36, %v12251_v58  ;;  %v6439_v25 = vrot.slane %v6431_v39, %v10108_v51  ;;  %v13959_v45 = vld [vmem:[#allocation444_spill] sm:$0xff]  ;;  %v13960_v6 = vld [vmem:[#allocation217_spill] sm:$0xff] }
 0x760   : > { %v7693_v32 = vpop.permute.xlu1 %7692  ;;  %v8325_v34 = vsel %vm13930_vm15, %v8324_v14, %v7689_v35  ;;  %vm13942_vm15 = vcmask 343040   ;;  %v6480_v14 = vcombine.high %v2690_v49, %v12242_v4  ;;  %v6448_v36 = vcombine.high %v2562_v20, %v12265_v46  ;;  %v13947_v4 = vld [vmem:[#allocation274_spill] sm:$0xff] }
 0x761   : > { %7920 = vrot.lane.b32.xlu0 %v6293_v48, %s13725_s3  ;;  %v8326_v38 = vsel %vm13937_vm0, %v8325_v34, %v7693_v32  ;;  %vm13943_vm0 = vcmask 359424   ;;  %v6527_v35 = vcombine.low %v6471_v26, %v6487_v16  ;;  %v6422_v48 = vrot.slane %v6408_v15, %v10123_v2  ;;  %s14020_s3 = smov 86  }
 0x762   : > { %7924 = vrot.lane.b32.xlu1 %v6294_v56, %s13544_s10  ;;  %v6427_v10 = vcombine.low %v6383_v12, %v6415_v24  ;;  %v6464_v32 = vcombine.high %v2658_v57, %v2722_v54  ;;  %v6428_v28 = vcombine.high %v6383_v12, %v6415_v24  ;;  %v6495_v58 = vcombine.low %v6439_v25, %v6455_v44  ;;  %v13950_v54 = vld [vmem:[#allocation306_spill] sm:$0xff]  ;;  %v13955_v57 = vld [vmem:[#allocation360_spill] sm:$0xff]  ;;  %s14117_s10 = sld [smem:[#allocation18_spill]] }
 0x763   : > { %v7697_v59 = vpop.permute.xlu0 %7696  ;;  %v6390_v30 = vrot.slane %v6376_v17, %v10123_v2  ;;  %v12309_v42 = vsel %vm2502_vm5, %v13948_v31, %v13947_v4  ;;  %v12312_v49 = vrot.slane %v6432_v33, %v10108_v51  ;;  %v6494_v40 = vrot.slane %v6480_v14, %v10108_v51  ;;  %v13965_v17 = vld [vmem:[#allocation160_spill] sm:$0xff] }
 0x764   : > { %v7701_v55 = vpop.permute.xlu1 %7700  ;;  %v8327_v8 = vsel %vm13942_vm15, %v8326_v38, %v7697_v59  ;;  %vm13944_vm15 = vcmask 375808   ;;  %v6528_v22 = vcombine.high %v6471_v26, %v6487_v16  ;;  %v6535_v52 = vrot.slane %v6527_v35, %v10123_v2 }
 0x765   : > { %7928 = vrot.lane.b32.xlu0 %v6423_v7, %s13547_s9  ;;  %v8328_v50 = vsel %vm13943_vm0, %v8327_v8, %v7701_v55  ;;  %vm13945_vm0 = vcmask 392192   ;;  %v6429_v18 = vcombine.low %v6390_v30, %v6422_v48  ;;  %v6478_v13 = vrot.slane %v6464_v32, %v10108_v51  ;;  %v13953_v7 = vld [vmem:[#allocation332_spill] sm:$0xff]  ;;  %s14112_s9 = sld [smem:[#allocation11_spill]] }
 0x766   : > { %7932 = vrot.lane.b32.xlu1 %v6424_v5, %s13550_s8  ;;  %v12322_v53 = vsel %vm2502_vm5, %v13951_v41, %v13950_v54  ;;  %v6430_v59 = vcombine.high %v6390_v30, %v6422_v48  ;;  %v12328_v1 = vsel %vm2502_vm5, %v13954_v60, %v13953_v7  ;;  %v6462_v20 = vrot.slane %v6448_v36, %v10108_v51  ;;  %v13956_v55 = vld [vmem:[#allocation144_spill] sm:$0xff]  ;;  %v13957_v5 = vld [vmem:[#allocation417_spill] sm:$0xff]  ;;  %s14066_s8 = smov 124  }
 0x767   : > { %v7705_v37 = vpop.permute.xlu0 %7704  ;;  %v6496_v19 = vcombine.high %v6439_v25, %v6455_v44  ;;  %v6503_v0 = vrot.slane %v6495_v58, %v10123_v2  ;;  %v12336_v8 = vsel %vm2502_vm5, %v13956_v55, %v13955_v57  ;;  %v2691_v43 = vsel %vm2502_vm5, %v13958_v11, %v13957_v5  ;;  %v13964_v44 = vld [vmem:[#allocation389_spill] sm:$0xff]  ;;  %v13974_v5 = vld [vmem:[#allocation244_spill] sm:$0xff] }
 0x768   : > { %v7709_v29 = vpop.permute.xlu1 %7708  ;;  %v8329_v62 = vsel %vm13944_vm15, %v8328_v50, %v7705_v37  ;;  %vm13946_vm15 = vcmask 408576   ;;  %v12344_v39 = vsel %vm2502_vm5, %v13960_v6, %v13959_v45  ;;  %v6543_v16 = vcombine.low %v6478_v13, %v6494_v40 }
 0x769   : > { %7936 = vrot.lane.b32.xlu0 %v6425_v3, %s13551_s24  ;;  %v8330_v21 = vsel %vm13945_vm0, %v8329_v62, %v7709_v29  ;;  %vm13949_vm0 = vcmask 424960   ;;  %v6542_v15 = vrot.slane %v6528_v22, %v10123_v2  ;;  %v6615_v24 = vcombine.low %v2691_v43, %v12322_v53  ;;  %v13962_v29 = vld [vmem:[#allocation303_spill] sm:$0xff]  ;;  %v13963_v62 = vld [vmem:[#allocation112_spill] sm:$0xff]  ;;  %s14067_s24 = smov 126  }
 0x76a   : > { %7940 = vrot.lane.b32.xlu1 %v6426_v9, %s13554_s6  ;;  %v6559_v3 = vcombine.low %v6503_v0, %v6535_v52  ;;  %v2563_v9 = vsel %vm2502_vm5, %v13963_v62, %v13962_v29  ;;  %v2659_v12 = vsel %vm2502_vm5, %v13965_v17, %v13964_v44  ;;  %v6560_v25 = vcombine.high %v6503_v0, %v6535_v52  ;;  %v13972_v0 = vld [vmem:[#allocation95_spill] sm:$0xff]  ;;  %v13979_v44 = vld [vmem:[#allocation416_spill] sm:$0xff]  ;;  %s14064_s6 = smov 120  }
 0x76b   : > { %v7713_v23 = vpop.permute.xlu0 %7712  ;;  %v6510_v14 = vrot.slane %v6496_v19, %v10123_v2  ;;  %v6511_v35 = vcombine.low %v12312_v49, %v6462_v20  ;;  %v6583_v48 = vcombine.low %v2563_v9, %v12336_v8  ;;  %v6551_v32 = vrot.slane %v6543_v16, %v10123_v2  ;;  %v13971_v19 = vld [vmem:[#allocation273_spill] sm:$0xff]  ;;  %v13980_v17 = vld [vmem:[#allocation187_spill] sm:$0xff] }
 0x76c   : > { %v7717_v34 = vpop.permute.xlu1 %7716  ;;  %v8331_v56 = vsel %vm13946_vm15, %v8330_v21, %v7713_v23  ;;  %vm13952_vm15 = vcmask 441344   ;;  %v6599_v21 = vcombine.low %v2659_v12, %v12344_v39  ;;  %v6567_v23 = vcombine.low %v12309_v42, %v12328_v1 }
 0x76d   : > { %7944 = vrot.lane.b32.xlu0 %v6427_v10, %s13555_s7  ;;  %v8332_v27 = vsel %vm13949_vm0, %v8331_v56, %v7717_v34  ;;  %vm13961_vm0 = vcmask 457728   ;;  %v6544_v10 = vcombine.high %v6478_v13, %v6494_v40  ;;  %v6623_v34 = vrot.slane %v6615_v24, %v10108_v51  ;;  %v13976_v24 = vld [vmem:[#allocation331_spill] sm:$0xff]  ;;  %s14065_s7 = smov 122  }
 0x76e   : > { %7948 = vrot.lane.b32.xlu1 %v6428_v28, %s13560_s4  ;;  %v6561_v36 = vcombine.low %v6510_v14, %v6542_v15  ;;  %v6562_v4 = vcombine.high %v6510_v14, %v6542_v15  ;;  %v6512_v31 = vcombine.high %v12312_v49, %v6462_v20  ;;  %v6519_v22 = vrot.slane %v6511_v35, %v10123_v2  ;;  %v13982_v14 = vld [vmem:[#allocation143_spill] sm:$0xff]  ;;  %s14061_s4 = smov 114  }
 0x76f   : > { %v7721_v46 = vpop.permute.xlu0 %7720  ;;  %v6591_v40 = vrot.slane %v6583_v48, %v10108_v51  ;;  %v6607_v52 = vrot.slane %v6599_v21, %v10108_v51  ;;  %v12387_v57 = vsel %vm2502_vm5, %v13972_v0, %v13971_v19  ;;  %v6568_v55 = vcombine.high %v12309_v42, %v12328_v1  ;;  %v13983_v48 = vld [vmem:[#allocation447_spill] sm:$0xff]  ;;  %v13984_v21 = vld [vmem:[#allocation216_spill] sm:$0xff] }
 0x770   : > { %v7725_v47 = vpop.permute.xlu1 %7724  ;;  %v8333_v38 = vsel %vm13952_vm15, %v8332_v27, %v7721_v46  ;;  %vm13966_vm15 = vcmask 474112   ;;  %v6575_v27 = vrot.slane %v6567_v23, %v10108_v51  ;;  %v6616_v46 = vcombine.high %v2691_v43, %v12322_v53 }
 0x771   : > { %7952 = vrot.lane.b32.xlu0 %v6429_v18, %s13562_s5  ;;  %v8334_v50 = vsel %vm13961_vm0, %v8333_v38, %v7725_v47  ;;  %vm13967_vm0 = vcmask 490496   ;;  %v6558_v18 = vrot.slane %v6544_v10, %v10123_v2  ;;  %v6663_v13 = vcombine.low %v6607_v52, %v6623_v34  ;;  %s14063_s5 = smov 118  }
 0x772   : > { %7956 = vrot.lane.b32.xlu1 %v6430_v59, %s13567_s29  ;;  %v6563_v41 = vcombine.low %v6519_v22, %v6551_v32  ;;  %v6584_v47 = vcombine.high %v2563_v9, %v12336_v8  ;;  %v6564_v7 = vcombine.high %v6519_v22, %v6551_v32  ;;  %v6526_v60 = vrot.slane %v6512_v31, %v10123_v2  ;;  %v13973_v8 = vld [vmem:[#allocation32_spill] sm:$0xff]  ;;  %v13989_v22 = vld [vmem:[#allocation159_spill] sm:$0xff]  ;;  %s14058_s29 = smov 108  }
 0x773   : > { %v7729_v37 = vpop.permute.xlu0 %7728  ;;  %v6631_v20 = vcombine.low %v6575_v27, %v6591_v40  ;;  %v6600_v53 = vcombine.high %v2659_v12, %v12344_v39  ;;  %v12394_v11 = vsel %vm2502_vm5, %v13974_v5, %v13973_v8  ;;  %v6630_v43 = vrot.slane %v6616_v46, %v10108_v51  ;;  %v13988_v31 = vld [vmem:[#allocation388_spill] sm:$0xff] }
 0x774   : > { %v7733_v26 = vpop.permute.xlu1 %7732  ;;  %v8335_v33 = vsel %vm13966_vm15, %v8334_v50, %v7729_v37  ;;  %vm13968_vm15 = vcmask 506880   ;;  %v6664_v45 = vcombine.high %v6607_v52, %v6623_v34  ;;  %v6671_v6 = vrot.slane %v6663_v13, %v10123_v2  ;;  %v13977_v50 = vld [vmem:[#allocation127_spill] sm:$0xff] }
 0x775   : > { %7960 = vrot.lane.b32.xlu0 %v6559_v3, %s13570_s30  ;;  %v8336_v56 = vsel %vm13967_vm0, %v8335_v33, %v7733_v26  ;;  %vm13969_vm0 = vcmask 523264   ;;  %v6565_v15 = vcombine.low %v6526_v60, %v6558_v18  ;;  %v12403_v42 = vsel %vm2502_vm5, %v13977_v50, %v13976_v24  ;;  %s14060_s30 = smov 112  }
 0x776   : > { %7964 = vrot.lane.b32.xlu1 %v6560_v25, %s13575_s23  ;;  %v6598_v1 = vrot.slane %v6584_v47, %v10108_v51  ;;  %v6566_v29 = vcombine.high %v6526_v60, %v6558_v18  ;;  %v6632_v62 = vcombine.high %v6575_v27, %v6591_v40  ;;  %v6639_v9 = vrot.slane %v6631_v20, %v10123_v2  ;;  %v13981_v25 = vld [vmem:[#allocation359_spill] sm:$0xff]  ;;  %s14054_s23 = smov 104  }
 0x777   : > { %v7737_v28 = vpop.permute.xlu0 %7736  ;;  %v2692_v12 = vsel %vm2502_vm5, %v13980_v17, %v13979_v44  ;;  %v6614_v26 = vrot.slane %v6600_v53, %v10108_v51  ;;  %v6582_v33 = vrot.slane %v6568_v55, %v10108_v51  ;;  %v12417_v35 = vsel %vm2502_vm5, %v13982_v14, %v13981_v25  ;;  %v13996_v44 = vld [vmem:[#allocation98_spill] sm:$0xff] }
 0x778   : > { %v7741_v58 = vpop.permute.xlu1 %7740  ;;  %v8337_v30 = vsel %vm13968_vm15, %v8336_v56, %v7737_v28  ;;  %vm13970_vm15 = vcmask 539648   ;;  %v2724_v23 = vsel %vm2502_vm5, %v13984_v21, %v13983_v48  ;;  %v6751_v10 = vcombine.low %v2692_v12, %v12394_v11 }
 0x779   : > { %7968 = vrot.lane.b32.xlu0 %v6561_v36, %s13576_s28  ;;  %v8338_v54 = vsel %vm13969_vm0, %v8337_v30, %v7741_v58  ;;  %vm13975_vm0 = vcmask 556032   ;;  %v6678_v32 = vrot.slane %v6664_v45, %v10123_v2  ;;  %v6679_v34 = vcombine.low %v6614_v26, %v6630_v43  ;;  %v13986_v58 = vld [vmem:[#allocation302_spill] sm:$0xff]  ;;  %v13987_v30 = vld [vmem:[#allocation111_spill] sm:$0xff]  ;;  %s14055_s28 = smov 106  }
 0x77a   : > { %7972 = vrot.lane.b32.xlu1 %v6562_v4, %s13579_s19  ;;  %v6695_v36 = vcombine.low %v6639_v9, %v6671_v6  ;;  %v2564_v4 = vsel %vm2502_vm5, %v13987_v30, %v13986_v58  ;;  %v2660_v40 = vsel %vm2502_vm5, %v13989_v22, %v13988_v31  ;;  %v6696_v46 = vcombine.high %v6639_v9, %v6671_v6  ;;  %v14002_v58 = vld [vmem:[#allocation130_spill] sm:$0xff]  ;;  %s14050_s19 = smov 100  }
 0x77b   : > { %v7745_v49 = vpop.permute.xlu0 %7744  ;;  %v6719_v18 = vcombine.low %v2564_v4, %v12417_v35  ;;  %v6646_v13 = vrot.slane %v6632_v62, %v10123_v2  ;;  %v6759_v47 = vrot.slane %v6751_v10, %v10108_v51  ;;  %v6648_v8 = vcombine.high %v6582_v33, %v6598_v1  ;;  %v13999_v10 = vld [vmem:[#allocation247_spill] sm:$0xff] }
 0x77c   : > { %v7749_v38 = vpop.permute.xlu1 %7748  ;;  %v8339_v59 = vsel %vm13970_vm15, %v8338_v54, %v7745_v49  ;;  %vm13978_vm15 = vcmask 572416   ;;  %v6647_v54 = vcombine.low %v6582_v33, %v6598_v1  ;;  %v6735_v49 = vcombine.low %v2660_v40, %v2724_v23 }
 0x77d   : > { %7976 = vrot.lane.b32.xlu0 %v6563_v41, %s13580_s21  ;;  %v8340_v39 = vsel %vm13975_vm0, %v8339_v59, %v7749_v38  ;;  %vm13985_vm0 = vcmask 588800   ;;  %v6703_v41 = vcombine.low %v12387_v57, %v12403_v42  ;;  %v6680_v38 = vcombine.high %v6614_v26, %v6630_v43  ;;  %s14051_s21 = smov 102  }
 0x77e   : > { %7980 = vrot.lane.b32.xlu1 %v6564_v7, %s13584_s18  ;;  %v6687_v59 = vrot.slane %v6679_v34, %v10123_v2  ;;  %v6697_v20 = vcombine.low %v6646_v13, %v6678_v32  ;;  %v6698_v0 = vcombine.high %v6646_v13, %v6678_v32  ;;  %v6727_v55 = vrot.slane %v6719_v18, %v10108_v51  ;;  %v14006_v18 = vld [vmem:[#allocation190_spill] sm:$0xff]  ;;  %s8572_s18 = sshll.u32 %s14112_s9, 9 }
 0x77f   : > { %v7753_v16 = vpop.permute.xlu0 %7752  ;;  %v6655_v5 = vrot.slane %v6647_v54, %v10123_v2  ;;  %v6743_v45 = vrot.slane %v6735_v49, %v10108_v51  ;;  %v6704_v43 = vcombine.high %v12387_v57, %v12403_v42  ;;  %v6711_v6 = vrot.slane %v6703_v41, %v10108_v51  ;;  %v14007_v54 = vld [vmem:[#allocation446_spill] sm:$0xff]  ;;  %v14008_v49 = vld [vmem:[#allocation219_spill] sm:$0xff] }
 0x780   : > { %v7757_v37 = vpop.permute.xlu1 %7756  ;;  %v8341_v3 = vsel %vm13978_vm15, %v8340_v39, %v7753_v16  ;;  %vm13990_vm15 = vcmask 605184   ;;  %v6752_v39 = vcombine.high %v2692_v12, %v12394_v11  ;;  %v6720_v57 = vcombine.high %v2564_v4, %v12417_v35  ;;  %v13995_v11 = vld [vmem:[#allocation276_spill] sm:$0xff] }
 0x781   : > { %7984 = vrot.lane.b32.xlu0 %v6565_v15, %s13587_s11  ;;  %v8342_v56 = vsel %vm13985_vm0, %v8341_v3, %v7757_v37  ;;  %vm13991_vm0 = vcmask 621568   ;;  %v6799_v16 = vcombine.low %v6743_v45, %v6759_v47  ;;  %v6694_v15 = vrot.slane %v6680_v38, %v10123_v2 }
 0x782   : > { %7988 = vrot.lane.b32.xlu1 %v6566_v29, %s13590_s0  ;;  %v6699_v1 = vcombine.low %v6655_v5, %v6687_v59  ;;  %v6736_v37 = vcombine.high %v2660_v40, %v2724_v23  ;;  %v6700_v62 = vcombine.high %v6655_v5, %v6687_v59  ;;  %v6767_v42 = vcombine.low %v6711_v6, %v6727_v55  ;;  %v13998_v23 = vld [vmem:[#allocation363_spill] sm:$0xff]  ;;  %v14003_v40 = vld [vmem:[#allocation362_spill] sm:$0xff]  ;;  %s14015_s0 = smov 80  }
 0x783   : > { %v7761_v28 = vpop.permute.xlu0 %7760  ;;  %v6662_v9 = vrot.slane %v6648_v8, %v10123_v2  ;;  %v12461_v17 = vsel %vm2502_vm5, %v13996_v44, %v13995_v11  ;;  %v12464_v12 = vrot.slane %v6704_v43, %v10108_v51  ;;  %v6766_v26 = vrot.slane %v6752_v39, %v10108_v51  ;;  %v14013_v8 = vld [vmem:[#allocation162_spill] sm:$0xff] }
 0x784   : > { %v7765_v52 = vpop.permute.xlu1 %7764  ;;  %v8343_v27 = vsel %vm13990_vm15, %v8342_v56, %v7761_v28  ;;  %vm13992_vm15 = vcmask 637952   ;;  %v6800_v33 = vcombine.high %v6743_v45, %v6759_v47  ;;  %v6807_v25 = vrot.slane %v6799_v16, %v10123_v2 }
 0x785   : > { %7992 = vrot.lane.b32.xlu0 %v6695_v36, %s13593_s1  ;;  %v8344_v7 = vsel %vm13991_vm0, %v8343_v27, %v7765_v52  ;;  %vm13993_vm0 = vcmask 654336   ;;  %v6701_v48 = vcombine.low %v6662_v9, %v6694_v15  ;;  %v6750_v21 = vrot.slane %v6736_v37, %v10108_v51  ;;  %v14001_v36 = vld [vmem:[#allocation334_spill] sm:$0xff]  ;;  %s14016_s1 = smov 82  }
 0x786   : > { %7996 = vrot.lane.b32.xlu1 %v6696_v46, %s13596_s2  ;;  %v12474_v32 = vsel %vm2502_vm5, %v13999_v10, %v13998_v23  ;;  %v6702_v28 = vcombine.high %v6662_v9, %v6694_v15  ;;  %v12480_v30 = vsel %vm2502_vm5, %v14002_v58, %v14001_v36  ;;  %v6734_v4 = vrot.slane %v6720_v57, %v10108_v51  ;;  %v14004_v52 = vld [vmem:[#allocation146_spill] sm:$0xff]  ;;  %v14005_v46 = vld [vmem:[#allocation419_spill] sm:$0xff]  ;;  %s14019_s2 = smov 84  }
 0x787   : > { %v7769_v60 = vpop.permute.xlu0 %7768  ;;  %v6768_v31 = vcombine.high %v6711_v6, %v6727_v55  ;;  %v6775_v22 = vrot.slane %v6767_v42, %v10123_v2  ;;  %v12488_v27 = vsel %vm2502_vm5, %v14004_v52, %v14003_v40  ;;  %v2693_v13 = vsel %vm2502_vm5, %v14006_v18, %v14005_v46  ;;  %v14012_v55 = vld [vmem:[#allocation391_spill] sm:$0xff]  ;;  %v14027_v46 = vld [vmem:[#allocation246_spill] sm:$0xff] }
 0x788   : > { %v7773_v53 = vpop.permute.xlu1 %7772  ;;  %v8345_v19 = vsel %vm13992_vm15, %v8344_v7, %v7769_v60  ;;  %vm13994_vm15 = vcmask 670720   ;;  %v12496_v41 = vsel %vm2502_vm5, %v14008_v49, %v14007_v54  ;;  %v6815_v47 = vcombine.low %v6750_v21, %v6766_v26 }
 0x789   : > { %8000 = vrot.lane.b32.xlu0 %v6697_v20, %s13597_s20  ;;  %v8346_v24 = vsel %vm13993_vm0, %v8345_v19, %v7773_v53  ;;  %vm13997_vm0 = vcmask 687104   ;;  %v6814_v38 = vrot.slane %v6800_v33, %v10123_v2  ;;  %v6887_v59 = vcombine.low %v2693_v13, %v12474_v32  ;;  %v14010_v53 = vld [vmem:[#allocation305_spill] sm:$0xff]  ;;  %v14011_v19 = vld [vmem:[#allocation114_spill] sm:$0xff]  ;;  %s14047_s20 = smov 96  }
 0x78a   : > { %8004 = vrot.lane.b32.xlu1 %v6698_v0, %s13600_s16  ;;  %v6831_v20 = vcombine.low %v6775_v22, %v6807_v25  ;;  %v2565_v0 = vsel %vm2502_vm5, %v14011_v19, %v14010_v53  ;;  %v2661_v5 = vsel %vm2502_vm5, %v14013_v8, %v14012_v55  ;;  %v6832_v6 = vcombine.high %v6775_v22, %v6807_v25  ;;  %v14025_v22 = vld [vmem:[#allocation97_spill] sm:$0xff]  ;;  %v14033_v55 = vld [vmem:[#allocation418_spill] sm:$0xff]  ;;  %s14035_s16 = smov 92  }
 0x78b   : > { %v7777_v50 = vpop.permute.xlu0 %7776  ;;  %v6782_v39 = vrot.slane %v6768_v31, %v10123_v2  ;;  %v6783_v16 = vcombine.low %v12464_v12, %v6734_v4  ;;  %v6855_v15 = vcombine.low %v2565_v0, %v12488_v27  ;;  %v6823_v37 = vrot.slane %v6815_v47, %v10123_v2  ;;  %v14024_v31 = vld [vmem:[#allocation275_spill] sm:$0xff]  ;;  %v14034_v8 = vld [vmem:[#allocation189_spill] sm:$0xff] }
 0x78c   : > { %v7781_v3 = vpop.permute.xlu1 %7780  ;;  %v8347_v29 = vsel %vm13994_vm15, %v8346_v24, %v7777_v50  ;;  %vm14000_vm15 = vcmask 703488   ;;  %v6871_v24 = vcombine.low %v2661_v5, %v12496_v41  ;;  %v6839_v50 = vcombine.low %v12461_v17, %v12480_v30 }
 0x78d   : > { %8008 = vrot.lane.b32.xlu0 %v6699_v1, %s13601_s26  ;;  %v8348_v14 = vsel %vm13997_vm0, %v8347_v29, %v7781_v3  ;;  %vm14009_vm0 = vcmask 719872   ;;  %v6816_v1 = vcombine.high %v6750_v21, %v6766_v26  ;;  %v6895_v3 = vrot.slane %v6887_v59, %v10108_v51  ;;  %v14030_v59 = vld [vmem:[#allocation333_spill] sm:$0xff]  ;;  %s14048_s26 = smov 98  }
 0x78e   : > { %8012 = vrot.lane.b32.xlu1 %v6700_v62, %s13606_s14  ;;  %v6833_v57 = vcombine.low %v6782_v39, %v6814_v38  ;;  %v6834_v11 = vcombine.high %v6782_v39, %v6814_v38  ;;  %v6784_v44 = vcombine.high %v12464_v12, %v6734_v4  ;;  %v6791_v33 = vrot.slane %v6783_v16, %v10123_v2  ;;  %s14028_s14 = smov 90   ;;  %v14037_v39 = vld [vmem:[#allocation145_spill] sm:$0xff] }
 0x78f   : > { %v7785_v35 = vpop.permute.xlu0 %7784  ;;  %v6863_v26 = vrot.slane %v6855_v15, %v10108_v51  ;;  %v6879_v25 = vrot.slane %v6871_v24, %v10108_v51  ;;  %v12539_v40 = vsel %vm2502_vm5, %v14025_v22, %v14024_v31  ;;  %v6840_v52 = vcombine.high %v12461_v17, %v12480_v30  ;;  %v14038_v15 = vld [vmem:[#allocation448_spill] sm:$0xff]  ;;  %v14039_v24 = vld [vmem:[#allocation218_spill] sm:$0xff] }
 0x790   : > { %v7789_v34 = vpop.permute.xlu1 %7788  ;;  %v8349_v56 = vsel %vm14000_vm15, %v8348_v14, %v7785_v35  ;;  %vm14014_vm15 = vcmask 736256   ;;  %v6847_v14 = vrot.slane %v6839_v50, %v10108_v51  ;;  %v6888_v35 = vcombine.high %v2693_v13, %v12474_v32 }
 0x791   : > { %8016 = vrot.lane.b32.xlu0 %v6701_v48, %s13608_s13  ;;  %v8350_v7 = vsel %vm14009_vm0, %v8349_v56, %v7789_v34  ;;  %vm14017_vm0 = vcmask 752640   ;;  %v6830_v48 = vrot.slane %v6816_v1, %v10123_v2  ;;  %v6935_v21 = vcombine.low %v6879_v25, %v6895_v3  ;;  %s14023_s13 = smov 88  }
 0x792   : > { %8020 = vrot.lane.b32.xlu1 %v6702_v28, %s13613_s17  ;;  %v6835_v10 = vcombine.low %v6791_v33, %v6823_v37  ;;  %v6856_v34 = vcombine.high %v2565_v0, %v12488_v27  ;;  %v6836_v36 = vcombine.high %v6791_v33, %v6823_v37  ;;  %v6798_v58 = vrot.slane %v6784_v44, %v10123_v2  ;;  %v14026_v27 = vld [vmem:[#allocation45_spill] sm:$0xff]  ;;  %s14040_s17 = smov 94   ;;  %v14044_v44 = vld [vmem:[#allocation390_spill] sm:$0xff] }
 0x793   : > { %v7793_v60 = vpop.permute.xlu0 %7792  ;;  %v6903_v4 = vcombine.low %v6847_v14, %v6863_v26  ;;  %v6872_v32 = vcombine.high %v2661_v5, %v12496_v41  ;;  %v12546_v18 = vsel %vm2502_vm5, %v14027_v46, %v14026_v27  ;;  %v6902_v13 = vrot.slane %v6888_v35, %v10108_v51  ;;  %v14045_v33 = vld [vmem:[#allocation161_spill] sm:$0xff] }
 0x794   : > { %v7797_v45 = vpop.permute.xlu1 %7796  ;;  %v8351_v43 = vsel %vm14014_vm15, %v8350_v7, %v7793_v60  ;;  %vm14018_vm15 = vcmask 769024   ;;  %v6936_v54 = vcombine.high %v6879_v25, %v6895_v3  ;;  %v6943_v49 = vrot.slane %v6935_v21, %v10123_v2  ;;  %v14031_v7 = vld [vmem:[#allocation129_spill] sm:$0xff] }
 0x795   : > { %8024 = vrot.lane.b32.xlu0 %v6831_v20, %s14015_s0  ;;  %v8352_v29 = vsel %vm14017_vm0, %v8351_v43, %v7797_v45  ;;  %vm14021_vm0 = vcmask 785408   ;;  %v6837_v38 = vcombine.low %v6798_v58, %v6830_v48  ;;  %v12555_v17 = vsel %vm2502_vm5, %v14031_v7, %v14030_v59  ;;  %s14121_s0 = sld [smem:[#allocation452_spill]] }
 0x796   : > { %8028 = vrot.lane.b32.xlu1 %v6832_v6, %s14016_s1  ;;  %v6870_v30 = vrot.slane %v6856_v34, %v10108_v51  ;;  %v6838_v53 = vcombine.high %v6798_v58, %v6830_v48  ;;  %v6904_v19 = vcombine.high %v6847_v14, %v6863_v26  ;;  %v6911_v0 = vrot.slane %v6903_v4, %v10123_v2  ;;  %v14036_v6 = vld [vmem:[#allocation361_spill] sm:$0xff] }
 0x797   : > { %v7801_v62 = vpop.permute.xlu0 %7800  ;;  %v2694_v5 = vsel %vm2502_vm5, %v14034_v8, %v14033_v55  ;;  %v6886_v45 = vrot.slane %v6872_v32, %v10108_v51  ;;  %v6854_v43 = vrot.slane %v6840_v52, %v10108_v51  ;;  %v12569_v16 = vsel %vm2502_vm5, %v14037_v39, %v14036_v6 }
 0x798   : > { %v7805_v42 = vpop.permute.xlu1 %7804  ;;  %v8353_v9 = vsel %vm14018_vm15, %v8352_v29, %v7801_v62  ;;  %vm14022_vm15 = vcmask 801792   ;;  %v12574_v50 = vsel %vm2502_vm5, %v14039_v24, %v14038_v15  ;;  %v7023_v1 = vcombine.low %v2694_v5, %v12546_v18 }
 0x799   : > { %8032 = vrot.lane.b32.xlu0 %v6833_v57, %s14019_s2  ;;  %v8354_v23 = vsel %vm14021_vm0, %v8353_v9, %v7805_v42  ;;  %vm14029_vm0 = vcmask 818176   ;;  %v6950_v37 = vrot.slane %v6936_v54, %v10123_v2  ;;  %v6951_v3 = vcombine.low %v6886_v45, %v6902_v13  ;;  %v14042_v42 = vld [vmem:[#allocation304_spill] sm:$0xff]  ;;  %v14043_v9 = vld [vmem:[#allocation113_spill] sm:$0xff]  ;;  %s8438_s2 = scalar_lea.sflag [#allocation4], %s14117_s10 }
 0x79a   : > { %8036 = vrot.lane.b32.xlu1 %v6834_v11, %s14020_s3  ;;  %v6967_v57 = vcombine.low %v6911_v0, %v6943_v49  ;;  %v2566_v11 = vsel %vm2502_vm5, %v14043_v9, %v14042_v42  ;;  %v2662_v26 = vsel %vm2502_vm5, %v14045_v33, %v14044_v44  ;;  %v6968_v35 = vcombine.high %v6911_v0, %v6943_v49  ;;  %s8742_s3 = scalar_lea.vmem %s8455_s25, 512 }
 0x79b   : > { %v7809_v12 = vpop.permute.xlu0 %7808  ;;  %v6991_v48 = vcombine.low %v2566_v11, %v12569_v16  ;;  %v6918_v21 = vrot.slane %v6904_v19, %v10123_v2  ;;  %v7031_v34 = vrot.slane %v7023_v1, %v10108_v51  ;;  %vm14049_vm5 = vcmask 900096   ;;  %s12713_s1 = scalar_lea.hbm %s14121_s0, %s8572_s18  ;;  %p8743_p8 = scmp.ne.s32.totalorder %s8455_s25, %s8742_s3 }
 0x79c   : > { %v7813_v56 = vpop.permute.xlu1 %7812  ;;  %v8355_v28 = vsel %vm14022_vm15, %v8354_v23, %v7809_v12  ;;  %vm14032_vm15 = vcmask 834560   ;;  %v6919_v23 = vcombine.low %v6854_v43, %v6870_v30  ;;  %v7007_v12 = vcombine.low %v2662_v26, %v12574_v50 }
 0x79d   : > { %8040 = vrot.lane.b32.xlu0 %v6835_v10, %s14023_s13  ;;  %v8356_v41 = vsel %vm14029_vm0, %v8355_v28, %v7813_v56  ;;  %vm14041_vm0 = vcmask 850944   ;;  %v6975_v10 = vcombine.low %v12539_v40, %v12555_v17  ;;  %v6952_v56 = vcombine.high %v6886_v45, %v6902_v13  ;;  %p8744_p11 = pnand %p8743_p8, %p8967_p9  ;;  %s8895_s13 = smov [#allocation5]  }
 0x79e   : > { %8044 = vrot.lane.b32.xlu1 %v6836_v36, %s14028_s14  ;;  %v6959_v28 = vrot.slane %v6951_v3, %v10123_v2  ;;  %v6969_v4 = vcombine.low %v6918_v21, %v6950_v37  ;;  %v6970_v22 = vcombine.high %v6918_v21, %v6950_v37  ;;  %v6999_v52 = vrot.slane %v6991_v48, %v10108_v51  ;;  %s8746_s14 = sshll.u32 %s8895_s13, 4  ;;  %s8747_s14 = int_to_ptr.vmem [resolvable:$false] %s8746_s14 }
 0x79f   : > { %v7817_v47 = vpop.permute.xlu0 %7816  ;;  %v6920_v27 = vcombine.high %v6854_v43, %v6870_v30  ;;  %v6927_v46 = vrot.slane %v6919_v23, %v10123_v2  ;;  %v7015_v54 = vrot.slane %v7007_v12, %v10108_v51  ;;  %v6983_v13 = vrot.slane %v6975_v10, %v10108_v51  ;;  %p8745_p0 = pneg %p8744_p11  ;;  %p8749_p1 = scmp.lt.s32.totalorder %s8455_s25, %s8747_s14 }
 0x7a0   : > { %v7821_v60 = vpop.permute.xlu1 %7820  ;;  %v8357_v20 = vsel %vm14032_vm15, %v8356_v41, %v7817_v47  ;;  %vm14046_vm15 = vcmask 867328   ;;  %v7024_v49 = vcombine.high %v2694_v5, %v12546_v18  ;;  %v6966_v47 = vrot.slane %v6952_v56, %v10123_v2 }
 0x7a1   : > { %8048 = vrot.lane.b32.xlu0 %v6837_v38, %s14035_s16  ;;  %v8358_v29 = vsel %vm14041_vm0, %v8357_v20, %v7821_v60  ;;  %v7071_v41 = vcombine.low %v7015_v54, %v7031_v34  ;;  %vm14052_vm0 = vcmask 916480   ;;  %v6971_v7 = vcombine.low %v6927_v46, %v6959_v28  ;;  %s8748_s16 = scalar_lea.vmem %s8747_s14, 1024 }
 0x7a2   : > { %8052 = vrot.lane.b32.xlu1 %v6838_v53, %s14040_s17  ;;  %v6972_v20 = vcombine.high %v6927_v46, %v6959_v28  ;;  %v6992_v53 = vcombine.high %v2566_v11, %v12569_v16  ;;  %v7039_v19 = vcombine.low %v6983_v13, %v6999_v52  ;;  %v6934_v0 = vrot.slane %v6920_v27, %v10123_v2  ;;  %p8750_p2 = scmp.lt.s32.totalorder %s8748_s16, %s8742_s3 }
 0x7a3   : > { %v7825_v62 = vpop.permute.xlu0 %7824  ;;  %v7008_v18 = vcombine.high %v2662_v26, %v12574_v50  ;;  %v6976_v55 = vcombine.high %v12539_v40, %v12555_v17  ;;  %v7038_v8 = vrot.slane %v7024_v49, %v10108_v51  ;;  %v7072_v5 = vcombine.high %v7015_v54, %v7031_v34 }
 0x7a4   : > { %v7829_v25 = vpop.permute.xlu1 %7828  ;;  %v8359_v14 = vsel %vm14046_vm15, %v8358_v29, %v7825_v62  ;;  %vm14053_vm15 = vcmask 932864   ;;  %v7079_v45 = vrot.slane %v7071_v41, %v10123_v2  ;;  %v6973_v39 = vcombine.low %v6934_v0, %v6966_v47  ;;  %p8751_p3 = por %p8750_p2, %p8749_p1 }
 0x7a5   : > { %8056 = vrot.lane.b32.xlu0 %v6967_v57, %s14047_s20  ;;  %v8360_v36 = vsel %vm8224_vm4, %v8359_v14, %v7829_v25  ;;  %v6974_v24 = vcombine.high %v6934_v0, %v6966_v47  ;;  %v7006_v50 = vrot.slane %v6992_v53, %v10108_v51  ;;  %v7040_v1 = vcombine.high %v6983_v13, %v6999_v52 }
 0x7a6   : > { %8060 = vrot.lane.b32.xlu1 %v6968_v35, %s14048_s26  ;;  %v7047_v40 = vrot.slane %v7039_v19, %v10123_v2  ;;  %v7022_v17 = vrot.slane %v7008_v18, %v10108_v51  ;;  %v6990_v37 = vrot.slane %v6976_v55, %v10108_v51  ;;  %v7086_v3 = vrot.slane %v7072_v5, %v10123_v2  ;;  %p8752_p5 = pnand %p8751_p3, %p8745_p0 }
 0x7a7   : > { %v7833_v58 = vpop.permute.xlu0 %7832  ;;  %v7054_v33 = vrot.slane %v7040_v1, %v10123_v2  ;;  %v6151_v56 = vcombine.low %v12111_v61, %v12096_v63 }
 0x7a8   : > { %v7837_v32 = vpop.permute.xlu1 %7836  ;;  %v8361_v31 = vsel %vm14049_vm5, %v8360_v36, %v7833_v58  ;;  %vm14056_vm5 = vcmask 949248   ;;  %v7087_v29 = vcombine.low %v7022_v17, %v7038_v8  ;;  %v7103_v42 = vcombine.low %v7047_v40, %v7079_v45 }
 0x7a9   : > { %8064 = vrot.lane.b32.xlu0 %v6969_v4, %s14050_s19  ;;  %v8362_v38 = vsel %vm14052_vm0, %v8361_v31, %v7837_v32  ;;  %vm14057_vm0 = vcmask 965632   ;;  %v7104_v44 = vcombine.high %v7047_v40, %v7079_v45  ;;  %v7055_v26 = vcombine.low %v6990_v37, %v7006_v50 }
 0x7aa   : > { %8068 = vrot.lane.b32.xlu1 %v6970_v22, %s14051_s21  ;;  %v7088_v51 = vcombine.high %v7022_v17, %v7038_v8  ;;  %v7095_v25 = vrot.slane %v7087_v29, %v10123_v2  ;;  %v7105_v48 = vcombine.low %v7054_v33, %v7086_v3  ;;  %v7106_v12 = vcombine.high %v7054_v33, %v7086_v3 }
 0x7ab   : > { %v7841_v59 = vpop.permute.xlu0 %7840  ;;  %v7056_v10 = vcombine.high %v6990_v37, %v7006_v50  ;;  %v7063_v34 = vrot.slane %v7055_v26, %v10123_v2 }
 0x7ac   : > { %v7845_v30 = vpop.permute.xlu1 %7844  ;;  %v8363_v60 = vsel %vm14053_vm15, %v8362_v38, %v7841_v59  ;;  %vm14059_vm15 = vcmask 982016   ;;  %v7102_v28 = vrot.slane %v7088_v51, %v10123_v2 }
 0x7ad   : > { %8072 = vrot.lane.b32.xlu0 %v6971_v7, %s14054_s23  ;;  %v8364_v43 = vsel %vm14056_vm5, %v8363_v60, %v7845_v30  ;;  %v7107_v4 = vcombine.low %v7063_v34, %v7095_v25  ;;  %v7108_v22 = vcombine.high %v7063_v34, %v7095_v25  ;;  %v7070_v52 = vrot.slane %v7056_v10, %v10123_v2 }
 0x7ae   : > { %8076 = vrot.lane.b32.xlu1 %v6972_v20, %s14055_s28  ;;  %vm14077_vm5 = vcmask 310272  }
 0x7af   : > { %v7849_v6 = vpop.permute.xlu0 %7848  ;;  %v7109_v27 = vcombine.low %v7070_v52, %v7102_v28  ;;  %v7110_v13 = vcombine.high %v7070_v52, %v7102_v28 }
 0x7b0   : > { %v7853_v16 = vpop.permute.xlu1 %7852  ;;  %v8365_v15 = vsel %vm14057_vm0, %v8364_v43, %v7849_v6  ;;  %vm14078_vm0 = vcmask 326656  }
 0x7b1   : > { %8080 = vrot.lane.b32.xlu0 %v6973_v39, %s14058_s29  ;;  %v8366_v62 = vsel %vm14059_vm15, %v8365_v15, %v7853_v16  ;;  %vm14079_vm15 = vcmask 343040  }
 0x7b2   : > { %8084 = vrot.lane.b32.xlu1 %v6974_v24, %s13861_s12  ;;  %s14062_s12 = smov 116  }
 0x7b3   : > { %v7857_v57 = vpop.permute.xlu0 %7856 }
 0x7b4   : > { %v7861_v9 = vpop.permute.xlu1 %7860  ;;  %v8367_v11 = vsel %vm8238_vm3, %v8366_v62, %v7857_v57 }
 0x7b5   : > { %8088 = vrot.lane.b32.xlu0 %v7103_v42, %s14060_s30  ;;  %v8368_v14 = vsel %vm8240_vm1, %v8367_v11, %v7861_v9 }
 0x7b6   : > { %8092 = vrot.lane.b32.xlu1 %v7104_v44, %s14061_s4 }
 0x7b7   : > { %v7865_v35 = vpop.permute.xlu0 %7864 }
 0x7b8   : > { %v7869_v21 = vpop.permute.xlu1 %7868  ;;  %v8369_v23 = vsel %vm8242_vm2, %v8368_v14, %v7865_v35 }
 0x7b9   : > { %8435 = vst [vmem:[%s11476_s22 + $0x10] sm:$0xff] %v8369_v23  ;;  %8096 = vrot.lane.b32.xlu0 %v7105_v48, %s14062_s12  ;;  %v8370_v36 = vsel %vm8119_vm6, %v6151_v56, %v7869_v21  ;;  %vm14068_vm6 = vcmask 162816  }
 0x7ba   : > { %8100 = vrot.lane.b32.xlu1 %v7106_v12, %s14063_s5 }
 0x7bb   : > { %v7873_v58 = vpop.permute.xlu0 %7872 }
 0x7bc   : > { %v7877_v32 = vpop.permute.xlu1 %7876  ;;  %v8371_v31 = vsel %vm8121_vm7, %v8370_v36, %v7873_v58  ;;  %vm14069_vm7 = vcmask 179200  }
 0x7bd   : > { %8104 = vrot.lane.b32.xlu0 %v7107_v4, %s14064_s6  ;;  %v8372_v63 = vsel %vm8123_vm8, %v8371_v31, %v7877_v32  ;;  %vm14070_vm8 = vcmask 195584  }
 0x7be   : > { %8108 = vrot.lane.b32.xlu1 %v7108_v22, %s14065_s7 }
 0x7bf   : > { %v7881_v61 = vpop.permute.xlu0 %7880 }
 0x7c0   : > { %v7885_v46 = vpop.permute.xlu1 %7884  ;;  %v8373_v54 = vsel %vm8125_vm9, %v8372_v63, %v7881_v61  ;;  %vm14071_vm9 = vcmask 211968  }
 0x7c1   : > { %8112 = vrot.lane.b32.xlu0 %v7109_v27, %s14066_s8  ;;  %v8374_v49 = vsel %vm8127_vm10, %v8373_v54, %v7885_v46  ;;  %vm14072_vm10 = vcmask 228352  }
 0x7c2   : > { %8116 = vrot.lane.b32.xlu1 %v7110_v13, %s14067_s24 }
 0x7c3   : > { %v7889_v41 = vpop.permute.xlu0 %7888 }
 0x7c4   : > { %v7893_v2 = vpop.permute.xlu1 %7892  ;;  %v8375_v47 = vsel %vm8129_vm11, %v8374_v49, %v7889_v41  ;;  %vm14073_vm11 = vcmask 244736  }
 0x7c5   : > { %v8376_v38 = vsel %vm8131_vm12, %v8375_v47, %v7893_v2  ;;  %vm14074_vm12 = vcmask 261120  }
 0x7c7   : > { %v7897_v59 = vpop.permute.xlu0 %7896 }
 0x7c8   : > { %v7901_v7 = vpop.permute.xlu1 %7900  ;;  %v8377_v30 = vsel %vm8133_vm13, %v8376_v38, %v7897_v59  ;;  %vm14075_vm13 = vcmask 277504  }
 0x7c9   : > { %v8378_v60 = vsel %vm8135_vm14, %v8377_v30, %v7901_v7  ;;  %vm14076_vm14 = vcmask 293888  }
 0x7cb   : > { %v7905_v20 = vpop.permute.xlu0 %7904 }
 0x7cc   : > { %v7909_v53 = vpop.permute.xlu1 %7908  ;;  %v8379_v19 = vsel %vm14068_vm6, %v8378_v60, %v7905_v20  ;;  %vm14080_vm6 = vcmask 359424  }
 0x7cd   : > { %v8380_v0 = vsel %vm14069_vm7, %v8379_v19, %v7909_v53  ;;  %vm14081_vm7 = vcmask 375808  }
 0x7cf   : > { %v7913_v18 = vpop.permute.xlu0 %7912 }
 0x7d0   : > { %v7917_v55 = vpop.permute.xlu1 %7916  ;;  %v8381_v8 = vsel %vm14070_vm8, %v8380_v0, %v7913_v18  ;;  %vm14082_vm8 = vcmask 392192  }
 0x7d1   : > { %v8382_v5 = vsel %vm14071_vm9, %v8381_v8, %v7917_v55  ;;  %vm14083_vm9 = vcmask 408576  }
 0x7d3   : > { %v7921_v45 = vpop.permute.xlu0 %7920 }
 0x7d4   : > { %v7925_v43 = vpop.permute.xlu1 %7924  ;;  %v8383_v6 = vsel %vm14072_vm10, %v8382_v5, %v7921_v45  ;;  %vm14084_vm10 = vcmask 424960  }
 0x7d5   : > { %v8384_v39 = vsel %vm14073_vm11, %v8383_v6, %v7925_v43  ;;  %vm14085_vm11 = vcmask 441344  }
 0x7d7   : > { %v7929_v16 = vpop.permute.xlu0 %7928 }
 0x7d8   : > { %v7933_v15 = vpop.permute.xlu1 %7932  ;;  %v8385_v24 = vsel %vm14074_vm12, %v8384_v39, %v7929_v16  ;;  %vm14086_vm12 = vcmask 457728  }
 0x7d9   : > { %v8386_v50 = vsel %vm14075_vm13, %v8385_v24, %v7933_v15  ;;  %vm14087_vm13 = vcmask 474112  }
 0x7db   : > { %v7937_v1 = vpop.permute.xlu0 %7936 }
 0x7dc   : > { %v7941_v40 = vpop.permute.xlu1 %7940  ;;  %v8387_v17 = vsel %vm14076_vm14, %v8386_v50, %v7937_v1  ;;  %vm14088_vm14 = vcmask 490496  }
 0x7dd   : > { %v8388_v37 = vsel %vm14077_vm5, %v8387_v17, %v7941_v40  ;;  %vm14089_vm5 = vcmask 506880  }
 0x7df   : > { %v7945_v3 = vpop.permute.xlu0 %7944 }
 0x7e0   : > { %v7949_v29 = vpop.permute.xlu1 %7948  ;;  %v8389_v62 = vsel %vm14078_vm0, %v8388_v37, %v7945_v3  ;;  %vm14090_vm0 = vcmask 523264  }
 0x7e1   : > { %v8390_v57 = vsel %vm14079_vm15, %v8389_v62, %v7949_v29  ;;  %vm14091_vm15 = vcmask 539648  }
 0x7e3   : > { %v7953_v42 = vpop.permute.xlu0 %7952 }
 0x7e4   : > { %v7957_v9 = vpop.permute.xlu1 %7956  ;;  %v8391_v11 = vsel %vm14080_vm6, %v8390_v57, %v7953_v42  ;;  %vm14092_vm6 = vcmask 556032  }
 0x7e5   : > { %v8392_v44 = vsel %vm14081_vm7, %v8391_v11, %v7957_v9  ;;  %vm14093_vm7 = vcmask 572416  }
 0x7e7   : > { %v7961_v33 = vpop.permute.xlu0 %7960 }
 0x7e8   : > { %v7965_v26 = vpop.permute.xlu1 %7964  ;;  %v8393_v51 = vsel %vm14082_vm8, %v8392_v44, %v7961_v33  ;;  %vm14094_vm8 = vcmask 588800  }
 0x7e9   : > { %v8394_v25 = vsel %vm14083_vm9, %v8393_v51, %v7965_v26  ;;  %vm14095_vm9 = vcmask 605184  }
 0x7eb   : > { %v7969_v14 = vpop.permute.xlu0 %7968 }
 0x7ec   : > { %v7973_v35 = vpop.permute.xlu1 %7972  ;;  %v8395_v48 = vsel %vm14084_vm10, %v8394_v25, %v7969_v14  ;;  %vm14096_vm10 = vcmask 621568  }
 0x7ed   : > { %v8396_v21 = vsel %vm14085_vm11, %v8395_v48, %v7973_v35  ;;  %vm14097_vm11 = vcmask 637952  }
 0x7ef   : > { %v7977_v23 = vpop.permute.xlu0 %7976 }
 0x7f0   : > { %v7981_v12 = vpop.permute.xlu1 %7980  ;;  %v8397_v10 = vsel %vm14086_vm12, %v8396_v21, %v7977_v23  ;;  %vm14098_vm12 = vcmask 654336  }
 0x7f1   : > { %v8398_v34 = vsel %vm14087_vm13, %v8397_v10, %v7981_v12  ;;  %vm14099_vm13 = vcmask 670720  }
 0x7f3   : > { %v7985_v56 = vpop.permute.xlu0 %7984 }
 0x7f4   : > { %v7989_v28 = vpop.permute.xlu1 %7988  ;;  %v8399_v36 = vsel %vm14088_vm14, %v8398_v34, %v7985_v56  ;;  %vm14100_vm14 = vcmask 687104  }
 0x7f5   : > { %v8400_v58 = vsel %vm14089_vm5, %v8399_v36, %v7989_v28  ;;  %vm14101_vm5 = vcmask 703488  }
 0x7f7   : > { %v7993_v4 = vpop.permute.xlu0 %7992 }
 0x7f8   : > { %v7997_v32 = vpop.permute.xlu1 %7996  ;;  %v8401_v31 = vsel %vm14090_vm0, %v8400_v58, %v7993_v4  ;;  %vm14102_vm0 = vcmask 719872  }
 0x7f9   : > { %v8402_v22 = vsel %vm14091_vm15, %v8401_v31, %v7997_v32  ;;  %vm14103_vm15 = vcmask 736256  }
 0x7fb   : > { %v8001_v52 = vpop.permute.xlu0 %8000 }
 0x7fc   : > { %v8005_v63 = vpop.permute.xlu1 %8004  ;;  %v8403_v61 = vsel %vm14092_vm6, %v8402_v22, %v8001_v52  ;;  %vm14104_vm6 = vcmask 752640  }
 0x7fd   : > { %v8404_v27 = vsel %vm14093_vm7, %v8403_v61, %v8005_v63  ;;  %vm14105_vm7 = vcmask 769024  }
 0x7ff   : > { %v8009_v46 = vpop.permute.xlu0 %8008 }
 0x800   : > { %v8013_v54 = vpop.permute.xlu1 %8012  ;;  %v8405_v13 = vsel %vm14094_vm8, %v8404_v27, %v8009_v46  ;;  %vm14106_vm8 = vcmask 785408  }
 0x801   : > { %v8406_v49 = vsel %vm14095_vm9, %v8405_v13, %v8013_v54  ;;  %vm14107_vm9 = vcmask 801792  }
 0x803   : > { %v8017_v41 = vpop.permute.xlu0 %8016 }
 0x804   : > { %v8021_v2 = vpop.permute.xlu1 %8020  ;;  %v8407_v47 = vsel %vm14096_vm10, %v8406_v49, %v8017_v41  ;;  %vm14108_vm10 = vcmask 818176  }
 0x805   : > { %v8408_v38 = vsel %vm14097_vm11, %v8407_v47, %v8021_v2  ;;  %vm14109_vm11 = vcmask 834560  }
 0x807   : > { %v8025_v59 = vpop.permute.xlu0 %8024 }
 0x808   : > { %v8029_v7 = vpop.permute.xlu1 %8028  ;;  %v8409_v30 = vsel %vm14098_vm12, %v8408_v38, %v8025_v59  ;;  %vm14110_vm12 = vcmask 850944  }
 0x809   : > { %v8410_v60 = vsel %vm14099_vm13, %v8409_v30, %v8029_v7  ;;  %vm14111_vm13 = vcmask 867328  }
 0x80b   : > { %v8033_v20 = vpop.permute.xlu0 %8032 }
 0x80c   : > { %v8037_v53 = vpop.permute.xlu1 %8036  ;;  %v8411_v19 = vsel %vm14100_vm14, %v8410_v60, %v8033_v20  ;;  %vm14113_vm14 = vcmask 900096  }
 0x80d   : > { %v8412_v0 = vsel %vm14101_vm5, %v8411_v19, %v8037_v53  ;;  %vm14114_vm5 = vcmask 916480  }
 0x80f   : > { %v8041_v18 = vpop.permute.xlu0 %8040 }
 0x810   : > { %v8045_v55 = vpop.permute.xlu1 %8044  ;;  %v8413_v8 = vsel %vm14102_vm0, %v8412_v0, %v8041_v18  ;;  %vm14115_vm0 = vcmask 932864  }
 0x811   : > { %v8414_v5 = vsel %vm14103_vm15, %v8413_v8, %v8045_v55  ;;  %vm14116_vm15 = vcmask 949248  }
 0x813   : > { %v8049_v45 = vpop.permute.xlu0 %8048 }
 0x814   : > { %v8053_v43 = vpop.permute.xlu1 %8052  ;;  %v8415_v6 = vsel %vm14104_vm6, %v8414_v5, %v8049_v45  ;;  %vm14118_vm6 = vcmask 965632  }
 0x815   : > { %v8416_v39 = vsel %vm14105_vm7, %v8415_v6, %v8053_v43 }
 0x817   : > { %v8057_v16 = vpop.permute.xlu0 %8056 }
 0x818   : > { %v8061_v15 = vpop.permute.xlu1 %8060  ;;  %v8417_v24 = vsel %vm14106_vm8, %v8416_v39, %v8057_v16 }
 0x819   : > { %v8418_v50 = vsel %vm14107_vm9, %v8417_v24, %v8061_v15 }
 0x81b   : > { %v8065_v1 = vpop.permute.xlu0 %8064 }
 0x81c   : > { %v8069_v40 = vpop.permute.xlu1 %8068  ;;  %v8419_v17 = vsel %vm14108_vm10, %v8418_v50, %v8065_v1 }
 0x81d   : > { %v8420_v37 = vsel %vm14109_vm11, %v8419_v17, %v8069_v40 }
 0x81f   : > { %v8073_v3 = vpop.permute.xlu0 %8072 }
 0x820   : > { %v8077_v29 = vpop.permute.xlu1 %8076  ;;  %v8421_v62 = vsel %vm14110_vm12, %v8420_v37, %v8073_v3 }
 0x821   : > { %v8422_v57 = vsel %vm14111_vm13, %v8421_v62, %v8077_v29 }
 0x823   : > { %v8081_v42 = vpop.permute.xlu0 %8080 }
 0x824   : > { %v8085_v9 = vpop.permute.xlu1 %8084  ;;  %v8423_v11 = vsel %vm8224_vm4, %v8422_v57, %v8081_v42  ;;  %vm14120_vm4 = vcmask 982016  }
 0x825   : > { %v8424_v44 = vsel %vm14113_vm14, %v8423_v11, %v8085_v9 }
 0x827   : > { %v8089_v33 = vpop.permute.xlu0 %8088 }
 0x828   : > { %v8093_v26 = vpop.permute.xlu1 %8092  ;;  %v8425_v51 = vsel %vm14114_vm5, %v8424_v44, %v8089_v33 }
 0x829   : > { %v8426_v25 = vsel %vm14115_vm0, %v8425_v51, %v8093_v26 }
 0x82b   : > { %v8097_v14 = vpop.permute.xlu0 %8096 }
 0x82c   : > { %v8101_v35 = vpop.permute.xlu1 %8100  ;;  %v8427_v48 = vsel %vm14116_vm15, %v8426_v25, %v8097_v14 }
 0x82d   : > { %v8428_v21 = vsel %vm14118_vm6, %v8427_v48, %v8101_v35 }
 0x82f   : > { %v8105_v23 = vpop.permute.xlu0 %8104 }
 0x830   : > { %v8109_v12 = vpop.permute.xlu1 %8108  ;;  %v8429_v10 = vsel %vm14120_vm4, %v8428_v21, %v8105_v23 }
 0x831   : > { %v8430_v34 = vsel %vm8238_vm3, %v8429_v10, %v8109_v12 }
 0x833   : > { %v8113_v56 = vpop.permute.xlu0 %8112 }
 0x834   : > { %v8117_v28 = vpop.permute.xlu1 %8116  ;;  %v8431_v36 = vsel %vm8240_vm1, %v8430_v34, %v8113_v56 }
 0x835   : > { %v8432_v58 = vsel %vm8242_vm2, %v8431_v36, %v8117_v28 }
 0x836   : > { %8436 = vst [vmem:[%s11476_s22 + $0x18] sm:$0xff] %v8432_v58 }
 0x837   : > { %8755 = shalt.err (!%p8752_p5)
}
 0x838   : > { %s8756_s22 = scalar_lea.hbm %s12713_s1, 512  ;;  %s8760_s26 = scalar_lea.hbm %s14121_s0, 1024 }
 0x839   : > { %p8757_p6 = scmp.ne.s32.totalorder %s12713_s1, %s8756_s22  ;;  %p8761_p4 = scmp.lt.s32.totalorder %s12713_s1, %s14121_s0 }
 0x83a   : > { %p8762_p13 = scmp.lt.s32.totalorder %s8760_s26, %s8756_s22 }
 0x83b   : > { %p8758_p7 = pnand %p8757_p6, %p8967_p9 }
 0x83c   : > { %p8763_p12 = por %p8762_p13, %p8761_p4 }
 0x83d   : > { %p8759_p10 = pneg %p8758_p7 }
 0x83f   : > { %p8764_p8 = pnand %p8763_p12, %p8759_p10 }
 0x841   : > { %8767 = shalt.err (!%p8764_p8)
}
 0x842   : > { %8581 = dma.vmem_to_hbm [thread:$0]  (%p8967_p9), %s8455_s25, 512, %s12713_s1, %s8438_s2  }
 0x843 PF: > { %s14122_s23 = sld [smem:[#allocation8_spill]] }
 0x844   : > { %s14123_s28 = sld [smem:[#allocation17_spill]] }
 0x845   : > { %s14124_s29 = sld [smem:[#allocation13_spill]] }
 0x849   : > { %s8466_s30 = sand.u32 1, %s14122_s23  }
 0x84a   : > { %p14125_p11 = scmp.ne.s32.totalorder %s14123_s28, 0  ;;  %s8467_s4 = scalar_lea.sflag [#allocation4], %s8466_s30 }
 0x84b   : > { %p14126_p0 = scmp.ge.s32.totalorder %s14124_s29, 2 }
 0x84d   : > { %p8588_p1 = pnand %p14126_p0, %p14125_p11 }
 0x84f   : > { %p8589_p2 = pneg %p8588_p1 }
 0x851   : > { %8797 = dma.done.wait (%p8589_p2), %s8467_s4, 512  }
 0x852   : > { %8799 = vsyncadd (%p8589_p2), %s8467_s4, 4294966784  ;;  %s19_s17 = sadd.s32 1, %s14124_s29   ;;  %s14127_s12 = sld [smem:[#allocation9_spill]] }
 0x853   : > { %p16_p3 = scmp.ge.s32.totalorder %s19_s17, 4   ;;  %s14128_s13 = sld [smem:[#allocation10_spill]] }
 0x854   : > { %s14129_s14 = sld [smem:[#allocation16_spill]] }
 0x855   : > { %s14130_s15 = sld [smem:[#allocation12_spill]]  ;;  %18 = sbr.rel (!%p16_p3) target bundleno = 11 (0xb), region = 80 }
 0x856   : > { %s14131_s16 = sld [smem:[#allocation14_spill]] }
 0x85a   :  { %8472 = vsyncpa [#allocation3], 1 }
 0x85b   :  { %8474 = vsyncpa [#allocation3 + $0x1], 1 }
 0x85c   :  { %8475 = vsyncpa [#allocation4], 1 }
 0x85d   :  { %8477 = vsyncpa [#allocation4 + $0x1], 1 }

</bundles_post_ra>
